<compile_context>
chip_gen: v7x
topology: tpu7x:2x2x1
jax: 0.10.0
libtpu: 0.0.40
codegen_flags: <defaults>
</compile_context>

<pallas_src>
import functools

import numpy as np

import jax
import jax.numpy as jnp
from jax import lax
from jax.experimental import pallas as pl
from jax.experimental.pallas import tpu as pltpu

_CP = 128  # lane-padded channel width used for all weights / activations in VMEM

# 3x3 conv taps: (row-block index in the stacked weight, dy, dx) with tap = ky*3 + kx.
_ALL9 = tuple((ky * 3 + kx, ky - 1, kx - 1) for ky in range(3) for kx in range(3))

# ConvTranspose2d(k=3, s=2, p=1, output_padding=1) sub-pixel phase decomposition.
# Stacked deconv weight order (ky, kx):
_DECONV_TAP_ORDER = ((1, 1), (1, 0), (1, 2), (0, 1), (2, 1), (0, 0), (0, 2), (2, 0), (2, 2))
# Per-phase tap lists: (row-block index into the stacked weight, dy, dx), (dy, dx) = INPUT offset.
_PH_EE = ((0, 0, 0),)                                    # out[2a,   2b  ]
_PH_EO = ((1, 0, 1), (2, 0, 0))                          # out[2a,   2b+1]
_PH_OE = ((3, 1, 0), (4, 0, 0))                          # out[2a+1, 2b  ]
_PH_OO = ((5, 1, 1), (6, 1, 0), (7, 0, 1), (8, 0, 0))    # out[2a+1, 2b+1]
_PHASES = (_PH_EE, _PH_EO, _PH_OE, _PH_OO)
_PHASE_ROW0 = (0, 1, 3, 5)


# --------------------------------------------------------------------------
# The fused Pallas kernel (one batch image per grid step)
# --------------------------------------------------------------------------
def _hourglass_kernel(x_ref, w1_ref, w2_ref, w3_ref, w4_ref, w5_ref, wo_ref,
                      sx1_ref, sx2_ref, p4_ref, p5_ref, shifts_ref,
                      y_ref, feat_ref, xpad_ref, *, H, W, C, Cp):
    f32, bf16 = jnp.float32, jnp.bfloat16
    H2, W2, H4, W4 = H // 2, W // 2, H // 4, W // 4
    M = H * W

    def relu_shift(a, idx):
        # folded (conv bias + BN) per-channel shift, then ReLU; padded lanes stay exactly zero.
        return jnp.maximum(a + shifts_ref[idx:idx + 1, :], 0.0)

    def col_of(Mx, Wd):
        # x coordinate of each flattened row (Wd is a power of two).
        return jnp.bitwise_and(lax.broadcasted_iota(jnp.int32, (Mx, Cp), 0), Wd - 1)

    def shifted_pieces(act, taps, Wd, need_front_pad):
        """bf16 shifted / edge-masked windows of a flattened (Mx, Cp) f32 activation."""
        Mx = act.shape[0]
        padz = jnp.zeros((Wd + 1, Cp), f32)
        parts = [padz, act, padz] if need_front_pad else [act, padz]
        big = jnp.concatenate(parts, axis=0)
        base = (Wd + 1) if need_front_pad else 0
        col = col_of(Mx, Wd)
        out = []
        for _, dy, dx in taps:
            d = dy * Wd + dx
            s = big[base + d: base + d + Mx, :]
            if dx == -1:
                s = jnp.where(col >= 1, s, 0.0)
            elif dx == 1:
                s = jnp.where(col <= Wd - 2, s, 0.0)
            out.append(s.astype(bf16))
        return out

    def conv3x3(act, w_ref, Wd):
        """stride-1 3x3 conv: one (Mx, 9*Cp) @ (9*Cp, Cp) bf16 MXU matmul, f32 accumulation."""
        patch = jnp.concatenate(shifted_pieces(act, _ALL9, Wd, True), axis=1)
        return jnp.dot(patch, w_ref[...], preferred_element_type=f32)

    def subsample(full, Hh, Ww, sx_ref):
        """keep even (y, x) rows of a flattened (Hh*Ww, Cp) map -> (Hh//2 * Ww//2, Cp)."""
        sx = sx_ref[...]                                          # (Ww//2, Ww) exact 0/1 bf16
        pieces = [jnp.dot(sx, full[(2 * yo) * Ww:(2 * yo + 1) * Ww, :].astype(bf16),
                          preferred_element_type=f32)
                  for yo in range(Hh // 2)]
        return jnp.concatenate(pieces, axis=0)

    def deconv_phases(act, w_ref, Wd, idx):
        """4 sub-pixel phase maps of ConvTranspose2d(k=3, s=2, p=1, out_pad=1) + BN + ReLU."""
        outs = []
        for taps, row0 in zip(_PHASES, _PHASE_ROW0):
            pieces = shifted_pieces(act, taps, Wd, False)
            patch = pieces[0] if len(pieces) == 1 else jnp.concatenate(pieces, axis=1)
            wsl = w_ref[row0 * Cp:(row0 + len(taps)) * Cp, :]
            outs.append(relu_shift(jnp.dot(patch, wsl, preferred_element_type=f32), idx))
        return outs

    def interleave(phases, hh, ww, p_ref):
        """[ee, eo, oe, oo] phase maps (hh*ww, Cp) -> raster (2hh*2ww, Cp) via tiny 0/1 dots."""
        pv = p_ref[...]                                           # (4*ww, 4*ww) exact 0/1 bf16
        rows = []
        for yo in range(hh):
            blk = jnp.concatenate([ph[yo * ww:(yo + 1) * ww, :] for ph in phases],
                                  axis=0).astype(bf16)            # (4*ww, Cp)
            rows.append(jnp.dot(pv, blk, preferred_element_type=f32))
        return jnp.concatenate(rows, axis=0)

    # ---- lane-pad the un-padded (M, C) bf16 input once, in VMEM -------------------------
    xpad_ref[...] = jnp.zeros((M, Cp), f32)
    xpad_ref[:, :C] = x_ref[0].astype(f32)
    x = xpad_ref[...]                                             # (M, Cp) f32, lanes >= C are 0

    # ---- conv1 / conv2: stride-2 conv = full-res stride-1 conv + exact even-(y,x) select --
    h1 = relu_shift(subsample(conv3x3(x, w1_ref, W), H, W, sx1_ref), 0)        # (M/4,  Cp)
    h2 = relu_shift(subsample(conv3x3(h1, w2_ref, W2), H2, W2, sx2_ref), 1)    # (M/16, Cp)

    # ---- conv3: stride-1 -----------------------------------------------------------------
    h3 = relu_shift(conv3x3(h2, w3_ref, W4), 2)                                # (M/16, Cp)

    # ---- conv4 / conv5: ConvTranspose(s=2) = 4 sub-pixel phase convs + exact interleave ---
    h4 = interleave(deconv_phases(h3, w4_ref, W4, 3), H4, W4, p4_ref)          # (M/4,  Cp)
    h5 = interleave(deconv_phases(h4, w5_ref, W2, 4), H2, W2, p5_ref)          # (M,    Cp)

    # ---- output head: Conv2d(C, 1, 3, padding=1, bias=False) as VPU taps + one lane-reduce
    acc = jnp.zeros((M, Cp), f32)
    padz = jnp.zeros((W + 1, Cp), f32)
    bigh = jnp.concatenate([padz, h5, padz], axis=0)
    colh = col_of(M, W)
    for t, dy, dx in _ALL9:
        d = dy * W + dx
        s = bigh[(W + 1) + d:(W + 1) + d + M, :]
        if dx == -1:
            s = jnp.where(colh >= 1, s, 0.0)
        elif dx == 1:
            s = jnp.where(colh <= W - 2, s, 0.0)
        acc = acc + s * wo_ref[t:t + 1, :]
    y_col = jnp.sum(acc, axis=-1, keepdims=True)                               # (M, 1)

    # ---- lane-dense, un-padded outputs: one transpose serves both feat (C, M) and y (1, M)
    lane = lax.broadcasted_iota(jnp.int32, (M, Cp), 1)
    packed = jnp.where(lane == C, y_col, h5)        # lane C of h5 is exactly zero -> reuse it
    packed_t = jnp.transpose(packed)                                           # (Cp, M)
    feat_ref[0] = packed_t[:C, :]
    y_ref[0] = packed_t[C:C + 1, :]


# --------------------------------------------------------------------------
# Host-side parameter folding / tiny exact constants
# --------------------------------------------------------------------------
def _bn_scale_shift(bn, bias=None, eps=1e-5):
    inv = bn["gamma"] / jnp.sqrt(bn["var"] + eps)
    b = bias if bias is not None else 0.0
    shift = (b - bn["mean"]) * inv + bn["beta"]
    return inv, shift


def _prep_conv_w(w, scale, Cp):
    """Conv2d weight (Cout, Cin, 3, 3) -> stacked (9*Cp, Cp) bf16, BN scale folded in."""
    Cout, Cin = w.shape[0], w.shape[1]
    taps = jnp.transpose(w, (2, 3, 1, 0)).reshape(9, Cin, Cout) * scale[None, None, :]
    taps = jnp.pad(taps, ((0, 0), (0, Cp - Cin), (0, Cp - Cout)))
    return taps.reshape(9 * Cp, Cp).astype(jnp.bfloat16)


def _prep_deconv_w(w_t, scale, Cp):
    """ConvTranspose2d weight (Cin, Cout, 3, 3) -> stacked (9*Cp, Cp) bf16 (phase tap order)."""
    Cin, Cout = w_t.shape[0], w_t.shape[1]
    taps = jnp.stack([w_t[:, :, ky, kx] for ky, kx in _DECONV_TAP_ORDER], axis=0)
    taps = taps * scale[None, None, :]
    taps = jnp.pad(taps, ((0, 0), (0, Cp - Cin), (0, Cp - Cout)))
    return taps.reshape(9 * Cp, Cp).astype(jnp.bfloat16)


def _prep_head_w(w, Cp):
    """Conv2d(C -> 1, 3x3) weight -> (9, Cp) f32 per-tap input-channel rows."""
    C = w.shape[1]
    taps = jnp.transpose(w[0], (1, 2, 0)).reshape(9, C)
    return jnp.pad(taps, ((0, 0), (0, Cp - C))).astype(jnp.float32)


def _even_cols_matrix(Ww):
    """(Ww//2, Ww) exact 0/1 matrix selecting even columns of one image row."""
    S = np.zeros((Ww // 2, Ww), np.float32)
    S[np.arange(Ww // 2), 2 * np.arange(Ww // 2)] = 1.0
    return S


def _interleave_perm_matrix(w):
    """(4w, 4w) exact 0/1 permutation: [ee_yo; eo_yo; oe_yo; oo_yo] -> 2 interleaved out rows."""
    P = np.zeros((4 * w, 4 * w), np.float32)
    for xo in range(w):
        P[2 * xo, xo] = 1.0                          # out row 2yo,   col 2xo     <- ee
        P[2 * xo + 1, w + xo] = 1.0                  # out row 2yo,   col 2xo + 1 <- eo
        P[2 * w + 2 * xo, 2 * w + xo] = 1.0          # out row 2yo+1, col 2xo     <- oe
        P[2 * w + 2 * xo + 1, 3 * w + xo] = 1.0      # out row 2yo+1, col 2xo + 1 <- oo
    return P


# --------------------------------------------------------------------------
# Hourglass forward (NCHW in / NCHW out, like the PyTorch module)
# --------------------------------------------------------------------------
def hourglass_forward(x_nchw, params, Cp=_CP):
    N, C, H, W = x_nchw.shape
    assert H % 4 == 0 and W % 4 == 0, "two stride-2 stages need H, W divisible by 4"
    assert W & (W - 1) == 0, "row width must be a power of two for the in-kernel edge mask"
    assert 2 * C <= Cp
    M = H * W
    W2, W4 = W // 2, W // 4

    # Fold inference BatchNorm (+ conv bias) into per-channel scale/shift.
    s1, sh1 = _bn_scale_shift(params["conv1"]["bn"], params["conv1"]["b"])
    s2, sh2 = _bn_scale_shift(params["conv2"]["bn"], params["conv2"]["b"])
    s3, sh3 = _bn_scale_shift(params["conv3"]["bn"], params["conv3"]["b"])
    s4, sh4 = _bn_scale_shift(params["conv4"]["bn"])
    s5, sh5 = _bn_scale_shift(params["conv5"]["bn"])

    w1 = _prep_conv_w(params["conv1"]["w"], s1, Cp)
    w2 = _prep_conv_w(params["conv2"]["w"], s2, Cp)
    w3 = _prep_conv_w(params["conv3"]["w"], s3, Cp)
    w4 = _prep_deconv_w(params["conv4"]["w"], s4, Cp)
    w5 = _prep_deconv_w(params["conv5"]["w"], s5, Cp)
    wo = _prep_head_w(params["output"]["w"], Cp)

    def lane_pad(v):
        return jnp.pad(v, (0, Cp - v.shape[0]))
    shifts = jnp.stack([lane_pad(sh1), lane_pad(sh2), lane_pad(sh3),
                        lane_pad(sh4), lane_pad(sh5)]
                       + [jnp.zeros((Cp,), jnp.float32)] * 3, axis=0)          # (8, Cp)

    # Tiny exact 0/1 constants (O(W^2), bf16 is bit-exact for them).
    sx1 = jnp.asarray(_even_cols_matrix(W), jnp.bfloat16)                      # (W/2, W)
    sx2 = jnp.asarray(_even_cols_matrix(W2), jnp.bfloat16)                     # (W/4, W/2)
    p4 = jnp.asarray(_interleave_perm_matrix(W4), jnp.bfloat16)                # (W,   W)
    p5 = jnp.asarray(_interleave_perm_matrix(W2), jnp.bfloat16)                # (2W, 2W)

    # NCHW -> flattened, UN-padded (N, M, C) bf16 rows (lane padding happens once in VMEM).
    x_flat = jnp.transpose(x_nchw, (0, 2, 3, 1)).reshape(N, M, C).astype(jnp.bfloat16)

    kernel = functools.partial(_hourglass_kernel, H=H, W=W, C=C, Cp=Cp)

    def const_spec(arr):
        nd = arr.ndim
        return pl.BlockSpec(arr.shape, lambda i, _nd=nd: (0,) * _nd)   # resident across the grid

    y_flat, feat_flat = pl.pallas_call(
        kernel,
        out_shape=(jax.ShapeDtypeStruct((N, 1, M), jnp.float32),      # lane-dense y
                   jax.ShapeDtypeStruct((N, C, M), jnp.float32)),     # lane-dense feat
        grid=(N,),
        in_specs=[
            pl.BlockSpec((1, M, C), lambda i: (i, 0, 0)),             # one image per grid step
            const_spec(w1), const_spec(w2), const_spec(w3),
            const_spec(w4), const_spec(w5), const_spec(wo),
            const_spec(sx1), const_spec(sx2), const_spec(p4), const_spec(p5),
            const_spec(shifts),
        ],
        out_specs=(pl.BlockSpec((1, 1, M), lambda i: (i, 0, 0)),
                   pl.BlockSpec((1, C, M), lambda i: (i, 0, 0))),
        scratch_shapes=[pltpu.VMEM((M, Cp), jnp.float32)],            # lane-pad staging for x
        compiler_params=pltpu.CompilerParams(
            dimension_semantics=("parallel",),          # v7x: the two images split across TCs
            vmem_limit_bytes=32 * 1024 * 1024,          # explicit, sized well above resident set
        ),
    )(x_flat, w1, w2, w3, w4, w5, wo, sx1, sx2, p4, p5, shifts)

    # Outputs are already channel-major -> plain reshapes back to NCHW.
    y = y_flat.reshape(N, 1, H, W)
    feat = feat_flat.reshape(N, C, H, W)
    return y, feat


# --------------------------------------------------------------------------
# Pure-JAX (f32, XLA) reference for correctness checking
# --------------------------------------------------------------------------
def _ref_forward(x, params, eps=1e-5):
    dn = ("NCHW", "OIHW", "NCHW")

    def conv(z, w, stride):
        return lax.conv_general_dilated(z, w, (stride, stride), ((1, 1), (1, 1)),
                                        dimension_numbers=dn)

    def deconv(z, w_t):
        # ConvTranspose2d(k=3, s=2, p=1, output_padding=1) == dilated conv with flipped kernel.
        w = jnp.transpose(w_t[:, :, ::-1, ::-1], (1, 0, 2, 3))
        return lax.conv_general_dilated(z, w, (1, 1), ((1, 2), (1, 2)),
                                        lhs_dilation=(2, 2), dimension_numbers=dn)

    def bn_relu(z, bnp, bias=None):
        if bias is not None:
            z = z + bias[None, :, None, None]
        inv = bnp["gamma"] / jnp.sqrt(bnp["var"] + eps)
        z = (z - bnp["mean"][None, :, None, None]) * inv[None, :, None, None] \
            + bnp["beta"][None, :, None, None]
        return jnp.maximum(z, 0.0)

    h = bn_relu(conv(x, params["conv1"]["w"], 2), params["conv1"]["bn"], params["conv1"]["b"])
    h = bn_relu(conv(h, params["conv2"]["w"], 2), params["conv2"]["bn"], params["conv2"]["b"])
    h = bn_relu(conv(h, params["conv3"]["w"], 1), params["conv3"]["bn"], params["conv3"]["b"])
    h = bn_relu(deconv(h, params["conv4"]["w"]), params["conv4"]["bn"])
    h = bn_relu(deconv(h, params["conv5"]["w"]), params["conv5"]["bn"])
    y = conv(h, params["output"]["w"], 1)
    return y, h


# --------------------------------------------------------------------------
# Deterministic parameter construction (shapes from Hourglass.__init__)
# --------------------------------------------------------------------------
def _bn_params(key, c):
    k1, k2, k3, k4 = jax.random.split(key, 4)
    return dict(
        gamma=1.0 + 0.1 * jax.random.normal(k1, (c,), jnp.float32),
        beta=0.1 * jax.random.normal(k2, (c,), jnp.float32),
        mean=0.1 * jax.random.normal(k3, (c,), jnp.float32),
        var=1.0 + 0.1 * jax.random.uniform(k4, (c,), jnp.float32),
    )


def init_params(key, C):
    ks = jax.random.split(key, 14)

    def kaiming(k, shape, fan_in):
        return jax.random.normal(k, shape, jnp.float32) * jnp.sqrt(2.0 / fan_in)

    P = {}
    P["conv1"] = dict(w=kaiming(ks[0], (2 * C, C, 3, 3), C * 9),
                      b=0.05 * jax.random.normal(ks[1], (2 * C,), jnp.float32),
                      bn=_bn_params(ks[2], 2 * C))
    P["conv2"] = dict(w=kaiming(ks[3], (2 * C, 2 * C, 3, 3), 2 * C * 9),
                      b=0.05 * jax.random.normal(ks[4], (2 * C,), jnp.float32),
                      bn=_bn_params(ks[5], 2 * C))
    P["conv3"] = dict(w=kaiming(ks[6], (2 * C, 2 * C, 3, 3), 2 * C * 9),
                      b=0.05 * jax.random.normal(ks[7], (2 * C,), jnp.float32),
                      bn=_bn_params(ks[8], 2 * C))
    # ConvTranspose2d weight layout: (Cin, Cout, 3, 3), bias=False
    P["conv4"] = dict(w=kaiming(ks[9], (2 * C, 2 * C, 3, 3), 2 * C * 9),
                      bn=_bn_params(ks[10], 2 * C))
    P["conv5"] = dict(w=kaiming(ks[11], (2 * C, C, 3, 3), 2 * C * 9),
                      bn=_bn_params(ks[12], C))
    # output head: Conv2d(C, 1, k=3, p=1, bias=False)
    P["output"] = dict(w=kaiming(ks[13], (1, C, 3, 3), C * 9))
    return P


if __name__ == "__main__":
    key = jax.random.PRNGKey(0)
    kx, kp = jax.random.split(key)

    N, C, H, W = 2, 4, 16, 16
    x = jax.random.normal(kx, (N, C, H, W), jnp.float32)   # PyTorch NCHW input
    params = init_params(kp, C)

    y, feat = jax.jit(hourglass_forward)(x, params)
    y, feat = jax.block_until_ready((y, feat))

    assert y.shape == (N, 1, H, W), y.shape        # predict_class(in_planes, 1) output
    assert feat.shape == (N, C, H, W), feat.shape  # conv5 feature output
    assert bool(jnp.all(jnp.isfinite(y))) and bool(jnp.all(jnp.isfinite(feat)))

    # Check against the pure-f32 XLA reference (kernel uses bf16 MXU operands).
    y_ref, feat_ref = _ref_forward(x, params)
    assert bool(jnp.allclose(y, y_ref, rtol=0.1, atol=0.1))
    assert bool(jnp.allclose(feat, feat_ref, rtol=0.1, atol=0.1))

    print("KERNEL_OK")
</pallas_src>

<mosaic_0001>
module attributes {stable_mosaic.version = 11 : i64} {
  func.func @_hourglass_kernel(%arg0: i32, %arg1: memref<1x256x4xbf16, #tpu.memory_space<vmem>>, %arg2: memref<1152x128xbf16, #tpu.memory_space<vmem>>, %arg3: memref<1152x128xbf16, #tpu.memory_space<vmem>>, %arg4: memref<1152x128xbf16, #tpu.memory_space<vmem>>, %arg5: memref<1152x128xbf16, #tpu.memory_space<vmem>>, %arg6: memref<1152x128xbf16, #tpu.memory_space<vmem>>, %arg7: memref<9x128xf32, #tpu.memory_space<vmem>>, %arg8: memref<8x16xbf16, #tpu.memory_space<vmem>>, %arg9: memref<4x8xbf16, #tpu.memory_space<vmem>>, %arg10: memref<16x16xbf16, #tpu.memory_space<vmem>>, %arg11: memref<32x32xbf16, #tpu.memory_space<vmem>>, %arg12: memref<8x128xf32, #tpu.memory_space<vmem>>, %arg13: memref<1x1x256xf32, #tpu.memory_space<vmem>>, %arg14: memref<1x4x256xf32, #tpu.memory_space<vmem>>, %arg15: memref<256x128xf32, #tpu.memory_space<vmem>>) attributes {dimension_semantics = [#tpu.dimension_semantics<parallel>], iteration_bounds = array<i64: 2>, scalar_prefetch = 0 : i64, scratch_operands = 1 : i64, tpu.core_type = #tpu.core_type<tc>, window_params = [{transform_indices = @transform_0, window_bounds = array<i64: 1, 256, 4>}, {pipeline_mode = #tpu.pipeline_mode<synchronous>, transform_indices = @transform_1, window_bounds = array<i64: 1152, 128>}, {pipeline_mode = #tpu.pipeline_mode<synchronous>, transform_indices = @transform_2, window_bounds = array<i64: 1152, 128>}, {pipeline_mode = #tpu.pipeline_mode<synchronous>, transform_indices = @transform_3, window_bounds = array<i64: 1152, 128>}, {pipeline_mode = #tpu.pipeline_mode<synchronous>, transform_indices = @transform_4, window_bounds = array<i64: 1152, 128>}, {pipeline_mode = #tpu.pipeline_mode<synchronous>, transform_indices = @transform_5, window_bounds = array<i64: 1152, 128>}, {pipeline_mode = #tpu.pipeline_mode<synchronous>, transform_indices = @transform_6, window_bounds = array<i64: 9, 128>}, {pipeline_mode = #tpu.pipeline_mode<synchronous>, transform_indices = @transform_7, window_bounds = array<i64: 8, 16>}, {pipeline_mode = #tpu.pipeline_mode<synchronous>, transform_indices = @transform_8, window_bounds = array<i64: 4, 8>}, {pipeline_mode = #tpu.pipeline_mode<synchronous>, transform_indices = @transform_9, window_bounds = array<i64: 16, 16>}, {pipeline_mode = #tpu.pipeline_mode<synchronous>, transform_indices = @transform_10, window_bounds = array<i64: 32, 32>}, {pipeline_mode = #tpu.pipeline_mode<synchronous>, transform_indices = @transform_11, window_bounds = array<i64: 8, 128>}, {transform_indices = @transform_12, window_bounds = array<i64: 1, 1, 256>}, {transform_indices = @transform_13, window_bounds = array<i64: 1, 4, 256>}]} {
    %cst = arith.constant 0.000000e+00 : f32
    %0 = vector.broadcast %cst : f32 to vector<256x128xf32>
    %c0 = arith.constant 0 : index
    %c0_0 = arith.constant 0 : index
    %1 = vector.load %arg15[%c0, %c0_0] : memref<256x128xf32, #tpu.memory_space<vmem>>, vector<256x128xf32>
    tpu.vector_store %arg15[%c0, %c0_0], %0 {strides = array<i32>} : memref<256x128xf32, #tpu.memory_space<vmem>>, vector<256x128xf32>,
    %c0_1 = arith.constant 0 : index
    %c0_2 = arith.constant 0 : index
    %c0_3 = arith.constant 0 : index
    %2 = vector.load %arg1[%c0_1, %c0_2, %c0_3] : memref<1x256x4xbf16, #tpu.memory_space<vmem>>, vector<1x256x4xbf16>
    %3 = vector.shape_cast %2 : vector<1x256x4xbf16> to vector<256x4xbf16>
    %4 = arith.extf %3 : vector<256x4xbf16> to vector<256x4xf32>
    %c0_4 = arith.constant 0 : index
    %c0_5 = arith.constant 0 : index
    %5 = vector.load %arg15[%c0_4, %c0_5] : memref<256x128xf32, #tpu.memory_space<vmem>>, vector<256x4xf32>
    tpu.vector_store %arg15[%c0_4, %c0_5], %4 {strides = array<i32>} : memref<256x128xf32, #tpu.memory_space<vmem>>, vector<256x4xf32>,
    %c0_6 = arith.constant 0 : index
    %c0_7 = arith.constant 0 : index
    %6 = vector.load %arg15[%c0_6, %c0_7] : memref<256x128xf32, #tpu.memory_space<vmem>>, vector<256x128xf32>
    %cst_8 = arith.constant 0.000000e+00 : f32
    %7 = vector.broadcast %cst_8 : f32 to vector<17x128xf32>
    %8 = tpu.concatenate %7, %6, %7 in 0 : vector<17x128xf32>, vector<256x128xf32>, vector<17x128xf32> -> vector<290x128xf32>
    %9 = tpu.iota {dimensions = array<i32: 0>} : vector<256x128xi32>
    %c15_i32 = arith.constant 15 : i32
    %10 = vector.broadcast %c15_i32 : i32 to vector<256x128xi32>
    %11 = arith.andi %9, %10 : vector<256x128xi32>
    %12 = vector.extract_strided_slice %8 {offsets = [0, 0], sizes = [256, 128], strides = [1, 1]} : vector<290x128xf32> to vector<256x128xf32>
    %c1_i32 = arith.constant 1 : i32
    %13 = vector.broadcast %c1_i32 : i32 to vector<256x128xi32>
    %14 = arith.cmpi sge, %11, %13 : vector<256x128xi32>
    %cst_9 = arith.constant 0.000000e+00 : f32
    %15 = vector.broadcast %cst_9 : f32 to vector<256x128xf32>
    %16 = arith.select %14, %12, %15 : vector<256x128xi1>, vector<256x128xf32>
    %17 = arith.truncf %16 : vector<256x128xf32> to vector<256x128xbf16>
    %18 = vector.extract_strided_slice %8 {offsets = [1, 0], sizes = [256, 128], strides = [1, 1]} : vector<290x128xf32> to vector<256x128xf32>
    %19 = arith.truncf %18 : vector<256x128xf32> to vector<256x128xbf16>
    %20 = vector.extract_strided_slice %8 {offsets = [2, 0], sizes = [256, 128], strides = [1, 1]} : vector<290x128xf32> to vector<256x128xf32>
    %c14_i32 = arith.constant 14 : i32
    %21 = vector.broadcast %c14_i32 : i32 to vector<256x128xi32>
    %22 = arith.cmpi sle, %11, %21 : vector<256x128xi32>
    %cst_10 = arith.constant 0.000000e+00 : f32
    %23 = vector.broadcast %cst_10 : f32 to vector<256x128xf32>
    %24 = arith.select %22, %20, %23 : vector<256x128xi1>, vector<256x128xf32>
    %25 = arith.truncf %24 : vector<256x128xf32> to vector<256x128xbf16>
    %26 = vector.extract_strided_slice %8 {offsets = [16, 0], sizes = [256, 128], strides = [1, 1]} : vector<290x128xf32> to vector<256x128xf32>
    %c1_i32_11 = arith.constant 1 : i32
    %27 = vector.broadcast %c1_i32_11 : i32 to vector<256x128xi32>
    %28 = arith.cmpi sge, %11, %27 : vector<256x128xi32>
    %cst_12 = arith.constant 0.000000e+00 : f32
    %29 = vector.broadcast %cst_12 : f32 to vector<256x128xf32>
    %30 = arith.select %28, %26, %29 : vector<256x128xi1>, vector<256x128xf32>
    %31 = arith.truncf %30 : vector<256x128xf32> to vector<256x128xbf16>
    %32 = vector.extract_strided_slice %8 {offsets = [17, 0], sizes = [256, 128], strides = [1, 1]} : vector<290x128xf32> to vector<256x128xf32>
    %33 = arith.truncf %32 : vector<256x128xf32> to vector<256x128xbf16>
    %34 = vector.extract_strided_slice %8 {offsets = [18, 0], sizes = [256, 128], strides = [1, 1]} : vector<290x128xf32> to vector<256x128xf32>
    %c14_i32_13 = arith.constant 14 : i32
    %35 = vector.broadcast %c14_i32_13 : i32 to vector<256x128xi32>
    %36 = arith.cmpi sle, %11, %35 : vector<256x128xi32>
    %cst_14 = arith.constant 0.000000e+00 : f32
    %37 = vector.broadcast %cst_14 : f32 to vector<256x128xf32>
    %38 = arith.select %36, %34, %37 : vector<256x128xi1>, vector<256x128xf32>
    %39 = arith.truncf %38 : vector<256x128xf32> to vector<256x128xbf16>
    %40 = vector.extract_strided_slice %8 {offsets = [32, 0], sizes = [256, 128], strides = [1, 1]} : vector<290x128xf32> to vector<256x128xf32>
    %c1_i32_15 = arith.constant 1 : i32
    %41 = vector.broadcast %c1_i32_15 : i32 to vector<256x128xi32>
    %42 = arith.cmpi sge, %11, %41 : vector<256x128xi32>
    %cst_16 = arith.constant 0.000000e+00 : f32
    %43 = vector.broadcast %cst_16 : f32 to vector<256x128xf32>
    %44 = arith.select %42, %40, %43 : vector<256x128xi1>, vector<256x128xf32>
    %45 = arith.truncf %44 : vector<256x128xf32> to vector<256x128xbf16>
    %46 = vector.extract_strided_slice %8 {offsets = [33, 0], sizes = [256, 128], strides = [1, 1]} : vector<290x128xf32> to vector<256x128xf32>
    %47 = arith.truncf %46 : vector<256x128xf32> to vector<256x128xbf16>
    %48 = vector.extract_strided_slice %8 {offsets = [34, 0], sizes = [256, 128], strides = [1, 1]} : vector<290x128xf32> to vector<256x128xf32>
    %c14_i32_17 = arith.constant 14 : i32
    %49 = vector.broadcast %c14_i32_17 : i32 to vector<256x128xi32>
    %50 = arith.cmpi sle, %11, %49 : vector<256x128xi32>
    %cst_18 = arith.constant 0.000000e+00 : f32
    %51 = vector.broadcast %cst_18 : f32 to vector<256x128xf32>
    %52 = arith.select %50, %48, %51 : vector<256x128xi1>, vector<256x128xf32>
    %53 = arith.truncf %52 : vector<256x128xf32> to vector<256x128xbf16>
    %54 = tpu.concatenate %17, %19, %25, %31, %33, %39, %45, %47, %53 in 1 : vector<256x128xbf16>, vector<256x128xbf16>, vector<256x128xbf16>, vector<256x128xbf16>, vector<256x128xbf16>, vector<256x128xbf16>, vector<256x128xbf16>, vector<256x128xbf16>, vector<256x128xbf16> -> vector<256x1152xbf16>
    %c0_19 = arith.constant 0 : index
    %c0_20 = arith.constant 0 : index
    %55 = vector.load %arg2[%c0_19, %c0_20] : memref<1152x128xbf16, #tpu.memory_space<vmem>>, vector<1152x128xbf16>
    %cst_21 = arith.constant dense<0.000000e+00> : vector<256x128xf32>
    %56 = tpu.matmul %54, %55, %cst_21 {dimension_numbers = #tpu.dot_dimension_numbers<[1], [0], [0], [1], [0, 0, 1, 1], [], []>} : vector<256x1152xbf16>, vector<1152x128xbf16>, vector<256x128xf32> -> vector<256x128xf32>
    %c0_22 = arith.constant 0 : index
    %c0_23 = arith.constant 0 : index
    %57 = vector.load %arg8[%c0_22, %c0_23] : memref<8x16xbf16, #tpu.memory_space<vmem>>, vector<8x16xbf16>
    %58 = vector.extract_strided_slice %56 {offsets = [0, 0], sizes = [16, 128], strides = [1, 1]} : vector<256x128xf32> to vector<16x128xf32>
    %59 = arith.truncf %58 : vector<16x128xf32> to vector<16x128xbf16>
    %cst_24 = arith.constant dense<0.000000e+00> : vector<8x128xf32>
    %60 = tpu.matmul %57, %59, %cst_24 {dimension_numbers = #tpu.dot_dimension_numbers<[1], [0], [0], [1], [0, 0, 1, 1], [], []>} : vector<8x16xbf16>, vector<16x128xbf16>, vector<8x128xf32> -> vector<8x128xf32>
    %61 = vector.extract_strided_slice %56 {offsets = [32, 0], sizes = [16, 128], strides = [1, 1]} : vector<256x128xf32> to vector<16x128xf32>
    %62 = arith.truncf %61 : vector<16x128xf32> to vector<16x128xbf16>
    %cst_25 = arith.constant dense<0.000000e+00> : vector<8x128xf32>
    %63 = tpu.matmul %57, %62, %cst_25 {dimension_numbers = #tpu.dot_dimension_numbers<[1], [0], [0], [1], [0, 0, 1, 1], [], []>} : vector<8x16xbf16>, vector<16x128xbf16>, vector<8x128xf32> -> vector<8x128xf32>
    %64 = vector.extract_strided_slice %56 {offsets = [64, 0], sizes = [16, 128], strides = [1, 1]} : vector<256x128xf32> to vector<16x128xf32>
    %65 = arith.truncf %64 : vector<16x128xf32> to vector<16x128xbf16>
    %cst_26 = arith.constant dense<0.000000e+00> : vector<8x128xf32>
    %66 = tpu.matmul %57, %65, %cst_26 {dimension_numbers = #tpu.dot_dimension_numbers<[1], [0], [0], [1], [0, 0, 1, 1], [], []>} : vector<8x16xbf16>, vector<16x128xbf16>, vector<8x128xf32> -> vector<8x128xf32>
    %67 = vector.extract_strided_slice %56 {offsets = [96, 0], sizes = [16, 128], strides = [1, 1]} : vector<256x128xf32> to vector<16x128xf32>
    %68 = arith.truncf %67 : vector<16x128xf32> to vector<16x128xbf16>
    %cst_27 = arith.constant dense<0.000000e+00> : vector<8x128xf32>
    %69 = tpu.matmul %57, %68, %cst_27 {dimension_numbers = #tpu.dot_dimension_numbers<[1], [0], [0], [1], [0, 0, 1, 1], [], []>} : vector<8x16xbf16>, vector<16x128xbf16>, vector<8x128xf32> -> vector<8x128xf32>
    %70 = vector.extract_strided_slice %56 {offsets = [128, 0], sizes = [16, 128], strides = [1, 1]} : vector<256x128xf32> to vector<16x128xf32>
    %71 = arith.truncf %70 : vector<16x128xf32> to vector<16x128xbf16>
    %cst_28 = arith.constant dense<0.000000e+00> : vector<8x128xf32>
    %72 = tpu.matmul %57, %71, %cst_28 {dimension_numbers = #tpu.dot_dimension_numbers<[1], [0], [0], [1], [0, 0, 1, 1], [], []>} : vector<8x16xbf16>, vector<16x128xbf16>, vector<8x128xf32> -> vector<8x128xf32>
    %73 = vector.extract_strided_slice %56 {offsets = [160, 0], sizes = [16, 128], strides = [1, 1]} : vector<256x128xf32> to vector<16x128xf32>
    %74 = arith.truncf %73 : vector<16x128xf32> to vector<16x128xbf16>
    %cst_29 = arith.constant dense<0.000000e+00> : vector<8x128xf32>
    %75 = tpu.matmul %57, %74, %cst_29 {dimension_numbers = #tpu.dot_dimension_numbers<[1], [0], [0], [1], [0, 0, 1, 1], [], []>} : vector<8x16xbf16>, vector<16x128xbf16>, vector<8x128xf32> -> vector<8x128xf32>
    %76 = vector.extract_strided_slice %56 {offsets = [192, 0], sizes = [16, 128], strides = [1, 1]} : vector<256x128xf32> to vector<16x128xf32>
    %77 = arith.truncf %76 : vector<16x128xf32> to vector<16x128xbf16>
    %cst_30 = arith.constant dense<0.000000e+00> : vector<8x128xf32>
    %78 = tpu.matmul %57, %77, %cst_30 {dimension_numbers = #tpu.dot_dimension_numbers<[1], [0], [0], [1], [0, 0, 1, 1], [], []>} : vector<8x16xbf16>, vector<16x128xbf16>, vector<8x128xf32> -> vector<8x128xf32>
    %79 = vector.extract_strided_slice %56 {offsets = [224, 0], sizes = [16, 128], strides = [1, 1]} : vector<256x128xf32> to vector<16x128xf32>
    %80 = arith.truncf %79 : vector<16x128xf32> to vector<16x128xbf16>
    %cst_31 = arith.constant dense<0.000000e+00> : vector<8x128xf32>
    %81 = tpu.matmul %57, %80, %cst_31 {dimension_numbers = #tpu.dot_dimension_numbers<[1], [0], [0], [1], [0, 0, 1, 1], [], []>} : vector<8x16xbf16>, vector<16x128xbf16>, vector<8x128xf32> -> vector<8x128xf32>
    %82 = tpu.concatenate %60, %63, %66, %69, %72, %75, %78, %81 in 0 : vector<8x128xf32>, vector<8x128xf32>, vector<8x128xf32>, vector<8x128xf32>, vector<8x128xf32>, vector<8x128xf32>, vector<8x128xf32>, vector<8x128xf32> -> vector<64x128xf32>
    %c0_32 = arith.constant 0 : index
    %c0_33 = arith.constant 0 : index
    %83 = vector.load %arg12[%c0_32, %c0_33] : memref<8x128xf32, #tpu.memory_space<vmem>>, vector<1x128xf32>
    %84 = vector.broadcast %83 : vector<1x128xf32> to vector<64x128xf32>
    %85 = arith.addf %82, %84 : vector<64x128xf32>
    %cst_34 = arith.constant 0.000000e+00 : f32
    %86 = vector.broadcast %cst_34 : f32 to vector<64x128xf32>
    %87 = arith.maximumf %85, %86 : vector<64x128xf32>
    %cst_35 = arith.constant 0.000000e+00 : f32
    %88 = vector.broadcast %cst_35 : f32 to vector<9x128xf32>
    %89 = tpu.concatenate %88, %87, %88 in 0 : vector<9x128xf32>, vector<64x128xf32>, vector<9x128xf32> -> vector<82x128xf32>
    %90 = tpu.iota {dimensions = array<i32: 0>} : vector<64x128xi32>
    %c7_i32 = arith.constant 7 : i32
    %91 = vector.broadcast %c7_i32 : i32 to vector<64x128xi32>
    %92 = arith.andi %90, %91 : vector<64x128xi32>
    %93 = vector.extract_strided_slice %89 {offsets = [0, 0], sizes = [64, 128], strides = [1, 1]} : vector<82x128xf32> to vector<64x128xf32>
    %c1_i32_36 = arith.constant 1 : i32
    %94 = vector.broadcast %c1_i32_36 : i32 to vector<64x128xi32>
    %95 = arith.cmpi sge, %92, %94 : vector<64x128xi32>
    %cst_37 = arith.constant 0.000000e+00 : f32
    %96 = vector.broadcast %cst_37 : f32 to vector<64x128xf32>
    %97 = arith.select %95, %93, %96 : vector<64x128xi1>, vector<64x128xf32>
    %98 = arith.truncf %97 : vector<64x128xf32> to vector<64x128xbf16>
    %99 = vector.extract_strided_slice %89 {offsets = [1, 0], sizes = [64, 128], strides = [1, 1]} : vector<82x128xf32> to vector<64x128xf32>
    %100 = arith.truncf %99 : vector<64x128xf32> to vector<64x128xbf16>
    %101 = vector.extract_strided_slice %89 {offsets = [2, 0], sizes = [64, 128], strides = [1, 1]} : vector<82x128xf32> to vector<64x128xf32>
    %c6_i32 = arith.constant 6 : i32
    %102 = vector.broadcast %c6_i32 : i32 to vector<64x128xi32>
    %103 = arith.cmpi sle, %92, %102 : vector<64x128xi32>
    %cst_38 = arith.constant 0.000000e+00 : f32
    %104 = vector.broadcast %cst_38 : f32 to vector<64x128xf32>
    %105 = arith.select %103, %101, %104 : vector<64x128xi1>, vector<64x128xf32>
    %106 = arith.truncf %105 : vector<64x128xf32> to vector<64x128xbf16>
    %107 = vector.extract_strided_slice %89 {offsets = [8, 0], sizes = [64, 128], strides = [1, 1]} : vector<82x128xf32> to vector<64x128xf32>
    %c1_i32_39 = arith.constant 1 : i32
    %108 = vector.broadcast %c1_i32_39 : i32 to vector<64x128xi32>
    %109 = arith.cmpi sge, %92, %108 : vector<64x128xi32>
    %cst_40 = arith.constant 0.000000e+00 : f32
    %110 = vector.broadcast %cst_40 : f32 to vector<64x128xf32>
    %111 = arith.select %109, %107, %110 : vector<64x128xi1>, vector<64x128xf32>
    %112 = arith.truncf %111 : vector<64x128xf32> to vector<64x128xbf16>
    %113 = vector.extract_strided_slice %89 {offsets = [9, 0], sizes = [64, 128], strides = [1, 1]} : vector<82x128xf32> to vector<64x128xf32>
    %114 = arith.truncf %113 : vector<64x128xf32> to vector<64x128xbf16>
    %115 = vector.extract_strided_slice %89 {offsets = [10, 0], sizes = [64, 128], strides = [1, 1]} : vector<82x128xf32> to vector<64x128xf32>
    %c6_i32_41 = arith.constant 6 : i32
    %116 = vector.broadcast %c6_i32_41 : i32 to vector<64x128xi32>
    %117 = arith.cmpi sle, %92, %116 : vector<64x128xi32>
    %cst_42 = arith.constant 0.000000e+00 : f32
    %118 = vector.broadcast %cst_42 : f32 to vector<64x128xf32>
    %119 = arith.select %117, %115, %118 : vector<64x128xi1>, vector<64x128xf32>
    %120 = arith.truncf %119 : vector<64x128xf32> to vector<64x128xbf16>
    %121 = vector.extract_strided_slice %89 {offsets = [16, 0], sizes = [64, 128], strides = [1, 1]} : vector<82x128xf32> to vector<64x128xf32>
    %c1_i32_43 = arith.constant 1 : i32
    %122 = vector.broadcast %c1_i32_43 : i32 to vector<64x128xi32>
    %123 = arith.cmpi sge, %92, %122 : vector<64x128xi32>
    %cst_44 = arith.constant 0.000000e+00 : f32
    %124 = vector.broadcast %cst_44 : f32 to vector<64x128xf32>
    %125 = arith.select %123, %121, %124 : vector<64x128xi1>, vector<64x128xf32>
    %126 = arith.truncf %125 : vector<64x128xf32> to vector<64x128xbf16>
    %127 = vector.extract_strided_slice %89 {offsets = [17, 0], sizes = [64, 128], strides = [1, 1]} : vector<82x128xf32> to vector<64x128xf32>
    %128 = arith.truncf %127 : vector<64x128xf32> to vector<64x128xbf16>
    %129 = vector.extract_strided_slice %89 {offsets = [18, 0], sizes = [64, 128], strides = [1, 1]} : vector<82x128xf32> to vector<64x128xf32>
    %c6_i32_45 = arith.constant 6 : i32
    %130 = vector.broadcast %c6_i32_45 : i32 to vector<64x128xi32>
    %131 = arith.cmpi sle, %92, %130 : vector<64x128xi32>
    %cst_46 = arith.constant 0.000000e+00 : f32
    %132 = vector.broadcast %cst_46 : f32 to vector<64x128xf32>
    %133 = arith.select %131, %129, %132 : vector<64x128xi1>, vector<64x128xf32>
    %134 = arith.truncf %133 : vector<64x128xf32> to vector<64x128xbf16>
    %135 = tpu.concatenate %98, %100, %106, %112, %114, %120, %126, %128, %134 in 1 : vector<64x128xbf16>, vector<64x128xbf16>, vector<64x128xbf16>, vector<64x128xbf16>, vector<64x128xbf16>, vector<64x128xbf16>, vector<64x128xbf16>, vector<64x128xbf16>, vector<64x128xbf16> -> vector<64x1152xbf16>
    %c0_47 = arith.constant 0 : index
    %c0_48 = arith.constant 0 : index
    %136 = vector.load %arg3[%c0_47, %c0_48] : memref<1152x128xbf16, #tpu.memory_space<vmem>>, vector<1152x128xbf16>
    %cst_49 = arith.constant dense<0.000000e+00> : vector<64x128xf32>
    %137 = tpu.matmul %135, %136, %cst_49 {dimension_numbers = #tpu.dot_dimension_numbers<[1], [0], [0], [1], [0, 0, 1, 1], [], []>} : vector<64x1152xbf16>, vector<1152x128xbf16>, vector<64x128xf32> -> vector<64x128xf32>
    %c0_50 = arith.constant 0 : index
    %c0_51 = arith.constant 0 : index
    %138 = vector.load %arg9[%c0_50, %c0_51] : memref<4x8xbf16, #tpu.memory_space<vmem>>, vector<4x8xbf16>
    %139 = vector.extract_strided_slice %137 {offsets = [0, 0], sizes = [8, 128], strides = [1, 1]} : vector<64x128xf32> to vector<8x128xf32>
    %140 = arith.truncf %139 : vector<8x128xf32> to vector<8x128xbf16>
    %cst_52 = arith.constant dense<0.000000e+00> : vector<4x128xf32>
    %141 = tpu.matmul %138, %140, %cst_52 {dimension_numbers = #tpu.dot_dimension_numbers<[1], [0], [0], [1], [0, 0, 1, 1], [], []>} : vector<4x8xbf16>, vector<8x128xbf16>, vector<4x128xf32> -> vector<4x128xf32>
    %142 = vector.extract_strided_slice %137 {offsets = [16, 0], sizes = [8, 128], strides = [1, 1]} : vector<64x128xf32> to vector<8x128xf32>
    %143 = arith.truncf %142 : vector<8x128xf32> to vector<8x128xbf16>
    %cst_53 = arith.constant dense<0.000000e+00> : vector<4x128xf32>
    %144 = tpu.matmul %138, %143, %cst_53 {dimension_numbers = #tpu.dot_dimension_numbers<[1], [0], [0], [1], [0, 0, 1, 1], [], []>} : vector<4x8xbf16>, vector<8x128xbf16>, vector<4x128xf32> -> vector<4x128xf32>
    %145 = vector.extract_strided_slice %137 {offsets = [32, 0], sizes = [8, 128], strides = [1, 1]} : vector<64x128xf32> to vector<8x128xf32>
    %146 = arith.truncf %145 : vector<8x128xf32> to vector<8x128xbf16>
    %cst_54 = arith.constant dense<0.000000e+00> : vector<4x128xf32>
    %147 = tpu.matmul %138, %146, %cst_54 {dimension_numbers = #tpu.dot_dimension_numbers<[1], [0], [0], [1], [0, 0, 1, 1], [], []>} : vector<4x8xbf16>, vector<8x128xbf16>, vector<4x128xf32> -> vector<4x128xf32>
    %148 = vector.extract_strided_slice %137 {offsets = [48, 0], sizes = [8, 128], strides = [1, 1]} : vector<64x128xf32> to vector<8x128xf32>
    %149 = arith.truncf %148 : vector<8x128xf32> to vector<8x128xbf16>
    %cst_55 = arith.constant dense<0.000000e+00> : vector<4x128xf32>
    %150 = tpu.matmul %138, %149, %cst_55 {dimension_numbers = #tpu.dot_dimension_numbers<[1], [0], [0], [1], [0, 0, 1, 1], [], []>} : vector<4x8xbf16>, vector<8x128xbf16>, vector<4x128xf32> -> vector<4x128xf32>
    %151 = tpu.concatenate %141, %144, %147, %150 in 0 : vector<4x128xf32>, vector<4x128xf32>, vector<4x128xf32>, vector<4x128xf32> -> vector<16x128xf32>
    %c1 = arith.constant 1 : index
    %c0_56 = arith.constant 0 : index
    %152 = vector.load %arg12[%c1, %c0_56] : memref<8x128xf32, #tpu.memory_space<vmem>>, vector<1x128xf32>
    %153 = vector.broadcast %152 : vector<1x128xf32> to vector<16x128xf32>
    %154 = arith.addf %151, %153 : vector<16x128xf32>
    %cst_57 = arith.constant 0.000000e+00 : f32
    %155 = vector.broadcast %cst_57 : f32 to vector<16x128xf32>
    %156 = arith.maximumf %154, %155 : vector<16x128xf32>
    %cst_58 = arith.constant 0.000000e+00 : f32
    %157 = vector.broadcast %cst_58 : f32 to vector<5x128xf32>
    %158 = tpu.concatenate %157, %156, %157 in 0 : vector<5x128xf32>, vector<16x128xf32>, vector<5x128xf32> -> vector<26x128xf32>
    %159 = tpu.iota {dimensions = array<i32: 0>} : vector<16x128xi32>
    %c3_i32 = arith.constant 3 : i32
    %160 = vector.broadcast %c3_i32 : i32 to vector<16x128xi32>
    %161 = arith.andi %159, %160 : vector<16x128xi32>
    %162 = vector.extract_strided_slice %158 {offsets = [0, 0], sizes = [16, 128], strides = [1, 1]} : vector<26x128xf32> to vector<16x128xf32>
    %c1_i32_59 = arith.constant 1 : i32
    %163 = vector.broadcast %c1_i32_59 : i32 to vector<16x128xi32>
    %164 = arith.cmpi sge, %161, %163 : vector<16x128xi32>
    %cst_60 = arith.constant 0.000000e+00 : f32
    %165 = vector.broadcast %cst_60 : f32 to vector<16x128xf32>
    %166 = arith.select %164, %162, %165 : vector<16x128xi1>, vector<16x128xf32>
    %167 = arith.truncf %166 : vector<16x128xf32> to vector<16x128xbf16>
    %168 = vector.extract_strided_slice %158 {offsets = [1, 0], sizes = [16, 128], strides = [1, 1]} : vector<26x128xf32> to vector<16x128xf32>
    %169 = arith.truncf %168 : vector<16x128xf32> to vector<16x128xbf16>
    %170 = vector.extract_strided_slice %158 {offsets = [2, 0], sizes = [16, 128], strides = [1, 1]} : vector<26x128xf32> to vector<16x128xf32>
    %c2_i32 = arith.constant 2 : i32
    %171 = vector.broadcast %c2_i32 : i32 to vector<16x128xi32>
    %172 = arith.cmpi sle, %161, %171 : vector<16x128xi32>
    %cst_61 = arith.constant 0.000000e+00 : f32
    %173 = vector.broadcast %cst_61 : f32 to vector<16x128xf32>
    %174 = arith.select %172, %170, %173 : vector<16x128xi1>, vector<16x128xf32>
    %175 = arith.truncf %174 : vector<16x128xf32> to vector<16x128xbf16>
    %176 = vector.extract_strided_slice %158 {offsets = [4, 0], sizes = [16, 128], strides = [1, 1]} : vector<26x128xf32> to vector<16x128xf32>
    %c1_i32_62 = arith.constant 1 : i32
    %177 = vector.broadcast %c1_i32_62 : i32 to vector<16x128xi32>
    %178 = arith.cmpi sge, %161, %177 : vector<16x128xi32>
    %cst_63 = arith.constant 0.000000e+00 : f32
    %179 = vector.broadcast %cst_63 : f32 to vector<16x128xf32>
    %180 = arith.select %178, %176, %179 : vector<16x128xi1>, vector<16x128xf32>
    %181 = arith.truncf %180 : vector<16x128xf32> to vector<16x128xbf16>
    %182 = vector.extract_strided_slice %158 {offsets = [5, 0], sizes = [16, 128], strides = [1, 1]} : vector<26x128xf32> to vector<16x128xf32>
    %183 = arith.truncf %182 : vector<16x128xf32> to vector<16x128xbf16>
    %184 = vector.extract_strided_slice %158 {offsets = [6, 0], sizes = [16, 128], strides = [1, 1]} : vector<26x128xf32> to vector<16x128xf32>
    %c2_i32_64 = arith.constant 2 : i32
    %185 = vector.broadcast %c2_i32_64 : i32 to vector<16x128xi32>
    %186 = arith.cmpi sle, %161, %185 : vector<16x128xi32>
    %cst_65 = arith.constant 0.000000e+00 : f32
    %187 = vector.broadcast %cst_65 : f32 to vector<16x128xf32>
    %188 = arith.select %186, %184, %187 : vector<16x128xi1>, vector<16x128xf32>
    %189 = arith.truncf %188 : vector<16x128xf32> to vector<16x128xbf16>
    %190 = vector.extract_strided_slice %158 {offsets = [8, 0], sizes = [16, 128], strides = [1, 1]} : vector<26x128xf32> to vector<16x128xf32>
    %c1_i32_66 = arith.constant 1 : i32
    %191 = vector.broadcast %c1_i32_66 : i32 to vector<16x128xi32>
    %192 = arith.cmpi sge, %161, %191 : vector<16x128xi32>
    %cst_67 = arith.constant 0.000000e+00 : f32
    %193 = vector.broadcast %cst_67 : f32 to vector<16x128xf32>
    %194 = arith.select %192, %190, %193 : vector<16x128xi1>, vector<16x128xf32>
    %195 = arith.truncf %194 : vector<16x128xf32> to vector<16x128xbf16>
    %196 = vector.extract_strided_slice %158 {offsets = [9, 0], sizes = [16, 128], strides = [1, 1]} : vector<26x128xf32> to vector<16x128xf32>
    %197 = arith.truncf %196 : vector<16x128xf32> to vector<16x128xbf16>
    %198 = vector.extract_strided_slice %158 {offsets = [10, 0], sizes = [16, 128], strides = [1, 1]} : vector<26x128xf32> to vector<16x128xf32>
    %c2_i32_68 = arith.constant 2 : i32
    %199 = vector.broadcast %c2_i32_68 : i32 to vector<16x128xi32>
    %200 = arith.cmpi sle, %161, %199 : vector<16x128xi32>
    %cst_69 = arith.constant 0.000000e+00 : f32
    %201 = vector.broadcast %cst_69 : f32 to vector<16x128xf32>
    %202 = arith.select %200, %198, %201 : vector<16x128xi1>, vector<16x128xf32>
    %203 = arith.truncf %202 : vector<16x128xf32> to vector<16x128xbf16>
    %204 = tpu.concatenate %167, %169, %175, %181, %183, %189, %195, %197, %203 in 1 : vector<16x128xbf16>, vector<16x128xbf16>, vector<16x128xbf16>, vector<16x128xbf16>, vector<16x128xbf16>, vector<16x128xbf16>, vector<16x128xbf16>, vector<16x128xbf16>, vector<16x128xbf16> -> vector<16x1152xbf16>
    %c0_70 = arith.constant 0 : index
    %c0_71 = arith.constant 0 : index
    %205 = vector.load %arg4[%c0_70, %c0_71] : memref<1152x128xbf16, #tpu.memory_space<vmem>>, vector<1152x128xbf16>
    %cst_72 = arith.constant dense<0.000000e+00> : vector<16x128xf32>
    %206 = tpu.matmul %204, %205, %cst_72 {dimension_numbers = #tpu.dot_dimension_numbers<[1], [0], [0], [1], [0, 0, 1, 1], [], []>} : vector<16x1152xbf16>, vector<1152x128xbf16>, vector<16x128xf32> -> vector<16x128xf32>
    %c2 = arith.constant 2 : index
    %c0_73 = arith.constant 0 : index
    %207 = vector.load %arg12[%c2, %c0_73] : memref<8x128xf32, #tpu.memory_space<vmem>>, vector<1x128xf32>
    %208 = vector.broadcast %207 : vector<1x128xf32> to vector<16x128xf32>
    %209 = arith.addf %206, %208 : vector<16x128xf32>
    %cst_74 = arith.constant 0.000000e+00 : f32
    %210 = vector.broadcast %cst_74 : f32 to vector<16x128xf32>
    %211 = arith.maximumf %209, %210 : vector<16x128xf32>
    %cst_75 = arith.constant 0.000000e+00 : f32
    %212 = vector.broadcast %cst_75 : f32 to vector<5x128xf32>
    %213 = tpu.concatenate %211, %212 in 0 : vector<16x128xf32>, vector<5x128xf32> -> vector<21x128xf32>
    %214 = vector.extract_strided_slice %213 {offsets = [0, 0], sizes = [16, 128], strides = [1, 1]} : vector<21x128xf32> to vector<16x128xf32>
    %215 = arith.truncf %214 : vector<16x128xf32> to vector<16x128xbf16>
    %c0_76 = arith.constant 0 : index
    %c0_77 = arith.constant 0 : index
    %216 = vector.load %arg5[%c0_76, %c0_77] : memref<1152x128xbf16, #tpu.memory_space<vmem>>, vector<128x128xbf16>
    %cst_78 = arith.constant dense<0.000000e+00> : vector<16x128xf32>
    %217 = tpu.matmul %215, %216, %cst_78 {dimension_numbers = #tpu.dot_dimension_numbers<[1], [0], [0], [1], [0, 0, 1, 1], [], []>} : vector<16x128xbf16>, vector<128x128xbf16>, vector<16x128xf32> -> vector<16x128xf32>
    %c3 = arith.constant 3 : index
    %c0_79 = arith.constant 0 : index
    %218 = vector.load %arg12[%c3, %c0_79] : memref<8x128xf32, #tpu.memory_space<vmem>>, vector<1x128xf32>
    %219 = vector.broadcast %218 : vector<1x128xf32> to vector<16x128xf32>
    %220 = arith.addf %217, %219 : vector<16x128xf32>
    %cst_80 = arith.constant 0.000000e+00 : f32
    %221 = vector.broadcast %cst_80 : f32 to vector<16x128xf32>
    %222 = arith.maximumf %220, %221 : vector<16x128xf32>
    %cst_81 = arith.constant 0.000000e+00 : f32
    %223 = vector.broadcast %cst_81 : f32 to vector<5x128xf32>
    %224 = tpu.concatenate %211, %223 in 0 : vector<16x128xf32>, vector<5x128xf32> -> vector<21x128xf32>
    %225 = tpu.iota {dimensions = array<i32: 0>} : vector<16x128xi32>
    %c3_i32_82 = arith.constant 3 : i32
    %226 = vector.broadcast %c3_i32_82 : i32 to vector<16x128xi32>
    %227 = arith.andi %225, %226 : vector<16x128xi32>
    %228 = vector.extract_strided_slice %224 {offsets = [1, 0], sizes = [16, 128], strides = [1, 1]} : vector<21x128xf32> to vector<16x128xf32>
    %c2_i32_83 = arith.constant 2 : i32
    %229 = vector.broadcast %c2_i32_83 : i32 to vector<16x128xi32>
    %230 = arith.cmpi sle, %227, %229 : vector<16x128xi32>
    %cst_84 = arith.constant 0.000000e+00 : f32
    %231 = vector.broadcast %cst_84 : f32 to vector<16x128xf32>
    %232 = arith.select %230, %228, %231 : vector<16x128xi1>, vector<16x128xf32>
    %233 = arith.truncf %232 : vector<16x128xf32> to vector<16x128xbf16>
    %234 = vector.extract_strided_slice %224 {offsets = [0, 0], sizes = [16, 128], strides = [1, 1]} : vector<21x128xf32> to vector<16x128xf32>
    %235 = arith.truncf %234 : vector<16x128xf32> to vector<16x128xbf16>
    %236 = tpu.concatenate %233, %235 in 1 : vector<16x128xbf16>, vector<16x128xbf16> -> vector<16x256xbf16>
    %c128 = arith.constant 128 : index
    %c0_85 = arith.constant 0 : index
    %237 = vector.load %arg5[%c128, %c0_85] : memref<1152x128xbf16, #tpu.memory_space<vmem>>, vector<256x128xbf16>
    %cst_86 = arith.constant dense<0.000000e+00> : vector<16x128xf32>
    %238 = tpu.matmul %236, %237, %cst_86 {dimension_numbers = #tpu.dot_dimension_numbers<[1], [0], [0], [1], [0, 0, 1, 1], [], []>} : vector<16x256xbf16>, vector<256x128xbf16>, vector<16x128xf32> -> vector<16x128xf32>
    %c3_87 = arith.constant 3 : index
    %c0_88 = arith.constant 0 : index
    %239 = vector.load %arg12[%c3_87, %c0_88] : memref<8x128xf32, #tpu.memory_space<vmem>>, vector<1x128xf32>
    %240 = vector.broadcast %239 : vector<1x128xf32> to vector<16x128xf32>
    %241 = arith.addf %238, %240 : vector<16x128xf32>
    %cst_89 = arith.constant 0.000000e+00 : f32
    %242 = vector.broadcast %cst_89 : f32 to vector<16x128xf32>
    %243 = arith.maximumf %241, %242 : vector<16x128xf32>
    %cst_90 = arith.constant 0.000000e+00 : f32
    %244 = vector.broadcast %cst_90 : f32 to vector<5x128xf32>
    %245 = tpu.concatenate %211, %244 in 0 : vector<16x128xf32>, vector<5x128xf32> -> vector<21x128xf32>
    %246 = vector.extract_strided_slice %245 {offsets = [4, 0], sizes = [16, 128], strides = [1, 1]} : vector<21x128xf32> to vector<16x128xf32>
    %247 = arith.truncf %246 : vector<16x128xf32> to vector<16x128xbf16>
    %248 = vector.extract_strided_slice %245 {offsets = [0, 0], sizes = [16, 128], strides = [1, 1]} : vector<21x128xf32> to vector<16x128xf32>
    %249 = arith.truncf %248 : vector<16x128xf32> to vector<16x128xbf16>
    %250 = tpu.concatenate %247, %249 in 1 : vector<16x128xbf16>, vector<16x128xbf16> -> vector<16x256xbf16>
    %c384 = arith.constant 384 : index
    %c0_91 = arith.constant 0 : index
    %251 = vector.load %arg5[%c384, %c0_91] : memref<1152x128xbf16, #tpu.memory_space<vmem>>, vector<256x128xbf16>
    %cst_92 = arith.constant dense<0.000000e+00> : vector<16x128xf32>
    %252 = tpu.matmul %250, %251, %cst_92 {dimension_numbers = #tpu.dot_dimension_numbers<[1], [0], [0], [1], [0, 0, 1, 1], [], []>} : vector<16x256xbf16>, vector<256x128xbf16>, vector<16x128xf32> -> vector<16x128xf32>
    %c3_93 = arith.constant 3 : index
    %c0_94 = arith.constant 0 : index
    %253 = vector.load %arg12[%c3_93, %c0_94] : memref<8x128xf32, #tpu.memory_space<vmem>>, vector<1x128xf32>
    %254 = vector.broadcast %253 : vector<1x128xf32> to vector<16x128xf32>
    %255 = arith.addf %252, %254 : vector<16x128xf32>
    %cst_95 = arith.constant 0.000000e+00 : f32
    %256 = vector.broadcast %cst_95 : f32 to vector<16x128xf32>
    %257 = arith.maximumf %255, %256 : vector<16x128xf32>
    %cst_96 = arith.constant 0.000000e+00 : f32
    %258 = vector.broadcast %cst_96 : f32 to vector<5x128xf32>
    %259 = tpu.concatenate %211, %258 in 0 : vector<16x128xf32>, vector<5x128xf32> -> vector<21x128xf32>
    %260 = tpu.iota {dimensions = array<i32: 0>} : vector<16x128xi32>
    %c3_i32_97 = arith.constant 3 : i32
    %261 = vector.broadcast %c3_i32_97 : i32 to vector<16x128xi32>
    %262 = arith.andi %260, %261 : vector<16x128xi32>
    %263 = vector.extract_strided_slice %259 {offsets = [5, 0], sizes = [16, 128], strides = [1, 1]} : vector<21x128xf32> to vector<16x128xf32>
    %c2_i32_98 = arith.constant 2 : i32
    %264 = vector.broadcast %c2_i32_98 : i32 to vector<16x128xi32>
    %265 = arith.cmpi sle, %262, %264 : vector<16x128xi32>
    %cst_99 = arith.constant 0.000000e+00 : f32
    %266 = vector.broadcast %cst_99 : f32 to vector<16x128xf32>
    %267 = arith.select %265, %263, %266 : vector<16x128xi1>, vector<16x128xf32>
    %268 = arith.truncf %267 : vector<16x128xf32> to vector<16x128xbf16>
    %269 = vector.extract_strided_slice %259 {offsets = [4, 0], sizes = [16, 128], strides = [1, 1]} : vector<21x128xf32> to vector<16x128xf32>
    %270 = arith.truncf %269 : vector<16x128xf32> to vector<16x128xbf16>
    %271 = vector.extract_strided_slice %259 {offsets = [1, 0], sizes = [16, 128], strides = [1, 1]} : vector<21x128xf32> to vector<16x128xf32>
    %c2_i32_100 = arith.constant 2 : i32
    %272 = vector.broadcast %c2_i32_100 : i32 to vector<16x128xi32>
    %273 = arith.cmpi sle, %262, %272 : vector<16x128xi32>
    %cst_101 = arith.constant 0.000000e+00 : f32
    %274 = vector.broadcast %cst_101 : f32 to vector<16x128xf32>
    %275 = arith.select %273, %271, %274 : vector<16x128xi1>, vector<16x128xf32>
    %276 = arith.truncf %275 : vector<16x128xf32> to vector<16x128xbf16>
    %277 = vector.extract_strided_slice %259 {offsets = [0, 0], sizes = [16, 128], strides = [1, 1]} : vector<21x128xf32> to vector<16x128xf32>
    %278 = arith.truncf %277 : vector<16x128xf32> to vector<16x128xbf16>
    %279 = tpu.concatenate %268, %270, %276, %278 in 1 : vector<16x128xbf16>, vector<16x128xbf16>, vector<16x128xbf16>, vector<16x128xbf16> -> vector<16x512xbf16>
    %c640 = arith.constant 640 : index
    %c0_102 = arith.constant 0 : index
    %280 = vector.load %arg5[%c640, %c0_102] : memref<1152x128xbf16, #tpu.memory_space<vmem>>, vector<512x128xbf16>
    %cst_103 = arith.constant dense<0.000000e+00> : vector<16x128xf32>
    %281 = tpu.matmul %279, %280, %cst_103 {dimension_numbers = #tpu.dot_dimension_numbers<[1], [0], [0], [1], [0, 0, 1, 1], [], []>} : vector<16x512xbf16>, vector<512x128xbf16>, vector<16x128xf32> -> vector<16x128xf32>
    %c3_104 = arith.constant 3 : index
    %c0_105 = arith.constant 0 : index
    %282 = vector.load %arg12[%c3_104, %c0_105] : memref<8x128xf32, #tpu.memory_space<vmem>>, vector<1x128xf32>
    %283 = vector.broadcast %282 : vector<1x128xf32> to vector<16x128xf32>
    %284 = arith.addf %281, %283 : vector<16x128xf32>
    %cst_106 = arith.constant 0.000000e+00 : f32
    %285 = vector.broadcast %cst_106 : f32 to vector<16x128xf32>
    %286 = arith.maximumf %284, %285 : vector<16x128xf32>
    %c0_107 = arith.constant 0 : index
    %c0_108 = arith.constant 0 : index
    %287 = vector.load %arg10[%c0_107, %c0_108] : memref<16x16xbf16, #tpu.memory_space<vmem>>, vector<16x16xbf16>
    %288 = vector.extract_strided_slice %222 {offsets = [0, 0], sizes = [4, 128], strides = [1, 1]} : vector<16x128xf32> to vector<4x128xf32>
    %289 = vector.extract_strided_slice %243 {offsets = [0, 0], sizes = [4, 128], strides = [1, 1]} : vector<16x128xf32> to vector<4x128xf32>
    %290 = vector.extract_strided_slice %257 {offsets = [0, 0], sizes = [4, 128], strides = [1, 1]} : vector<16x128xf32> to vector<4x128xf32>
    %291 = vector.extract_strided_slice %286 {offsets = [0, 0], sizes = [4, 128], strides = [1, 1]} : vector<16x128xf32> to vector<4x128xf32>
    %292 = tpu.concatenate %288, %289, %290, %291 in 0 : vector<4x128xf32>, vector<4x128xf32>, vector<4x128xf32>, vector<4x128xf32> -> vector<16x128xf32>
    %293 = arith.truncf %292 : vector<16x128xf32> to vector<16x128xbf16>
    %cst_109 = arith.constant dense<0.000000e+00> : vector<16x128xf32>
    %294 = tpu.matmul %287, %293, %cst_109 {dimension_numbers = #tpu.dot_dimension_numbers<[1], [0], [0], [1], [0, 0, 1, 1], [], []>} : vector<16x16xbf16>, vector<16x128xbf16>, vector<16x128xf32> -> vector<16x128xf32>
    %295 = vector.extract_strided_slice %222 {offsets = [4, 0], sizes = [4, 128], strides = [1, 1]} : vector<16x128xf32> to vector<4x128xf32>
    %296 = vector.extract_strided_slice %243 {offsets = [4, 0], sizes = [4, 128], strides = [1, 1]} : vector<16x128xf32> to vector<4x128xf32>
    %297 = vector.extract_strided_slice %257 {offsets = [4, 0], sizes = [4, 128], strides = [1, 1]} : vector<16x128xf32> to vector<4x128xf32>
    %298 = vector.extract_strided_slice %286 {offsets = [4, 0], sizes = [4, 128], strides = [1, 1]} : vector<16x128xf32> to vector<4x128xf32>
    %299 = tpu.concatenate %295, %296, %297, %298 in 0 : vector<4x128xf32>, vector<4x128xf32>, vector<4x128xf32>, vector<4x128xf32> -> vector<16x128xf32>
    %300 = arith.truncf %299 : vector<16x128xf32> to vector<16x128xbf16>
    %cst_110 = arith.constant dense<0.000000e+00> : vector<16x128xf32>
    %301 = tpu.matmul %287, %300, %cst_110 {dimension_numbers = #tpu.dot_dimension_numbers<[1], [0], [0], [1], [0, 0, 1, 1], [], []>} : vector<16x16xbf16>, vector<16x128xbf16>, vector<16x128xf32> -> vector<16x128xf32>
    %302 = vector.extract_strided_slice %222 {offsets = [8, 0], sizes = [4, 128], strides = [1, 1]} : vector<16x128xf32> to vector<4x128xf32>
    %303 = vector.extract_strided_slice %243 {offsets = [8, 0], sizes = [4, 128], strides = [1, 1]} : vector<16x128xf32> to vector<4x128xf32>
    %304 = vector.extract_strided_slice %257 {offsets = [8, 0], sizes = [4, 128], strides = [1, 1]} : vector<16x128xf32> to vector<4x128xf32>
    %305 = vector.extract_strided_slice %286 {offsets = [8, 0], sizes = [4, 128], strides = [1, 1]} : vector<16x128xf32> to vector<4x128xf32>
    %306 = tpu.concatenate %302, %303, %304, %305 in 0 : vector<4x128xf32>, vector<4x128xf32>, vector<4x128xf32>, vector<4x128xf32> -> vector<16x128xf32>
    %307 = arith.truncf %306 : vector<16x128xf32> to vector<16x128xbf16>
    %cst_111 = arith.constant dense<0.000000e+00> : vector<16x128xf32>
    %308 = tpu.matmul %287, %307, %cst_111 {dimension_numbers = #tpu.dot_dimension_numbers<[1], [0], [0], [1], [0, 0, 1, 1], [], []>} : vector<16x16xbf16>, vector<16x128xbf16>, vector<16x128xf32> -> vector<16x128xf32>
    %309 = vector.extract_strided_slice %222 {offsets = [12, 0], sizes = [4, 128], strides = [1, 1]} : vector<16x128xf32> to vector<4x128xf32>
    %310 = vector.extract_strided_slice %243 {offsets = [12, 0], sizes = [4, 128], strides = [1, 1]} : vector<16x128xf32> to vector<4x128xf32>
    %311 = vector.extract_strided_slice %257 {offsets = [12, 0], sizes = [4, 128], strides = [1, 1]} : vector<16x128xf32> to vector<4x128xf32>
    %312 = vector.extract_strided_slice %286 {offsets = [12, 0], sizes = [4, 128], strides = [1, 1]} : vector<16x128xf32> to vector<4x128xf32>
    %313 = tpu.concatenate %309, %310, %311, %312 in 0 : vector<4x128xf32>, vector<4x128xf32>, vector<4x128xf32>, vector<4x128xf32> -> vector<16x128xf32>
    %314 = arith.truncf %313 : vector<16x128xf32> to vector<16x128xbf16>
    %cst_112 = arith.constant dense<0.000000e+00> : vector<16x128xf32>
    %315 = tpu.matmul %287, %314, %cst_112 {dimension_numbers = #tpu.dot_dimension_numbers<[1], [0], [0], [1], [0, 0, 1, 1], [], []>} : vector<16x16xbf16>, vector<16x128xbf16>, vector<16x128xf32> -> vector<16x128xf32>
    %316 = tpu.concatenate %294, %301, %308, %315 in 0 : vector<16x128xf32>, vector<16x128xf32>, vector<16x128xf32>, vector<16x128xf32> -> vector<64x128xf32>
    %cst_113 = arith.constant 0.000000e+00 : f32
    %317 = vector.broadcast %cst_113 : f32 to vector<9x128xf32>
    %318 = tpu.concatenate %316, %317 in 0 : vector<64x128xf32>, vector<9x128xf32> -> vector<73x128xf32>
    %319 = vector.extract_strided_slice %318 {offsets = [0, 0], sizes = [64, 128], strides = [1, 1]} : vector<73x128xf32> to vector<64x128xf32>
    %320 = arith.truncf %319 : vector<64x128xf32> to vector<64x128xbf16>
    %c0_114 = arith.constant 0 : index
    %c0_115 = arith.constant 0 : index
    %321 = vector.load %arg6[%c0_114, %c0_115] : memref<1152x128xbf16, #tpu.memory_space<vmem>>, vector<128x128xbf16>
    %cst_116 = arith.constant dense<0.000000e+00> : vector<64x128xf32>
    %322 = tpu.matmul %320, %321, %cst_116 {dimension_numbers = #tpu.dot_dimension_numbers<[1], [0], [0], [1], [0, 0, 1, 1], [], []>} : vector<64x128xbf16>, vector<128x128xbf16>, vector<64x128xf32> -> vector<64x128xf32>
    %c4 = arith.constant 4 : index
    %c0_117 = arith.constant 0 : index
    %323 = vector.load %arg12[%c4, %c0_117] : memref<8x128xf32, #tpu.memory_space<vmem>>, vector<1x128xf32>
    %324 = vector.broadcast %323 : vector<1x128xf32> to vector<64x128xf32>
    %325 = arith.addf %322, %324 : vector<64x128xf32>
    %cst_118 = arith.constant 0.000000e+00 : f32
    %326 = vector.broadcast %cst_118 : f32 to vector<64x128xf32>
    %327 = arith.maximumf %325, %326 : vector<64x128xf32>
    %cst_119 = arith.constant 0.000000e+00 : f32
    %328 = vector.broadcast %cst_119 : f32 to vector<9x128xf32>
    %329 = tpu.concatenate %316, %328 in 0 : vector<64x128xf32>, vector<9x128xf32> -> vector<73x128xf32>
    %330 = tpu.iota {dimensions = array<i32: 0>} : vector<64x128xi32>
    %c7_i32_120 = arith.constant 7 : i32
    %331 = vector.broadcast %c7_i32_120 : i32 to vector<64x128xi32>
    %332 = arith.andi %330, %331 : vector<64x128xi32>
    %333 = vector.extract_strided_slice %329 {offsets = [1, 0], sizes = [64, 128], strides = [1, 1]} : vector<73x128xf32> to vector<64x128xf32>
    %c6_i32_121 = arith.constant 6 : i32
    %334 = vector.broadcast %c6_i32_121 : i32 to vector<64x128xi32>
    %335 = arith.cmpi sle, %332, %334 : vector<64x128xi32>
    %cst_122 = arith.constant 0.000000e+00 : f32
    %336 = vector.broadcast %cst_122 : f32 to vector<64x128xf32>
    %337 = arith.select %335, %333, %336 : vector<64x128xi1>, vector<64x128xf32>
    %338 = arith.truncf %337 : vector<64x128xf32> to vector<64x128xbf16>
    %339 = vector.extract_strided_slice %329 {offsets = [0, 0], sizes = [64, 128], strides = [1, 1]} : vector<73x128xf32> to vector<64x128xf32>
    %340 = arith.truncf %339 : vector<64x128xf32> to vector<64x128xbf16>
    %341 = tpu.concatenate %338, %340 in 1 : vector<64x128xbf16>, vector<64x128xbf16> -> vector<64x256xbf16>
    %c128_123 = arith.constant 128 : index
    %c0_124 = arith.constant 0 : index
    %342 = vector.load %arg6[%c128_123, %c0_124] : memref<1152x128xbf16, #tpu.memory_space<vmem>>, vector<256x128xbf16>
    %cst_125 = arith.constant dense<0.000000e+00> : vector<64x128xf32>
    %343 = tpu.matmul %341, %342, %cst_125 {dimension_numbers = #tpu.dot_dimension_numbers<[1], [0], [0], [1], [0, 0, 1, 1], [], []>} : vector<64x256xbf16>, vector<256x128xbf16>, vector<64x128xf32> -> vector<64x128xf32>
    %c4_126 = arith.constant 4 : index
    %c0_127 = arith.constant 0 : index
    %344 = vector.load %arg12[%c4_126, %c0_127] : memref<8x128xf32, #tpu.memory_space<vmem>>, vector<1x128xf32>
    %345 = vector.broadcast %344 : vector<1x128xf32> to vector<64x128xf32>
    %346 = arith.addf %343, %345 : vector<64x128xf32>
    %cst_128 = arith.constant 0.000000e+00 : f32
    %347 = vector.broadcast %cst_128 : f32 to vector<64x128xf32>
    %348 = arith.maximumf %346, %347 : vector<64x128xf32>
    %cst_129 = arith.constant 0.000000e+00 : f32
    %349 = vector.broadcast %cst_129 : f32 to vector<9x128xf32>
    %350 = tpu.concatenate %316, %349 in 0 : vector<64x128xf32>, vector<9x128xf32> -> vector<73x128xf32>
    %351 = vector.extract_strided_slice %350 {offsets = [8, 0], sizes = [64, 128], strides = [1, 1]} : vector<73x128xf32> to vector<64x128xf32>
    %352 = arith.truncf %351 : vector<64x128xf32> to vector<64x128xbf16>
    %353 = vector.extract_strided_slice %350 {offsets = [0, 0], sizes = [64, 128], strides = [1, 1]} : vector<73x128xf32> to vector<64x128xf32>
    %354 = arith.truncf %353 : vector<64x128xf32> to vector<64x128xbf16>
    %355 = tpu.concatenate %352, %354 in 1 : vector<64x128xbf16>, vector<64x128xbf16> -> vector<64x256xbf16>
    %c384_130 = arith.constant 384 : index
    %c0_131 = arith.constant 0 : index
    %356 = vector.load %arg6[%c384_130, %c0_131] : memref<1152x128xbf16, #tpu.memory_space<vmem>>, vector<256x128xbf16>
    %cst_132 = arith.constant dense<0.000000e+00> : vector<64x128xf32>
    %357 = tpu.matmul %355, %356, %cst_132 {dimension_numbers = #tpu.dot_dimension_numbers<[1], [0], [0], [1], [0, 0, 1, 1], [], []>} : vector<64x256xbf16>, vector<256x128xbf16>, vector<64x128xf32> -> vector<64x128xf32>
    %c4_133 = arith.constant 4 : index
    %c0_134 = arith.constant 0 : index
    %358 = vector.load %arg12[%c4_133, %c0_134] : memref<8x128xf32, #tpu.memory_space<vmem>>, vector<1x128xf32>
    %359 = vector.broadcast %358 : vector<1x128xf32> to vector<64x128xf32>
    %360 = arith.addf %357, %359 : vector<64x128xf32>
    %cst_135 = arith.constant 0.000000e+00 : f32
    %361 = vector.broadcast %cst_135 : f32 to vector<64x128xf32>
    %362 = arith.maximumf %360, %361 : vector<64x128xf32>
    %cst_136 = arith.constant 0.000000e+00 : f32
    %363 = vector.broadcast %cst_136 : f32 to vector<9x128xf32>
    %364 = tpu.concatenate %316, %363 in 0 : vector<64x128xf32>, vector<9x128xf32> -> vector<73x128xf32>
    %365 = tpu.iota {dimensions = array<i32: 0>} : vector<64x128xi32>
    %c7_i32_137 = arith.constant 7 : i32
    %366 = vector.broadcast %c7_i32_137 : i32 to vector<64x128xi32>
    %367 = arith.andi %365, %366 : vector<64x128xi32>
    %368 = vector.extract_strided_slice %364 {offsets = [9, 0], sizes = [64, 128], strides = [1, 1]} : vector<73x128xf32> to vector<64x128xf32>
    %c6_i32_138 = arith.constant 6 : i32
    %369 = vector.broadcast %c6_i32_138 : i32 to vector<64x128xi32>
    %370 = arith.cmpi sle, %367, %369 : vector<64x128xi32>
    %cst_139 = arith.constant 0.000000e+00 : f32
    %371 = vector.broadcast %cst_139 : f32 to vector<64x128xf32>
    %372 = arith.select %370, %368, %371 : vector<64x128xi1>, vector<64x128xf32>
    %373 = arith.truncf %372 : vector<64x128xf32> to vector<64x128xbf16>
    %374 = vector.extract_strided_slice %364 {offsets = [8, 0], sizes = [64, 128], strides = [1, 1]} : vector<73x128xf32> to vector<64x128xf32>
    %375 = arith.truncf %374 : vector<64x128xf32> to vector<64x128xbf16>
    %376 = vector.extract_strided_slice %364 {offsets = [1, 0], sizes = [64, 128], strides = [1, 1]} : vector<73x128xf32> to vector<64x128xf32>
    %c6_i32_140 = arith.constant 6 : i32
    %377 = vector.broadcast %c6_i32_140 : i32 to vector<64x128xi32>
    %378 = arith.cmpi sle, %367, %377 : vector<64x128xi32>
    %cst_141 = arith.constant 0.000000e+00 : f32
    %379 = vector.broadcast %cst_141 : f32 to vector<64x128xf32>
    %380 = arith.select %378, %376, %379 : vector<64x128xi1>, vector<64x128xf32>
    %381 = arith.truncf %380 : vector<64x128xf32> to vector<64x128xbf16>
    %382 = vector.extract_strided_slice %364 {offsets = [0, 0], sizes = [64, 128], strides = [1, 1]} : vector<73x128xf32> to vector<64x128xf32>
    %383 = arith.truncf %382 : vector<64x128xf32> to vector<64x128xbf16>
    %384 = tpu.concatenate %373, %375, %381, %383 in 1 : vector<64x128xbf16>, vector<64x128xbf16>, vector<64x128xbf16>, vector<64x128xbf16> -> vector<64x512xbf16>
    %c640_142 = arith.constant 640 : index
    %c0_143 = arith.constant 0 : index
    %385 = vector.load %arg6[%c640_142, %c0_143] : memref<1152x128xbf16, #tpu.memory_space<vmem>>, vector<512x128xbf16>
    %cst_144 = arith.constant dense<0.000000e+00> : vector<64x128xf32>
    %386 = tpu.matmul %384, %385, %cst_144 {dimension_numbers = #tpu.dot_dimension_numbers<[1], [0], [0], [1], [0, 0, 1, 1], [], []>} : vector<64x512xbf16>, vector<512x128xbf16>, vector<64x128xf32> -> vector<64x128xf32>
    %c4_145 = arith.constant 4 : index
    %c0_146 = arith.constant 0 : index
    %387 = vector.load %arg12[%c4_145, %c0_146] : memref<8x128xf32, #tpu.memory_space<vmem>>, vector<1x128xf32>
    %388 = vector.broadcast %387 : vector<1x128xf32> to vector<64x128xf32>
    %389 = arith.addf %386, %388 : vector<64x128xf32>
    %cst_147 = arith.constant 0.000000e+00 : f32
    %390 = vector.broadcast %cst_147 : f32 to vector<64x128xf32>
    %391 = arith.maximumf %389, %390 : vector<64x128xf32>
    %c0_148 = arith.constant 0 : index
    %c0_149 = arith.constant 0 : index
    %392 = vector.load %arg11[%c0_148, %c0_149] : memref<32x32xbf16, #tpu.memory_space<vmem>>, vector<32x32xbf16>
    %393 = vector.extract_strided_slice %327 {offsets = [0, 0], sizes = [8, 128], strides = [1, 1]} : vector<64x128xf32> to vector<8x128xf32>
    %394 = vector.extract_strided_slice %348 {offsets = [0, 0], sizes = [8, 128], strides = [1, 1]} : vector<64x128xf32> to vector<8x128xf32>
    %395 = vector.extract_strided_slice %362 {offsets = [0, 0], sizes = [8, 128], strides = [1, 1]} : vector<64x128xf32> to vector<8x128xf32>
    %396 = vector.extract_strided_slice %391 {offsets = [0, 0], sizes = [8, 128], strides = [1, 1]} : vector<64x128xf32> to vector<8x128xf32>
    %397 = tpu.concatenate %393, %394, %395, %396 in 0 : vector<8x128xf32>, vector<8x128xf32>, vector<8x128xf32>, vector<8x128xf32> -> vector<32x128xf32>
    %398 = arith.truncf %397 : vector<32x128xf32> to vector<32x128xbf16>
    %cst_150 = arith.constant dense<0.000000e+00> : vector<32x128xf32>
    %399 = tpu.matmul %392, %398, %cst_150 {dimension_numbers = #tpu.dot_dimension_numbers<[1], [0], [0], [1], [0, 0, 1, 1], [], []>} : vector<32x32xbf16>, vector<32x128xbf16>, vector<32x128xf32> -> vector<32x128xf32>
    %400 = vector.extract_strided_slice %327 {offsets = [8, 0], sizes = [8, 128], strides = [1, 1]} : vector<64x128xf32> to vector<8x128xf32>
    %401 = vector.extract_strided_slice %348 {offsets = [8, 0], sizes = [8, 128], strides = [1, 1]} : vector<64x128xf32> to vector<8x128xf32>
    %402 = vector.extract_strided_slice %362 {offsets = [8, 0], sizes = [8, 128], strides = [1, 1]} : vector<64x128xf32> to vector<8x128xf32>
    %403 = vector.extract_strided_slice %391 {offsets = [8, 0], sizes = [8, 128], strides = [1, 1]} : vector<64x128xf32> to vector<8x128xf32>
    %404 = tpu.concatenate %400, %401, %402, %403 in 0 : vector<8x128xf32>, vector<8x128xf32>, vector<8x128xf32>, vector<8x128xf32> -> vector<32x128xf32>
    %405 = arith.truncf %404 : vector<32x128xf32> to vector<32x128xbf16>
    %cst_151 = arith.constant dense<0.000000e+00> : vector<32x128xf32>
    %406 = tpu.matmul %392, %405, %cst_151 {dimension_numbers = #tpu.dot_dimension_numbers<[1], [0], [0], [1], [0, 0, 1, 1], [], []>} : vector<32x32xbf16>, vector<32x128xbf16>, vector<32x128xf32> -> vector<32x128xf32>
    %407 = vector.extract_strided_slice %327 {offsets = [16, 0], sizes = [8, 128], strides = [1, 1]} : vector<64x128xf32> to vector<8x128xf32>
    %408 = vector.extract_strided_slice %348 {offsets = [16, 0], sizes = [8, 128], strides = [1, 1]} : vector<64x128xf32> to vector<8x128xf32>
    %409 = vector.extract_strided_slice %362 {offsets = [16, 0], sizes = [8, 128], strides = [1, 1]} : vector<64x128xf32> to vector<8x128xf32>
    %410 = vector.extract_strided_slice %391 {offsets = [16, 0], sizes = [8, 128], strides = [1, 1]} : vector<64x128xf32> to vector<8x128xf32>
    %411 = tpu.concatenate %407, %408, %409, %410 in 0 : vector<8x128xf32>, vector<8x128xf32>, vector<8x128xf32>, vector<8x128xf32> -> vector<32x128xf32>
    %412 = arith.truncf %411 : vector<32x128xf32> to vector<32x128xbf16>
    %cst_152 = arith.constant dense<0.000000e+00> : vector<32x128xf32>
    %413 = tpu.matmul %392, %412, %cst_152 {dimension_numbers = #tpu.dot_dimension_numbers<[1], [0], [0], [1], [0, 0, 1, 1], [], []>} : vector<32x32xbf16>, vector<32x128xbf16>, vector<32x128xf32> -> vector<32x128xf32>
    %414 = vector.extract_strided_slice %327 {offsets = [24, 0], sizes = [8, 128], strides = [1, 1]} : vector<64x128xf32> to vector<8x128xf32>
    %415 = vector.extract_strided_slice %348 {offsets = [24, 0], sizes = [8, 128], strides = [1, 1]} : vector<64x128xf32> to vector<8x128xf32>
    %416 = vector.extract_strided_slice %362 {offsets = [24, 0], sizes = [8, 128], strides = [1, 1]} : vector<64x128xf32> to vector<8x128xf32>
    %417 = vector.extract_strided_slice %391 {offsets = [24, 0], sizes = [8, 128], strides = [1, 1]} : vector<64x128xf32> to vector<8x128xf32>
    %418 = tpu.concatenate %414, %415, %416, %417 in 0 : vector<8x128xf32>, vector<8x128xf32>, vector<8x128xf32>, vector<8x128xf32> -> vector<32x128xf32>
    %419 = arith.truncf %418 : vector<32x128xf32> to vector<32x128xbf16>
    %cst_153 = arith.constant dense<0.000000e+00> : vector<32x128xf32>
    %420 = tpu.matmul %392, %419, %cst_153 {dimension_numbers = #tpu.dot_dimension_numbers<[1], [0], [0], [1], [0, 0, 1, 1], [], []>} : vector<32x32xbf16>, vector<32x128xbf16>, vector<32x128xf32> -> vector<32x128xf32>
    %421 = vector.extract_strided_slice %327 {offsets = [32, 0], sizes = [8, 128], strides = [1, 1]} : vector<64x128xf32> to vector<8x128xf32>
    %422 = vector.extract_strided_slice %348 {offsets = [32, 0], sizes = [8, 128], strides = [1, 1]} : vector<64x128xf32> to vector<8x128xf32>
    %423 = vector.extract_strided_slice %362 {offsets = [32, 0], sizes = [8, 128], strides = [1, 1]} : vector<64x128xf32> to vector<8x128xf32>
    %424 = vector.extract_strided_slice %391 {offsets = [32, 0], sizes = [8, 128], strides = [1, 1]} : vector<64x128xf32> to vector<8x128xf32>
    %425 = tpu.concatenate %421, %422, %423, %424 in 0 : vector<8x128xf32>, vector<8x128xf32>, vector<8x128xf32>, vector<8x128xf32> -> vector<32x128xf32>
    %426 = arith.truncf %425 : vector<32x128xf32> to vector<32x128xbf16>
    %cst_154 = arith.constant dense<0.000000e+00> : vector<32x128xf32>
    %427 = tpu.matmul %392, %426, %cst_154 {dimension_numbers = #tpu.dot_dimension_numbers<[1], [0], [0], [1], [0, 0, 1, 1], [], []>} : vector<32x32xbf16>, vector<32x128xbf16>, vector<32x128xf32> -> vector<32x128xf32>
    %428 = vector.extract_strided_slice %327 {offsets = [40, 0], sizes = [8, 128], strides = [1, 1]} : vector<64x128xf32> to vector<8x128xf32>
    %429 = vector.extract_strided_slice %348 {offsets = [40, 0], sizes = [8, 128], strides = [1, 1]} : vector<64x128xf32> to vector<8x128xf32>
    %430 = vector.extract_strided_slice %362 {offsets = [40, 0], sizes = [8, 128], strides = [1, 1]} : vector<64x128xf32> to vector<8x128xf32>
    %431 = vector.extract_strided_slice %391 {offsets = [40, 0], sizes = [8, 128], strides = [1, 1]} : vector<64x128xf32> to vector<8x128xf32>
    %432 = tpu.concatenate %428, %429, %430, %431 in 0 : vector<8x128xf32>, vector<8x128xf32>, vector<8x128xf32>, vector<8x128xf32> -> vector<32x128xf32>
    %433 = arith.truncf %432 : vector<32x128xf32> to vector<32x128xbf16>
    %cst_155 = arith.constant dense<0.000000e+00> : vector<32x128xf32>
    %434 = tpu.matmul %392, %433, %cst_155 {dimension_numbers = #tpu.dot_dimension_numbers<[1], [0], [0], [1], [0, 0, 1, 1], [], []>} : vector<32x32xbf16>, vector<32x128xbf16>, vector<32x128xf32> -> vector<32x128xf32>
    %435 = vector.extract_strided_slice %327 {offsets = [48, 0], sizes = [8, 128], strides = [1, 1]} : vector<64x128xf32> to vector<8x128xf32>
    %436 = vector.extract_strided_slice %348 {offsets = [48, 0], sizes = [8, 128], strides = [1, 1]} : vector<64x128xf32> to vector<8x128xf32>
    %437 = vector.extract_strided_slice %362 {offsets = [48, 0], sizes = [8, 128], strides = [1, 1]} : vector<64x128xf32> to vector<8x128xf32>
    %438 = vector.extract_strided_slice %391 {offsets = [48, 0], sizes = [8, 128], strides = [1, 1]} : vector<64x128xf32> to vector<8x128xf32>
    %439 = tpu.concatenate %435, %436, %437, %438 in 0 : vector<8x128xf32>, vector<8x128xf32>, vector<8x128xf32>, vector<8x128xf32> -> vector<32x128xf32>
    %440 = arith.truncf %439 : vector<32x128xf32> to vector<32x128xbf16>
    %cst_156 = arith.constant dense<0.000000e+00> : vector<32x128xf32>
    %441 = tpu.matmul %392, %440, %cst_156 {dimension_numbers = #tpu.dot_dimension_numbers<[1], [0], [0], [1], [0, 0, 1, 1], [], []>} : vector<32x32xbf16>, vector<32x128xbf16>, vector<32x128xf32> -> vector<32x128xf32>
    %442 = vector.extract_strided_slice %327 {offsets = [56, 0], sizes = [8, 128], strides = [1, 1]} : vector<64x128xf32> to vector<8x128xf32>
    %443 = vector.extract_strided_slice %348 {offsets = [56, 0], sizes = [8, 128], strides = [1, 1]} : vector<64x128xf32> to vector<8x128xf32>
    %444 = vector.extract_strided_slice %362 {offsets = [56, 0], sizes = [8, 128], strides = [1, 1]} : vector<64x128xf32> to vector<8x128xf32>
    %445 = vector.extract_strided_slice %391 {offsets = [56, 0], sizes = [8, 128], strides = [1, 1]} : vector<64x128xf32> to vector<8x128xf32>
    %446 = tpu.concatenate %442, %443, %444, %445 in 0 : vector<8x128xf32>, vector<8x128xf32>, vector<8x128xf32>, vector<8x128xf32> -> vector<32x128xf32>
    %447 = arith.truncf %446 : vector<32x128xf32> to vector<32x128xbf16>
    %cst_157 = arith.constant dense<0.000000e+00> : vector<32x128xf32>
    %448 = tpu.matmul %392, %447, %cst_157 {dimension_numbers = #tpu.dot_dimension_numbers<[1], [0], [0], [1], [0, 0, 1, 1], [], []>} : vector<32x32xbf16>, vector<32x128xbf16>, vector<32x128xf32> -> vector<32x128xf32>
    %449 = tpu.concatenate %399, %406, %413, %420, %427, %434, %441, %448 in 0 : vector<32x128xf32>, vector<32x128xf32>, vector<32x128xf32>, vector<32x128xf32>, vector<32x128xf32>, vector<32x128xf32>, vector<32x128xf32>, vector<32x128xf32> -> vector<256x128xf32>
    %cst_158 = arith.constant 0.000000e+00 : f32
    %450 = vector.broadcast %cst_158 : f32 to vector<256x128xf32>
    %cst_159 = arith.constant 0.000000e+00 : f32
    %451 = vector.broadcast %cst_159 : f32 to vector<17x128xf32>
    %452 = tpu.concatenate %451, %449, %451 in 0 : vector<17x128xf32>, vector<256x128xf32>, vector<17x128xf32> -> vector<290x128xf32>
    %453 = tpu.iota {dimensions = array<i32: 0>} : vector<256x128xi32>
    %c15_i32_160 = arith.constant 15 : i32
    %454 = vector.broadcast %c15_i32_160 : i32 to vector<256x128xi32>
    %455 = arith.andi %453, %454 : vector<256x128xi32>
    %456 = vector.extract_strided_slice %452 {offsets = [0, 0], sizes = [256, 128], strides = [1, 1]} : vector<290x128xf32> to vector<256x128xf32>
    %c1_i32_161 = arith.constant 1 : i32
    %457 = vector.broadcast %c1_i32_161 : i32 to vector<256x128xi32>
    %458 = arith.cmpi sge, %455, %457 : vector<256x128xi32>
    %cst_162 = arith.constant 0.000000e+00 : f32
    %459 = vector.broadcast %cst_162 : f32 to vector<256x128xf32>
    %460 = arith.select %458, %456, %459 : vector<256x128xi1>, vector<256x128xf32>
    %c0_163 = arith.constant 0 : index
    %c0_164 = arith.constant 0 : index
    %461 = vector.load %arg7[%c0_163, %c0_164] : memref<9x128xf32, #tpu.memory_space<vmem>>, vector<1x128xf32>
    %462 = vector.broadcast %461 : vector<1x128xf32> to vector<256x128xf32>
    %463 = arith.mulf %460, %462 : vector<256x128xf32>
    %464 = arith.addf %450, %463 : vector<256x128xf32>
    %465 = vector.extract_strided_slice %452 {offsets = [1, 0], sizes = [256, 128], strides = [1, 1]} : vector<290x128xf32> to vector<256x128xf32>
    %c1_165 = arith.constant 1 : index
    %c0_166 = arith.constant 0 : index
    %466 = vector.load %arg7[%c1_165, %c0_166] : memref<9x128xf32, #tpu.memory_space<vmem>>, vector<1x128xf32>
    %467 = vector.broadcast %466 : vector<1x128xf32> to vector<256x128xf32>
    %468 = arith.mulf %465, %467 : vector<256x128xf32>
    %469 = arith.addf %464, %468 : vector<256x128xf32>
    %470 = vector.extract_strided_slice %452 {offsets = [2, 0], sizes = [256, 128], strides = [1, 1]} : vector<290x128xf32> to vector<256x128xf32>
    %c14_i32_167 = arith.constant 14 : i32
    %471 = vector.broadcast %c14_i32_167 : i32 to vector<256x128xi32>
    %472 = arith.cmpi sle, %455, %471 : vector<256x128xi32>
    %cst_168 = arith.constant 0.000000e+00 : f32
    %473 = vector.broadcast %cst_168 : f32 to vector<256x128xf32>
    %474 = arith.select %472, %470, %473 : vector<256x128xi1>, vector<256x128xf32>
    %c2_169 = arith.constant 2 : index
    %c0_170 = arith.constant 0 : index
    %475 = vector.load %arg7[%c2_169, %c0_170] : memref<9x128xf32, #tpu.memory_space<vmem>>, vector<1x128xf32>
    %476 = vector.broadcast %475 : vector<1x128xf32> to vector<256x128xf32>
    %477 = arith.mulf %474, %476 : vector<256x128xf32>
    %478 = arith.addf %469, %477 : vector<256x128xf32>
    %479 = vector.extract_strided_slice %452 {offsets = [16, 0], sizes = [256, 128], strides = [1, 1]} : vector<290x128xf32> to vector<256x128xf32>
    %c1_i32_171 = arith.constant 1 : i32
    %480 = vector.broadcast %c1_i32_171 : i32 to vector<256x128xi32>
    %481 = arith.cmpi sge, %455, %480 : vector<256x128xi32>
    %cst_172 = arith.constant 0.000000e+00 : f32
    %482 = vector.broadcast %cst_172 : f32 to vector<256x128xf32>
    %483 = arith.select %481, %479, %482 : vector<256x128xi1>, vector<256x128xf32>
    %c3_173 = arith.constant 3 : index
    %c0_174 = arith.constant 0 : index
    %484 = vector.load %arg7[%c3_173, %c0_174] : memref<9x128xf32, #tpu.memory_space<vmem>>, vector<1x128xf32>
    %485 = vector.broadcast %484 : vector<1x128xf32> to vector<256x128xf32>
    %486 = arith.mulf %483, %485 : vector<256x128xf32>
    %487 = arith.addf %478, %486 : vector<256x128xf32>
    %488 = vector.extract_strided_slice %452 {offsets = [17, 0], sizes = [256, 128], strides = [1, 1]} : vector<290x128xf32> to vector<256x128xf32>
    %c4_175 = arith.constant 4 : index
    %c0_176 = arith.constant 0 : index
    %489 = vector.load %arg7[%c4_175, %c0_176] : memref<9x128xf32, #tpu.memory_space<vmem>>, vector<1x128xf32>
    %490 = vector.broadcast %489 : vector<1x128xf32> to vector<256x128xf32>
    %491 = arith.mulf %488, %490 : vector<256x128xf32>
    %492 = arith.addf %487, %491 : vector<256x128xf32>
    %493 = vector.extract_strided_slice %452 {offsets = [18, 0], sizes = [256, 128], strides = [1, 1]} : vector<290x128xf32> to vector<256x128xf32>
    %c14_i32_177 = arith.constant 14 : i32
    %494 = vector.broadcast %c14_i32_177 : i32 to vector<256x128xi32>
    %495 = arith.cmpi sle, %455, %494 : vector<256x128xi32>
    %cst_178 = arith.constant 0.000000e+00 : f32
    %496 = vector.broadcast %cst_178 : f32 to vector<256x128xf32>
    %497 = arith.select %495, %493, %496 : vector<256x128xi1>, vector<256x128xf32>
    %c5 = arith.constant 5 : index
    %c0_179 = arith.constant 0 : index
    %498 = vector.load %arg7[%c5, %c0_179] : memref<9x128xf32, #tpu.memory_space<vmem>>, vector<1x128xf32>
    %499 = vector.broadcast %498 : vector<1x128xf32> to vector<256x128xf32>
    %500 = arith.mulf %497, %499 : vector<256x128xf32>
    %501 = arith.addf %492, %500 : vector<256x128xf32>
    %502 = vector.extract_strided_slice %452 {offsets = [32, 0], sizes = [256, 128], strides = [1, 1]} : vector<290x128xf32> to vector<256x128xf32>
    %c1_i32_180 = arith.constant 1 : i32
    %503 = vector.broadcast %c1_i32_180 : i32 to vector<256x128xi32>
    %504 = arith.cmpi sge, %455, %503 : vector<256x128xi32>
    %cst_181 = arith.constant 0.000000e+00 : f32
    %505 = vector.broadcast %cst_181 : f32 to vector<256x128xf32>
    %506 = arith.select %504, %502, %505 : vector<256x128xi1>, vector<256x128xf32>
    %c6 = arith.constant 6 : index
    %c0_182 = arith.constant 0 : index
    %507 = vector.load %arg7[%c6, %c0_182] : memref<9x128xf32, #tpu.memory_space<vmem>>, vector<1x128xf32>
    %508 = vector.broadcast %507 : vector<1x128xf32> to vector<256x128xf32>
    %509 = arith.mulf %506, %508 : vector<256x128xf32>
    %510 = arith.addf %501, %509 : vector<256x128xf32>
    %511 = vector.extract_strided_slice %452 {offsets = [33, 0], sizes = [256, 128], strides = [1, 1]} : vector<290x128xf32> to vector<256x128xf32>
    %c7 = arith.constant 7 : index
    %c0_183 = arith.constant 0 : index
    %512 = vector.load %arg7[%c7, %c0_183] : memref<9x128xf32, #tpu.memory_space<vmem>>, vector<1x128xf32>
    %513 = vector.broadcast %512 : vector<1x128xf32> to vector<256x128xf32>
    %514 = arith.mulf %511, %513 : vector<256x128xf32>
    %515 = arith.addf %510, %514 : vector<256x128xf32>
    %516 = vector.extract_strided_slice %452 {offsets = [34, 0], sizes = [256, 128], strides = [1, 1]} : vector<290x128xf32> to vector<256x128xf32>
    %c14_i32_184 = arith.constant 14 : i32
    %517 = vector.broadcast %c14_i32_184 : i32 to vector<256x128xi32>
    %518 = arith.cmpi sle, %455, %517 : vector<256x128xi32>
    %cst_185 = arith.constant 0.000000e+00 : f32
    %519 = vector.broadcast %cst_185 : f32 to vector<256x128xf32>
    %520 = arith.select %518, %516, %519 : vector<256x128xi1>, vector<256x128xf32>
    %c8 = arith.constant 8 : index
    %c0_186 = arith.constant 0 : index
    %521 = vector.load %arg7[%c8, %c0_186] : memref<9x128xf32, #tpu.memory_space<vmem>>, vector<1x128xf32>
    %522 = vector.broadcast %521 : vector<1x128xf32> to vector<256x128xf32>
    %523 = arith.mulf %520, %522 : vector<256x128xf32>
    %524 = arith.addf %515, %523 : vector<256x128xf32>
    %cst_187 = arith.constant dense<0.000000e+00> : vector<256xf32>
    %525 = vector.multi_reduction <add>, %524, %cst_187 [1] : vector<256x128xf32> to vector<256xf32>
    %526 = vector.shape_cast %525 : vector<256xf32> to vector<256x1xf32>
    %527 = tpu.iota {dimensions = array<i32: 1>} : vector<256x128xi32>
    %c4_i32 = arith.constant 4 : i32
    %528 = vector.broadcast %c4_i32 : i32 to vector<256x128xi32>
    %529 = arith.cmpi eq, %527, %528 : vector<256x128xi32>
    %530 = vector.shape_cast %526 : vector<256x1xf32> to vector<256x1xf32>
    %531 = vector.broadcast %530 : vector<256x1xf32> to vector<256x128xf32>
    %532 = arith.select %529, %531, %449 : vector<256x128xi1>, vector<256x128xf32>
    %533 = tpu.transpose %532, [1, 0] : vector<256x128xf32> -> vector<128x256xf32>
    %534 = vector.extract_strided_slice %533 {offsets = [0, 0], sizes = [4, 256], strides = [1, 1]} : vector<128x256xf32> to vector<4x256xf32>
    %c0_188 = arith.constant 0 : index
    %c0_189 = arith.constant 0 : index
    %c0_190 = arith.constant 0 : index
    %535 = vector.load %arg14[%c0_188, %c0_189, %c0_190] : memref<1x4x256xf32, #tpu.memory_space<vmem>>, vector<1x4x256xf32>
    %536 = vector.shape_cast %535 : vector<1x4x256xf32> to vector<4x256xf32>
    %537 = vector.shape_cast %534 : vector<4x256xf32> to vector<1x4x256xf32>
    tpu.vector_store %arg14[%c0_188, %c0_189, %c0_190], %537 {strides = array<i32>} : memref<1x4x256xf32, #tpu.memory_space<vmem>>, vector<1x4x256xf32>,
    %538 = vector.extract_strided_slice %533 {offsets = [4, 0], sizes = [1, 256], strides = [1, 1]} : vector<128x256xf32> to vector<1x256xf32>
    %c0_191 = arith.constant 0 : index
    %c0_192 = arith.constant 0 : index
    %c0_193 = arith.constant 0 : index
    %539 = vector.load %arg13[%c0_191, %c0_192, %c0_193] : memref<1x1x256xf32, #tpu.memory_space<vmem>>, vector<1x1x256xf32>
    %540 = vector.shape_cast %539 : vector<1x1x256xf32> to vector<1x256xf32>
    %541 = vector.shape_cast %538 : vector<1x256xf32> to vector<1x1x256xf32>
    tpu.vector_store %arg13[%c0_191, %c0_192, %c0_193], %541 {strides = array<i32>} : memref<1x1x256xf32, #tpu.memory_space<vmem>>, vector<1x1x256xf32>,
    return
  }
  func.func @transform_0(%arg0: i32) -> (i32, i32, i32) {
    %c0_i32 = arith.constant 0 : i32
    %c0_i32_0 = arith.constant 0 : i32
    %c0_i32_1 = arith.constant 0 : i32
    return %arg0, %c0_i32, %c0_i32_0 : i32, i32, i32
  }
  func.func @transform_1(%arg0: i32) -> (i32, i32) {
    %c0_i32 = arith.constant 0 : i32
    %c0_i32_0 = arith.constant 0 : i32
    %c0_i32_1 = arith.constant 0 : i32
    return %c0_i32, %c0_i32_0 : i32, i32
  }
  func.func @transform_2(%arg0: i32) -> (i32, i32) {
    %c0_i32 = arith.constant 0 : i32
    %c0_i32_0 = arith.constant 0 : i32
    %c0_i32_1 = arith.constant 0 : i32
    return %c0_i32, %c0_i32_0 : i32, i32
  }
  func.func @transform_3(%arg0: i32) -> (i32, i32) {
    %c0_i32 = arith.constant 0 : i32
    %c0_i32_0 = arith.constant 0 : i32
    %c0_i32_1 = arith.constant 0 : i32
    return %c0_i32, %c0_i32_0 : i32, i32
  }
  func.func @transform_4(%arg0: i32) -> (i32, i32) {
    %c0_i32 = arith.constant 0 : i32
    %c0_i32_0 = arith.constant 0 : i32
    %c0_i32_1 = arith.constant 0 : i32
    return %c0_i32, %c0_i32_0 : i32, i32
  }
  func.func @transform_5(%arg0: i32) -> (i32, i32) {
    %c0_i32 = arith.constant 0 : i32
    %c0_i32_0 = arith.constant 0 : i32
    %c0_i32_1 = arith.constant 0 : i32
    return %c0_i32, %c0_i32_0 : i32, i32
  }
  func.func @transform_6(%arg0: i32) -> (i32, i32) {
    %c0_i32 = arith.constant 0 : i32
    %c0_i32_0 = arith.constant 0 : i32
    %c0_i32_1 = arith.constant 0 : i32
    return %c0_i32, %c0_i32_0 : i32, i32
  }
  func.func @transform_7(%arg0: i32) -> (i32, i32) {
    %c0_i32 = arith.constant 0 : i32
    %c0_i32_0 = arith.constant 0 : i32
    %c0_i32_1 = arith.constant 0 : i32
    return %c0_i32, %c0_i32_0 : i32, i32
  }
  func.func @transform_8(%arg0: i32) -> (i32, i32) {
    %c0_i32 = arith.constant 0 : i32
    %c0_i32_0 = arith.constant 0 : i32
    %c0_i32_1 = arith.constant 0 : i32
    return %c0_i32, %c0_i32_0 : i32, i32
  }
  func.func @transform_9(%arg0: i32) -> (i32, i32) {
    %c0_i32 = arith.constant 0 : i32
    %c0_i32_0 = arith.constant 0 : i32
    %c0_i32_1 = arith.constant 0 : i32
    return %c0_i32, %c0_i32_0 : i32, i32
  }
  func.func @transform_10(%arg0: i32) -> (i32, i32) {
    %c0_i32 = arith.constant 0 : i32
    %c0_i32_0 = arith.constant 0 : i32
    %c0_i32_1 = arith.constant 0 : i32
    return %c0_i32, %c0_i32_0 : i32, i32
  }
  func.func @transform_11(%arg0: i32) -> (i32, i32) {
    %c0_i32 = arith.constant 0 : i32
    %c0_i32_0 = arith.constant 0 : i32
    %c0_i32_1 = arith.constant 0 : i32
    return %c0_i32, %c0_i32_0 : i32, i32
  }
  func.func @transform_12(%arg0: i32) -> (i32, i32, i32) {
    %c0_i32 = arith.constant 0 : i32
    %c0_i32_0 = arith.constant 0 : i32
    %c0_i32_1 = arith.constant 0 : i32
    return %arg0, %c0_i32, %c0_i32_0 : i32, i32, i32
  }
  func.func @transform_13(%arg0: i32) -> (i32, i32, i32) {
    %c0_i32 = arith.constant 0 : i32
    %c0_i32_0 = arith.constant 0 : i32
    %c0_i32_1 = arith.constant 0 : i32
    return %arg0, %c0_i32, %c0_i32_0 : i32, i32, i32
  }
}

</mosaic_0001>

<bundles_post_ra>
// kernel: hourglass_forward.1
= control target key start
LH: loop header
LB: loop body
LE: loop exit
PB: predicated region body
PF: predicated region fallthrough
CT: control target
= control target key end

     0   :  { %s12281_s25 = smov 0   ;;  %s17680_s0 = inlined_call_operand.vmem [shape: bf16[2,256,4], index: 0, kind: input, shape index: {}]   ;;  %s17681_s1 = inlined_call_operand.vmem [shape: bf16[1152,128], index: 1, kind: input, shape index: {}]   ;;  %s17682_s2 = inlined_call_operand.vmem [shape: bf16[1152,128], index: 2, kind: input, shape index: {}]   ;;  %s17683_s3 = inlined_call_operand.vmem [shape: bf16[1152,128], index: 3, kind: input, shape index: {}]   ;;  %s17684_s4 = inlined_call_operand.vmem [shape: bf16[1152,128], index: 4, kind: input, shape index: {}]   ;;  %s17685_s5 = inlined_call_operand.vmem [shape: bf16[1152,128], index: 5, kind: input, shape index: {}]   ;;  %s17686_s6 = inlined_call_operand.vmem [shape: f32[9,128], index: 6, kind: input, shape index: {}]   ;;  %s17687_s7 = inlined_call_operand.vmem [shape: bf16[8,16], index: 7, kind: input, shape index: {}]   ;;  %s17688_s8 = inlined_call_operand.vmem [shape: bf16[4,8], index: 8, kind: input, shape index: {}]   ;;  %s17689_s9 = inlined_call_operand.vmem [shape: bf16[16,16], index: 9, kind: input, shape index: {}]   ;;  %s17690_s10 = inlined_call_operand.vmem [shape: bf16[32,32], index: 10, kind: input, shape index: {}]   ;;  %s17691_s11 = inlined_call_operand.vmem [shape: f32[8,128], index: 11, kind: input, shape index: {}]   ;;  %s17692_s12 = inlined_call_operand.vmem [shape: f32[2,1,256], index: 12, kind: output, shape index: {0}]   ;;  %s17693_s13 = inlined_call_operand.vmem [shape: f32[2,4,256], index: 13, kind: output, shape index: {1}]  }
   0x1 LB: > { %s9517_s26 = sadd.s32 4294967295, %s12203_s25   ;;  %p9521_p0 = scmp.ge.s32.totalorder %s12203_s25, 1  ;;  %s12203_s25 = sphi %s12281_s25, %s24_s25  }
   0x2   : > { %p390_p1 = scmp.lt.s32.totalorder %s12203_s25, 3 }
   0x4   : > { %p391_p2 = pnand %p9521_p0, %p390_p1 }
   0x6   : > { %394 = sbr.rel (%p391_p2) target bundleno = 3123 (0xc33), region = 68 }
   0xd   : > { %v11824_v0 = vld [vmem:[%s17681_s1 + $0x40] sm:$0xff]   ;;  %v12205_v3 = vmov 0.0   ;;  %v11828_v5 = vld [vmem:[%s17681_s1 + $0x48] sm:$0xff]   ;;  %v11832_v9 = vld [vmem:[%s17681_s1 + $0x50] sm:$0xff]   ;;  %p438_p3 = scmp.lt.s32.totalorder %s9517_s26, 1  ;;  %v17712_v26 = vlaneseq  ;;  %vm17694_vm0 = vcmask 31744  }
   0xe   : > { %v11825_v1 = vld [vmem:[%s17681_s1 + $0xc0] sm:$0xff]   ;;  %10440 = vmatprep.subr.bf16.mxu0 %v11824_v0  ;;  %453 = vst [vmem:[#allocation2] sm:$0xff] %v12205_v3  ;;  %454 = vst [vmem:[#allocation2 + $0x8] sm:$0xff] %v12205_v3  ;;  %v11829_v6 = vld [vmem:[%s17681_s1 + $0xc8] sm:$0xff]   ;;  %vm17695_vm1 = vcmask 1040384   ;;  %v12206_v59 = vmov 0  }
   0xf   : > { %v11826_v2 = vld [vmem:[%s17681_s1] sm:$0xff]   ;;  %455 = vst [vmem:[#allocation2 + $0x10] sm:$0xff] %v12205_v3  ;;  %456 = vst [vmem:[#allocation2 + $0x18] sm:$0xff] %v12205_v3  ;;  %10552 = vmatprep.subr.bf16.mxu1 %v11825_v1  ;;  %v11830_v7 = vld [vmem:[%s17681_s1 + $0x8] sm:$0xff]   ;;  %s19006_s26 = smov (!%p438_p3, %s9517_s26), 1  ;;  %v12416_v31 = vshrl.u32 %v17712_v26, 7 }
  0x10   : > { %457 = vst [vmem:[#allocation2 + $0x20] sm:$0xff] %v12205_v3  ;;  %458 = vst [vmem:[#allocation2 + $0x28] sm:$0xff] %v12205_v3  ;;  %v11827_v4 = vld [vmem:[%s17681_s1 + $0x80] sm:$0xff]   ;;  %10441 = vmatpush3.bf16.msra.mxu0 %v11826_v2  ;;  %v11831_v8 = vld [vmem:[%s17681_s1 + $0x88] sm:$0xff]   ;;  %s10359_s19 = sshll.u32 %s19006_s26, 7  ;;  %v12458_v60 = vrot.slane %v12206_v59, 1 }
  0x11   : > { %459 = vst [vmem:[#allocation2 + $0x30] sm:$0xff] %v12205_v3  ;;  %460 = vst [vmem:[#allocation2 + $0x38] sm:$0xff] %v12205_v3  ;;  %10553 = vmatpush3.bf16.msra.mxu1 %v11827_v4  ;;  %10442 = vmatprep.subr.bf16.mxu0 %v11828_v5  ;;  %v11833_v10 = vld [vmem:[%s17681_s1 + $0xd0] sm:$0xff]   ;;  %v11836_v13 = vld [vmem:[%s17681_s1 + $0x58] sm:$0xff]   ;;  %s12424_s30 = scalar_lea.vmem %s17680_s0, %s10359_s19  ;;  %v12434_v36 = vadd.s32 8, %v12416_v31  ;;  %v12438_v38 = vadd.s32 16, %v12416_v31 }
  0x12   : > { %461 = vst [vmem:[#allocation2 + $0x40] sm:$0xff] %v12205_v3  ;;  %462 = vst [vmem:[#allocation2 + $0x48] sm:$0xff] %v12205_v3  ;;  %10554 = vmatprep.subr.bf16.mxu1 %v11829_v6  ;;  %v11834_v11 = vld [vmem:[%s17681_s1 + $0x10] sm:$0xff]   ;;  %v11837_v14 = vld [vmem:[%s17681_s1 + $0xd8] sm:$0xff]   ;;  %v778_v51 = vand.u32 15, %v12416_v31  ;;  %v12452_v56 = vadd.s32 24, %v12416_v31 }
  0x13   : > { %463 = vst [vmem:[#allocation2 + $0x50] sm:$0xff] %v12205_v3  ;;  %464 = vst [vmem:[#allocation2 + $0x58] sm:$0xff] %v12205_v3  ;;  %v11835_v12 = vld [vmem:[%s17681_s1 + $0x90] sm:$0xff]   ;;  %v11838_v15 = vld [vmem:[%s17681_s1 + $0x18] sm:$0xff]   ;;  %v779_v55 = vand.u32 15, %v12434_v36  ;;  %v780_v61 = vand.u32 15, %v12438_v38 }
  0x14   : > { %465 = vst [vmem:[#allocation2 + $0x60] sm:$0xff] %v12205_v3  ;;  %466 = vst [vmem:[#allocation2 + $0x68] sm:$0xff] %v12205_v3  ;;  %10443 = vmatpush3.bf16.msra.mxu0 %v11830_v7  ;;  %v11839_v16 = vld [vmem:[%s17681_s1 + $0x98] sm:$0xff]   ;;  %v11840_v17 = vld [vmem:[%s17681_s1 + $0x60] sm:$0xff]   ;;  %v12462_v62 = vadd.s32 32, %v12416_v31  ;;  %v12465_v63 = vadd.s32 40, %v12416_v31 }
  0x15   : > { %467 = vst [vmem:[#allocation2 + $0x70] sm:$0xff] %v12205_v3  ;;  %468 = vst [vmem:[#allocation2 + $0x78] sm:$0xff] %v12205_v3  ;;  %10555 = vmatpush3.bf16.msra.mxu1 %v11831_v8  ;;  %10444 = vmatprep.subr.bf16.mxu0 %v11832_v9  ;;  %v11841_v18 = vld [vmem:[%s17681_s1 + $0xe0] sm:$0xff]   ;;  %v11844_v21 = vld [vmem:[%s17681_s1 + $0x68] sm:$0xff]   ;;  %vm12472_vm2 = vcmp.ge.s32.totalorder %v778_v51, 1  ;;  %v18089_v4 = vmov 0 }
  0x16   : > { %469 = vst [vmem:[#allocation2 + $0x80] sm:$0xff] %v12205_v3  ;;  %470 = vst [vmem:[#allocation2 + $0x88] sm:$0xff] %v12205_v3  ;;  %10556 = vmatprep.subr.bf16.mxu1 %v11833_v10  ;;  %v11842_v19 = vld [vmem:[%s17681_s1 + $0x20] sm:$0xff]   ;;  %v11845_v22 = vld [vmem:[%s17681_s1 + $0xe8] sm:$0xff]   ;;  %v18090_v4 = vsel %vm12472_vm2, 4294967295, %v18089_v4  ;;  %vm17699_vm3 = vcmask 1045504  }
  0x17   : > { %471 = vst [vmem:[#allocation2 + $0x90] sm:$0xff] %v12205_v3  ;;  %472 = vst [vmem:[#allocation2 + $0x98] sm:$0xff] %v12205_v3  ;;  %v11843_v20 = vld [vmem:[%s17681_s1 + $0xa0] sm:$0xff]   ;;  %v11846_v23 = vld [vmem:[%s17681_s1 + $0x28] sm:$0xff]   ;;  %v12477_v5 = vrot.slane %v12205_v3, 2  ;;  %vm12480_vm4 = vcmp.le.s32.totalorder %v779_v55, 14 }
  0x18   : > { %473 = vst [vmem:[#allocation2 + $0xa0] sm:$0xff] %v12205_v3  ;;  %474 = vst [vmem:[#allocation2 + $0xa8] sm:$0xff] %v12205_v3  ;;  %10445 = vmatpush3.bf16.msra.mxu0 %v11834_v11  ;;  %v11847_v24 = vld [vmem:[%s17681_s1 + $0xa8] sm:$0xff]   ;;  %v11848_v25 = vld [vmem:[%s17681_s1 + $0x70] sm:$0xff]   ;;  %v18093_v7 = vmov 0  ;;  %v781_v8 = vand.u32 15, %v12452_v56 }
  0x19   : > { %475 = vst [vmem:[#allocation2 + $0xb0] sm:$0xff] %v12205_v3  ;;  %476 = vst [vmem:[#allocation2 + $0xb8] sm:$0xff] %v12205_v3  ;;  %10557 = vmatpush3.bf16.msra.mxu1 %v11835_v12  ;;  %10446 = vmatprep.subr.bf16.mxu0 %v11836_v13  ;;  %v11849_v27 = vld [vmem:[%s17681_s1 + $0xf0] sm:$0xff]   ;;  %v11852_v30 = vld [vmem:[%s17681_s1 + $0x78] sm:$0xff]   ;;  %v18094_v7 = vsel %vm12480_vm4, 4294967295, %v18093_v7  ;;  %vm12491_vm5 = vcmp.ge.s32.totalorder %v780_v61, 1 }
  0x1a   : > { %477 = vst [vmem:[#allocation2 + $0xc0] sm:$0xff] %v12205_v3  ;;  %478 = vst [vmem:[#allocation2 + $0xc8] sm:$0xff] %v12205_v3  ;;  %10558 = vmatprep.subr.bf16.mxu1 %v11837_v14  ;;  %v11850_v28 = vld [vmem:[%s17681_s1 + $0x30] sm:$0xff]   ;;  %v11853_v32 = vld [vmem:[%s17681_s1 + $0xf8] sm:$0xff]   ;;  %v782_v13 = vand.u32 15, %v12462_v62  ;;  %v783_v14 = vand.u32 15, %v12465_v63 }
  0x1b   : > { %479 = vst [vmem:[#allocation2 + $0xd0] sm:$0xff] %v12205_v3  ;;  %480 = vst [vmem:[#allocation2 + $0xd8] sm:$0xff] %v12205_v3  ;;  %v11851_v29 = vld [vmem:[%s17681_s1 + $0xb0] sm:$0xff]   ;;  %v11854_v33 = vld [vmem:[%s17681_s1 + $0x38] sm:$0xff]   ;;  %vm17698_vm6 = vsmask.f32 7424 }
  0x1c   : > { %481 = vst [vmem:[#allocation2 + $0xe0] sm:$0xff] %v12205_v3  ;;  %482 = vst [vmem:[#allocation2 + $0xe8] sm:$0xff] %v12205_v3  ;;  %10447 = vmatpush3.bf16.msra.mxu0 %v11838_v15  ;;  %v11855_v34 = vld [vmem:[%s17681_s1 + $0xb8] sm:$0xff]   ;;  %v10362_v35 = vld [vmem:[%s12424_s30] sm:$0xff]   ;;  %v12498_v15 = vadd.s32 48, %v12416_v31  ;;  %vm17696_vm7 = vmmov 1  }
  0x1d   : > { %483 = vst [vmem:[#allocation2 + $0xf0] sm:$0xff] %v12205_v3  ;;  %484 = vst [vmem:[#allocation2 + $0xf8] sm:$0xff] %v12205_v3  ;;  %10559 = vmatpush3.bf16.msra.mxu1 %v11839_v16  ;;  %10448 = vmatprep.subr.bf16.mxu0 %v11840_v17  ;;  %v10425_v37 = vld [vmem:[%s12424_s30 + $0x8] sm:$0xff]   ;;  %v10363_v39 = vunpack.c.l.bf16 %v10362_v35  ;;  %v10364_v40 = vunpack.c.h.bf16 %v10362_v35  ;;  %v10426_v43 = vld [vmem:[%s12424_s30 + $0x10] sm:$0xff]   ;;  %v18096_v3 = vmov 0  ;;  %vm12519_vm9 = vcmp.le.s32.totalorder %v781_v8, 14 }
  0x1e   : > { %10560 = vmatprep.subr.bf16.mxu1 %v11841_v18  ;;  %18082 = vst [vmem:[#allocation3_spill] sm:$0xff] %v12416_v31  ;;  %18083 = vst [vmem:[#allocation4_spill] sm:$0xff] %v12434_v36  ;;  %v10367_v41 = vunpack.c.l.bf16 %v10425_v37  ;;  %v10368_v42 = vunpack.c.h.bf16 %v10425_v37  ;;  %v10427_v44 = vld [vmem:[%s12424_s30 + $0x18] sm:$0xff]   ;;  %v10371_v45 = vunpack.c.l.bf16 %v10426_v43  ;;  %v10372_v46 = vunpack.c.h.bf16 %v10426_v43  ;;  %v10428_v49 = vld [vmem:[%s12424_s30 + $0x20] sm:$0xff]   ;;  %s10360_s14 = sshll.u32 %s19006_s26, 3  ;;  %s9524_s18 = sshll.u32 %s19006_s26, 1 }
  0x1f   : > { %18084 = vst [vmem:[#allocation5_spill] sm:$0xff] %v12438_v38  ;;  %v10375_v47 = vunpack.c.l.bf16 %v10427_v44  ;;  %v10376_v48 = vunpack.c.h.bf16 %v10427_v44  ;;  %v10429_v50 = vld [vmem:[%s12424_s30 + $0x28] sm:$0xff]   ;;  %550 = vst.msk [vmem:[#allocation2] sm:$0xff] %vm17694_vm0, %v10363_v39  ;;  %v10379_v52 = vunpack.c.l.bf16 %v10428_v49  ;;  %v10380_v53 = vunpack.c.h.bf16 %v10428_v49  ;;  %v10430_v54 = vld [vmem:[%s12424_s30 + $0x30] sm:$0xff]   ;;  %s451_s17 = scalar_lea.vmem %s17693_s13, %s10360_s14  ;;  %s446_s21 = scalar_lea.vmem %s17692_s12, %s9524_s18 }
  0x20   : > { %10449 = vmatpush3.bf16.msra.mxu0 %v11842_v19  ;;  %551 = vst.msk [vmem:[#allocation2 + $0x8] sm:$0xff] %vm17694_vm0, %v10364_v40  ;;  %552 = vst.msk [vmem:[#allocation2 + $0x10] sm:$0xff] %vm17694_vm0, %v10367_v41  ;;  %v10383_v57 = vunpack.c.l.bf16 %v10429_v50  ;;  %v10384_v58 = vunpack.c.h.bf16 %v10429_v50  ;;  %v10431_v0 = vld [vmem:[%s12424_s30 + $0x38] sm:$0xff]   ;;  %v10387_v1 = vunpack.c.l.bf16 %v10430_v54  ;;  %v10388_v2 = vunpack.c.h.bf16 %v10430_v54  ;;  %v10432_v6 = vld [vmem:[%s12424_s30 + $0x40] sm:$0xff]  }
  0x21   : > { %10561 = vmatpush3.bf16.msra.mxu1 %v11843_v20  ;;  %10450 = vmatprep.subr.bf16.mxu0 %v11844_v21  ;;  %553 = vst.msk [vmem:[#allocation2 + $0x18] sm:$0xff] %vm17694_vm0, %v10368_v42  ;;  %18085 = vst [vmem:[#allocation6_spill] sm:$0xff] %v12452_v56  ;;  %v10391_v9 = vunpack.c.l.bf16 %v10431_v0  ;;  %v10392_v10 = vunpack.c.h.bf16 %v10431_v0  ;;  %v10433_v11 = vld [vmem:[%s12424_s30 + $0x48] sm:$0xff]   ;;  %v11856_v12 = vld [vmem:[%s17681_s1 + $0x140] sm:$0xff]   ;;  %v18097_v3 = vsel %vm12491_vm5, 4294967295, %v18096_v3  ;;  %v12501_v19 = vadd.s32 56, %v12416_v31 }
  0x22   : > { %10562 = vmatprep.subr.bf16.mxu1 %v11845_v22  ;;  %554 = vst.msk [vmem:[#allocation2 + $0x20] sm:$0xff] %vm17694_vm0, %v10371_v45  ;;  %555 = vst.msk [vmem:[#allocation2 + $0x28] sm:$0xff] %vm17694_vm0, %v10372_v46  ;;  %v10395_v20 = vunpack.c.l.bf16 %v10432_v6  ;;  %v10396_v21 = vunpack.c.h.bf16 %v10432_v6  ;;  %v18103_v41 = vmov 0  ;;  %v12524_v42 = vadd.s32 64, %v12416_v31  ;;  %v11874_v26 = vld [vmem:[%s17681_s1 + $0x1e0] sm:$0xff]   ;;  %v10437_v38 = vld [vmem:[%s12424_s30 + $0x68] sm:$0xff]  }
  0x23   : > { %556 = vst.msk [vmem:[#allocation2 + $0x30] sm:$0xff] %vm17694_vm0, %v10375_v47  ;;  %557 = vst.msk [vmem:[#allocation2 + $0x38] sm:$0xff] %vm17694_vm0, %v10376_v48  ;;  %v18104_v41 = vsel %vm12519_vm9, 4294967295, %v18103_v41  ;;  %vm12579_vm12 = vcmp.ge.s32.totalorder %v782_v13, 1  ;;  %vm12607_vm13 = vcmp.le.s32.totalorder %v783_v14, 14  ;;  %v11893_v0 = vld [vmem:[%s17681_s1 + $0x228] sm:$0xff]  }
  0x24   : > { %10451 = vmatpush3.bf16.msra.mxu0 %v11846_v23  ;;  %18086 = vst [vmem:[#allocation7_spill] sm:$0xff] %v12458_v60  ;;  %18087 = vst [vmem:[#allocation8_spill] sm:$0xff] %v12462_v62  ;;  %v10435_v62 = vld [vmem:[%s12424_s30 + $0x58] sm:$0xff]  }
  0x25   : > { %10563 = vmatpush3.bf16.msra.mxu1 %v11847_v24  ;;  %10452 = vmatprep.subr.bf16.mxu0 %v11848_v25  ;;  %18088 = vst [vmem:[#allocation9_spill] sm:$0xff] %v12465_v63  ;;  %558 = vst.msk [vmem:[#allocation2 + $0x40] sm:$0xff] %vm17694_vm0, %v10379_v52 }
  0x26   : > { %10564 = vmatprep.subr.bf16.mxu1 %v11849_v27  ;;  %559 = vst.msk [vmem:[#allocation2 + $0x48] sm:$0xff] %vm17694_vm0, %v10380_v53  ;;  %560 = vst.msk [vmem:[#allocation2 + $0x50] sm:$0xff] %vm17694_vm0, %v10383_v57  ;;  %v582_v16 = vld [vmem:[#allocation2] sm:$0xff] }
  0x27   : > { %561 = vst.msk [vmem:[#allocation2 + $0x58] sm:$0xff] %vm17694_vm0, %v10384_v58  ;;  %18091 = vst [vmem:[#allocation10_spill] sm:$0xff] %v18090_v4  ;;  %v583_v17 = vld [vmem:[#allocation2 + $0x8] sm:$0xff]  ;;  %v584_v18 = vld [vmem:[#allocation2 + $0x10] sm:$0xff]  ;;  %v647_v22 = vrot.slane %v582_v16, 7 }
  0x28   : > { %10453 = vmatpush3.bf16.msra.mxu0 %v11850_v28  ;;  %18092 = vst [vmem:[#allocation11_spill] sm:$0xff] %v12477_v5  ;;  %18095 = vst [vmem:[#allocation12_spill] sm:$0xff] %v18094_v7  ;;  %v648_v23 = vrot.slane %v583_v17, 7  ;;  %v585_v24 = vld [vmem:[#allocation2 + $0x18] sm:$0xff]  ;;  %v650_v25 = vrot.slane %v584_v18, 7  ;;  %v11858_v57 = vld [vmem:[%s17681_s1 + $0x1c0] sm:$0xff]  }
  0x29   : > { %10565 = vmatpush3.bf16.msra.mxu1 %v11851_v29  ;;  %10454 = vmatprep.subr.bf16.mxu0 %v11852_v30  ;;  %562 = vst.msk [vmem:[#allocation2 + $0x60] sm:$0xff] %vm17694_vm0, %v10387_v1  ;;  %563 = vst.msk [vmem:[#allocation2 + $0x68] sm:$0xff] %vm17694_vm0, %v10388_v2  ;;  %v586_v27 = vld [vmem:[#allocation2 + $0x20] sm:$0xff]  ;;  %v587_v28 = vld [vmem:[#allocation2 + $0x28] sm:$0xff]  ;;  %v10399_v29 = vunpack.c.l.bf16 %v10433_v11  ;;  %v652_v30 = vrot.slane %v585_v24, 7  ;;  %v743_v37 = vsel %vm17695_vm1, 0.0, %v647_v22 }
  0x2a   : > { %10566 = vmatprep.subr.bf16.mxu1 %v11853_v32  ;;  %18098 = vst [vmem:[#allocation13_spill] sm:$0xff] %v18097_v3  ;;  %18099 = vst [vmem:[#allocation14_spill] sm:$0xff] %v12498_v15  ;;  %v654_v32 = vrot.slane %v586_v27, 7  ;;  %v649_v35 = vsel %vm17695_vm1, %v647_v22, %v648_v23  ;;  %v12517_v40 = vsel %vm17695_vm1, %v648_v23, %v650_v25  ;;  %v941_v44 = vrot.slane %v743_v37, 2  ;;  %v588_v47 = vld [vmem:[#allocation2 + $0x30] sm:$0xff]  ;;  %v11859_v58 = vld [vmem:[%s17681_s1 + $0x180] sm:$0xff]  }
  0x2b   : > { %18100 = vst [vmem:[#allocation15_spill] sm:$0xff] %v12501_v19  ;;  %564 = vst.msk [vmem:[#allocation2 + $0x70] sm:$0xff] %vm17694_vm0, %v10391_v9  ;;  %v12527_v43 = vpack.c.bf16 %v649_v35, %v743_v37  ;;  %v12530_v45 = vsel %vm17695_vm1, %v650_v25, %v652_v30  ;;  %v943_v46 = vrot.slane %v649_v35, 2  ;;  %v945_v50 = vrot.slane %v12517_v40, 2  ;;  %v12577_v2 = vld [vmem:[#allocation2 + $0x38] sm:$0xff]  ;;  %v11857_v18 = vld [vmem:[%s17681_s1 + $0x100] sm:$0xff]  }
  0x2c   : > { %10455 = vmatpush3.bf16.msra.mxu0 %v11854_v33  ;;  %565 = vst.msk [vmem:[#allocation2 + $0x78] sm:$0xff] %vm17694_vm0, %v10392_v10  ;;  %v656_v33 = vrot.slane %v587_v28, 7  ;;  %566 = vst.msk [vmem:[#allocation2 + $0x80] sm:$0xff] %vm17694_vm0, %v10395_v20  ;;  %v12542_v49 = vpack.c.bf16 %v12530_v45, %v12517_v40  ;;  %v12546_v51 = vsel %vm17695_vm1, %v652_v30, %v654_v32  ;;  %v658_v6 = vrot.slane %v588_v47, 7  ;;  %v11860_v20 = vld [vmem:[%s17681_s1 + $0x148] sm:$0xff]   ;;  %v590_v25 = vld [vmem:[#allocation2 + $0x40] sm:$0xff] }
  0x2d   : > { %10567 = vmatpush3.bf16.msra.mxu1 %v11855_v34  ;;  %10664 = vmatprep.subr.bf16.mxu0 %v11856_v12  ;;  %567 = vst.msk [vmem:[#allocation2 + $0x88] sm:$0xff] %vm17694_vm0, %v10396_v21  ;;  %v10400_v34 = vunpack.c.h.bf16 %v10433_v11  ;;  %vm12512_vm8 = vmpackc.low %vm17696_vm7, %vm12472_vm2  ;;  %v1295_v53 = vshll.u32 %v12527_v43, 16  ;;  %v942_v54 = vsel %vm17699_vm3, %v12477_v5, %v941_v44  ;;  %v1299_v55 = vshrl.u32 %v12527_v43, 16  ;;  %v11863_v47 = vld [vmem:[%s17681_s1 + $0x188] sm:$0xff]  }
  0x2e   : > { %18105 = vst [vmem:[#allocation16_spill] sm:$0xff] %v18104_v41  ;;  %568 = vst.msk [vmem:[#allocation2 + $0x90] sm:$0xff] %vm17694_vm0, %v10399_v29  ;;  %v12549_v52 = vsel %vm17695_vm1, %v654_v32, %v656_v33  ;;  %9646 = vmatprep.mubr.msk.bf16.mxu1 %vm12512_vm8, %v12527_v43  ;;  %v9648_v59 = vpack.c.bf16 %v942_v54, %v12477_v5  ;;  %v1303_v61 = vshll.u32 %v12542_v49, 16  ;;  %v18110_v9 = vmov 0  ;;  %10776 = vmatprep.subr.bf16.mxu1 %v11858_v57  ;;  %v12614_v29 = vld [vmem:[#allocation2 + $0x48] sm:$0xff] }
  0x2f   : > { %569 = vst.msk [vmem:[#allocation2 + $0x98] sm:$0xff] %vm17694_vm0, %v10400_v34  ;;  %vm12536_vm10 = vmpackc.low %vm12480_vm4, %vm17696_vm7  ;;  %v12575_v1 = vpack.c.bf16 %v12549_v52, %v12546_v51  ;;  %v1297_v8 = vrot.slane %v1295_v53, 1  ;;  %v18111_v9 = vsel %vm12579_vm12, 4294967295, %v18110_v9  ;;  %v784_v10 = vand.u32 15, %v12498_v15  ;;  %v11862_v34 = vld [vmem:[%s17681_s1 + $0x1c8] sm:$0xff]  }
  0x30   : > { %vm12569_vm11 = vmpackc.low %vm17696_vm7, %vm12491_vm5  ;;  %18112 = vst [vmem:[#allocation17_spill] sm:$0xff] %v18111_v9  ;;  %v785_v11 = vand.u32 15, %v12501_v19  ;;  %9649 = vmatmul.mubr.msk.bf16.vlgmr.msra.gmra.mrb[0].mxu1 %vm12536_vm10, %v9648_v59  ;;  %v1305_v12 = vrot.slane %v1303_v61, 1  ;;  %v944_v16 = vsel %vm17699_vm3, %v941_v44, %v943_v46  ;;  %v946_v17 = vsel %vm17699_vm3, %v943_v46, %v945_v50  ;;  %v11879_v4 = vld [vmem:[%s17681_s1 + $0x1a8] sm:$0xff]  }
  0x31   : > { %v1307_v13 = vshrl.u32 %v12542_v49, 16  ;;  %v1298_v21 = vsel %vm17698_vm6, %v12458_v60, %v1297_v8  ;;  %v1301_v22 = vor.u32 %v1299_v55, %v1297_v8  ;;  %9652 = vmatprep.mubr.msk.bf16.mxu1 %vm12569_vm11, %v12542_v49  ;;  %v1311_v23 = vshll.u32 %v12575_v1, 16  ;;  %10777 = vmatpush3.bf16.msra.mxu1 %v11859_v58  ;;  %vm12647_vm15 = vmpackc.low %vm12519_vm9, %vm17696_vm7 }
  0x32   : > { %v660_v24 = vrot.slane %v12577_v2, 7  ;;  %2069 = vmatprep.mubr.bf16.mxu0 %v1298_v21  ;;  %v18113_v27 = vmov 0  ;;  %v12612_v28 = vsel %vm17695_vm1, %v656_v33, %v658_v6  ;;  %v786_v30 = vand.u32 15, %v12524_v42  ;;  %v11861_v42 = vld [vmem:[%s17681_s1 + $0x108] sm:$0xff]   ;;  %10778 = vmatprep.subr.bf16.mxu1 %v11862_v34  ;;  %vm12662_vm0 = vmpackc.low %vm17696_vm7, %vm12579_vm12  ;;  %v11867_v21 = vld [vmem:[%s17681_s1 + $0x190] sm:$0xff]  }
  0x33   : > { %v18114_v27 = vsel %vm12607_vm13, 4294967295, %v18113_v27  ;;  %v12618_v32 = vadd.s32 72, %v12416_v31  ;;  %v17714_v35 = vmov 0.0|0.0   ;;  %v12625_v14 = vsel %vm17698_vm6, %v1301_v22, %v1305_v12 }
  0x34   : > { %18115 = vst [vmem:[#allocation18_spill] sm:$0xff] %v18114_v27  ;;  %2070 = vmatmul.mubr.bf16.vlgmr.msra.gmra.mrb[0].mxu0 %v17714_v35  ;;  %v12628_v33 = vsel %vm17695_vm1, %v658_v6, %v660_v24  ;;  %vm12630_vm14 = vcmp.ge.s32.totalorder %v784_v10, 1  ;;  %v18116_v37 = vmov 0  ;;  %v12638_v44 = vpack.c.bf16 %v946_v17, %v944_v16 }
  0x35   : > { %v18117_v37 = vsel %vm12630_vm14, 4294967295, %v18116_v37  ;;  %2077 = vmatprep.mubr.bf16.mxu0 %v12625_v14  ;;  %v947_v46 = vrot.slane %v12530_v45, 2  ;;  %10665 = vmatpush3.bf16.msra.mxu0 %v11857_v18  ;;  %v1309_v54 = vor.u32 %v1307_v13, %v1305_v12  ;;  %v1313_v55 = vrot.slane %v1311_v23, 1  ;;  %v11864_v45 = vld [vmem:[%s17681_s1 + $0x150] sm:$0xff]   ;;  %v12699_v18 = vld [vmem:[#allocation2 + $0x58] sm:$0xff] }
  0x36   : > { %18118 = vst [vmem:[#allocation19_spill] sm:$0xff] %v18117_v37  ;;  %v949_v57 = vrot.slane %v12546_v51, 2  ;;  %v12654_v58 = vpack.c.bf16 %v12628_v33, %v12612_v28  ;;  %10666 = vmatprep.subr.bf16.mxu0 %v11860_v20  ;;  %v18122_v59 = vmov 0  ;;  %vm12666_vm1 = vcmp.le.s32.totalorder %v785_v11, 14  ;;  %10779 = vmatpush3.bf16.msra.mxu1 %v11863_v47  ;;  %v11865_v12 = vld [vmem:[%s17681_s1 + $0x110] sm:$0xff]  }
  0x37   : > { %v18123_v59 = vsel %vm12662_vm0, 4294967295, %v18122_v59  ;;  %v18125_v61 = vmov 0  ;;  %v662_v51 = vrot.slane %v590_v25, 7  ;;  %v664_v2 = vrot.slane %v12614_v29, 7  ;;  %v592_v13 = vld [vmem:[#allocation2 + $0x50] sm:$0xff]  ;;  %v11868_v29 = vld [vmem:[%s17681_s1 + $0x158] sm:$0xff]  }
  0x38   : > { %18121 = vst [vmem:[#allocation20_spill] sm:$0xff] %v12654_v58  ;;  %18124 = vst [vmem:[#allocation21_spill] sm:$0xff] %v18123_v59  ;;  %v18126_v61 = vsel %vm12666_vm1, 4294967295, %v18125_v61  ;;  %v12672_v6 = vadd.s32 80, %v12416_v31  ;;  %v12675_v8 = vadd.s32 88, %v12416_v31  ;;  %9655 = vmatmul.mubr.msk.bf16.gmra.mrb[4].mxu1 %vm12647_vm15, %v12638_v44  ;;  %v948_v10 = vsel %vm17699_vm3, %v945_v50, %v947_v46  ;;  %v11866_v20 = vld [vmem:[%s17681_s1 + $0x1d0] sm:$0xff]  }
  0x39   : > { %18127 = vst [vmem:[#allocation22_spill] sm:$0xff] %v18126_v61  ;;  %vm12683_vm7 = vcmp.ge.s32.totalorder %v786_v30, 1  ;;  %v18128_v11 = vmov 0  ;;  %10667 = vmatpush3.bf16.msra.mxu0 %v11861_v42  ;;  %v12691_v16 = vsel %vm17698_vm6, %v1309_v54, %v1313_v55  ;;  %9658 = vmatprep.mubr.msk.bf16.mxu1 %vm12662_vm0, %v12575_v1  ;;  %v950_v40 = vsel %vm17699_vm3, %v947_v46, %v949_v57  ;;  %v11870_v42 = vld [vmem:[%s17681_s1 + $0x1d8] sm:$0xff]   ;;  %v596_v61 = vld [vmem:[#allocation2 + $0x70] sm:$0xff] }
  0x3a   : > { %v18129_v11 = vsel %vm12683_vm7, 4294967295, %v18128_v11  ;;  %v1315_v50 = vshrl.u32 %v12575_v1, 16  ;;  %v1319_v17 = vshll.u32 %v12654_v58, 16  ;;  %10668 = vmatprep.subr.bf16.mxu0 %v11864_v45  ;;  %vm18131_vm6 = vcmask 1040384   ;;  %10780 = vmatprep.subr.bf16.mxu1 %v11866_v20  ;;  %v600_v9 = vld [vmem:[#allocation2 + $0x90] sm:$0xff] }
  0x3b   : > { %18130 = vst [vmem:[#allocation23_spill] sm:$0xff] %v18129_v11  ;;  %v12708_v22 = vsel %vm18131_vm6, %v660_v24, %v662_v51  ;;  %vm18132_vm3 = vmmov %vm18131_vm6  ;;  %v787_v25 = vand.u32 15, %v12618_v32  ;;  %v788_v30 = vand.u32 15, %v12672_v6  ;;  %v11869_v24 = vld [vmem:[%s17681_s1 + $0x118] sm:$0xff]   ;;  %v12725_v34 = vpack.c.bf16 %v950_v40, %v948_v10  ;;  %10781 = vmatpush3.bf16.msra.mxu1 %v11867_v21 }
  0x3c   : > { %v12711_v23 = vsel %vm18132_vm3, %v662_v51, %v664_v2  ;;  %9601 = vmatmul.mubr.msk.bf16.gmra.mrb[4].mxu0 %vm12569_vm11, %v12527_v43  ;;  %v951_v32 = vrot.slane %v12549_v52, 2  ;;  %vm18133_vm3 = vmmov 1   ;;  %v18134_v43 = vmov 0  ;;  %10782 = vmatprep.subr.bf16.mxu1 %v11870_v42 }
  0x3d   : > { %2083 = vmatprep.mubr.bf16.mxu0 %v12691_v16  ;;  %10669 = vmatpush3.bf16.msra.mxu0 %v11865_v12  ;;  %vm12734_vm6 = vmpackc.low %vm12607_vm13, %vm18133_vm3  ;;  %v1317_v46 = vor.u32 %v1315_v50, %v1313_v55  ;;  %v1321_v47 = vrot.slane %v1319_v17, 1  ;;  %v953_v54 = vrot.slane %v12612_v28, 2  ;;  %v12741_v45 = vpack.c.bf16 %v12711_v23, %v12708_v22  ;;  %v594_v28 = vld [vmem:[#allocation2 + $0x60] sm:$0xff]  ;;  %v11871_v12 = vld [vmem:[%s17681_s1 + $0x198] sm:$0xff]  }
  0x3e   : > { %v18135_v43 = vsel %vm12734_vm6, 4294967295, %v18134_v43  ;;  %10670 = vmatprep.subr.bf16.mxu0 %v11868_v29  ;;  %vm12746_vm9 = vmpackc.low %vm18133_vm3, %vm12630_vm14  ;;  %v18138_v52 = vmov 0  ;;  %v666_v51 = vrot.slane %v592_v13, 7  ;;  %v668_v6 = vrot.slane %v12699_v18, 7  ;;  %v12766_v17 = vld [vmem:[#allocation2 + $0x68] sm:$0xff]  ;;  %v11872_v18 = vld [vmem:[%s17681_s1 + $0x160] sm:$0xff]  }
  0x3f   : > { %18136 = vst [vmem:[#allocation24_spill] sm:$0xff] %v18135_v43  ;;  %18137 = vst [vmem:[#allocation25_spill] sm:$0xff] %v12741_v45  ;;  %v18139_v52 = vsel %vm12746_vm9, 4294967295, %v18138_v52  ;;  %v12753_v10 = vadd.s32 96, %v12416_v31  ;;  %vm18141_vm14 = vcmask 1045504   ;;  %vm12762_vm13 = vcmp.le.s32.totalorder %v787_v25, 14  ;;  %10783 = vmatpush3.bf16.msra.mxu1 %v11871_v12 }
  0x40   : > { %18140 = vst [vmem:[#allocation26_spill] sm:$0xff] %v18139_v52  ;;  %9661 = vmatmul.mubr.msk.bf16.gmra.mrb[8].mxu1 %vm12734_vm6, %v12725_v34  ;;  %v952_v40 = vsel %vm18141_vm14, %v949_v57, %v951_v32  ;;  %v18142_v50 = vmov 0  ;;  %v12769_v13 = vadd.s32 104, %v12416_v31  ;;  %vm18145_vm4 = vsmask.f32 7424  ;;  %vm12784_vm12 = vmpackc.low %vm12666_vm1, %vm18133_vm3  ;;  %10784 = vmatprep.subr.bf16.mxu1 %v11874_v26  ;;  %v11878_v26 = vld [vmem:[%s17681_s1 + $0x1e8] sm:$0xff]  }
  0x41   : > { %v18143_v50 = vsel %vm12762_vm13, 4294967295, %v18142_v50  ;;  %10671 = vmatpush3.bf16.msra.mxu0 %v11869_v24  ;;  %v12775_v20 = vsel %vm18145_vm4, %v1317_v46, %v1321_v47  ;;  %9664 = vmatprep.mubr.msk.bf16.mxu1 %vm12746_vm9, %v12654_v58  ;;  %v954_v57 = vsel %vm18141_vm14, %v951_v32, %v953_v54  ;;  %v18146_v21 = vmov 0  ;;  %v11873_v46 = vld [vmem:[%s17681_s1 + $0x120] sm:$0xff]   ;;  %vm12808_vm14 = vmpackc.low %vm18133_vm3, %vm12683_vm7 }
  0x42   : > { %18144 = vst [vmem:[#allocation27_spill] sm:$0xff] %v18143_v50  ;;  %v18147_v21 = vsel %vm12784_vm12, 4294967295, %v18146_v21  ;;  %v1323_v25 = vshrl.u32 %v12654_v58, 16  ;;  %v1327_v29 = vshll.u32 %v12741_v45, 16  ;;  %vm18149_vm4 = vcmask 1040384   ;;  %10672 = vmatprep.subr.bf16.mxu0 %v11872_v18 }
  0x43   : > { %18148 = vst [vmem:[#allocation28_spill] sm:$0xff] %v18147_v21  ;;  %v12791_v24 = vsel %vm18149_vm4, %v664_v2, %v666_v51  ;;  %vm18150_vm2 = vmmov %vm18149_vm4  ;;  %v12797_v32 = vadd.s32 112, %v12416_v31  ;;  %v18151_v2 = vmov 0  ;;  %v670_v12 = vrot.slane %v594_v28, 7 }
  0x44   : > { %v12794_v42 = vsel %vm18150_vm2, %v666_v51, %v668_v6  ;;  %9604 = vmatmul.mubr.msk.bf16.gmra.mrb[8].mxu0 %vm12662_vm0, %v12542_v49  ;;  %v18152_v2 = vsel %vm12808_vm14, 4294967295, %v18151_v2  ;;  %vm12812_vm2 = vcmp.ge.s32.totalorder %v788_v30, 1  ;;  %v18154_v51 = vmov 0  ;;  %v11875_v30 = vld [vmem:[%s17681_s1 + $0x1a0] sm:$0xff]   ;;  %vm18159_vm7 = vmmov %vm18149_vm4 }
  0x45   : > { %18153 = vst [vmem:[#allocation29_spill] sm:$0xff] %v18152_v2  ;;  %v18155_v51 = vsel %vm12812_vm2, 4294967295, %v18154_v51  ;;  %v672_v18 = vrot.slane %v12766_v17, 7  ;;  %2091 = vmatprep.mubr.bf16.mxu0 %v12775_v20  ;;  %v12821_v35 = vpack.c.bf16 %v954_v57, %v952_v40  ;;  %v955_v55 = vrot.slane %v12628_v33, 2  ;;  %10673 = vmatpush3.bf16.msra.mxu0 %v11873_v46  ;;  %v597_v40 = vld [vmem:[#allocation2 + $0x78] sm:$0xff]  ;;  %v11876_v33 = vld [vmem:[%s17681_s1 + $0x168] sm:$0xff]  }
  0x46   : > { %18156 = vst [vmem:[#allocation30_spill] sm:$0xff] %v18155_v51  ;;  %v957_v11 = vrot.slane %v12708_v22, 2  ;;  %v1325_v28 = vor.u32 %v1323_v25, %v1321_v47  ;;  %v1329_v17 = vrot.slane %v1327_v29, 1  ;;  %v12830_v37 = vpack.c.bf16 %v12794_v42, %v12791_v24  ;;  %10785 = vmatpush3.bf16.msra.mxu1 %v11875_v30  ;;  %v11877_v47 = vld [vmem:[%s17681_s1 + $0x128] sm:$0xff]   ;;  %10674 = vmatprep.subr.bf16.mxu0 %v11876_v33  ;;  %v13068_v2 = vld [vmem:[%s12424_s30 + $0x78] sm:$0xff]  }
  0x47   : > { %18157 = vst [vmem:[#allocation31_spill] sm:$0xff] %v12821_v35  ;;  %v959_v22 = vrot.slane %v12711_v23, 2  ;;  %v961_v57 = vrot.slane %v12791_v24, 2  ;;  %v12842_v25 = vsel %vm18149_vm4, %v668_v6, %v670_v12  ;;  %v12845_v29 = vsel %vm18159_vm7, %v670_v12, %v672_v18  ;;  %v598_v12 = vld [vmem:[#allocation2 + $0x80] sm:$0xff]  ;;  %v12857_v30 = vld [vmem:[#allocation2 + $0x88] sm:$0xff]  ;;  %10786 = vmatprep.subr.bf16.mxu1 %v11878_v26 }
  0x48   : > { %18158 = vst [vmem:[#allocation32_spill] sm:$0xff] %v12830_v37  ;;  %9667 = vmatmul.mubr.msk.bf16.gmra.mrb[12].mxu1 %vm12784_vm12, %v12821_v35  ;;  %vm18160_vm1 = vcmask 1045504   ;;  %v1331_v6 = vshrl.u32 %v12741_v45, 16  ;;  %v791_v46 = vand.u32 15, %v12769_v13  ;;  %vm18162_vm7 = vsmask.f32 7424 }
  0x49   : > { %v956_v23 = vsel %vm18160_vm1, %v953_v54, %v955_v55  ;;  %vm18161_vm5 = vmmov %vm18160_vm1  ;;  %10675 = vmatpush3.bf16.msra.mxu0 %v11877_v47  ;;  %v12860_v33 = vsel %vm18162_vm7, %v1325_v28, %v1329_v17  ;;  %9670 = vmatprep.mubr.msk.bf16.mxu1 %vm12808_vm14, %v12741_v45  ;;  %v1335_v27 = vshll.u32 %v12830_v37, 16  ;;  %v674_v54 = vrot.slane %v596_v61, 7 }
  0x4a   : > { %v958_v24 = vsel %vm18161_vm5, %v955_v55, %v957_v11  ;;  %18163 = vst [vmem:[#allocation33_spill] sm:$0xff] %v12860_v33  ;;  %v676_v41 = vrot.slane %v597_v40, 7  ;;  %v10434_v55 = vld [vmem:[%s12424_s30 + $0x50] sm:$0xff]   ;;  %vm12870_vm1 = vmpackc.low %vm12762_vm13, %vm18133_vm3  ;;  %v18164_v13 = vmov 0  ;;  %v18167_v28 = vand.u32 15, %v12675_v8  ;;  %10787 = vmatpush3.bf16.msra.mxu1 %v11879_v4 }
  0x4b   : > { %v18165_v13 = vsel %vm12870_vm1, 4294967295, %v18164_v13  ;;  %v18168_v47 = vmov 0  ;;  %v12882_v7 = vpack.c.bf16 %v12845_v29, %v12842_v25  ;;  %v12886_v40 = vadd.s32 120, %v12416_v31 }
  0x4c   : > { %18166 = vst [vmem:[#allocation34_spill] sm:$0xff] %v18165_v13  ;;  %vm12876_vm5 = vcmp.le.s32.totalorder %v18167_v28, 14  ;;  %9607 = vmatmul.mubr.msk.bf16.gmra.mrb[12].mxu0 %vm12746_vm9, %v12575_v1  ;;  %vm18172_vm4 = vcmask 1045504   ;;  %v678_v28 = vrot.slane %v598_v12, 7  ;;  %v680_v50 = vrot.slane %v12857_v30, 7 }
  0x4d   : > { %v18169_v47 = vsel %vm12876_vm5, 4294967295, %v18168_v47  ;;  %18171 = vst [vmem:[#allocation36_spill] sm:$0xff] %v12882_v7  ;;  %v960_v26 = vsel %vm18172_vm4, %v957_v11, %v959_v22  ;;  %vm18173_vm7 = vmmov %vm18172_vm4  ;;  %2097 = vmatprep.mubr.bf16.mxu0 %v12860_v33  ;;  %v12898_v61 = vpack.c.bf16 %v958_v24, %v956_v23  ;;  %v1333_v3 = vor.u32 %v1331_v6, %v1329_v17  ;;  %v12902_v11 = vld [vmem:[#allocation2 + $0x98] sm:$0xff]  ;;  %v11882_v17 = vld [vmem:[%s17681_s1 + $0x1f0] sm:$0xff]  }
  0x4e   : > { %18170 = vst [vmem:[#allocation35_spill] sm:$0xff] %v18169_v47  ;;  %v962_v8 = vsel %vm18173_vm7, %v959_v22, %v961_v57  ;;  %v1339_v19 = vshrl.u32 %v12830_v37, 16  ;;  %v963_v15 = vrot.slane %v12794_v42, 2  ;;  %v11880_v22 = vld [vmem:[%s17681_s1 + $0x170] sm:$0xff]   ;;  %v1337_v12 = vrot.slane %v1335_v27, 1  ;;  %vm12910_vm4 = vmpackc.low %vm18133_vm3, %vm12812_vm2  ;;  %10788 = vmatprep.subr.bf16.mxu1 %v11882_v17 }
  0x4f   : > { %18174 = vst [vmem:[#allocation37_spill] sm:$0xff] %v12898_v61  ;;  %v18175_v30 = vmov 0  ;;  %vm18178_vm7 = vcmask 1040384   ;;  %v11881_v27 = vld [vmem:[%s17681_s1 + $0x130] sm:$0xff]   ;;  %v12924_v24 = vpack.c.bf16 %v962_v8, %v960_v26  ;;  %v1343_v6 = vshll.u32 %v12882_v7, 16  ;;  %10676 = vmatprep.subr.bf16.mxu0 %v11880_v22 }
  0x50   : > { %v18176_v30 = vsel %vm12910_vm4, 4294967295, %v18175_v30  ;;  %v12916_v23 = vsel %vm18178_vm7, %v672_v18, %v674_v54  ;;  %vm18179_vm13 = vmmov %vm18178_vm7  ;;  %v10403_v51 = vunpack.c.l.bf16 %v10434_v55  ;;  %v12931_v18 = vsel %vm18178_vm7, %v676_v41, %v678_v28  ;;  %10677 = vmatpush3.bf16.msra.mxu0 %v11881_v27  ;;  %v11883_v26 = vld [vmem:[%s17681_s1 + $0x1b0] sm:$0xff]   ;;  %9673 = vmatmul.mubr.msk.bf16.gmra.mrb[16].mxu1 %vm12870_vm1, %v12898_v61 }
  0x51   : > { %18177 = vst [vmem:[#allocation38_spill] sm:$0xff] %v18176_v30  ;;  %v12919_v42 = vsel %vm18179_vm13, %v674_v54, %v676_v41  ;;  %18180 = vst [vmem:[#allocation39_spill] sm:$0xff] %v12924_v24  ;;  %v682_v4 = vrot.slane %v600_v9, 7  ;;  %v17763_v63 = vrot.slane %v12902_v11, 7  ;;  %v18182_v8 = vand.u32 15, %v12753_v10  ;;  %9676 = vmatprep.mubr.msk.bf16.mxu1 %vm12910_vm4, %v12830_v37  ;;  %10789 = vmatpush3.bf16.msra.mxu1 %v11883_v26  ;;  %v18400_v39 = vld [vmem:[#allocation33_spill] sm:$0xff] }
  0x52   : > { %vm18181_vm13 = vmmov %vm18178_vm7  ;;  %v18183_v41 = vmov 0  ;;  %v10404_v22 = vunpack.c.h.bf16 %v10434_v55  ;;  %vm18187_vm2 = vcmask 31744   ;;  %vm18188_vm9 = vsmask.f32 7424 }
  0x53   : > { %v12934_v54 = vsel %vm18181_vm13, %v678_v28, %v680_v50  ;;  %vm12946_vm7 = vcmp.ge.s32.totalorder %v18182_v8, 1  ;;  %vm18186_vm13 = vcmask 1045504   ;;  %v12953_v28 = vpack.c.bf16 %v12919_v42, %v12916_v23  ;;  %570 = vst.msk [vmem:[#allocation2 + $0xa0] sm:$0xff] %vm18187_vm2, %v10403_v51 }
  0x54   : > { %v18184_v41 = vsel %vm12946_vm7, 4294967295, %v18183_v41  ;;  %v964_v9 = vsel %vm18186_vm13, %v961_v57, %v963_v15  ;;  %v12957_v27 = vsel %vm18188_vm9, %v1333_v3, %v1337_v12  ;;  %v1341_v10 = vor.u32 %v1339_v19, %v1337_v12  ;;  %v11884_v3 = vld [vmem:[%s17681_s1 + $0x178] sm:$0xff]   ;;  %vm18194_vm9 = vmmov %vm18187_vm2  ;;  %v10436_v12 = vld [vmem:[%s12424_s30 + $0x60] sm:$0xff]   ;;  %9610 = vmatmul.mubr.msk.bf16.gmra.mrb[16].mxu0 %vm12808_vm14, %v12654_v58 }
  0x55   : > { %18185 = vst [vmem:[#allocation40_spill] sm:$0xff] %v18184_v41  ;;  %18189 = vst [vmem:[#allocation41_spill] sm:$0xff] %v12957_v27  ;;  %vm12962_vm1 = vcmp.le.s32.totalorder %v791_v46, 14  ;;  %v18190_v8 = vmov 0  ;;  %v18193_v57 = vrot.slane %v12842_v25, 2  ;;  %v1347_v51 = vshrl.u32 %v12882_v7, 16  ;;  %10678 = vmatprep.subr.bf16.mxu0 %v11884_v3  ;;  %2105 = vmatprep.mubr.bf16.mxu0 %v12957_v27 }
  0x56   : > { %v18191_v8 = vsel %vm12962_vm1, 4294967295, %v18190_v8  ;;  %v12975_v17 = vpack.c.bf16 %v12934_v54, %v12931_v18  ;;  %v762_v19 = vadd.s32 128, %v12416_v31  ;;  %571 = vst.msk [vmem:[#allocation2 + $0xa8] sm:$0xff] %vm18194_vm9, %v10404_v22  ;;  %v10407_v46 = vunpack.c.l.bf16 %v10435_v62 }
  0x57   : > { %18192 = vst [vmem:[#allocation42_spill] sm:$0xff] %v18191_v8  ;;  %v966_v55 = vsel %vm18186_vm13, %v963_v15, %v18193_v57  ;;  %v11885_v15 = vld [vmem:[%s17681_s1 + $0x138] sm:$0xff]   ;;  %v1345_v26 = vrot.slane %v1343_v6, 1  ;;  %vm18195_vm2 = vcmask 1040384   ;;  %v10408_v22 = vunpack.c.h.bf16 %v10435_v62 }
  0x58   : > { %v12987_v57 = vsel %vm18195_vm2, %v680_v50, %v682_v4  ;;  %vm18196_vm13 = vmmov %vm18195_vm2  ;;  %v12996_v36 = vpack.c.bf16 %v966_v55, %v964_v9  ;;  %v1351_v60 = vshll.u32 %v12953_v28, 16  ;;  %v18198_v5 = vand.u32 15, %v12797_v32  ;;  %10679 = vmatpush3.bf16.msra.mxu0 %v11885_v15  ;;  %v11886_v62 = vld [vmem:[%s17681_s1 + $0x1f8] sm:$0xff]  }
  0x59   : > { %v12992_v56 = vsel %vm18196_vm13, %v682_v4, %v17763_v63  ;;  %v18199_v6 = vmov 0  ;;  %v793_v50 = vand.u32 15, %v12886_v40  ;;  %vm18202_vm2 = vcmask 31744   ;;  %v10438_v4 = vld [vmem:[%s12424_s30 + $0x70] sm:$0xff]   ;;  %vm13014_vm13 = vmpackc.low %vm12876_vm5, %vm18133_vm3  ;;  %10790 = vmatprep.subr.bf16.mxu1 %v11886_v62 }
  0x5a   : > { %18197 = vst [vmem:[#allocation43_spill] sm:$0xff] %v12996_v36  ;;  %vm13001_vm9 = vcmp.ge.s32.totalorder %v18198_v5, 1  ;;  %572 = vst.msk [vmem:[#allocation2 + $0xb0] sm:$0xff] %vm18202_vm2, %v10407_v46  ;;  %v18203_v9 = vmov 0  ;;  %v13020_v32 = vadd.s32 136, %v12416_v31  ;;  %v10411_v40 = vunpack.c.l.bf16 %v10436_v12  ;;  %9679 = vmatmul.mubr.msk.bf16.gmra.mrb[20].mxu1 %vm13014_vm13, %v12924_v24 }
  0x5b   : > { %v18200_v6 = vsel %vm13001_vm9, 4294967295, %v18199_v6  ;;  %v18204_v9 = vsel %vm13014_vm13, 4294967295, %v18203_v9  ;;  %vm18206_vm14 = vmmov %vm18202_vm2  ;;  %v10412_v55 = vunpack.c.h.bf16 %v10436_v12  ;;  %v18207_v3 = vmov 0  ;;  %v11887_v12 = vld [vmem:[%s17681_s1 + $0x1b8] sm:$0xff]  }
  0x5c   : > { %18201 = vst [vmem:[#allocation44_spill] sm:$0xff] %v18200_v6  ;;  %18205 = vst [vmem:[#allocation45_spill] sm:$0xff] %v18204_v9  ;;  %v1359_v46 = vshll.u32 %v12975_v17, 16  ;;  %v794_v15 = vand.u32 15, %v762_v19  ;;  %v13033_v63 = vpack.c.bf16 %v12992_v56, %v12987_v57  ;;  %v10415_v5 = vunpack.c.l.bf16 %v10437_v38  ;;  %10791 = vmatpush3.bf16.msra.mxu1 %v11887_v12  ;;  %9613 = vmatmul.mubr.msk.bf16.gmra.mrb[20].mxu0 %vm12910_vm4, %v12741_v45 }
  0x5d   : > { %573 = vst.msk [vmem:[#allocation2 + $0xb8] sm:$0xff] %vm18206_vm14, %v10408_v22  ;;  %vm13026_vm2 = vmpackc.low %vm18133_vm3, %vm12946_vm7  ;;  %vm18210_vm14 = vsmask.f32 7424  ;;  %v1349_v41 = vor.u32 %v1347_v51, %v1345_v26  ;;  %vm18212_vm7 = vcmask 31744   ;;  %v10416_v19 = vunpack.c.h.bf16 %v10437_v38 }
  0x5e   : > { %v18208_v3 = vsel %vm13026_vm2, 4294967295, %v18207_v3  ;;  %v13039_v22 = vsel %vm18210_vm14, %v1341_v10, %v1345_v26  ;;  %574 = vst.msk [vmem:[#allocation2 + $0xc0] sm:$0xff] %vm18212_vm7, %v10411_v40  ;;  %vm18213_vm5 = vmmov %vm18212_vm7  ;;  %v13047_v62 = vrot.slane %v1351_v60, 1  ;;  %v13051_v10 = vadd.s32 144, %v12416_v31  ;;  %9682 = vmatprep.mubr.msk.bf16.mxu1 %vm13026_vm2, %v12882_v7 }
  0x5f   : > { %18209 = vst [vmem:[#allocation46_spill] sm:$0xff] %v18208_v3  ;;  %18211 = vst [vmem:[#allocation47_spill] sm:$0xff] %v13039_v22  ;;  %v13054_v51 = vadd.s32 152, %v12416_v31  ;;  %v18215_v38 = vmov 0  ;;  %v795_v60 = vand.u32 15, %v13020_v32  ;;  %v10419_v40 = vunpack.c.l.bf16 %v10438_v4  ;;  %v13078_v32 = vld [vmem:[#allocation2 + $0xe0] sm:$0xff]  ;;  %2111 = vmatprep.mubr.bf16.mxu0 %v13039_v22 }
  0x60   : > { %575 = vst.msk [vmem:[#allocation2 + $0xc8] sm:$0xff] %vm18213_vm5, %v10412_v55  ;;  %vm18214_vm14 = vmmov %vm18213_vm5  ;;  %vm13060_vm5 = vcmp.le.s32.totalorder %v793_v50, 14  ;;  %v10420_v55 = vunpack.c.h.bf16 %v10438_v4  ;;  %v18218_v47 = vmov 0  ;;  %v1367_v9 = vshll.u32 %v13033_v63, 16  ;;  %11562 = vmatprep.subr.bf16.mxu1 %v13078_v32 }
  0x61   : > { %576 = vst.msk [vmem:[#allocation2 + $0xd0] sm:$0xff] %vm18214_vm14, %v10415_v5  ;;  %v18216_v38 = vsel %vm13060_vm5, 4294967295, %v18215_v38  ;;  %v13070_v5 = vrot.slane %v1359_v46, 1  ;;  %vm13072_vm14 = vcmp.ge.s32.totalorder %v794_v15, 1  ;;  %18221 = vst [vmem:[#allocation50_spill] sm:$0xff] %v13078_v32  ;;  %v18222_v4 = vmov 0 }
  0x62   : > { %18217 = vst [vmem:[#allocation48_spill] sm:$0xff] %v18216_v38  ;;  %577 = vst.msk [vmem:[#allocation2 + $0xd8] sm:$0xff] %vm18212_vm7, %v10416_v19  ;;  %v18219_v47 = vsel %vm13072_vm14, 4294967295, %v18218_v47  ;;  %v13095_v19 = vadd.s32 160, %v12416_v31  ;;  %vm18225_vm13 = vcmask 31744   ;;  %v18227_v50 = vmov 0 }
  0x63   : > { %18220 = vst [vmem:[#allocation49_spill] sm:$0xff] %v18219_v47  ;;  %vm13087_vm7 = vmpackc.low %vm12962_vm1, %vm18133_vm3  ;;  %v796_v15 = vand.u32 15, %v13051_v10  ;;  %v797_v12 = vand.u32 15, %v13054_v51  ;;  %v602_v46 = vld [vmem:[#allocation2 + $0xa0] sm:$0xff]  ;;  %v13110_v26 = vadd.s32 168, %v12416_v31  ;;  %v13114_v8 = vadd.s32 176, %v12416_v31 }
  0x64   : > { %v18223_v4 = vsel %vm13087_vm7, 4294967295, %v18222_v4  ;;  %578 = vst.msk [vmem:[#allocation2 + $0xe0] sm:$0xff] %vm18225_vm13, %v10419_v40  ;;  %vm18226_vm12 = vmmov %vm18225_vm13  ;;  %v10423_v40 = vunpack.c.l.bf16 %v13068_v2  ;;  %v18230_v6 = vrot.slane %v12845_v29, 2  ;;  %v18231_v32 = vrot.slane %v12842_v25, 2  ;;  %v604_v51 = vld [vmem:[#allocation2 + $0xb0] sm:$0xff]  ;;  %v605_v24 = vld [vmem:[#allocation2 + $0xb8] sm:$0xff]  ;;  %9685 = vmatmul.mubr.msk.bf16.gmra.mrb[24].mxu1 %vm13087_vm7, %v12996_v36  ;;  %9616 = vmatmul.mubr.msk.bf16.gmra.mrb[24].mxu0 %vm13026_vm2, %v12830_v37 }
  0x65   : > { %18224 = vst [vmem:[#allocation51_spill] sm:$0xff] %v18223_v4  ;;  %579 = vst.msk [vmem:[#allocation2 + $0xe8] sm:$0xff] %vm18226_vm12, %v10420_v55  ;;  %v603_v55 = vld [vmem:[#allocation2 + $0xa8] sm:$0xff]  ;;  %vm18232_vm12 = vcmask 1045504   ;;  %v13121_v13 = vrot.slane %v1367_v9, 1  ;;  %v18235_v52 = vrot.slane %v12916_v23, 2 }
  0x66   : > { %vm13103_vm1 = vmpackc.low %vm18133_vm3, %vm13001_vm9  ;;  %v968_v30 = vsel %vm18232_vm12, %v18231_v32, %v18230_v6  ;;  %580 = vst.msk [vmem:[#allocation2 + $0xf0] sm:$0xff] %vm18225_vm13, %v10423_v40  ;;  %vm18233_vm9 = vsmask.f32 7424  ;;  %v18236_v45 = vmov %v18230_v6  ;;  %v798_v6 = vand.u32 15, %v13095_v19  ;;  %v606_v32 = vld [vmem:[#allocation2 + $0xc0] sm:$0xff] }
  0x67   : > { %v18228_v50 = vsel %vm13103_vm1, 4294967295, %v18227_v50  ;;  %v13127_v22 = vsel %vm18233_vm9, %v1349_v41, %v13047_v62  ;;  %vm18237_vm4 = vmmov %vm18232_vm12  ;;  %v607_v10 = vld [vmem:[#allocation2 + $0xc8] sm:$0xff]  ;;  %v686_v40 = vrot.slane %v602_v46, 7  ;;  %v688_v21 = vrot.slane %v603_v55, 7  ;;  %9688 = vmatprep.mubr.msk.bf16.mxu1 %vm13103_vm1, %v12953_v28 }
  0x68   : > { %18229 = vst [vmem:[#allocation52_spill] sm:$0xff] %v18228_v50  ;;  %18234 = vst [vmem:[#allocation53_spill] sm:$0xff] %v13127_v22  ;;  %v970_v25 = vsel %vm18237_vm4, %v18236_v45, %v18235_v52  ;;  %v799_v41 = vand.u32 15, %v13110_v26  ;;  %v13141_v61 = vadd.s32 184, %v12416_v31  ;;  %v690_v45 = vrot.slane %v604_v51, 7  ;;  %v608_v55 = vld [vmem:[#allocation2 + $0xd0] sm:$0xff]  ;;  %2119 = vmatprep.mubr.bf16.mxu0 %v13127_v22 }
  0x69   : > { %v692_v52 = vrot.slane %v605_v24, 7  ;;  %v13148_v19 = vadd.s32 192, %v12416_v31  ;;  %vm13150_vm4 = vcmp.le.s32.totalorder %v795_v60, 14  ;;  %v18238_v9 = vmov 0  ;;  %v13154_v4 = vld [vmem:[#allocation2 + $0xd8] sm:$0xff]  ;;  %vm13172_vm12 = vmpackc.low %vm13060_vm5, %vm18133_vm3 }
  0x6a   : > { %v18239_v9 = vsel %vm13150_vm4, 4294967295, %v18238_v9  ;;  %v694_v46 = vrot.slane %v606_v32, 7  ;;  %v696_v26 = vrot.slane %v607_v10, 7  ;;  %v13159_v51 = vpack.c.bf16 %v970_v25, %v968_v30  ;;  %vm13191_vm5 = vmpackc.low %vm18133_vm3, %vm13072_vm14 }
  0x6b   : > { %18240 = vst [vmem:[#allocation54_spill] sm:$0xff] %v18239_v9  ;;  %v18242_v24 = vshrl.u32 %v12953_v28, 16  ;;  %vm13164_vm9 = vcmp.ge.s32.totalorder %v796_v15, 1  ;;  %v18243_v60 = vmov 0  ;;  %v18246_v10 = vmov 0 }
  0x6c   : > { %18241 = vst [vmem:[#allocation55_spill] sm:$0xff] %v13159_v51  ;;  %v18244_v60 = vsel %vm13164_vm9, 4294967295, %v18243_v60  ;;  %v18247_v10 = vsel %vm13172_vm12, 4294967295, %v18246_v10  ;;  %v18249_v30 = vrot.slane %v12902_v11, 7  ;;  %vm18250_vm13 = vcmask 1040384   ;;  %9691 = vmatmul.mubr.msk.bf16.gmra.mrb[28].mxu1 %vm13172_vm12, %v13159_v51  ;;  %9619 = vmatmul.mubr.msk.bf16.gmra.mrb[28].mxu0 %vm13103_vm1, %v12882_v7 }
  0x6d   : > { %v1357_v29 = vor.u32 %v18242_v24, %v13047_v62  ;;  %18245 = vst [vmem:[#allocation56_spill] sm:$0xff] %v18244_v60  ;;  %18248 = vst [vmem:[#allocation57_spill] sm:$0xff] %v18247_v10  ;;  %v13186_v32 = vadd.s32 200, %v12416_v31  ;;  %v18252_v24 = vmov 0  ;;  %v700_v38 = vrot.slane %v13154_v4, 7  ;;  %9694 = vmatprep.mubr.msk.bf16.mxu1 %vm13191_vm5, %v12975_v17 }
  0x6e   : > { %v13179_v25 = vsel %vm18250_vm13, %v18249_v30, %v686_v40  ;;  %vm18251_vm2 = vmmov %vm18250_vm13  ;;  %v18253_v24 = vsel %vm13191_vm5, 4294967295, %v18252_v24  ;;  %v18257_v15 = vrot.slane %v12919_v42, 2  ;;  %v18258_v3 = vrot.slane %v12916_v23, 2 }
  0x6f   : > { %v13182_v62 = vsel %vm18251_vm2, %v686_v40, %v688_v21  ;;  %18254 = vst [vmem:[#allocation58_spill] sm:$0xff] %v18253_v24  ;;  %vm18255_vm7 = vmmov %vm18251_vm2  ;;  %v698_v40 = vrot.slane %v608_v55, 7  ;;  %v18262_v23 = vmov 0  ;;  %v13236_v55 = vadd.s32 224, %v12416_v31 }
  0x70   : > { %v13196_v11 = vsel %vm18255_vm7, %v688_v21, %v690_v45  ;;  %vm18256_vm13 = vmmov %vm18251_vm2  ;;  %vm18259_vm2 = vcmask 1045504   ;;  %v13214_v21 = vadd.s32 208, %v12416_v31  ;;  %v18268_v10 = vrot.slane %v12919_v42, 2  ;;  %v13267_v42 = vld [vmem:[#allocation2 + $0xe8] sm:$0xff] }
  0x71   : > { %v13199_v30 = vsel %vm18256_vm13, %v690_v45, %v692_v52  ;;  %v972_v47 = vsel %vm18259_vm2, %v18258_v3, %v18257_v15  ;;  %vm18260_vm0 = vmmov %vm18255_vm7  ;;  %v13217_v45 = vadd.s32 216, %v12416_v31  ;;  %vm13222_vm7 = vcmp.le.s32.totalorder %v797_v12, 14 }
  0x72   : > { %v13208_v36 = vsel %vm18260_vm0, %v692_v52, %v694_v46  ;;  %vm18261_vm14 = vmmov %vm18260_vm0  ;;  %v18263_v23 = vsel %vm13222_vm7, 4294967295, %v18262_v23  ;;  %v13228_v3 = vpack.c.bf16 %v13182_v62, %v13179_v25  ;;  %v13232_v4 = vpack.c.bf16 %v13199_v30, %v13196_v11 }
  0x73   : > { %v13211_v22 = vsel %vm18261_vm14, %v694_v46, %v696_v26  ;;  %18264 = vst [vmem:[#allocation59_spill] sm:$0xff] %v18263_v23  ;;  %v802_v52 = vand.u32 15, %v13148_v19  ;;  %v610_v46 = vld [vmem:[#allocation2 + $0xe0] sm:$0xff]  ;;  %vm18265_vm0 = vsmask.f32 7424  ;;  %v18267_v15 = vrot.slane %v12931_v18, 2  ;;  %vm18269_vm14 = vmmov %vm18259_vm2 }
  0x74   : > { %v13240_v12 = vsel %vm18265_vm0, %v1357_v29, %v13070_v5  ;;  %vm13250_vm13 = vcmp.ge.s32.totalorder %v798_v6, 1  ;;  %v18270_v19 = vmov 0  ;;  %vm18273_vm2 = vcmask 1040384  }
  0x75   : > { %18266 = vst [vmem:[#allocation60_spill] sm:$0xff] %v13240_v12  ;;  %v974_v51 = vsel %vm18269_vm14, %v18268_v10, %v18267_v15  ;;  %v18271_v19 = vsel %vm13250_vm13, 4294967295, %v18270_v19  ;;  %v13255_v37 = vsel %vm18273_vm2, %v696_v26, %v698_v40  ;;  %vm18274_vm12 = vmmov %vm18273_vm2  ;;  %v18275_v27 = vshrl.u32 %v12975_v17, 16  ;;  %2125 = vmatprep.mubr.bf16.mxu0 %v13240_v12 }
  0x76   : > { %18272 = vst [vmem:[#allocation61_spill] sm:$0xff] %v18271_v19  ;;  %v13258_v29 = vsel %vm18274_vm12, %v698_v40, %v700_v38  ;;  %v13265_v58 = vpack.c.bf16 %v13211_v22, %v13208_v36  ;;  %v13270_v6 = vadd.s32 232, %v12416_v31  ;;  %v803_v10 = vand.u32 15, %v13186_v32  ;;  %vm13291_vm12 = vmpackc.low %vm13150_vm4, %vm18133_vm3  ;;  %9622 = vmatmul.mubr.msk.bf16.gmra.mrb[32].mxu0 %vm13191_vm5, %v12953_v28 }
  0x77   : > { %v1365_v59 = vor.u32 %v18275_v27, %v13070_v5  ;;  %v804_v40 = vand.u32 15, %v13214_v21  ;;  %v13280_v5 = vpack.c.bf16 %v974_v51, %v972_v47  ;;  %v1375_v15 = vshll.u32 %v13228_v3, 16  ;;  %vm13305_vm14 = vmpackc.low %vm18133_vm3, %vm13164_vm9 }
  0x78   : > { %v1383_v43 = vshll.u32 %v13232_v4, 16  ;;  %v13286_v50 = vpack.c.bf16 %v13258_v29, %v13255_v37  ;;  %v18277_v32 = vmov 0  ;;  %vm13295_vm0 = vcmp.le.s32.totalorder %v799_v41, 14 }
  0x79   : > { %18276 = vst [vmem:[#allocation62_spill] sm:$0xff] %v13280_v5  ;;  %v18278_v32 = vsel %vm13291_vm12, 4294967295, %v18277_v32  ;;  %v18280_v21 = vmov 0  ;;  %v702_v51 = vrot.slane %v610_v46, 7  ;;  %v18283_v9 = vmov 0  ;;  %9697 = vmatmul.mubr.msk.bf16.gmra.mrb[32].mxu1 %vm13291_vm12, %v13280_v5 }
  0x7a   : > { %18279 = vst [vmem:[#allocation63_spill] sm:$0xff] %v18278_v32  ;;  %v18281_v21 = vsel %vm13295_vm0, 4294967295, %v18280_v21  ;;  %v18284_v9 = vsel %vm13305_vm14, 4294967295, %v18283_v9  ;;  %v18285_v12 = vrot.slane %v12934_v54, 2  ;;  %v18286_v41 = vrot.slane %v12931_v18, 2  ;;  %9700 = vmatprep.mubr.msk.bf16.mxu1 %vm13305_vm14, %v13033_v63 }
  0x7b   : > { %18282 = vst [vmem:[#allocation64_spill] sm:$0xff] %v18281_v21  ;;  %vm18287_vm2 = vcmask 1045504   ;;  %v1391_v47 = vshll.u32 %v13265_v58, 16  ;;  %v10424_v27 = vunpack.c.h.bf16 %v13068_v2  ;;  %vm18288_vm4 = vsmask.f32 7424 }
  0x7c   : > { %v976_v7 = vsel %vm18287_vm2, %v18286_v41, %v18285_v12  ;;  %v13319_v26 = vsel %vm18288_vm4, %v1365_v59, %v13121_v13  ;;  %v18289_v60 = vrot.slane %v12987_v57, 2  ;;  %v18290_v35 = vmov %v18285_v12  ;;  %vm18291_vm9 = vmmov %vm18287_vm2 }
  0x7d   : > { %v1379_v18 = vshrl.u32 %v13228_v3, 16  ;;  %v1377_v41 = vrot.slane %v1375_v15, 1  ;;  %v1385_v2 = vrot.slane %v1383_v43, 1  ;;  %v18292_v46 = vand.u32 15, %v13114_v8  ;;  %2133 = vmatprep.mubr.bf16.mxu0 %v13319_v26 }
  0x7e   : > { %v978_v33 = vsel %vm18291_vm9, %v18290_v35, %v18289_v60  ;;  %v18293_v59 = vmov 0  ;;  %v987_v54 = vrot.slane %v13199_v30, 2  ;;  %v1399_v35 = vshll.u32 %v13286_v50, 16  ;;  %9625 = vmatmul.mubr.msk.bf16.gmra.mrb[36].mxu0 %vm13305_vm14, %v12975_v17 }
  0x7f   : > { %vm13333_vm4 = vcmp.ge.s32.totalorder %v18292_v46, 1  ;;  %vm18296_vm9 = vcmask 31744   ;;  %v1387_v60 = vshrl.u32 %v13232_v4, 16  ;;  %vm18297_vm2 = vcmask 1040384  }
  0x80   : > { %v18294_v59 = vsel %vm13333_vm4, 4294967295, %v18293_v59  ;;  %581 = vst.msk [vmem:[#allocation2 + $0xf8] sm:$0xff] %vm18296_vm9, %v10424_v27  ;;  %v13346_v8 = vsel %vm18297_vm2, %v700_v38, %v702_v51  ;;  %v18298_v15 = vrot.slane %v13267_v42, 7  ;;  %vm18299_vm12 = vmmov %vm18297_vm2  ;;  %v18300_v30 = vand.u32 15, %v13141_v61 }
  0x81   : > { %18295 = vst [vmem:[#allocation65_spill] sm:$0xff] %v18294_v59  ;;  %v18301_v27 = vmov 0  ;;  %v1393_v12 = vrot.slane %v1391_v47, 1  ;;  %v1395_v32 = vshrl.u32 %v13265_v58, 16  ;;  %vm13366_vm9 = vmpackc.low %vm13222_vm7, %vm18133_vm3  ;;  %v18304_v38 = vmov 0 }
  0x82   : > { %v13351_v46 = vsel %vm18299_vm12, %v702_v51, %v18298_v15  ;;  %vm13355_vm1 = vcmp.le.s32.totalorder %v18300_v30, 14  ;;  %v18305_v38 = vsel %vm13366_vm9, 4294967295, %v18304_v38  ;;  %vm13370_vm12 = vcmp.ge.s32.totalorder %v802_v52, 1  ;;  %v13376_v15 = vld [vmem:[#allocation2 + $0xf0] sm:$0xff]  ;;  %vm13384_vm2 = vmpackc.low %vm18133_vm3, %vm13250_vm13 }
  0x83   : > { %v18302_v27 = vsel %vm13355_vm1, 4294967295, %v18301_v27  ;;  %18306 = vst [vmem:[#allocation67_spill] sm:$0xff] %v18305_v38  ;;  %v18307_v61 = vmov 0  ;;  %v991_v51 = vrot.slane %v13211_v22, 2  ;;  %v13379_v30 = vpack.c.bf16 %v978_v33, %v976_v7  ;;  %vm13404_vm13 = vmpackc.low %vm13295_vm0, %vm18133_vm3 }
  0x84   : > { %18303 = vst [vmem:[#allocation66_spill] sm:$0xff] %v18302_v27  ;;  %v18308_v61 = vsel %vm13370_vm12, 4294967295, %v18307_v61  ;;  %v18311_v43 = vmov 0  ;;  %v1401_v52 = vrot.slane %v1399_v35, 1  ;;  %v13390_v23 = vpack.c.bf16 %v13351_v46, %v13346_v8 }
  0x85   : > { %18309 = vst [vmem:[#allocation68_spill] sm:$0xff] %v18308_v61  ;;  %18310 = vst [vmem:[#allocation69_spill] sm:$0xff] %v13379_v30  ;;  %v18312_v43 = vsel %vm13384_vm2, 4294967295, %v18311_v43  ;;  %v1403_v22 = vshrl.u32 %v13286_v50, 16  ;;  %v18313_v47 = vshrl.u32 %v13033_v63, 16  ;;  %9703 = vmatmul.mubr.msk.bf16.gmra.mrb[36].mxu1 %vm13366_vm9, %v13379_v30  ;;  %v18314_v35 = vmov 0 }
  0x86   : > { %v18315_v35 = vsel %vm13404_vm13, 4294967295, %v18314_v35  ;;  %v1407_v19 = vshll.u32 %v13390_v23, 16  ;;  %vm18316_vm7 = vsmask.f32 7424  ;;  %9706 = vmatprep.mubr.msk.bf16.mxu1 %vm13384_vm2, %v13228_v3  ;;  %v18318_v33 = vrot.slane %v12987_v57, 2 }
  0x87   : > { %v1373_v24 = vor.u32 %v18313_v47, %v13121_v13  ;;  %v18317_v47 = vrot.slane %v12992_v56, 2  ;;  %vm18319_vm9 = vcmask 1045504   ;;  %v18320_v21 = vrot.slane %v13179_v25, 2 }
  0x88   : > { %vm18322_vm0 = vmmov %vm18319_vm9  ;;  %vm13426_vm5 = vcmp.le.s32.totalorder %v803_v10, 14  ;;  %v18323_v5 = vmov 0  ;;  %v776_v56 = vadd.s32 240, %v12416_v31  ;;  %v13446_v10 = vadd.s32 248, %v12416_v31 }
  0x89   : > { %v13411_v13 = vsel %vm18316_vm7, %v1373_v24, %v1377_v41  ;;  %v980_v7 = vsel %vm18319_vm9, %v18318_v33, %v18317_v47  ;;  %v18321_v38 = vmov %v18317_v47  ;;  %v18324_v5 = vsel %vm13426_vm5, 4294967295, %v18323_v5  ;;  %vm13436_vm7 = vmpackc.low %vm18133_vm3, %vm13333_vm4 }
  0x8a   : > { %v982_v30 = vsel %vm18322_vm0, %v18321_v38, %v18320_v21  ;;  %18325 = vst [vmem:[#allocation70_spill] sm:$0xff] %v18324_v5  ;;  %vm13440_vm9 = vcmp.ge.s32.totalorder %v804_v40, 1  ;;  %v18328_v24 = vmov 0  ;;  %2139 = vmatprep.mubr.bf16.mxu0 %v13411_v13  ;;  %v1381_v38 = vor.u32 %v1379_v18, %v1377_v41  ;;  %vm13454_vm0 = vmpackc.low %vm13355_vm1, %vm18133_vm3 }
  0x8b   : > { %v18329_v24 = vsel %vm13440_vm9, 4294967295, %v18328_v24  ;;  %v13449_v21 = vpack.c.bf16 %v982_v30, %v980_v7  ;;  %vm13461_vm4 = vmpackc.low %vm18133_vm3, %vm13370_vm12  ;;  %v18333_v40 = vmov 0  ;;  %vm18335_vm14 = vsmask.f32 7424  ;;  %9628 = vmatmul.mubr.msk.bf16.gmra.mrb[40].mxu0 %vm13384_vm2, %v13033_v63 }
  0x8c   : > { %18330 = vst [vmem:[#allocation71_spill] sm:$0xff] %v18329_v24  ;;  %v18334_v40 = vsel %vm13461_vm4, 4294967295, %v18333_v40  ;;  %v13469_v18 = vsel %vm18335_vm14, %v1381_v38, %v1385_v2  ;;  %v18336_v41 = vrot.slane %v13182_v62, 2  ;;  %v18337_v30 = vrot.slane %v13179_v25, 2 }
  0x8d   : > { %9709 = vmatmul.mubr.msk.bf16.gmra.mrb[40].mxu1 %vm13404_vm13, %v13449_v21  ;;  %vm18338_vm1 = vcmask 1045504   ;;  %v18339_v47 = vrot.slane %v13196_v11, 2  ;;  %v18342_v59 = vand.u32 15, %v13217_v45  ;;  %v18343_v38 = vmov 0  ;;  %2147 = vmatprep.mubr.bf16.mxu0 %v13469_v18 }
  0x8e   : > { %9712 = vmatprep.mubr.msk.bf16.mxu1 %vm13436_vm7, %v13232_v4  ;;  %v984_v7 = vsel %vm18338_vm1, %v18337_v30, %v18336_v41  ;;  %v18340_v61 = vmov %v18336_v41  ;;  %vm18341_vm12 = vmmov %vm18338_vm1  ;;  %v1389_v41 = vor.u32 %v1387_v60, %v1385_v2  ;;  %v18346_v62 = vmov 0 }
  0x8f   : > { %v986_v27 = vsel %vm18341_vm12, %v18340_v61, %v18339_v47  ;;  %vm13486_vm14 = vcmp.le.s32.totalorder %v18342_v59, 14  ;;  %vm13499_vm1 = vmpackc.low %vm13426_vm5, %vm18133_vm3  ;;  %v18348_v45 = vmov 0  ;;  %vm18350_vm2 = vsmask.f32 7424 }
  0x90   : > { %v18344_v38 = vsel %vm13486_vm14, 4294967295, %v18343_v38  ;;  %v13494_v25 = vpack.c.bf16 %v986_v27, %v984_v7  ;;  %v18347_v62 = vsel %vm13499_vm1, 4294967295, %v18346_v62  ;;  %vm13506_vm12 = vmpackc.low %vm18133_vm3, %vm13440_vm9  ;;  %v13514_v2 = vsel %vm18350_vm2, %v1389_v41, %v1393_v12 }
  0x91   : > { %18345 = vst [vmem:[#allocation72_spill] sm:$0xff] %v18344_v38  ;;  %v18349_v45 = vsel %vm13506_vm12, 4294967295, %v18348_v45  ;;  %v18351_v59 = vmov %v18339_v47  ;;  %vm18352_vm5 = vcmask 1045504   ;;  %v18353_v27 = vrot.slane %v13208_v36, 2 }
  0x92   : > { %v988_v60 = vsel %vm18352_vm5, %v18351_v59, %v987_v54  ;;  %vm18354_vm9 = vmmov %vm18352_vm5  ;;  %v18355_v30 = vand.u32 15, %v13236_v55  ;;  %v18356_v7 = vmov 0  ;;  %v1397_v11 = vor.u32 %v1395_v32, %v1393_v12  ;;  %v613_v55 = vld [vmem:[#allocation2 + $0xf8] sm:$0xff] }
  0x93   : > { %v990_v61 = vsel %vm18354_vm9, %v987_v54, %v18353_v27  ;;  %9631 = vmatmul.mubr.msk.bf16.gmra.mrb[44].mxu0 %vm13436_vm7, %v13228_v3  ;;  %vm13540_vm5 = vmpackc.low %vm13486_vm14, %vm18133_vm3  ;;  %v18359_v54 = vmov 0  ;;  %v18361_v32 = vmov %v18353_v27  ;;  %v18362_v59 = vrot.slane %v13255_v37, 2 }
  0x94   : > { %vm13527_vm13 = vcmp.ge.s32.totalorder %v18355_v30, 1  ;;  %2153 = vmatprep.mubr.bf16.mxu0 %v13514_v2  ;;  %v13535_v47 = vpack.c.bf16 %v990_v61, %v988_v60  ;;  %v18360_v54 = vsel %vm13540_vm5, 4294967295, %v18359_v54  ;;  %v13548_v41 = vsel %vm18350_vm2, %v1397_v11, %v1401_v52  ;;  %vm18363_vm14 = vmmov %vm18354_vm9  ;;  %v11888_v11 = vld [vmem:[%s17681_s1 + $0x200] sm:$0xff]  }
  0x95   : > { %9715 = vmatmul.mubr.msk.bf16.gmra.mrb[44].mxu1 %vm13454_vm0, %v13494_v25  ;;  %v18357_v7 = vsel %vm13527_vm13, 4294967295, %v18356_v7  ;;  %v992_v12 = vsel %vm18354_vm9, %v18361_v32, %v991_v51  ;;  %v994_v60 = vsel %vm18363_vm14, %v991_v51, %v18362_v59  ;;  %v1409_v27 = vrot.slane %v1407_v19, 1  ;;  %11514 = vmatprep.subr.bf16.mxu0 %v11888_v11  ;;  %vm13582_vm14 = vmpackc.low %vm18133_vm3, %vm13527_vm13 }
  0x96   : > { %9718 = vmatprep.mubr.msk.bf16.mxu1 %vm13461_vm4, %v13265_v58  ;;  %18358 = vst [vmem:[#allocation73_spill] sm:$0xff] %v18357_v7  ;;  %v18364_v61 = vand.u32 15, %v13270_v6  ;;  %v18365_v30 = vmov 0  ;;  %v18368_v24 = vrot.slane %v13376_v15, 7  ;;  %v18369_v36 = vrot.slane %v13267_v42, 7  ;;  %vm18378_vm13 = vmmov %vm18354_vm9 }
  0x97   : > { %vm18370_vm2 = vcmask 1040384   ;;  %v13577_v19 = vpack.c.bf16 %v994_v60, %v992_v12  ;;  %v1405_v6 = vor.u32 %v1403_v22, %v1401_v52  ;;  %v808_v59 = vand.u32 15, %v776_v56 }
  0x98   : > { %v707_v32 = vsel %vm18370_vm2, %v18369_v36, %v18368_v24  ;;  %v708_v24 = vrot.slane %v613_v55, 7  ;;  %v809_v36 = vand.u32 15, %v13446_v10  ;;  %v18373_v52 = vrot.slane %v13258_v29, 2 }
  0x99   : > { %v903_v42 = vpack.c.bf16 %v707_v32, %v707_v32  ;;  %v18374_v22 = vrot.slane %v13255_v37, 2  ;;  %vm18375_vm2 = vsmask.f32 7424  ;;  %v18376_v56 = vrot.slane %v13346_v8, 2 }
  0x9a   : > { %v13597_v60 = vsel %vm18375_vm2, %v1405_v6, %v1409_v27  ;;  %v18377_v10 = vmov %v18373_v52  ;;  %v18379_v5 = vmov 0  ;;  %v18382_v37 = vrot.slane %v13376_v15, 7 }
  0x9b   : > { %9634 = vmatmul.mubr.msk.bf16.gmra.mrb[48].mxu0 %vm13461_vm4, %v13232_v4  ;;  %v996_v12 = vsel %vm18354_vm9, %v18374_v22, %v18373_v52  ;;  %v998_v55 = vsel %vm18378_vm13, %v18377_v10, %v18376_v56  ;;  %v1415_v38 = vshll.u32 %v903_v42, 16  ;;  %vm18383_vm9 = vcmask 1040384  }
  0x9c   : > { %2161 = vmatprep.mubr.bf16.mxu0 %v13548_v41  ;;  %v709_v6 = vsel %vm18383_vm9, %v18382_v37, %v708_v24  ;;  %v13625_v42 = vpack.c.bf16 %v998_v55, %v996_v12  ;;  %v1001_v15 = vrot.slane %v707_v32, 2  ;;  %v18386_v56 = vmov 0 }
  0x9d   : > { %9721 = vmatmul.mubr.msk.bf16.gmra.mrb[48].mxu1 %vm13499_vm1, %v13535_v47  ;;  %vm13561_vm1 = vcmp.le.s32.totalorder %v18364_v61, 14  ;;  %v1411_v61 = vshrl.u32 %v13390_v23, 16  ;;  %v1417_v22 = vrot.slane %v1415_v38, 1  ;;  %v13637_v10 = vpack.c.bf16 %v709_v6, %v707_v32 }
  0x9e   : > { %9724 = vmatprep.mubr.msk.bf16.mxu1 %vm13506_vm12, %v13286_v50  ;;  %v18366_v30 = vsel %vm13561_vm1, 4294967295, %v18365_v30  ;;  %vm13621_vm2 = vmpackc.low %vm13561_vm1, %vm18133_vm3  ;;  %vm13639_vm9 = vcmp.le.s32.totalorder %v809_v36, 14  ;;  %v18388_v37 = vmov 0  ;;  %vm18392_vm1 = vcmask 1045504  }
  0x9f   : > { %18367 = vst [vmem:[#allocation74_spill] sm:$0xff] %v18366_v30  ;;  %v13628_v52 = vor.u32 %v1411_v61, %v1409_v27  ;;  %v18389_v37 = vsel %vm13639_vm9, 4294967295, %v18388_v37  ;;  %v1134_v61 = vrot.slane %v709_v6, 2  ;;  %vm18395_vm4 = vcmask 1040384  }
  0xa0   : > { %18390 = vst [vmem:[#allocation76_spill] sm:$0xff] %v18389_v37  ;;  %v13656_v36 = vsel %vm18395_vm4, %v708_v24, 0.0 }
  0xa1   : > { %v17922_v55 = vrot.slane %v13656_v36, 2 }
  0xa3   : > { %9637 = vmatmul.mubr.msk.bf16.gmra.mrb[52].mxu0 %vm13506_vm12, %v13265_v58  ;;  %vm18393_vm12 = vsmask.f32 7424 }
  0xa4   : > { %2167 = vmatprep.mubr.bf16.mxu0 %v13597_v60  ;;  %v1418_v27 = vsel %vm18393_vm12, %v13628_v52, %v1417_v22  ;;  %v11890_v22 = vld [vmem:[%s17681_s1 + $0x210] sm:$0xff]  }
  0xa5   : > { %9727 = vmatmul.mubr.msk.bf16.gmra.mrb[52].mxu1 %vm13540_vm5, %v13577_v19  ;;  %vm13607_vm5 = vcmp.ge.s32.totalorder %v808_v59, 1  ;;  %v999_v59 = vrot.slane %v13351_v46, 2  ;;  %v18391_v46 = vrot.slane %v13346_v8, 2 }
  0xa6   : > { %9730 = vmatprep.mubr.msk.bf16.mxu1 %vm13582_vm14, %v13390_v23  ;;  %v18380_v5 = vsel %vm13607_vm5, 4294967295, %v18379_v5  ;;  %vm13633_vm13 = vmpackc.low %vm18133_vm3, %vm13607_vm5 }
  0xa7   : > { %18381 = vst [vmem:[#allocation75_spill] sm:$0xff] %v18380_v5  ;;  %v18387_v56 = vsel %vm13633_vm13, 4294967295, %v18386_v56  ;;  %v1000_v38 = vsel %vm18392_vm1, %v18391_v46, %v999_v59  ;;  %vm18394_vm5 = vmmov %vm18392_vm1  ;;  %v18404_v46 = vld [vmem:[#allocation21_spill] sm:$0xff] }
  0xa8   : > { %v1002_v32 = vsel %vm18394_vm5, %v999_v59, %v1001_v15  ;;  %vm13666_vm1 = vmpackc.low %vm13639_vm9, %vm18133_vm3 }
  0xa9   : > { %v13661_v8 = vpack.c.bf16 %v1002_v32, %v1000_v38  ;;  %vm18398_vm12 = vmmov %vm18394_vm5  ;;  %v11894_v38 = vld [vmem:[%s17681_s1 + $0x230] sm:$0xff]   ;;  %v11895_v32 = vld [vmem:[%s17681_s1 + $0x238] sm:$0xff]  }
  0xaa   : > { %v1135_v6 = vsel %vm18398_vm12, %v1001_v15, %v1134_v61  ;;  %vm18399_vm4 = vmmov %vm18394_vm5  ;;  %v11889_v15 = vld [vmem:[%s17681_s1 + $0x208] sm:$0xff]  }
  0xab   : > { %9640 = vmatmul.mubr.msk.bf16.gmra.mrb[56].mxu0 %vm13582_vm14, %v13286_v50  ;;  %v1137_v24 = vsel %vm18399_vm4, %v1134_v61, %v17922_v55  ;;  %v18408_v61 = vld [vmem:[#allocation28_spill] sm:$0xff]  ;;  %v18448_v55 = vld [vmem:[#allocation50_spill] sm:$0xff] }
  0xac   : > { %2175 = vmatprep.mubr.bf16.mxu0 %v1418_v27  ;;  %v13678_v59 = vpack.c.bf16 %v1137_v24, %v1135_v6  ;;  %v18407_v27 = vld [vmem:[#allocation37_spill] sm:$0xff]  ;;  %v18411_v24 = vld [vmem:[#allocation26_spill] sm:$0xff] }
  0xad   : > { %9733 = vmatmul.mubr.msk.bf16.gmra.mrb[56].mxu1 %vm13621_vm2, %v13625_v42  ;;  %v18410_v6 = vld [vmem:[#allocation25_spill] sm:$0xff]  ;;  %vm18412_vm5 = vnez %v18411_v24  ;;  %v18427_v24 = vld [vmem:[#allocation60_spill] sm:$0xff] }
  0xae   : > { %9736 = vmatprep.mubr.msk.bf16.mxu1 %vm13633_vm13, %v13637_v10 }
  0xb3   : > { %9643 = vmatmul.mubr.msk.bf16.gmra.mrb[60].mxu0 %vm13633_vm13, %v13390_v23 }
  0xb4   : > { %9742 = vmatprep.mubr.msk.bf16.mxu0 %vm12536_vm10, %v12638_v44  ;;  %v11891_v44 = vld [vmem:[%s17681_s1 + $0x218] sm:$0xff]  }
  0xb5   : > { %9739 = vmatmul.mubr.msk.bf16.gmra.mrb[60].mxu1 %vm13666_vm1, %v13661_v8 }
  0xb6   : > { %2504 = vmatprep.mubr.bf16.mxu1 %v12691_v16 }
  0xbb   : > { %2360 = vmatmul.mubr.bf16.vlgmr.msra.gmra.mrb[64].mxu0 %v12625_v14  ;;  %v18401_v14 = vld [vmem:[#allocation31_spill] sm:$0xff] }
  0xbc   : > { %9745 = vmatprep.mubr.msk.bf16.mxu0 %vm12647_vm15, %v12725_v34  ;;  %11515 = vmatpush3.bf16.msra.mxu0 %v11888_v11 }
  0xbd   : > { %9790 = vmatmul.mubr.msk.bf16.vlgmr.msra.gmra.mrb[64].mxu1 %vm12512_vm8, %v12542_v49  ;;  %11516 = vmatprep.subr.bf16.mxu0 %v11889_v15  ;;  %v11892_v49 = vld [vmem:[%s17681_s1 + $0x220] sm:$0xff]   ;;  %vm18405_vm8 = vnez %v18404_v46  ;;  %v18422_v46 = vld [vmem:[#allocation45_spill] sm:$0xff] }
  0xbe   : > { %2512 = vmatprep.mubr.bf16.mxu1 %v12775_v20 }
  0xc0   : > { %11517 = vmatpush3.bf16.msra.mxu0 %v11889_v15  ;;  %v18414_v15 = vld [vmem:[#allocation39_spill] sm:$0xff] }
  0xc1   : > { %11518 = vmatprep.subr.bf16.mxu0 %v11890_v22 }
  0xc3   : > { %2368 = vmatmul.mubr.bf16.gmra.mrb[68].mxu0 %v12691_v16  ;;  %v18406_v16 = vld [vmem:[#allocation41_spill] sm:$0xff] }
  0xc4   : > { %9748 = vmatprep.mubr.msk.bf16.mxu0 %vm12734_vm6, %v18401_v14  ;;  %11519 = vmatpush3.bf16.msra.mxu0 %v11890_v22  ;;  %v18415_v22 = vld [vmem:[#allocation34_spill] sm:$0xff] }
  0xc5   : > { %9793 = vmatmul.mubr.msk.bf16.gmra.mrb[68].mxu1 %vm12569_vm11, %v12575_v1  ;;  %11520 = vmatprep.subr.bf16.mxu0 %v11891_v44  ;;  %v18403_v1 = vld [vmem:[#allocation20_spill] sm:$0xff]  ;;  %vm18409_vm11 = vnez %v18408_v61  ;;  %vm18416_vm12 = vnez %v18415_v22 }
  0xc6   : > { %2518 = vmatprep.mubr.bf16.mxu1 %v18400_v39 }
  0xc8   : > { %11521 = vmatpush3.bf16.msra.mxu0 %v11891_v44  ;;  %v18417_v44 = vld [vmem:[#allocation32_spill] sm:$0xff] }
  0xc9   : > { %11522 = vmatprep.subr.bf16.mxu0 %v11892_v49 }
  0xcb   : > { %2374 = vmatmul.mubr.bf16.gmra.mrb[72].mxu0 %v12775_v20  ;;  %v18413_v20 = vld [vmem:[#allocation47_spill] sm:$0xff] }
  0xcc   : > { %9751 = vmatprep.mubr.msk.bf16.mxu0 %vm18409_vm11, %v18407_v27  ;;  %11523 = vmatpush3.bf16.msra.mxu0 %v11892_v49  ;;  %v18418_v49 = vld [vmem:[#allocation29_spill] sm:$0xff] }
  0xcd   : > { %9796 = vmatmul.mubr.msk.bf16.gmra.mrb[72].mxu1 %vm18405_vm8, %v18403_v1  ;;  %11524 = vmatprep.subr.bf16.mxu0 %v11893_v0  ;;  %vm18419_vm4 = vnez %v18418_v49  ;;  %v18420_v1 = vld [vmem:[#allocation53_spill] sm:$0xff]  ;;  %vm18423_vm8 = vnez %v18422_v46  ;;  %v18429_v49 = vld [vmem:[#allocation51_spill] sm:$0xff] }
  0xce   : > { %2526 = vmatprep.mubr.bf16.mxu1 %v18406_v16 }
  0xd0   : > { %11525 = vmatpush3.bf16.msra.mxu0 %v11893_v0  ;;  %v18421_v0 = vld [vmem:[#allocation43_spill] sm:$0xff] }
  0xd1   : > { %11526 = vmatprep.subr.bf16.mxu0 %v11894_v38 }
  0xd3   : > { %2382 = vmatmul.mubr.bf16.gmra.mrb[76].mxu0 %v18400_v39  ;;  %v18424_v39 = vld [vmem:[#allocation36_spill] sm:$0xff] }
  0xd4   : > { %9754 = vmatprep.mubr.msk.bf16.mxu0 %vm18416_vm12, %v18414_v15  ;;  %11527 = vmatpush3.bf16.msra.mxu0 %v11894_v38  ;;  %v18428_v38 = vld [vmem:[#allocation55_spill] sm:$0xff] }
  0xd5   : > { %9799 = vmatmul.mubr.msk.bf16.gmra.mrb[76].mxu1 %vm18412_vm5, %v18410_v6  ;;  %11528 = vmatprep.subr.bf16.mxu0 %v11895_v32  ;;  %v18425_v6 = vld [vmem:[#allocation38_spill] sm:$0xff] }
  0xd6   : > { %2532 = vmatprep.mubr.bf16.mxu1 %v18413_v20  ;;  %vm18426_vm5 = vnez %v18425_v6  ;;  %v18439_v6 = vld [vmem:[#allocation63_spill] sm:$0xff] }
  0xd7   : > { %vm18440_vm13 = vnez %v18439_v6 }
  0xd8   : > { %11529 = vmatpush3.bf16.msra.mxu0 %v11895_v32  ;;  %v18431_v32 = vld [vmem:[#allocation46_spill] sm:$0xff] }
  0xd9   : > { %vm18432_vm9 = vnez %v18431_v32 }
  0xdb   : > { %2388 = vmatmul.mubr.bf16.gmra.mrb[80].mxu0 %v18406_v16  ;;  %v18433_v16 = vld [vmem:[#allocation62_spill] sm:$0xff] }
  0xdc   : > { %9757 = vmatprep.mubr.msk.bf16.mxu0 %vm18423_vm8, %v18421_v0 }
  0xdd   : > { %9802 = vmatmul.mubr.msk.bf16.gmra.mrb[80].mxu1 %vm18419_vm4, %v18417_v44  ;;  %vm18430_vm4 = vnez %v18429_v49  ;;  %v18434_v44 = vld [vmem:[#allocation57_spill] sm:$0xff] }
  0xde   : > { %2540 = vmatprep.mubr.bf16.mxu1 %v18420_v1  ;;  %vm18435_vm3 = vnez %v18434_v44 }
  0xe3   : > { %2396 = vmatmul.mubr.bf16.gmra.mrb[84].mxu0 %v18413_v20  ;;  %v18438_v20 = vld [vmem:[#allocation69_spill] sm:$0xff] }
  0xe4   : > { %9760 = vmatprep.mubr.msk.bf16.mxu0 %vm18430_vm4, %v18428_v38 }
  0xe5   : > { %9805 = vmatmul.mubr.msk.bf16.gmra.mrb[84].mxu1 %vm18426_vm5, %v18424_v39  ;;  %v18436_v39 = vld [vmem:[#allocation52_spill] sm:$0xff] }
  0xe6   : > { %2546 = vmatprep.mubr.bf16.mxu1 %v18427_v24  ;;  %vm18437_vm5 = vnez %v18436_v39 }
  0xeb   : > { %2402 = vmatmul.mubr.bf16.gmra.mrb[88].mxu0 %v18420_v1  ;;  %v18443_v1 = vld [vmem:[#allocation67_spill] sm:$0xff] }
  0xec   : > { %9763 = vmatprep.mubr.msk.bf16.mxu0 %vm18435_vm3, %v18433_v16  ;;  %vm18444_vm3 = vnez %v18443_v1 }
  0xed   : > { %9808 = vmatmul.mubr.msk.bf16.gmra.mrb[88].mxu1 %vm18432_vm9, %v12953_v28  ;;  %v18441_v28 = vld [vmem:[#allocation58_spill] sm:$0xff] }
  0xee   : > { %2554 = vmatprep.mubr.bf16.mxu1 %v13319_v26  ;;  %vm18442_vm9 = vnez %v18441_v28 }
  0xf3   : > { %2410 = vmatmul.mubr.bf16.gmra.mrb[92].mxu0 %v18427_v24 }
  0xf4   : > { %9766 = vmatprep.mubr.msk.bf16.mxu0 %vm18440_vm13, %v18438_v20  ;;  %vm18446_vm13 = vnez %v18315_v35 }
  0xf5   : > { %9811 = vmatmul.mubr.msk.bf16.gmra.mrb[92].mxu1 %vm18437_vm5, %v12975_v17  ;;  %vm18445_vm5 = vnez %v18284_v9 }
  0xf6   : > { %2560 = vmatprep.mubr.bf16.mxu1 %v13411_v13 }
  0xfb   : > { %2416 = vmatmul.mubr.bf16.gmra.mrb[96].mxu0 %v13319_v26  ;;  %v1436_v26 = vshll.u32 %v13637_v10, 16 }
  0xfc   : > { %9769 = vmatprep.mubr.msk.bf16.mxu0 %vm18444_vm3, %v13449_v21 }
  0xfd   : > { %9814 = vmatmul.mubr.msk.bf16.gmra.mrb[96].mxu1 %vm18442_vm9, %v13033_v63  ;;  %vm18447_vm9 = vnez %v18312_v43  ;;  %v1438_v28 = vrot.slane %v1436_v26, 1 }
  0xfe   : > { %2568 = vmatprep.mubr.bf16.mxu1 %v13469_v18 }
 0x103   : > { %2424 = vmatmul.mubr.bf16.gmra.mrb[100].mxu0 %v13411_v13  ;;  %v10568_v63 = vpop.f32.mrb[0].mxu1 }
 0x104   : > { %9772 = vmatprep.mubr.msk.bf16.mxu0 %vm18446_vm13, %v13494_v25  ;;  %v10569_v17 = vpop.f32.mrb[1].mxu1 }
 0x105   : > { %9817 = vmatmul.mubr.msk.bf16.gmra.mrb[100].mxu1 %vm18445_vm5, %v13228_v3  ;;  %v10570_v9 = vadd.f32 %v10569_v17, %v10568_v63  ;;  %v10571_v3 = vpop.f32.mrb[2].mxu1  ;;  %v13803_v63 = vpack.c.bf16 %v18448_v55, %v13656_v36  ;;  %vm18449_vm5 = vnez %v18347_v62 }
 0x106   : > { %2574 = vmatprep.mubr.bf16.mxu1 %v13514_v2  ;;  %v10572_v24 = vpop.f32.mrb[3].mxu1 }
 0x107   : > { %v10456_v13 = vpop.f32.mrb[0].mxu0  ;;  %v10573_v39 = vadd.f32 %v10572_v24, %v10571_v3  ;;  %v1451_v24 = vshll.u32 %v13803_v63, 16 }
 0x108   : > { %v10457_v32 = vpop.f32.mrb[1].mxu0 }
 0x109   : > { %v10458_v43 = vadd.f32 %v10457_v32, %v10456_v13 }
 0x10b   : > { %2430 = vmatmul.mubr.bf16.gmra.mrb[104].mxu0 %v13469_v18  ;;  %v13805_v37 = vadd.f32 %v10570_v9, %v10458_v43  ;;  %v10574_v3 = vpop.f32.mrb[4].mxu1 }
 0x10c   : > { %9775 = vmatprep.mubr.msk.bf16.mxu0 %vm13454_vm0, %v13535_v47  ;;  %v10575_v57 = vpop.f32.mrb[5].mxu1 }
 0x10d   : > { %9820 = vmatmul.mubr.msk.bf16.gmra.mrb[104].mxu1 %vm18447_vm9, %v13232_v4  ;;  %v10459_v4 = vpop.f32.mrb[2].mxu0  ;;  %v10577_v26 = vpop.f32.mrb[6].mxu1  ;;  %vm18451_vm9 = vnez %v18334_v40 }
 0x10e   : > { %2582 = vmatprep.mubr.bf16.mxu1 %v13548_v41  ;;  %v10460_v18 = vpop.f32.mrb[3].mxu0  ;;  %v10578_v30 = vpop.f32.mrb[7].mxu1 }
 0x10f   : > { %v10461_v17 = vadd.f32 %v10460_v18, %v10459_v4  ;;  %v10462_v32 = vpop.f32.mrb[4].mxu0  ;;  %v13820_v18 = vrot.slane %v1451_v24, 1 }
 0x110   : > { %v10463_v43 = vpop.f32.mrb[5].mxu0 }
 0x111   : > { %v13812_v13 = vadd.f32 %v10573_v39, %v10461_v17 }
 0x113   : > { %2438 = vmatmul.mubr.bf16.gmra.mrb[108].mxu0 %v13514_v2  ;;  %v10465_v2 = vpop.f32.mrb[6].mxu0  ;;  %v10580_v17 = vpop.f32.mrb[8].mxu1 }
 0x114   : > { %9778 = vmatprep.mubr.msk.bf16.mxu0 %vm18449_vm5, %v13577_v19  ;;  %v10466_v4 = vpop.f32.mrb[7].mxu0  ;;  %v10581_v3 = vpop.f32.mrb[9].mxu1  ;;  %vm18452_vm5 = vnez %v18360_v54 }
 0x115   : > { %9823 = vmatmul.mubr.msk.bf16.gmra.mrb[108].mxu1 %vm13436_vm7, %v13265_v58  ;;  %v1440_v58 = vshrl.u32 %v13637_v10, 16  ;;  %vm18450_vm7 = vsmask.f32 7424  ;;  %v10582_v30 = vadd.f32 %v10581_v3, %v10580_v17  ;;  %v1132_v17 = vpack.c.bf16 %v13656_v36, %v13656_v36 }
 0x116   : > { %2588 = vmatprep.mubr.bf16.mxu1 %v13597_v60  ;;  %v1439_v9 = vsel %vm18450_vm7, %v13628_v52, %v1438_v28  ;;  %v10583_v52 = vpop.f32.mrb[10].mxu1 }
 0x117   : > { %v1442_v39 = vor.u32 %v1440_v58, %v1438_v28  ;;  %v10468_v57 = vpop.f32.mrb[8].mxu0  ;;  %v10584_v26 = vpop.f32.mrb[11].mxu1 }
 0x118   : > { %v10469_v40 = vpop.f32.mrb[9].mxu0  ;;  %v10585_v32 = vadd.f32 %v10584_v26, %v10583_v52 }
 0x119   : > { %v10470_v24 = vadd.f32 %v10469_v40, %v10468_v57  ;;  %v10471_v43 = vpop.f32.mrb[10].mxu0 }
 0x11b   : > { %2444 = vmatmul.mubr.bf16.gmra.mrb[112].mxu0 %v13548_v41  ;;  %v10472_v41 = vpop.f32.mrb[11].mxu0  ;;  %v13831_v58 = vadd.f32 %v10582_v30, %v10470_v24  ;;  %v10586_v2 = vpop.f32.mrb[12].mxu1 }
 0x11c   : > { %9781 = vmatprep.mubr.msk.bf16.mxu0 %vm18452_vm5, %v13625_v42  ;;  %v10473_v28 = vadd.f32 %v10472_v41, %v10471_v43  ;;  %v10587_v4 = vpop.f32.mrb[13].mxu1 }
 0x11d   : > { %9826 = vmatmul.mubr.msk.bf16.gmra.mrb[112].mxu1 %vm18451_vm9, %v13286_v50  ;;  %v1454_v50 = vsel %vm18450_vm7, %v1442_v39, %v13820_v18  ;;  %vm18453_vm9 = vnez %v18349_v45  ;;  %v10589_v45 = vpop.f32.mrb[14].mxu1 }
 0x11e   : > { %2596 = vmatprep.mubr.bf16.mxu1 %v1439_v9  ;;  %v13839_v3 = vadd.f32 %v10585_v32, %v10473_v28  ;;  %v10590_v52 = vpop.f32.mrb[15].mxu1 }
 0x123   : > { %2452 = vmatmul.mubr.bf16.gmra.mrb[116].mxu0 %v13597_v60  ;;  %v1444_v60 = vshll.u32 %v1132_v17, 16 }
 0x124   : > { %9784 = vmatprep.mubr.msk.bf16.mxu0 %vm13621_vm2, %v13661_v8 }
 0x125   : > { %9829 = vmatmul.mubr.msk.bf16.gmra.mrb[116].mxu1 %vm18453_vm9, %v13390_v23  ;;  %v10474_v23 = vpop.f32.mrb[12].mxu0  ;;  %v1446_v32 = vrot.slane %v1444_v60, 1 }
 0x126   : > { %2602 = vmatprep.mubr.bf16.mxu1 %v1454_v50  ;;  %v10475_v57 = vpop.f32.mrb[13].mxu0  ;;  %v10592_v50 = vpop.f32.mrb[16].mxu1 }
 0x127   : > { %v10477_v26 = vpop.f32.mrb[14].mxu0  ;;  %v10593_v40 = vpop.f32.mrb[17].mxu1  ;;  %v1447_v51 = vsel %vm18450_vm7, %v1442_v39, %v1446_v32 }
 0x128   : > { %v10478_v30 = vpop.f32.mrb[15].mxu0  ;;  %v10594_v24 = vadd.f32 %v10593_v40, %v10592_v50  ;;  %v10595_v43 = vpop.f32.mrb[18].mxu1 }
 0x129   : > { %v10480_v41 = vpop.f32.mrb[16].mxu0  ;;  %v10596_v28 = vpop.f32.mrb[19].mxu1 }
 0x12a   : > { %v10481_v2 = vpop.f32.mrb[17].mxu0  ;;  %v10597_v4 = vadd.f32 %v10596_v28, %v10595_v43 }
 0x12b   : > { %2458 = vmatmul.mubr.bf16.gmra.mrb[120].mxu0 %v1439_v9  ;;  %v10482_v45 = vadd.f32 %v10481_v2, %v10480_v41  ;;  %v10483_v23 = vpop.f32.mrb[18].mxu0 }
 0x12c   : > { %9787 = vmatprep.mubr.msk.bf16.mxu0 %vm13666_vm1, %v13678_v59 }
 0x12d   : > { %9832 = vmatmul.mubr.msk.bf16.gmra.mrb[120].mxu1 %vm13582_vm14, %v13637_v10  ;;  %v10484_v10 = vpop.f32.mrb[19].mxu0  ;;  %v13848_v17 = vadd.f32 %v10594_v24, %v10482_v45  ;;  %v10598_v52 = vpop.f32.mrb[20].mxu1  ;;  %vm18462_vm14 = vnez %v18387_v56 }
 0x12e   : > { %v10485_v9 = vadd.f32 %v10484_v10, %v10483_v23  ;;  %v10599_v26 = vpop.f32.mrb[21].mxu1 }
 0x12f   : > { %v10601_v60 = vpop.f32.mrb[22].mxu1  ;;  %v10486_v30 = vpop.f32.mrb[20].mxu0 }
 0x130   : > { %v13850_v57 = vadd.f32 %v10597_v4, %v10485_v9  ;;  %v10602_v50 = vpop.f32.mrb[23].mxu1  ;;  %v10487_v40 = vpop.f32.mrb[21].mxu0 }
 0x131   : > { %v10489_v43 = vpop.f32.mrb[22].mxu0 }
 0x132   : > { %v10490_v41 = vpop.f32.mrb[23].mxu0 }
 0x133   : > { %2466 = vmatmul.mubr.bf16.gmra.mrb[124].mxu0 %v1447_v51 }
 0x134   : > { %11530 = vmatprep.mubr.msk.bf16.mxu0 %vm12536_vm10, %v12725_v34  ;;  %vm18454_vm10 = vnez %v18434_v44 }
 0x137   : > { %v10604_v39 = vpop.f32.mrb[24].mxu1  ;;  %v10492_v34 = vpop.f32.mrb[24].mxu0 }
 0x138   : > { %v10605_v32 = vpop.f32.mrb[25].mxu1  ;;  %v10493_v2 = vpop.f32.mrb[25].mxu0 }
 0x139   : > { %v10606_v24 = vadd.f32 %v10605_v32, %v10604_v39  ;;  %v10607_v48 = vpop.f32.mrb[26].mxu1  ;;  %v10494_v45 = vadd.f32 %v10493_v2, %v10492_v34  ;;  %v10495_v23 = vpop.f32.mrb[26].mxu0 }
 0x13a   : > { %v10608_v28 = vpop.f32.mrb[27].mxu1  ;;  %v10496_v51 = vpop.f32.mrb[27].mxu0 }
 0x13b   : > { %11531 = vmatmul.mubr.msk.bf16.vlgmr.msra.gmra.mrb[128].mxu0 %vm12647_vm15, %v18401_v14  ;;  %v10609_v4 = vadd.f32 %v10608_v28, %v10607_v48  ;;  %v13861_v10 = vadd.f32 %v10606_v24, %v10494_v45  ;;  %v10497_v9 = vadd.f32 %v10496_v51, %v10495_v23  ;;  %vm18455_vm15 = vnez %v18439_v6 }
 0x13c   : > { %11534 = vmatprep.mubr.msk.bf16.mxu0 %vm12734_vm6, %v18407_v27  ;;  %vm18459_vm6 = vcmask 1045504  }
 0x13d   : > { %v13866_v14 = vadd.f32 %v10609_v4, %v10497_v9 }
 0x13f   : > { %v10610_v53 = vpop.f32.mrb[28].mxu1  ;;  %v10498_v52 = vpop.f32.mrb[28].mxu0 }
 0x140   : > { %v10611_v11 = vpop.f32.mrb[29].mxu1  ;;  %v10499_v60 = vpop.f32.mrb[29].mxu0 }
 0x141   : > { %v10613_v27 = vpop.f32.mrb[30].mxu1  ;;  %v10501_v30 = vpop.f32.mrb[30].mxu0 }
 0x142   : > { %v10614_v26 = vpop.f32.mrb[31].mxu1  ;;  %v10502_v50 = vpop.f32.mrb[31].mxu0 }
 0x143   : > { %11535 = vmatmul.mubr.msk.bf16.gmra.mrb[132].mxu0 %vm18409_vm11, %v18414_v15 }
 0x144   : > { %11538 = vmatprep.mubr.msk.bf16.mxu0 %vm18416_vm12, %v18421_v0 }
 0x149   : > { %v10504_v0 = vpop.f32.mrb[32].mxu0 }
 0x14a   : > { %v10505_v41 = vpop.f32.mrb[33].mxu0 }
 0x14b   : > { %11539 = vmatmul.mubr.msk.bf16.gmra.mrb[136].mxu0 %vm18423_vm8, %v18428_v38  ;;  %v10506_v32 = vadd.f32 %v10505_v41, %v10504_v0  ;;  %v10507_v24 = vpop.f32.mrb[34].mxu0 }
 0x14c   : > { %v10616_v61 = vpop.f32.mrb[32].mxu1  ;;  %11542 = vmatprep.mubr.msk.bf16.mxu0 %vm18430_vm4, %v18433_v16  ;;  %v10508_v48 = vpop.f32.mrb[35].mxu0 }
 0x14d   : > { %v10617_v15 = vpop.f32.mrb[33].mxu1  ;;  %v10509_v28 = vadd.f32 %v10508_v48, %v10507_v24 }
 0x14e   : > { %v10618_v40 = vadd.f32 %v10617_v15, %v10616_v61  ;;  %v10619_v22 = vpop.f32.mrb[34].mxu1 }
 0x14f   : > { %v10620_v43 = vpop.f32.mrb[35].mxu1 }
 0x150   : > { %v10621_v39 = vadd.f32 %v10620_v43, %v10619_v22  ;;  %v13877_v34 = vadd.f32 %v10618_v40, %v10506_v32  ;;  %v18457_v43 = vld [vmem:[#allocation11_spill] sm:$0xff] }
 0x151   : > { %v10510_v2 = vpop.f32.mrb[36].mxu0 }
 0x152   : > { %v13882_v38 = vadd.f32 %v10621_v39, %v10509_v28  ;;  %v10511_v45 = vpop.f32.mrb[37].mxu0 }
 0x153   : > { %11543 = vmatmul.mubr.msk.bf16.gmra.mrb[140].mxu0 %vm18454_vm10, %v18438_v20  ;;  %v10513_v23 = vpop.f32.mrb[38].mxu0  ;;  %vm18471_vm10 = vmmov %vm18459_vm6 }
 0x154   : > { %11546 = vmatprep.mubr.msk.bf16.mxu0 %vm18455_vm15, %v13449_v21  ;;  %v10514_v51 = vpop.f32.mrb[39].mxu0 }
 0x158   : > { %v10622_v46 = vpop.f32.mrb[36].mxu1 }
 0x159   : > { %v10623_v49 = vpop.f32.mrb[37].mxu1 }
 0x15a   : > { %v10625_v16 = vpop.f32.mrb[38].mxu1 }
 0x15b   : > { %v10626_v4 = vpop.f32.mrb[39].mxu1  ;;  %11547 = vmatmul.mubr.msk.bf16.gmra.mrb[144].mxu0 %vm18444_vm3, %v13494_v25  ;;  %vm18456_vm3 = vnez %v18347_v62  ;;  %v18458_v62 = vrot.slane %v13656_v36, 2 }
 0x15c   : > { %11550 = vmatprep.mubr.msk.bf16.mxu0 %vm18446_vm13, %v13535_v47  ;;  %vm17927_vm13 = vcmask 130048  }
 0x15e   : > { %v10516_v21 = vpop.f32.mrb[40].mxu0 }
 0x15f   : > { %v10517_v11 = vpop.f32.mrb[41].mxu0 }
 0x160   : > { %v10628_v44 = vpop.f32.mrb[40].mxu1  ;;  %v10518_v52 = vadd.f32 %v10517_v11, %v10516_v21  ;;  %v10519_v26 = vpop.f32.mrb[42].mxu0 }
 0x161   : > { %v10629_v20 = vpop.f32.mrb[41].mxu1  ;;  %v10520_v60 = vpop.f32.mrb[43].mxu0 }
 0x162   : > { %v10630_v9 = vadd.f32 %v10629_v20, %v10628_v44  ;;  %v10631_v6 = vpop.f32.mrb[42].mxu1  ;;  %v10521_v50 = vadd.f32 %v10520_v60, %v10519_v26 }
 0x163   : > { %v10632_v53 = vpop.f32.mrb[43].mxu1  ;;  %11551 = vmatmul.mubr.msk.bf16.gmra.mrb[148].mxu0 %vm13454_vm0, %v13577_v19  ;;  %vm18461_vm0 = vmmov %vm18450_vm7 }
 0x164   : > { %v10633_v27 = vadd.f32 %v10632_v53, %v10631_v6  ;;  %v13893_v30 = vadd.f32 %v10630_v9, %v10518_v52  ;;  %11554 = vmatprep.mubr.msk.bf16.mxu0 %vm18456_vm3, %v13625_v42  ;;  %v1236_v42 = vsel %vm18459_vm6, %v18458_v62, %v18457_v43  ;;  %v1455_v62 = vshrl.u32 %v13803_v63, 16  ;;  %vm18470_vm7 = vmmov %vm18459_vm6 }
 0x165   : > { %v9882_v54 = vpack.c.bf16 %v18457_v43, %v1236_v42 }
 0x166   : > { %v13898_v1 = vadd.f32 %v10633_v27, %v10521_v50  ;;  %v10522_v61 = vpop.f32.mrb[44].mxu0 }
 0x167   : > { %v10523_v40 = vpop.f32.mrb[45].mxu0 }
 0x168   : > { %v10634_v25 = vpop.f32.mrb[44].mxu1  ;;  %v10525_v22 = vpop.f32.mrb[46].mxu0 }
 0x169   : > { %v10635_v35 = vpop.f32.mrb[45].mxu1  ;;  %v10526_v0 = vpop.f32.mrb[47].mxu0 }
 0x16a   : > { %v10637_v47 = vpop.f32.mrb[46].mxu1 }
 0x16b   : > { %v10638_v15 = vpop.f32.mrb[47].mxu1  ;;  %11555 = vmatmul.mubr.msk.bf16.gmra.mrb[152].mxu0 %vm18452_vm5, %v13661_v8 }
 0x16c   : > { %11558 = vmatprep.mubr.msk.bf16.mxu0 %vm13621_vm2, %v13678_v59  ;;  %vm17928_vm2 = vmmov 0  }
 0x16e   : > { %v10528_v32 = vpop.f32.mrb[48].mxu0 }
 0x16f   : > { %v10529_v48 = vpop.f32.mrb[49].mxu0 }
 0x170   : > { %v10640_v33 = vpop.f32.mrb[48].mxu1  ;;  %v10530_v8 = vadd.f32 %v10529_v48, %v10528_v32  ;;  %v10531_v46 = vpop.f32.mrb[50].mxu0 }
 0x171   : > { %v10641_v19 = vpop.f32.mrb[49].mxu1  ;;  %v10532_v49 = vpop.f32.mrb[51].mxu0 }
 0x172   : > { %v10642_v41 = vadd.f32 %v10641_v19, %v10640_v33  ;;  %v10643_v39 = vpop.f32.mrb[50].mxu1  ;;  %v10533_v29 = vadd.f32 %v10532_v49, %v10531_v46 }
 0x173   : > { %v10644_v24 = vpop.f32.mrb[51].mxu1  ;;  %11559 = vmatmul.mubr.msk.bf16.gmra.mrb[156].mxu0 %vm13666_vm1, %v9882_v54  ;;  %vm18464_vm1 = vcmask 1040384  }
 0x174   : > { %v10645_v28 = vadd.f32 %v10644_v24, %v10643_v39  ;;  %v13914_v16 = vadd.f32 %v10642_v41, %v10530_v8  ;;  %v1457_v41 = vor.u32 %v1455_v62, %v13820_v18  ;;  %v18460_v24 = vld [vmem:[#allocation7_spill] sm:$0xff]  ;;  %vm18469_vm8 = vmmov %vm18464_vm1 }
 0x175   : > { %vm18474_vm3 = vmmov %vm18464_vm1 }
 0x176   : > { %v13918_v59 = vadd.f32 %v10645_v28, %v10533_v29  ;;  %v10534_v45 = vpop.f32.mrb[52].mxu0  ;;  %v1458_v48 = vsel %vm18461_vm0, %v1457_v41, %v18460_v24 }
 0x177   : > { %v10535_v51 = vpop.f32.mrb[53].mxu0  ;;  %2610 = vmatprep.mubr.bf16.mxu1 %v1458_v48 }
 0x178   : > { %v10646_v36 = vpop.f32.mrb[52].mxu1  ;;  %v10537_v44 = vpop.f32.mrb[54].mxu0  ;;  %9835 = vmatmul.mubr.msk.bf16.gmra.mrb[124].mxu1 %vm18462_vm14, %v13803_v63 }
 0x179   : > { %v10647_v2 = vpop.f32.mrb[53].mxu1  ;;  %v10538_v20 = vpop.f32.mrb[55].mxu0  ;;  %11564 = vmatprep.mubr.msk.bf16.mxu1 %vm17928_vm2, %v18448_v55 }
 0x17a   : > { %v10649_v4 = vpop.f32.mrb[54].mxu1 }
 0x17b   : > { %v10650_v23 = vpop.f32.mrb[55].mxu1 }
 0x17e   : > { %v10540_v11 = vpop.f32.mrb[56].mxu0 }
 0x17f   : > { %v10541_v52 = vpop.f32.mrb[57].mxu0 }
 0x180   : > { %v10652_v9 = vpop.f32.mrb[56].mxu1  ;;  %v10542_v12 = vadd.f32 %v10541_v52, %v10540_v11  ;;  %v10543_v60 = vpop.f32.mrb[58].mxu0 }
 0x181   : > { %v10653_v6 = vpop.f32.mrb[57].mxu1  ;;  %v10544_v50 = vpop.f32.mrb[59].mxu0 }
 0x182   : > { %v10654_v21 = vadd.f32 %v10653_v6, %v10652_v9  ;;  %v10655_v53 = vpop.f32.mrb[58].mxu1  ;;  %v10545_v35 = vadd.f32 %v10544_v50, %v10543_v60 }
 0x183   : > { %v10656_v27 = vpop.f32.mrb[59].mxu1 }
 0x184   : > { %v10657_v26 = vadd.f32 %v10656_v27, %v10655_v53  ;;  %v13920_v25 = vadd.f32 %v10654_v21, %v10542_v12 }
 0x186   : > { %v13922_v61 = vadd.f32 %v10657_v26, %v10545_v35  ;;  %v10546_v22 = vpop.f32.mrb[60].mxu0 }
 0x187   : > { %v10547_v33 = vpop.f32.mrb[61].mxu0 }
 0x188   : > { %v10658_v47 = vpop.f32.mrb[60].mxu1  ;;  %v10549_v19 = vpop.f32.mrb[62].mxu0 }
 0x189   : > { %v10659_v15 = vpop.f32.mrb[61].mxu1  ;;  %v10550_v42 = vpop.f32.mrb[63].mxu0 }
 0x18a   : > { %v10661_v40 = vpop.f32.mrb[62].mxu1 }
 0x18b   : > { %v10662_v0 = vpop.f32.mrb[63].mxu1 }
 0x18e   : > { %v10680_v8 = vpop.f32.mrb[64].mxu0 }
 0x18f   : > { %v10681_v49 = vpop.f32.mrb[65].mxu0 }
 0x190   : > { %v10792_v39 = vpop.f32.mrb[64].mxu1  ;;  %v10682_v36 = vadd.f32 %v10681_v49, %v10680_v8  ;;  %v10683_v2 = vpop.f32.mrb[66].mxu0 }
 0x191   : > { %v10793_v32 = vpop.f32.mrb[65].mxu1  ;;  %v10684_v4 = vpop.f32.mrb[67].mxu0 }
 0x192   : > { %v10794_v28 = vadd.f32 %v10793_v32, %v10792_v39  ;;  %v10795_v54 = vpop.f32.mrb[66].mxu1  ;;  %v2362_v18 = vadd.f32 %v10682_v36, %v13805_v37  ;;  %v10685_v45 = vadd.f32 %v10684_v4, %v10683_v2 }
 0x193   : > { %v10796_v46 = vpop.f32.mrb[67].mxu1 }
 0x194   : > { %v10797_v29 = vadd.f32 %v10796_v46, %v10795_v54  ;;  %v2365_v51 = vadd.f32 %v10685_v45, %v13812_v13  ;;  %v13933_v20 = vadd.f32 %v10794_v28, %v2362_v18 }
 0x196   : > { %v10686_v6 = vpop.f32.mrb[68].mxu0  ;;  %v13935_v53 = vadd.f32 %v10797_v29, %v2365_v51 }
 0x197   : > { %v10687_v56 = vpop.f32.mrb[69].mxu0 }
 0x198   : > { %v10798_v23 = vpop.f32.mrb[68].mxu1  ;;  %v10689_v63 = vpop.f32.mrb[70].mxu0 }
 0x199   : > { %v10799_v44 = vpop.f32.mrb[69].mxu1  ;;  %v10690_v11 = vpop.f32.mrb[71].mxu0 }
 0x19a   : > { %v10801_v9 = vpop.f32.mrb[70].mxu1 }
 0x19b   : > { %v10802_v21 = vpop.f32.mrb[71].mxu1 }
 0x19e   : > { %v10692_v13 = vpop.f32.mrb[72].mxu0 }
 0x19f   : > { %v10693_v60 = vpop.f32.mrb[73].mxu0 }
 0x1a0   : > { %v10804_v37 = vpop.f32.mrb[72].mxu1  ;;  %v10694_v35 = vadd.f32 %v10693_v60, %v10692_v13  ;;  %v10695_v47 = vpop.f32.mrb[74].mxu0 }
 0x1a1   : > { %v10805_v27 = vpop.f32.mrb[73].mxu1  ;;  %v10696_v15 = vpop.f32.mrb[75].mxu0 }
 0x1a2   : > { %v10806_v52 = vadd.f32 %v10805_v27, %v10804_v37  ;;  %v10807_v26 = vpop.f32.mrb[74].mxu1  ;;  %v2376_v40 = vadd.f32 %v10694_v35, %v13831_v58  ;;  %v10697_v22 = vadd.f32 %v10696_v15, %v10695_v47 }
 0x1a3   : > { %v10808_v12 = vpop.f32.mrb[75].mxu1 }
 0x1a4   : > { %v10809_v50 = vadd.f32 %v10808_v12, %v10807_v26  ;;  %v2379_v33 = vadd.f32 %v10697_v22, %v13839_v3  ;;  %v13941_v62 = vadd.f32 %v10806_v52, %v2376_v40 }
 0x1a6   : > { %v10698_v41 = vpop.f32.mrb[76].mxu0  ;;  %v13943_v32 = vadd.f32 %v10809_v50, %v2379_v33 }
 0x1a7   : > { %v10699_v48 = vpop.f32.mrb[77].mxu0 }
 0x1a8   : > { %v10810_v0 = vpop.f32.mrb[76].mxu1  ;;  %v10701_v28 = vpop.f32.mrb[78].mxu0 }
 0x1a9   : > { %v10811_v19 = vpop.f32.mrb[77].mxu1  ;;  %v10702_v54 = vpop.f32.mrb[79].mxu0 }
 0x1aa   : > { %v10813_v42 = vpop.f32.mrb[78].mxu1 }
 0x1ab   : > { %v10814_v39 = vpop.f32.mrb[79].mxu1 }
 0x1ae   : > { %v10704_v58 = vpop.f32.mrb[80].mxu0 }
 0x1af   : > { %v10705_v2 = vpop.f32.mrb[81].mxu0 }
 0x1b0   : > { %v10816_v8 = vpop.f32.mrb[80].mxu1  ;;  %v10706_v3 = vadd.f32 %v10705_v2, %v10704_v58  ;;  %v10707_v18 = vpop.f32.mrb[82].mxu0 }
 0x1b1   : > { %v10817_v46 = vpop.f32.mrb[81].mxu1  ;;  %v10708_v45 = vpop.f32.mrb[83].mxu0 }
 0x1b2   : > { %v10818_v49 = vadd.f32 %v10817_v46, %v10816_v8  ;;  %v10819_v29 = vpop.f32.mrb[82].mxu1  ;;  %v2390_v23 = vadd.f32 %v10706_v3, %v13848_v17  ;;  %v10709_v51 = vadd.f32 %v10708_v45, %v10707_v18 }
 0x1b3   : > { %v10820_v36 = vpop.f32.mrb[83].mxu1 }
 0x1b4   : > { %v10821_v4 = vadd.f32 %v10820_v36, %v10819_v29  ;;  %v2393_v9 = vadd.f32 %v10709_v51, %v13850_v57  ;;  %v13947_v21 = vadd.f32 %v10818_v49, %v2390_v23 }
 0x1b6   : > { %v10710_v63 = vpop.f32.mrb[84].mxu0  ;;  %v13949_v37 = vadd.f32 %v10821_v4, %v2393_v9  ;;  %v11897_v9 = vld [vmem:[%s17682_s2] sm:$0xff]  }
 0x1b7   : > { %v10711_v27 = vpop.f32.mrb[85].mxu0 }
 0x1b8   : > { %v10822_v44 = vpop.f32.mrb[84].mxu1  ;;  %v10713_v52 = vpop.f32.mrb[86].mxu0 }
 0x1b9   : > { %v10823_v6 = vpop.f32.mrb[85].mxu1  ;;  %v10714_v26 = vpop.f32.mrb[87].mxu0  ;;  %v11896_v44 = vld [vmem:[%s17682_s2 + $0x40] sm:$0xff]  }
 0x1ba   : > { %v10825_v56 = vpop.f32.mrb[86].mxu1  ;;  %10928 = vmatprep.subr.bf16.mxu0 %v11896_v44 }
 0x1bb   : > { %v10826_v11 = vpop.f32.mrb[87].mxu1  ;;  %10929 = vmatpush3.bf16.msra.mxu0 %v11897_v9 }
 0x1be   : > { %v10716_v17 = vpop.f32.mrb[88].mxu0 }
 0x1bf   : > { %v10717_v47 = vpop.f32.mrb[89].mxu0 }
 0x1c0   : > { %v10828_v13 = vpop.f32.mrb[88].mxu1  ;;  %v10718_v57 = vadd.f32 %v10717_v47, %v10716_v17  ;;  %v10719_v40 = vpop.f32.mrb[90].mxu0 }
 0x1c1   : > { %v10829_v12 = vpop.f32.mrb[89].mxu1  ;;  %v10720_v22 = vpop.f32.mrb[91].mxu0 }
 0x1c2   : > { %v10830_v60 = vadd.f32 %v10829_v12, %v10828_v13  ;;  %v10831_v50 = vpop.f32.mrb[90].mxu1  ;;  %v2404_v0 = vadd.f32 %v10718_v57, %v13861_v10  ;;  %v10721_v33 = vadd.f32 %v10720_v22, %v10719_v40 }
 0x1c3   : > { %v10832_v35 = vpop.f32.mrb[91].mxu1 }
 0x1c4   : > { %v10833_v15 = vadd.f32 %v10832_v35, %v10831_v50  ;;  %v2407_v42 = vadd.f32 %v10721_v33, %v13866_v14  ;;  %v13953_v39 = vadd.f32 %v10830_v60, %v2404_v0 }
 0x1c6   : > { %v10722_v28 = vpop.f32.mrb[92].mxu0  ;;  %v13955_v8 = vadd.f32 %v10833_v15, %v2407_v42 }
 0x1c7   : > { %v10723_v46 = vpop.f32.mrb[93].mxu0 }
 0x1c8   : > { %v10834_v19 = vpop.f32.mrb[92].mxu1  ;;  %v10725_v49 = vpop.f32.mrb[94].mxu0 }
 0x1c9   : > { %v10835_v41 = vpop.f32.mrb[93].mxu1  ;;  %v10726_v29 = vpop.f32.mrb[95].mxu0 }
 0x1ca   : > { %v10837_v48 = vpop.f32.mrb[94].mxu1  ;;  %v11898_v41 = vld [vmem:[%s17682_s2 + $0x48] sm:$0xff]  }
 0x1cb   : > { %v10838_v54 = vpop.f32.mrb[95].mxu1  ;;  %10930 = vmatprep.subr.bf16.mxu0 %v11898_v41 }
 0x1cc   : > { %v11899_v54 = vld [vmem:[%s17682_s2 + $0x8] sm:$0xff]  }
 0x1cd   : > { %10931 = vmatpush3.bf16.msra.mxu0 %v11899_v54 }
 0x1ce   : > { %v10728_v10 = vpop.f32.mrb[96].mxu0 }
 0x1cf   : > { %v10729_v18 = vpop.f32.mrb[97].mxu0 }
 0x1d0   : > { %v10840_v58 = vpop.f32.mrb[96].mxu1  ;;  %v10730_v14 = vadd.f32 %v10729_v18, %v10728_v10  ;;  %v10731_v23 = vpop.f32.mrb[98].mxu0 }
 0x1d1   : > { %v10841_v36 = vpop.f32.mrb[97].mxu1  ;;  %v10732_v51 = vpop.f32.mrb[99].mxu0 }
 0x1d2   : > { %v10842_v2 = vadd.f32 %v10841_v36, %v10840_v58  ;;  %v10843_v4 = vpop.f32.mrb[98].mxu1  ;;  %v2418_v6 = vadd.f32 %v10730_v14, %v13877_v34  ;;  %v10733_v56 = vadd.f32 %v10732_v51, %v10731_v23 }
 0x1d3   : > { %v10844_v3 = vpop.f32.mrb[99].mxu1 }
 0x1d4   : > { %v10845_v45 = vadd.f32 %v10844_v3, %v10843_v4  ;;  %v2421_v11 = vadd.f32 %v10733_v56, %v13882_v38  ;;  %v13965_v52 = vadd.f32 %v10842_v2, %v2418_v6 }
 0x1d6   : > { %v10734_v13 = vpop.f32.mrb[100].mxu0  ;;  %v13967_v60 = vadd.f32 %v10845_v45, %v2421_v11 }
 0x1d7   : > { %v10735_v50 = vpop.f32.mrb[101].mxu0 }
 0x1d8   : > { %v10846_v63 = vpop.f32.mrb[100].mxu1  ;;  %v10737_v17 = vpop.f32.mrb[102].mxu0 }
 0x1d9   : > { %v10847_v27 = vpop.f32.mrb[101].mxu1  ;;  %v10738_v35 = vpop.f32.mrb[103].mxu0 }
 0x1da   : > { %v10849_v26 = vpop.f32.mrb[102].mxu1 }
 0x1db   : > { %v10850_v12 = vpop.f32.mrb[103].mxu1 }
 0x1de   : > { %v10740_v40 = vpop.f32.mrb[104].mxu0 }
 0x1df   : > { %v10741_v0 = vpop.f32.mrb[105].mxu0 }
 0x1e0   : > { %v10852_v47 = vpop.f32.mrb[104].mxu1  ;;  %v10742_v33 = vadd.f32 %v10741_v0, %v10740_v40  ;;  %v10743_v19 = vpop.f32.mrb[106].mxu0 }
 0x1e1   : > { %v10853_v15 = vpop.f32.mrb[105].mxu1  ;;  %v10744_v42 = vpop.f32.mrb[107].mxu0 }
 0x1e2   : > { %v10854_v34 = vadd.f32 %v10853_v15, %v10852_v47  ;;  %v10855_v57 = vpop.f32.mrb[106].mxu1  ;;  %v2432_v48 = vadd.f32 %v10742_v33, %v13893_v30  ;;  %v10745_v28 = vadd.f32 %v10744_v42, %v10743_v19 }
 0x1e3   : > { %v10856_v22 = vpop.f32.mrb[107].mxu1 }
 0x1e4   : > { %v10857_v38 = vadd.f32 %v10856_v22, %v10855_v57  ;;  %v2435_v49 = vadd.f32 %v10745_v28, %v13898_v1  ;;  %v13977_v58 = vadd.f32 %v10854_v34, %v2432_v48 }
 0x1e6   : > { %v10746_v2 = vpop.f32.mrb[108].mxu0  ;;  %v13979_v10 = vadd.f32 %v10857_v38, %v2435_v49 }
 0x1e7   : > { %v10747_v3 = vpop.f32.mrb[109].mxu0 }
 0x1e8   : > { %v10858_v46 = vpop.f32.mrb[108].mxu1  ;;  %v10749_v30 = vpop.f32.mrb[110].mxu0 }
 0x1e9   : > { %v10859_v29 = vpop.f32.mrb[109].mxu1  ;;  %v10750_v18 = vpop.f32.mrb[111].mxu0 }
 0x1ea   : > { %v10861_v36 = vpop.f32.mrb[110].mxu1 }
 0x1eb   : > { %v10862_v4 = vpop.f32.mrb[111].mxu1 }
 0x1ee   : > { %v10752_v44 = vpop.f32.mrb[112].mxu0 }
 0x1ef   : > { %v10753_v6 = vpop.f32.mrb[113].mxu0 }
 0x1f0   : > { %v10864_v45 = vpop.f32.mrb[112].mxu1  ;;  %v10754_v56 = vadd.f32 %v10753_v6, %v10752_v44  ;;  %v10755_v63 = vpop.f32.mrb[114].mxu0 }
 0x1f1   : > { %v10865_v14 = vpop.f32.mrb[113].mxu1  ;;  %v10756_v11 = vpop.f32.mrb[115].mxu0 }
 0x1f2   : > { %v10866_v23 = vadd.f32 %v10865_v14, %v10864_v45  ;;  %v10867_v51 = vpop.f32.mrb[114].mxu1  ;;  %v2446_v27 = vadd.f32 %v10754_v56, %v13914_v16  ;;  %v10757_v26 = vadd.f32 %v10756_v11, %v10755_v63 }
 0x1f3   : > { %v10868_v9 = vpop.f32.mrb[115].mxu1 }
 0x1f4   : > { %v10869_v1 = vadd.f32 %v10868_v9, %v10867_v51  ;;  %v2449_v12 = vadd.f32 %v10757_v26, %v13918_v59  ;;  %v13983_v17 = vadd.f32 %v10866_v23, %v2446_v27 }
 0x1f6   : > { %v10758_v47 = vpop.f32.mrb[116].mxu0  ;;  %v13985_v34 = vadd.f32 %v10869_v1, %v2449_v12 }
 0x1f7   : > { %v10759_v57 = vpop.f32.mrb[117].mxu0 }
 0x1f8   : > { %v10870_v13 = vpop.f32.mrb[116].mxu1  ;;  %v10761_v40 = vpop.f32.mrb[118].mxu0 }
 0x1f9   : > { %v10871_v50 = vpop.f32.mrb[117].mxu1  ;;  %v10762_v22 = vpop.f32.mrb[119].mxu0 }
 0x1fa   : > { %v10873_v35 = vpop.f32.mrb[118].mxu1 }
 0x1fb   : > { %v10874_v15 = vpop.f32.mrb[119].mxu1 }
 0x1fe   : > { %v10764_v16 = vpop.f32.mrb[120].mxu0 }
 0x1ff   : > { %v10765_v41 = vpop.f32.mrb[121].mxu0 }
 0x200   : > { %v10876_v0 = vpop.f32.mrb[120].mxu1  ;;  %v10766_v59 = vadd.f32 %v10765_v41, %v10764_v16  ;;  %v10767_v28 = vpop.f32.mrb[122].mxu0 }
 0x201   : > { %v10877_v38 = vpop.f32.mrb[121].mxu1  ;;  %v10768_v54 = vpop.f32.mrb[123].mxu0 }
 0x202   : > { %v10878_v33 = vadd.f32 %v10877_v38, %v10876_v0  ;;  %v10879_v19 = vpop.f32.mrb[122].mxu1  ;;  %v2460_v46 = vadd.f32 %v10766_v59, %v13920_v25  ;;  %v10769_v49 = vadd.f32 %v10768_v54, %v10767_v28 }
 0x203   : > { %v10880_v42 = vpop.f32.mrb[123].mxu1 }
 0x204   : > { %v10881_v48 = vadd.f32 %v10880_v42, %v10879_v19  ;;  %v2463_v29 = vadd.f32 %v10769_v49, %v13922_v61  ;;  %v13989_v36 = vadd.f32 %v10878_v33, %v2460_v46  ;;  %v13998_v61 = vld [vmem:[%s17687_s7] sm:$0xf] }
 0x206   : > { %v10770_v2 = vpop.f32.mrb[124].mxu0  ;;  %v13991_v4 = vadd.f32 %v10881_v48, %v2463_v29 }
 0x207   : > { %v10771_v3 = vpop.f32.mrb[125].mxu0 }
 0x208   : > { %v10773_v30 = vpop.f32.mrb[126].mxu0 }
 0x209   : > { %v10774_v18 = vpop.f32.mrb[127].mxu0 }
 0x20e   : > { %v11532_v45 = vpop.f32.mrb[128].mxu0 }
 0x20f   : > { %v2651_v14 = vpop.f32.mrb[129].mxu0 }
 0x210   : > { %v2652_v23 = vadd.f32 %v2651_v14, %v13933_v20  ;;  %v11533_v51 = vpop.f32.mrb[130].mxu0  ;;  %v11907_v14 = vld [vmem:[%s17682_s2 + $0xc0] sm:$0xff]  }
 0x211   : > { %v2654_v44 = vpop.f32.mrb[131].mxu0 }
 0x212   : > { %v2655_v9 = vadd.f32 %v2654_v44, %v13935_v53  ;;  %v11911_v44 = vld [vmem:[%s17682_s2 + $0xc8] sm:$0xff]  }
 0x214   : > { %v2763_v25 = vpack.c.bf16 %v2655_v9, %v2652_v23 }
 0x216   : > { %v11536_v6 = vpop.f32.mrb[132].mxu0  ;;  %11563 = vmatpush3.bf16.msra.mxu1 %v2763_v25  ;;  %v11913_v25 = vld [vmem:[%s17682_s2 + $0x88] sm:$0xff]  }
 0x217   : > { %v2665_v1 = vpop.f32.mrb[133].mxu0  ;;  %11568 = vmatprep.subr.bf16.mxu1 %v18448_v55  ;;  %v11915_v6 = vld [vmem:[%s17682_s2 + $0xd0] sm:$0xff]  }
 0x218   : > { %v2666_v56 = vadd.f32 %v2665_v1, %v13941_v62  ;;  %v11537_v63 = vpop.f32.mrb[134].mxu0  ;;  %v11918_v1 = vld [vmem:[%s17682_s2 + $0xd8] sm:$0xff]  }
 0x219   : > { %v2668_v20 = vpop.f32.mrb[135].mxu0  ;;  %11565 = vmatmul.mubr.msk.bf16.vlgmr.msra.gmra.mrb[128].mxu1 %vm17927_vm13, %v13998_v61  ;;  %v11922_v63 = vld [vmem:[%s17682_s2 + $0xe0] sm:$0xff]  }
 0x21a   : > { %v2669_v53 = vadd.f32 %v2668_v20, %v13943_v32  ;;  %11570 = vmatprep.mubr.msk.bf16.mxu1 %vm17928_vm2, %v18448_v55  ;;  %v11924_v20 = vld [vmem:[%s17682_s2 + $0xa0] sm:$0xff]  }
 0x21c   : > { %v2808_v11 = vpack.c.bf16 %v2669_v53, %v2666_v56  ;;  %v11920_v56 = vld [vmem:[%s17682_s2 + $0x98] sm:$0xff]   ;;  %v11900_v53 = vld [vmem:[%s17682_s2 + $0x50] sm:$0xff]  }
 0x21d   : > { %10932 = vmatprep.subr.bf16.mxu0 %v11900_v53 }
 0x21e   : > { %v11540_v27 = vpop.f32.mrb[136].mxu0  ;;  %11569 = vmatpush3.bf16.msra.mxu1 %v2808_v11  ;;  %v11901_v11 = vld [vmem:[%s17682_s2 + $0x10] sm:$0xff]  }
 0x21f   : > { %v2679_v26 = vpop.f32.mrb[137].mxu0  ;;  %11574 = vmatprep.subr.bf16.mxu1 %v18448_v55  ;;  %v11926_v27 = vld [vmem:[%s17682_s2 + $0xe8] sm:$0xff]   ;;  %10933 = vmatpush3.bf16.msra.mxu0 %v11901_v11 }
 0x220   : > { %v2680_v13 = vadd.f32 %v2679_v26, %v13947_v21  ;;  %v11541_v12 = vpop.f32.mrb[138].mxu0  ;;  %v11928_v26 = vld [vmem:[%s17682_s2 + $0xa8] sm:$0xff]  }
 0x221   : > { %v2682_v62 = vpop.f32.mrb[139].mxu0  ;;  %11571 = vmatmul.mubr.msk.bf16.vlgmr.msra.gmra.mrb[132].mxu1 %vm17927_vm13, %v13998_v61  ;;  %v11903_v12 = vld [vmem:[%s17682_s2 + $0x18] sm:$0xff]  }
 0x222   : > { %v2683_v50 = vadd.f32 %v2682_v62, %v13949_v37  ;;  %11576 = vmatprep.mubr.msk.bf16.mxu1 %vm17928_vm2, %v18448_v55  ;;  %v11930_v62 = vld [vmem:[%s17682_s2 + $0xf0] sm:$0xff]  }
 0x224   : > { %v2849_v32 = vpack.c.bf16 %v2683_v50, %v2680_v13  ;;  %v11902_v13 = vld [vmem:[%s17682_s2 + $0x58] sm:$0xff]   ;;  %v11932_v50 = vld [vmem:[%s17682_s2 + $0xb0] sm:$0xff]  }
 0x225   : > { %10934 = vmatprep.subr.bf16.mxu0 %v11902_v13  ;;  %v18475_v13 = vld [vmem:[#allocation5_spill] sm:$0xff] }
 0x226   : > { %v11544_v35 = vpop.f32.mrb[140].mxu0  ;;  %11575 = vmatpush3.bf16.msra.mxu1 %v2849_v32  ;;  %10935 = vmatpush3.bf16.msra.mxu0 %v11903_v12  ;;  %v11904_v32 = vld [vmem:[%s17682_s2 + $0x60] sm:$0xff]   ;;  %v3152_v12 = vand.u32 7, %v18475_v13 }
 0x227   : > { %v2693_v47 = vpop.f32.mrb[141].mxu0  ;;  %11580 = vmatprep.subr.bf16.mxu1 %v18448_v55  ;;  %v11905_v35 = vld [vmem:[%s17682_s2 + $0x20] sm:$0xff]   ;;  %10936 = vmatprep.subr.bf16.mxu0 %v11904_v32 }
 0x228   : > { %v2694_v15 = vadd.f32 %v2693_v47, %v13953_v39  ;;  %v11545_v57 = vpop.f32.mrb[142].mxu0  ;;  %v11934_v47 = vld [vmem:[%s17682_s2 + $0xf8] sm:$0xff]   ;;  %vm14215_vm0 = vcmp.ge.s32.totalorder %v3152_v12, 1 }
 0x229   : > { %v2696_v21 = vpop.f32.mrb[143].mxu0  ;;  %11577 = vmatmul.mubr.msk.bf16.vlgmr.msra.gmra.mrb[136].mxu1 %vm17927_vm13, %v13998_v61  ;;  %v11906_v57 = vld [vmem:[%s17682_s2 + $0x68] sm:$0xff]  }
 0x22a   : > { %v2697_v40 = vadd.f32 %v2696_v21, %v13955_v8  ;;  %11582 = vmatprep.mubr.msk.bf16.mxu1 %vm17928_vm2, %v18448_v55  ;;  %10937 = vmatpush3.bf16.msra.mxu0 %v11905_v35  ;;  %v11908_v21 = vld [vmem:[%s17682_s2 + $0x28] sm:$0xff]  }
 0x22b   : > { %10938 = vmatprep.subr.bf16.mxu0 %v11906_v57 }
 0x22c   : > { %v2890_v37 = vpack.c.bf16 %v2697_v40, %v2694_v15  ;;  %v11936_v15 = vld [vmem:[%s17682_s2 + $0xb8] sm:$0xff]   ;;  %v11910_v40 = vld [vmem:[%s17682_s2 + $0x70] sm:$0xff]  }
 0x22e   : > { %v11548_v22 = vpop.f32.mrb[144].mxu0  ;;  %11581 = vmatpush3.bf16.msra.mxu1 %v2890_v37  ;;  %10939 = vmatpush3.bf16.msra.mxu0 %v11908_v21  ;;  %v11912_v37 = vld [vmem:[%s17682_s2 + $0x30] sm:$0xff]  }
 0x22f   : > { %v2707_v0 = vpop.f32.mrb[145].mxu0  ;;  %11586 = vmatprep.subr.bf16.mxu1 %v18448_v55  ;;  %10940 = vmatprep.subr.bf16.mxu0 %v11910_v40  ;;  %v11914_v22 = vld [vmem:[%s17682_s2 + $0x78] sm:$0xff]  }
 0x230   : > { %v2708_v38 = vadd.f32 %v2707_v0, %v13965_v52  ;;  %v11549_v33 = vpop.f32.mrb[146].mxu0  ;;  %v11916_v0 = vld [vmem:[%s17682_s2 + $0x38] sm:$0xff]  }
 0x231   : > { %v2710_v39 = vpop.f32.mrb[147].mxu0  ;;  %11583 = vmatmul.mubr.msk.bf16.vlgmr.msra.gmra.mrb[140].mxu1 %vm17927_vm13, %v13998_v61  ;;  %v11919_v33 = vld [vmem:[%s17682_s2 + $0x140] sm:$0xff]  }
 0x232   : > { %v2711_v19 = vadd.f32 %v2710_v39, %v13967_v60  ;;  %11588 = vmatprep.mubr.msk.bf16.mxu1 %vm17928_vm2, %v18448_v55  ;;  %10941 = vmatpush3.bf16.msra.mxu0 %v11912_v37  ;;  %v14144_v39 = vld [vmem:[%s17691_s11] ss:$0 sm:$0xff] }
 0x233   : > { %10942 = vmatprep.subr.bf16.mxu0 %v11914_v22 }
 0x234   : > { %v2931_v8 = vpack.c.bf16 %v2711_v19, %v2708_v38  ;;  %v11939_v38 = vld [vmem:[%s17682_s2 + $0x1c0] sm:$0xff]  }
 0x236   : > { %v11552_v16 = vpop.f32.mrb[148].mxu0  ;;  %11587 = vmatpush3.bf16.msra.mxu1 %v2931_v8  ;;  %10943 = vmatpush3.bf16.msra.mxu0 %v11916_v0 }
 0x237   : > { %v2721_v42 = vpop.f32.mrb[149].mxu0  ;;  %11592 = vmatprep.subr.bf16.mxu1 %v18448_v55  ;;  %11008 = vmatprep.subr.bf16.mxu0 %v11919_v33  ;;  %v11949_v33 = vld [vmem:[%s17682_s2 + $0x190] sm:$0xff]  }
 0x238   : > { %v2722_v41 = vadd.f32 %v2721_v42, %v13977_v58  ;;  %v11553_v48 = vpop.f32.mrb[150].mxu0 }
 0x239   : > { %v2724_v52 = vpop.f32.mrb[151].mxu0  ;;  %11589 = vmatmul.mubr.msk.bf16.vlgmr.msra.gmra.mrb[144].mxu1 %vm17927_vm13, %v13998_v61 }
 0x23a   : > { %v2725_v59 = vadd.f32 %v2724_v52, %v13979_v10  ;;  %11594 = vmatprep.mubr.msk.bf16.mxu1 %vm17928_vm2, %v18448_v55 }
 0x23c   : > { %v2972_v60 = vpack.c.bf16 %v2725_v59, %v2722_v41 }
 0x23e   : > { %v11556_v28 = vpop.f32.mrb[152].mxu0  ;;  %11593 = vmatpush3.bf16.msra.mxu1 %v2972_v60  ;;  %v18463_v60 = vld [vmem:[#allocation4_spill] sm:$0xff] }
 0x23f   : > { %v2735_v54 = vpop.f32.mrb[153].mxu0  ;;  %11598 = vmatprep.subr.bf16.mxu1 %v18448_v55  ;;  %v3151_v28 = vand.u32 7, %v18463_v60 }
 0x240   : > { %v2736_v46 = vadd.f32 %v2735_v54, %v13983_v17  ;;  %v11557_v49 = vpop.f32.mrb[154].mxu0  ;;  %v3150_v54 = vand.u32 7, %v12416_v31 }
 0x241   : > { %v2738_v58 = vpop.f32.mrb[155].mxu0  ;;  %11595 = vmatmul.mubr.msk.bf16.vlgmr.msra.gmra.mrb[148].mxu1 %vm17927_vm13, %v13998_v61  ;;  %vm14151_vm11 = vcmp.ge.s32.totalorder %v3151_v28, 1  ;;  %vm3183_vm9 = vcmp.le.s32.totalorder %v3151_v28, 6 }
 0x242   : > { %v2739_v29 = vadd.f32 %v2738_v58, %v13985_v34  ;;  %11600 = vmatprep.mubr.msk.bf16.mxu1 %vm17928_vm2, %v18448_v55  ;;  %vm14155_vm12 = vcmp.ge.s32.totalorder %v3150_v54, 1  ;;  %vm3182_vm4 = vcmp.le.s32.totalorder %v3150_v54, 6  ;;  %v11921_v54 = vld [vmem:[%s17682_s2 + $0x100] sm:$0xff]  }
 0x243   : > { %vm9977_vm5 = vmpackc.low %vm14151_vm11, %vm14155_vm12  ;;  %vm18525_vm12 = vmmov 0  }
 0x244   : > { %v3013_v10 = vpack.c.bf16 %v2739_v29, %v2736_v46  ;;  %vm14181_vm15 = vmpackc.low %vm3183_vm9, %vm3182_vm4  ;;  %vm18480_vm4 = vsmask.f32 7424 }
 0x245   : > { %vm18481_vm9 = vmmov %vm18474_vm3 }
 0x246   : > { %v11560_v2 = vpop.f32.mrb[156].mxu0  ;;  %11599 = vmatpush3.bf16.msra.mxu1 %v3013_v10 }
 0x247   : > { %v2749_v3 = vpop.f32.mrb[157].mxu0  ;;  %11604 = vmatprep.subr.bf16.mxu1 %v18448_v55 }
 0x248   : > { %v2750_v30 = vadd.f32 %v2749_v3, %v13989_v36  ;;  %v11561_v18 = vpop.f32.mrb[158].mxu0  ;;  %v11909_v36 = vld [vmem:[%s17682_s2 + $0x80] sm:$0xff]   ;;  %v11957_v3 = vld [vmem:[%s17682_s2 + $0x210] sm:$0xff]  }
 0x249   : > { %v2752_v17 = vpop.f32.mrb[159].mxu0  ;;  %11601 = vmatmul.mubr.msk.bf16.vlgmr.msra.gmra.mrb[152].mxu1 %vm17927_vm13, %v13998_v61 }
 0x24a   : > { %v2753_v45 = vadd.f32 %v2752_v17, %v13991_v4  ;;  %11606 = vmatprep.mubr.msk.bf16.mxu1 %vm17928_vm2, %v18448_v55 }
 0x24b   : > { %v10882_v23 = vpop.f32.mrb[124].mxu1 }
 0x24c   : > { %v3054_v34 = vpack.c.bf16 %v2753_v45, %v2750_v30  ;;  %v10883_v51 = vpop.f32.mrb[125].mxu1  ;;  %v11960_v30 = vld [vmem:[%s17682_s2 + $0x218] sm:$0xff]  }
 0x24d   : > { %v10885_v4 = vpop.f32.mrb[126].mxu1 }
 0x24e   : > { %11605 = vmatpush3.bf16.msra.mxu1 %v3054_v34  ;;  %v10886_v9 = vpop.f32.mrb[127].mxu1 }
 0x24f   : > { %10968 = vmatprep.subr.bf16.mxu1 %v11907_v14 }
 0x251   : > { %11607 = vmatmul.mubr.msk.bf16.vlgmr.msra.gmra.mrb[156].mxu1 %vm17927_vm13, %v13998_v61  ;;  %v11917_v61 = vld [vmem:[%s17682_s2 + $0x90] sm:$0xff]  }
 0x252   : > { %10969 = vmatpush3.bf16.msra.mxu1 %v11909_v36 }
 0x253   : > { %10970 = vmatprep.subr.bf16.mxu1 %v11911_v44 }
 0x256   : > { %10971 = vmatpush3.bf16.msra.mxu1 %v11913_v25 }
 0x257   : > { %10972 = vmatprep.subr.bf16.mxu1 %v11915_v6  ;;  %v15525_v6 = vld [vmem:[%s17690_s10] sm:$0xff]  }
 0x25a   : > { %10973 = vmatpush3.bf16.msra.mxu1 %v11917_v61  ;;  %v11941_v61 = vld [vmem:[%s17682_s2 + $0x180] sm:$0xff]  }
 0x25b   : > { %10974 = vmatprep.subr.bf16.mxu1 %v11918_v1 }
 0x25e   : > { %10975 = vmatpush3.bf16.msra.mxu1 %v11920_v56 }
 0x25f   : > { %10976 = vmatprep.subr.bf16.mxu1 %v11922_v63 }
 0x262   : > { %10977 = vmatpush3.bf16.msra.mxu1 %v11924_v20  ;;  %v11943_v20 = vld [vmem:[%s17682_s2 + $0x1c8] sm:$0xff]  }
 0x263   : > { %10978 = vmatprep.subr.bf16.mxu1 %v11926_v27  ;;  %v11945_v27 = vld [vmem:[%s17682_s2 + $0x188] sm:$0xff]  }
 0x266   : > { %10979 = vmatpush3.bf16.msra.mxu1 %v11928_v26 }
 0x267   : > { %10980 = vmatprep.subr.bf16.mxu1 %v11930_v62  ;;  %v11947_v62 = vld [vmem:[%s17682_s2 + $0x1d0] sm:$0xff]  }
 0x26a   : > { %10981 = vmatpush3.bf16.msra.mxu1 %v11932_v50 }
 0x26b   : > { %10982 = vmatprep.subr.bf16.mxu1 %v11934_v47 }
 0x26e   : > { %10983 = vmatpush3.bf16.msra.mxu1 %v11936_v15  ;;  %v18476_v15 = vld [vmem:[#allocation6_spill] sm:$0xff] }
 0x26f   : > { %11048 = vmatprep.subr.bf16.mxu1 %v11939_v38  ;;  %v3153_v57 = vand.u32 7, %v18476_v15 }
 0x271   : > { %vm3161_vm14 = vcmp.ge.s32.totalorder %v3153_v57, 1 }
 0x2ec   : > { %v2802_v19 = vpop.f32.mrb[128].mxu1 }
 0x2ed   : > { %v3100_v8 = vadd.f32 %v14144_v39, %v2802_v19  ;;  %v11566_v16 = vpop.f32.mrb[129].mxu1 }
 0x2ee   : > { %v2805_v42 = vpop.f32.mrb[130].mxu1 }
 0x2ef   : > { %v3108_v41 = vmax.f32 %v3100_v8, 0.0  ;;  %v11567_v48 = vpop.f32.mrb[131].mxu1 }
 0x2f1   : > { %v3124_v52 = vrot.slane %v3108_v41, 7  ;;  %v11950_v41 = vld [vmem:[%s17682_s2 + $0x1d8] sm:$0xff]  }
 0x2f3   : > { %v3148_v29 = vsel %vm18464_vm1, 0.0, %v3124_v52  ;;  %vm18479_vm1 = vmmov 1  }
 0x2f4   : > { %v2843_v59 = vpop.f32.mrb[132].mxu1  ;;  %v3191_v17 = vrot.slane %v3148_v29, 2  ;;  %v14165_v34 = vpack.c.bf16 %v3148_v29, %v18448_v55 }
 0x2f5   : > { %v3101_v46 = vadd.f32 %v14144_v39, %v2843_v59  ;;  %v11572_v49 = vpop.f32.mrb[133].mxu1 }
 0x2f6   : > { %v2846_v58 = vpop.f32.mrb[134].mxu1  ;;  %v3192_v44 = vsel %vm18470_vm7, %v18457_v43, %v3191_v17  ;;  %v3290_v53 = vshll.u32 %v14165_v34, 16  ;;  %v3288_v22 = vshrl.u32 %v14165_v34, 16  ;;  %v11923_v49 = vld [vmem:[%s17682_s2 + $0x148] sm:$0xff]   ;;  %vm14239_vm7 = vcmp.le.s32.totalorder %v3152_v12, 6 }
 0x2f7   : > { %v3109_v10 = vmax.f32 %v3101_v46, 0.0  ;;  %v11573_v2 = vpop.f32.mrb[135].mxu1  ;;  %v11956_v12 = vld [vmem:[%s17682_s2 + $0x1e8] sm:$0xff]  }
 0x2f8   : > { %v3292_v47 = vrot.slane %v3290_v53, 1  ;;  %v11965_v2 = vld [vmem:[%s17682_s2 + $0x228] sm:$0xff]  }
 0x2f9   : > { %v3125_v18 = vrot.slane %v3109_v10, 7 }
 0x2fa   : > { %v3293_v48 = vor.u32 %v3292_v47, %v3288_v22  ;;  %v18492_v22 = vld [vmem:[#allocation8_spill] sm:$0xff] }
 0x2fb   : > { %v3126_v45 = vsel %vm18469_vm8, %v3124_v52, %v3125_v18  ;;  %vm9965_vm8 = vmpackc.low %vm14151_vm11, %vm18479_vm1 }
 0x2fc   : > { %v3193_v14 = vrot.slane %v3126_v45, 2  ;;  %v2884_v36 = vpop.f32.mrb[136].mxu1  ;;  %v14167_v23 = vpack.c.bf16 %v3126_v45, %v3148_v29  ;;  %vm18491_vm1 = vmmov %vm18481_vm9 }
 0x2fd   : > { %v3102_v51 = vadd.f32 %v14144_v39, %v2884_v36  ;;  %v11578_v4 = vpop.f32.mrb[137].mxu1 }
 0x2fe   : > { %v14173_v9 = vsel %vm18471_vm10, %v3191_v17, %v3193_v14  ;;  %v2887_v25 = vpop.f32.mrb[138].mxu1  ;;  %9979 = vmatprep.mubr.msk.bf16.mxu1 %vm9977_vm5, %v14167_v23  ;;  %v3330_v59 = vshll.u32 %v14167_v23, 16  ;;  %vm14243_vm10 = vcmp.le.s32.totalorder %v3153_v57, 6  ;;  %v11958_v57 = vld [vmem:[%s17682_s2 + $0x1a8] sm:$0xff]  }
 0x2ff   : > { %v3110_v1 = vmax.f32 %v3102_v51, 0.0  ;;  %v11579_v56 = vpop.f32.mrb[139].mxu1  ;;  %v9981_v63 = vpack.c.bf16 %v14173_v9, %v3192_v44  ;;  %v11953_v51 = vld [vmem:[%s17682_s2 + $0x1e0] sm:$0xff]   ;;  %v11925_v25 = vld [vmem:[%s17682_s2 + $0x108] sm:$0xff]  }
 0x300   : > { %v3332_v36 = vrot.slane %v3330_v59, 1 }
 0x301   : > { %v3127_v11 = vrot.slane %v3110_v1, 7  ;;  %9982 = vmatmul.mubr.msk.bf16.vlgmr.msra.gmra.mrb[160].mxu1 %vm14181_vm15, %v9981_v63  ;;  %v3328_v1 = vshrl.u32 %v14167_v23, 16  ;;  %v15534_v63 = vld [vmem:[%s17691_s11 + $0x4] ss:$0 sm:$0xff] }
 0x302   : > { %11049 = vmatpush3.bf16.msra.mxu1 %v11941_v61 }
 0x303   : > { %v3128_v26 = vsel %vm18474_vm3, %v3125_v18, %v3127_v11  ;;  %11050 = vmatprep.subr.bf16.mxu1 %v11943_v20  ;;  %vm14249_vm3 = vmpackc.low %vm3161_vm14, %vm14215_vm0  ;;  %v11952_v18 = vld [vmem:[%s17682_s2 + $0x198] sm:$0xff]  }
 0x304   : > { %v14203_v50 = vpack.c.bf16 %v3128_v26, %v3126_v45  ;;  %v3195_v32 = vrot.slane %v3128_v26, 2  ;;  %v2925_v35 = vpop.f32.mrb[140].mxu1  ;;  %vm14280_vm0 = vmpackc.low %vm14243_vm10, %vm14239_vm7 }
 0x305   : > { %v3103_v21 = vadd.f32 %v14144_v39, %v2925_v35  ;;  %v11584_v40 = vpop.f32.mrb[141].mxu1  ;;  %v11931_v35 = vld [vmem:[%s17682_s2 + $0x158] sm:$0xff]   ;;  %vm18490_vm14 = vmmov %vm18480_vm4 }
 0x306   : > { %v2928_v37 = vpop.f32.mrb[142].mxu1  ;;  %v3295_v0 = vshll.u32 %v14203_v50, 16  ;;  %11051 = vmatpush3.bf16.msra.mxu1 %v11945_v27  ;;  %v14210_v38 = vsel %vm18459_vm6, %v3193_v14, %v3195_v32  ;;  %v11955_v27 = vld [vmem:[%s17682_s2 + $0x1a0] sm:$0xff]   ;;  %vm18495_vm7 = vmmov %vm18490_vm14 }
 0x307   : > { %v3111_v19 = vmax.f32 %v3103_v21, 0.0  ;;  %v11585_v8 = vpop.f32.mrb[143].mxu1  ;;  %11052 = vmatprep.subr.bf16.mxu1 %v11947_v62  ;;  %v10002_v42 = vpack.c.bf16 %v14210_v38, %v14173_v9  ;;  %vm18496_vm10 = vmmov %vm18491_vm1 }
 0x308   : > { %v14224_v52 = vrot.slane %v3295_v0, 1  ;;  %v3154_v0 = vand.u32 7, %v18492_v22  ;;  %v11959_v8 = vld [vmem:[%s17682_s2 + $0x1f0] sm:$0xff]  }
 0x309   : > { %v3129_v28 = vrot.slane %v3111_v19, 7 }
 0x30a   : > { %v3298_v46 = vsel %vm18480_vm4, %v3293_v48, %v14224_v52  ;;  %11053 = vmatpush3.bf16.msra.mxu1 %v11949_v33  ;;  %v18493_v33 = vld [vmem:[#allocation9_spill] sm:$0xff]  ;;  %v11933_v48 = vld [vmem:[%s17682_s2 + $0x118] sm:$0xff]   ;;  %vm3162_vm4 = vcmp.ge.s32.totalorder %v3154_v0, 1 }
 0x30b   : > { %v3130_v58 = vsel %vm18481_vm9, %v3127_v11, %v3129_v28  ;;  %3986 = vmatprep.mubr.bf16.mxu0 %v3298_v46  ;;  %11054 = vmatprep.subr.bf16.mxu1 %v11950_v41  ;;  %v3155_v19 = vand.u32 7, %v18493_v33  ;;  %v11935_v46 = vld [vmem:[%s17682_s2 + $0x160] sm:$0xff]  }
 0x30c   : > { %v3197_v17 = vrot.slane %v3130_v58, 2  ;;  %v2966_v45 = vpop.f32.mrb[144].mxu1  ;;  %9967 = vmatmul.mubr.msk.bf16.vlgmr.msra.gmra.mrb[160].mxu0 %vm9965_vm8, %v14165_v34  ;;  %v14257_v14 = vpack.c.bf16 %v3130_v58, %v3128_v26  ;;  %v11927_v34 = vld [vmem:[%s17682_s2 + $0x150] sm:$0xff]   ;;  %v3333_v26 = vor.u32 %v3332_v36, %v3328_v1  ;;  %vm18494_vm8 = vmmov %vm18459_vm6 }
 0x30d   : > { %v3104_v4 = vadd.f32 %v14144_v39, %v2966_v45  ;;  %v11590_v44 = vpop.f32.mrb[145].mxu1  ;;  %11009 = vmatpush3.bf16.msra.mxu0 %v11921_v54  ;;  %vm3163_vm9 = vcmp.ge.s32.totalorder %v3155_v19, 1 }
 0x30e   : > { %v2969_v61 = vpop.f32.mrb[146].mxu1  ;;  %11010 = vmatprep.subr.bf16.mxu0 %v11923_v49  ;;  %9985 = vmatprep.mubr.msk.bf16.mxu1 %vm14249_vm3, %v14257_v14  ;;  %v14274_v56 = vsel %vm18459_vm6, %v3195_v32, %v3197_v17  ;;  %v3335_v20 = vshll.u32 %v14257_v14, 16  ;;  %v11929_v32 = vld [vmem:[%s17682_s2 + $0x110] sm:$0xff]   ;;  %vm14356_vm6 = vcmp.le.s32.totalorder %v3154_v0, 6 }
 0x30f   : > { %v3112_v53 = vmax.f32 %v3104_v4, 0.0  ;;  %v11591_v11 = vpop.f32.mrb[147].mxu1  ;;  %v14287_v23 = vpack.c.bf16 %v14274_v56, %v14210_v38  ;;  %11055 = vmatpush3.bf16.msra.mxu1 %v11952_v18  ;;  %v11961_v18 = vld [vmem:[%s17682_s2 + $0x1b0] sm:$0xff]   ;;  %v11937_v4 = vld [vmem:[%s17682_s2 + $0x120] sm:$0xff]  }
 0x310   : > { %v14292_v13 = vrot.slane %v3335_v20, 1  ;;  %11056 = vmatprep.subr.bf16.mxu1 %v11953_v51  ;;  %v11964_v20 = vld [vmem:[%s17682_s2 + $0x1b8] sm:$0xff]   ;;  %v11963_v38 = vld [vmem:[%s17682_s2 + $0x220] sm:$0xff]  }
 0x311   : > { %v3131_v62 = vrot.slane %v3112_v53, 7  ;;  %11011 = vmatpush3.bf16.msra.mxu0 %v11925_v25  ;;  %9988 = vmatmul.mubr.msk.bf16.gmra.mrb[164].mxu1 %vm14280_vm0, %v14287_v23 }
 0x312   : > { %11012 = vmatprep.subr.bf16.mxu0 %v11927_v34  ;;  %v14308_v47 = vsel %vm18490_vm14, %v3333_v26, %v14292_v13  ;;  %vm14360_vm14 = vcmp.le.s32.totalorder %v3155_v19, 6 }
 0x313   : > { %v3132_v15 = vsel %vm18491_vm1, %v3129_v28, %v3131_v62  ;;  %11057 = vmatpush3.bf16.msra.mxu1 %v11955_v27  ;;  %v3299_v28 = vshrl.u32 %v14203_v50, 16  ;;  %vm14364_vm1 = vmpackc.low %vm3163_vm9, %vm3162_vm4 }
 0x314   : > { %v14314_v21 = vpack.c.bf16 %v3132_v15, %v3130_v58  ;;  %v3199_v40 = vrot.slane %v3132_v15, 2  ;;  %v3007_v37 = vpop.f32.mrb[148].mxu1  ;;  %11058 = vmatprep.subr.bf16.mxu1 %v11956_v12  ;;  %vm14393_vm4 = vmpackc.low %vm14360_vm14, %vm14356_vm6 }
 0x315   : > { %v3105_v16 = vadd.f32 %v14144_v39, %v3007_v37  ;;  %v11596_v41 = vpop.f32.mrb[149].mxu1  ;;  %11013 = vmatpush3.bf16.msra.mxu0 %v11929_v32  ;;  %v3301_v45 = vor.u32 %v3299_v28, %v14224_v52  ;;  %v11938_v52 = vld [vmem:[%s17682_s2 + $0x168] sm:$0xff]   ;;  %v3339_v37 = vshrl.u32 %v14257_v14, 16  ;;  %v11944_v14 = vld [vmem:[%s17682_s2 + $0x130] sm:$0xff]   ;;  %vm18505_vm9 = vmmov %vm18495_vm7 }
 0x316   : > { %v3010_v59 = vpop.f32.mrb[150].mxu1  ;;  %v3303_v54 = vshll.u32 %v14314_v21, 16  ;;  %11014 = vmatprep.subr.bf16.mxu0 %v11931_v35  ;;  %v14331_v49 = vsel %vm18494_vm8, %v3197_v17, %v3199_v40  ;;  %v11962_v17 = vld [vmem:[%s17682_s2 + $0x1f8] sm:$0xff]   ;;  %v11942_v35 = vld [vmem:[%s17682_s2 + $0x170] sm:$0xff]  }
 0x317   : > { %v3113_v58 = vmax.f32 %v3105_v16, 0.0  ;;  %v11597_v29 = vpop.f32.mrb[151].mxu1  ;;  %v10005_v10 = vpack.c.bf16 %v14331_v49, %v14274_v56  ;;  %11059 = vmatpush3.bf16.msra.mxu1 %v11958_v57  ;;  %v11946_v41 = vld [vmem:[%s17682_s2 + $0x178] sm:$0xff]   ;;  %v11966_v56 = vld [vmem:[%s17682_s2 + $0x230] sm:$0xff]  }
 0x318   : > { %v14339_v36 = vrot.slane %v3303_v54, 1  ;;  %11060 = vmatprep.subr.bf16.mxu1 %v11959_v8 }
 0x319   : > { %v3133_v51 = vrot.slane %v3113_v58, 7  ;;  %11015 = vmatpush3.bf16.msra.mxu0 %v11933_v48  ;;  %v18507_v58 = vld [vmem:[#allocation14_spill] sm:$0xff] }
 0x31a   : > { %v14349_v44 = vsel %vm18495_vm7, %v3301_v45, %v14339_v36  ;;  %11016 = vmatprep.subr.bf16.mxu0 %v11935_v46  ;;  %vm18506_vm7 = vmmov %vm18496_vm10  ;;  %v3156_v29 = vand.u32 7, %v18507_v58 }
 0x31b   : > { %v3134_v25 = vsel %vm18496_vm10, %v3131_v62, %v3133_v51  ;;  %3993 = vmatprep.mubr.bf16.mxu0 %v14349_v44  ;;  %11061 = vmatpush3.bf16.msra.mxu1 %v11961_v18  ;;  %v11940_v62 = vld [vmem:[%s17682_s2 + $0x128] sm:$0xff]   ;;  %v18508_v18 = vld [vmem:[#allocation15_spill] sm:$0xff]  ;;  %vm18509_vm10 = vmmov %vm18494_vm8 }
 0x31c   : > { %v3201_v53 = vrot.slane %v3134_v25, 2  ;;  %v3048_v11 = vpop.f32.mrb[152].mxu1  ;;  %9970 = vmatmul.mubr.msk.bf16.gmra.mrb[164].mxu0 %vm14249_vm3, %v14203_v50  ;;  %v14374_v27 = vpack.c.bf16 %v3134_v25, %v3132_v15  ;;  %11062 = vmatprep.subr.bf16.mxu1 %v11962_v17  ;;  %v3157_v45 = vand.u32 7, %v18508_v18  ;;  %v11948_v17 = vld [vmem:[%s17682_s2 + $0x138] sm:$0xff]   ;;  %vm14437_vm6 = vcmp.ge.s32.totalorder %v3156_v29, 1 }
 0x31d   : > { %v3106_v26 = vadd.f32 %v14144_v39, %v3048_v11  ;;  %v11602_v12 = vpop.f32.mrb[153].mxu1  ;;  %11017 = vmatpush3.bf16.msra.mxu0 %v11937_v4 }
 0x31e   : > { %v3051_v32 = vpop.f32.mrb[154].mxu1  ;;  %11018 = vmatprep.subr.bf16.mxu0 %v11938_v52  ;;  %9991 = vmatprep.mubr.msk.bf16.mxu1 %vm14364_vm1, %v14374_v27  ;;  %v14387_v15 = vsel %vm18494_vm8, %v3199_v40, %v3201_v53  ;;  %v3343_v22 = vshll.u32 %v14374_v27, 16  ;;  %v3341_v40 = vor.u32 %v3339_v37, %v14292_v13  ;;  %v3307_v52 = vshrl.u32 %v14314_v21, 16  ;;  %vm18512_vm8 = vmmov %vm18505_vm9 }
 0x31f   : > { %v3114_v0 = vmax.f32 %v3106_v26, 0.0  ;;  %v11603_v33 = vpop.f32.mrb[155].mxu1  ;;  %v14401_v19 = vpack.c.bf16 %v14387_v15, %v14331_v49  ;;  %11063 = vmatpush3.bf16.msra.mxu1 %v11964_v20  ;;  %vm3165_vm14 = vcmp.ge.s32.totalorder %v3157_v45, 1  ;;  %vm3189_vm13 = vcmp.le.s32.totalorder %v3157_v45, 6 }
 0x320   : > { %v3345_v8 = vrot.slane %v3343_v22, 1  ;;  %11646 = vmatprep.subr.bf16.mxu1 %v18448_v55  ;;  %v3309_v26 = vor.u32 %v3307_v52, %v14339_v36 }
 0x321   : > { %v3135_v16 = vrot.slane %v3114_v0, 7  ;;  %11019 = vmatpush3.bf16.msra.mxu0 %v11940_v62  ;;  %9994 = vmatmul.mubr.msk.bf16.gmra.mrb[168].mxu1 %vm14393_vm4, %v14401_v19 }
 0x322   : > { %11020 = vmatprep.subr.bf16.mxu0 %v11942_v35  ;;  %v14415_v13 = vsel %vm18505_vm9, %v3341_v40, %v3345_v8  ;;  %vm18513_vm9 = vmmov %vm18506_vm7 }
 0x323   : > { %v3136_v48 = vsel %vm18506_vm7, %v3133_v51, %v3135_v16 }
 0x324   : > { %v14418_v59 = vpack.c.bf16 %v3136_v48, %v3134_v25  ;;  %v3203_v28 = vrot.slane %v3136_v48, 2  ;;  %v3089_v54 = vpop.f32.mrb[156].mxu1  ;;  %v11951_v25 = vld [vmem:[%s17682_s2 + $0x200] sm:$0xff]  }
 0x325   : > { %v3107_v46 = vadd.f32 %v14144_v39, %v3089_v54  ;;  %11021 = vmatpush3.bf16.msra.mxu0 %v11944_v14  ;;  %v11608_v4 = vpop.f32.mrb[157].mxu1  ;;  %v3347_v54 = vshrl.u32 %v14374_v27, 16 }
 0x326   : > { %v3311_v51 = vshll.u32 %v14418_v59, 16  ;;  %11022 = vmatprep.subr.bf16.mxu0 %v11946_v41  ;;  %v14432_v39 = vsel %vm18509_vm10, %v3201_v53, %v3203_v28  ;;  %v3092_v61 = vpop.f32.mrb[158].mxu1  ;;  %vm3188_vm10 = vcmp.le.s32.totalorder %v3156_v29, 6  ;;  %v3315_v14 = vshrl.u32 %v14418_v59, 16 }
 0x327   : > { %v3115_v34 = vmax.f32 %v3107_v46, 0.0  ;;  %v10008_v20 = vpack.c.bf16 %v14432_v39, %v14387_v15  ;;  %v11609_v11 = vpop.f32.mrb[159].mxu1  ;;  %v3349_v52 = vor.u32 %v3347_v54, %v3345_v8 }
 0x328   : > { %v3313_v12 = vrot.slane %v3311_v51, 1 }
 0x329   : > { %v3137_v62 = vrot.slane %v3115_v34, 7  ;;  %11023 = vmatpush3.bf16.msra.mxu0 %v11948_v17 }
 0x32a   : > { %v3314_v35 = vsel %vm18512_vm8, %v3309_v26, %v3313_v12  ;;  %11610 = vmatprep.subr.bf16.mxu0 %v11951_v25  ;;  %vm14451_vm8 = vmpackc.low %vm3165_vm14, %vm14437_vm6 }
 0x32b   : > { %v3138_v53 = vsel %vm18513_vm9, %v3135_v16, %v3137_v62  ;;  %v3149_v37 = vsel %vm18506_vm7, %v3137_v62, 0.0  ;;  %4000 = vmatprep.mubr.bf16.mxu0 %v3314_v35  ;;  %vm18516_vm9 = vcmask 1045504   ;;  %vm14458_vm7 = vmpackc.low %vm3189_vm13, %vm3188_vm10  ;;  %vm18520_vm13 = vsmask.f32 7424 }
 0x32c   : > { %v3205_v22 = vrot.slane %v3138_v53, 2  ;;  %v3243_v36 = vpack.c.bf16 %v3149_v37, %v3149_v37  ;;  %v3245_v0 = vrot.slane %v3149_v37, 2  ;;  %v14444_v33 = vpack.c.bf16 %v3149_v37, %v3138_v53  ;;  %9973 = vmatmul.mubr.msk.bf16.gmra.mrb[168].mxu0 %vm14364_vm1, %v14314_v21  ;;  %vm18519_vm2 = vmmov %vm18516_vm9 }
 0x32d   : > { %v3181_v16 = vpack.c.bf16 %v3138_v53, %v3138_v53  ;;  %v3242_v41 = vpack.c.bf16 %v3138_v53, %v3136_v48  ;;  %vm18521_vm6 = vmmov %vm18520_vm13 }
 0x32e   : > { %v3359_v46 = vshll.u32 %v3243_v36, 16  ;;  %v3206_v58 = vsel %vm18516_vm9, %v3203_v28, %v3205_v22  ;;  %v14463_v18 = vsel %vm18519_vm2, %v3205_v22, %v3245_v0  ;;  %v3368_v45 = vshll.u32 %v14444_v33, 16  ;;  %vm18522_vm14 = vmmov %vm18521_vm6 }
 0x32f   : > { %v3319_v17 = vshll.u32 %v3181_v16, 16  ;;  %9997 = vmatprep.mubr.msk.bf16.mxu1 %vm14451_vm8, %v3242_v41  ;;  %v14469_v48 = vpack.c.bf16 %v3206_v58, %v14432_v39  ;;  %v3351_v27 = vshll.u32 %v3242_v41, 16  ;;  %v10011_v4 = vpack.c.bf16 %v14463_v18, %v3206_v58  ;;  %vm18523_vm10 = vmmov %vm18521_vm6 }
 0x330   : > { %v3317_v28 = vor.u32 %v3315_v14, %v3313_v12  ;;  %v3370_v51 = vrot.slane %v3368_v45, 1  ;;  %v3355_v11 = vshrl.u32 %v3242_v41, 16  ;;  %v3273_v26 = vsel %vm18519_vm2, %v3245_v0, %v18457_v43  ;;  %vm18524_vm11 = vmmov %vm18521_vm6 }
 0x331   : > { %v3321_v61 = vrot.slane %v3319_v17, 1  ;;  %10000 = vmatmul.mubr.msk.bf16.gmra.mrb[172].mxu1 %vm14458_vm7, %v14469_v48  ;;  %v3353_v34 = vrot.slane %v3351_v27, 1  ;;  %v10035_v32 = vpack.c.bf16 %v3273_v26, %v14463_v18  ;;  %v3361_v37 = vrot.slane %v3359_v46, 1 }
 0x332   : > { %4169 = vmatprep.mubr.bf16.mxu1 %v14349_v44  ;;  %v3371_v62 = vsel %vm18520_vm13, %v3317_v28, %v3370_v51  ;;  %v11954_v44 = vld [vmem:[%s17682_s2 + $0x208] sm:$0xff]   ;;  %v3372_v9 = vshrl.u32 %v14444_v33, 16  ;;  %vm4502_vm9 = vcmask 1041408  }
 0x333   : > { %v3322_v12 = vsel %vm18521_vm6, %v3317_v28, %v3321_v61  ;;  %v3354_v8 = vsel %vm18522_vm14, %v3349_v52, %v3353_v34  ;;  %v3357_v53 = vor.u32 %v3355_v11, %v3353_v34  ;;  %vm18534_vm14 = vcmask 1045504  }
 0x334   : > { %4007 = vmatprep.mubr.bf16.mxu0 %v3322_v12 }
 0x335   : > { %9976 = vmatmul.mubr.msk.bf16.gmra.mrb[172].mxu0 %vm14451_vm8, %v14418_v59  ;;  %v3362_v22 = vsel %vm18523_vm10, %v3357_v53, %v3361_v37  ;;  %vm18535_vm10 = vmmov %vm18534_vm14 }
 0x336   : > { %10003 = vmatprep.mubr.msk.bf16.mxu0 %vm14181_vm15, %v10002_v42 }
 0x339   : > { %10015 = vmatmul.mubr.msk.bf16.vlgmr.msra.gmra.mrb[176].mxu1 %vm9977_vm5, %v14203_v50  ;;  %v3374_v50 = vor.u32 %v3372_v9, %v3370_v51  ;;  %vm4265_vm5 = vcmask 1043456  }
 0x33a   : > { %4176 = vmatprep.mubr.bf16.mxu1 %v3314_v35 }
 0x33b   : > { %v3375_v42 = vsel %vm18524_vm11, %v3374_v50, %v18460_v24 }
 0x33d   : > { %4109 = vmatmul.mubr.bf16.vlgmr.msra.gmra.mrb[176].mxu0 %v14308_v47  ;;  %v11967_v47 = vld [vmem:[%s17682_s2 + $0x238] sm:$0xff]  }
 0x33e   : > { %11611 = vmatpush3.bf16.msra.mxu0 %v11951_v25  ;;  %10006 = vmatprep.mubr.msk.bf16.mxu0 %vm14280_vm0, %v10005_v10 }
 0x33f   : > { %11612 = vmatprep.subr.bf16.mxu0 %v11954_v44 }
 0x341   : > { %10018 = vmatmul.mubr.msk.bf16.gmra.mrb[180].mxu1 %vm14249_vm3, %v14314_v21  ;;  %vm4261_vm3 = vcmask 64512  }
 0x342   : > { %11613 = vmatpush3.bf16.msra.mxu0 %v11954_v44  ;;  %4183 = vmatprep.mubr.bf16.mxu1 %v3371_v62 }
 0x343   : > { %11614 = vmatprep.subr.bf16.mxu0 %v11957_v3 }
 0x345   : > { %4116 = vmatmul.mubr.bf16.gmra.mrb[180].mxu0 %v14415_v13 }
 0x346   : > { %11615 = vmatpush3.bf16.msra.mxu0 %v11957_v3  ;;  %10009 = vmatprep.mubr.msk.bf16.mxu0 %vm14393_vm4, %v10008_v20 }
 0x347   : > { %11616 = vmatprep.subr.bf16.mxu0 %v11960_v30 }
 0x349   : > { %10021 = vmatmul.mubr.msk.bf16.gmra.mrb[184].mxu1 %vm14364_vm1, %v14418_v59  ;;  %vm4460_vm1 = vcmask 1044480  }
 0x34a   : > { %11617 = vmatpush3.bf16.msra.mxu0 %v11960_v30  ;;  %4190 = vmatprep.mubr.bf16.mxu1 %v3375_v42 }
 0x34b   : > { %11618 = vmatprep.subr.bf16.mxu0 %v11963_v38 }
 0x34d   : > { %4123 = vmatmul.mubr.bf16.gmra.mrb[184].mxu0 %v3354_v8 }
 0x34e   : > { %11619 = vmatpush3.bf16.msra.mxu0 %v11963_v38  ;;  %10012 = vmatprep.mubr.msk.bf16.mxu0 %vm14458_vm7, %v10011_v4 }
 0x34f   : > { %11620 = vmatprep.subr.bf16.mxu0 %v11965_v2 }
 0x351   : > { %10024 = vmatmul.mubr.msk.bf16.gmra.mrb[188].mxu1 %vm14451_vm8, %v14444_v33 }
 0x352   : > { %11621 = vmatpush3.bf16.msra.mxu0 %v11965_v2  ;;  %11648 = vmatprep.mubr.msk.bf16.mxu1 %vm18525_vm12, %v18448_v55 }
 0x353   : > { %11622 = vmatprep.subr.bf16.mxu0 %v11966_v56 }
 0x355   : > { %4130 = vmatmul.mubr.bf16.gmra.mrb[188].mxu0 %v3362_v22 }
 0x356   : > { %11623 = vmatpush3.bf16.msra.mxu0 %v11966_v56  ;;  %11626 = vmatprep.mubr.msk.bf16.mxu0 %vm14181_vm15, %v14287_v23 }
 0x357   : > { %11624 = vmatprep.subr.bf16.mxu0 %v11967_v47 }
 0x35a   : > { %11625 = vmatpush3.bf16.msra.mxu0 %v11967_v47 }
 0x35b   : > { %11634 = vmatprep.subr.bf16.mxu0 %v18448_v55 }
 0x35d   : > { %11627 = vmatmul.mubr.msk.bf16.vlgmr.msra.gmra.mrb[192].mxu0 %vm14280_vm0, %v14401_v19 }
 0x35e   : > { %11630 = vmatprep.mubr.msk.bf16.mxu0 %vm14393_vm4, %v14469_v48 }
 0x365   : > { %11631 = vmatmul.mubr.msk.bf16.gmra.mrb[196].mxu0 %vm14458_vm7, %v10035_v32 }
 0x366   : > { %11636 = vmatprep.mubr.msk.bf16.mxu0 %vm18525_vm12, %v18448_v55 }
 0x3d4   : > { %v10984_v21 = vpop.f32.mrb[160].mxu1 }
 0x3d5   : > { %v10985_v23 = vpop.f32.mrb[161].mxu1 }
 0x3d6   : > { %v10986_v49 = vadd.f32 %v10985_v23, %v10984_v21  ;;  %v10987_v10 = vpop.f32.mrb[162].mxu1 }
 0x3d7   : > { %v10988_v1 = vpop.f32.mrb[163].mxu1 }
 0x3df   : > { %v10944_v15 = vpop.f32.mrb[160].mxu0 }
 0x3e0   : > { %v10945_v13 = vpop.f32.mrb[161].mxu0 }
 0x3e1   : > { %v10946_v59 = vadd.f32 %v10945_v13, %v10944_v15  ;;  %v10947_v25 = vpop.f32.mrb[162].mxu0 }
 0x3e2   : > { %v10948_v19 = vpop.f32.mrb[163].mxu0 }
 0x3e3   : > { %v4050_v39 = vadd.f32 %v10986_v49, %v10946_v59 }
 0x3e4   : > { %v10990_v20 = vpop.f32.mrb[164].mxu1 }
 0x3e5   : > { %v10991_v35 = vpop.f32.mrb[165].mxu1 }
 0x3e6   : > { %v10992_v36 = vadd.f32 %v10991_v35, %v10990_v20  ;;  %v10993_v0 = vpop.f32.mrb[166].mxu1 }
 0x3e7   : > { %v10994_v33 = vpop.f32.mrb[167].mxu1 }
 0x3ef   : > { %v10950_v40 = vpop.f32.mrb[164].mxu0 }
 0x3f0   : > { %v10951_v16 = vpop.f32.mrb[165].mxu0 }
 0x3f1   : > { %v10952_v14 = vadd.f32 %v10951_v16, %v10950_v40  ;;  %v10953_v41 = vpop.f32.mrb[166].mxu0 }
 0x3f2   : > { %v10954_v54 = vpop.f32.mrb[167].mxu0 }
 0x3f3   : > { %v4057_v46 = vadd.f32 %v10992_v36, %v10952_v14 }
 0x3f4   : > { %v10996_v58 = vpop.f32.mrb[168].mxu1 }
 0x3f5   : > { %v10997_v18 = vpop.f32.mrb[169].mxu1 }
 0x3f6   : > { %v10998_v45 = vadd.f32 %v10997_v18, %v10996_v58  ;;  %v10999_v17 = vpop.f32.mrb[170].mxu1 }
 0x3f7   : > { %v11000_v48 = vpop.f32.mrb[171].mxu1 }
 0x3ff   : > { %v10956_v27 = vpop.f32.mrb[168].mxu0 }
 0x400   : > { %v10957_v4 = vpop.f32.mrb[169].mxu0 }
 0x401   : > { %v10958_v28 = vadd.f32 %v10957_v4, %v10956_v27  ;;  %v10959_v52 = vpop.f32.mrb[170].mxu0 }
 0x402   : > { %v10960_v51 = vpop.f32.mrb[171].mxu0 }
 0x403   : > { %v4064_v61 = vadd.f32 %v10998_v45, %v10958_v28 }
 0x404   : > { %v11002_v34 = vpop.f32.mrb[172].mxu1 }
 0x405   : > { %v11003_v11 = vpop.f32.mrb[173].mxu1 }
 0x406   : > { %v11004_v26 = vadd.f32 %v11003_v11, %v11002_v34  ;;  %v11005_v62 = vpop.f32.mrb[174].mxu1 }
 0x407   : > { %v11006_v32 = vpop.f32.mrb[175].mxu1 }
 0x408   : > { %v10962_v12 = vpop.f32.mrb[172].mxu0 }
 0x409   : > { %v10963_v8 = vpop.f32.mrb[173].mxu0 }
 0x40a   : > { %v10964_v53 = vadd.f32 %v10963_v8, %v10962_v12  ;;  %v10965_v37 = vpop.f32.mrb[174].mxu0 }
 0x40b   : > { %v10966_v22 = vpop.f32.mrb[175].mxu0 }
 0x40c   : > { %v4071_v44 = vadd.f32 %v11004_v26, %v10964_v53  ;;  %v11064_v3 = vpop.f32.mrb[176].mxu1 }
 0x40d   : > { %v11065_v30 = vpop.f32.mrb[177].mxu1 }
 0x40e   : > { %v11066_v9 = vadd.f32 %v11065_v30, %v11064_v3  ;;  %v11067_v50 = vpop.f32.mrb[178].mxu1 }
 0x40f   : > { %v11068_v38 = vpop.f32.mrb[179].mxu1 }
 0x410   : > { %v11024_v42 = vpop.f32.mrb[176].mxu0 }
 0x411   : > { %v11025_v2 = vpop.f32.mrb[177].mxu0 }
 0x412   : > { %v11026_v56 = vadd.f32 %v11025_v2, %v11024_v42  ;;  %v11027_v47 = vpop.f32.mrb[178].mxu0  ;;  %v4259_v42 = vld [vmem:[%s17688_s8] sm:$0x3] }
 0x413   : > { %v11028_v21 = vpop.f32.mrb[179].mxu0 }
 0x414   : > { %v4111_v23 = vadd.f32 %v11026_v56, %v4050_v39  ;;  %v11070_v49 = vpop.f32.mrb[180].mxu1 }
 0x415   : > { %v11071_v10 = vpop.f32.mrb[181].mxu1 }
 0x416   : > { %v4172_v1 = vadd.f32 %v11066_v9, %v4111_v23  ;;  %v11072_v15 = vadd.f32 %v11071_v10, %v11070_v49  ;;  %v11073_v13 = vpop.f32.mrb[182].mxu1 }
 0x417   : > { %v11074_v59 = vpop.f32.mrb[183].mxu1 }
 0x418   : > { %v11030_v25 = vpop.f32.mrb[180].mxu0  ;;  %v11969_v59 = vld [vmem:[%s17683_s3] sm:$0xff]  }
 0x419   : > { %v11031_v19 = vpop.f32.mrb[181].mxu0 }
 0x41a   : > { %v11032_v20 = vadd.f32 %v11031_v19, %v11030_v25  ;;  %v11033_v35 = vpop.f32.mrb[182].mxu0  ;;  %v11970_v19 = vld [vmem:[%s17683_s3 + $0x48] sm:$0xff]  }
 0x41b   : > { %v11034_v36 = vpop.f32.mrb[183].mxu0  ;;  %v11971_v35 = vld [vmem:[%s17683_s3 + $0x8] sm:$0xff]  }
 0x41c   : > { %v4118_v0 = vadd.f32 %v11032_v20, %v4057_v46  ;;  %v11076_v33 = vpop.f32.mrb[184].mxu1  ;;  %v11982_v20 = vld [vmem:[%s17683_s3 + $0xc0] sm:$0xff]  }
 0x41d   : > { %v11077_v40 = vpop.f32.mrb[185].mxu1  ;;  %v11984_v36 = vld [vmem:[%s17683_s3 + $0x80] sm:$0xff]  }
 0x41e   : > { %v4179_v16 = vadd.f32 %v11072_v15, %v4118_v0  ;;  %v11078_v14 = vadd.f32 %v11077_v40, %v11076_v33  ;;  %v11079_v41 = vpop.f32.mrb[186].mxu1  ;;  %v11986_v0 = vld [vmem:[%s17683_s3 + $0xc8] sm:$0xff]   ;;  %v11990_v40 = vld [vmem:[%s17683_s3 + $0xd0] sm:$0xff]  }
 0x41f   : > { %v11080_v54 = vpop.f32.mrb[187].mxu1  ;;  %v11987_v33 = vld [vmem:[%s17683_s3 + $0x88] sm:$0xff]   ;;  %v11973_v41 = vld [vmem:[%s17683_s3 + $0x10] sm:$0xff]  }
 0x420   : > { %v11036_v58 = vpop.f32.mrb[184].mxu0  ;;  %v11994_v54 = vld [vmem:[%s17683_s3 + $0xd8] sm:$0xff]  }
 0x421   : > { %v11037_v39 = vpop.f32.mrb[185].mxu0 }
 0x422   : > { %v11038_v18 = vadd.f32 %v11037_v39, %v11036_v58  ;;  %v11039_v45 = vpop.f32.mrb[186].mxu0  ;;  %v11995_v58 = vld [vmem:[%s17683_s3 + $0x98] sm:$0xff]  }
 0x423   : > { %v11040_v17 = vpop.f32.mrb[187].mxu0  ;;  %v11974_v39 = vld [vmem:[%s17683_s3 + $0x58] sm:$0xff]  }
 0x424   : > { %v4125_v48 = vadd.f32 %v11038_v18, %v4064_v61  ;;  %v11082_v27 = vpop.f32.mrb[188].mxu1  ;;  %v11998_v18 = vld [vmem:[%s17683_s3 + $0xe0] sm:$0xff]   ;;  %v11975_v45 = vld [vmem:[%s17683_s3 + $0x18] sm:$0xff]  }
 0x425   : > { %v11083_v4 = vpop.f32.mrb[189].mxu1  ;;  %v11999_v17 = vld [vmem:[%s17683_s3 + $0xa0] sm:$0xff]  }
 0x426   : > { %v11084_v28 = vadd.f32 %v11083_v4, %v11082_v27  ;;  %v4186_v52 = vadd.f32 %v11078_v14, %v4125_v48  ;;  %v11085_v51 = vpop.f32.mrb[190].mxu1  ;;  %v11972_v14 = vld [vmem:[%s17683_s3 + $0x50] sm:$0xff]   ;;  %v11976_v48 = vld [vmem:[%s17683_s3 + $0x60] sm:$0xff]   ;;  %v12002_v27 = vld [vmem:[%s17683_s3 + $0xe8] sm:$0xff]  }
 0x427   : > { %v11086_v34 = vpop.f32.mrb[191].mxu1  ;;  %v11977_v4 = vld [vmem:[%s17683_s3 + $0x20] sm:$0xff]   ;;  %v12006_v51 = vld [vmem:[%s17683_s3 + $0xf0] sm:$0xff]  }
 0x428   : > { %v11042_v11 = vpop.f32.mrb[188].mxu0  ;;  %v11979_v34 = vld [vmem:[%s17683_s3 + $0x28] sm:$0xff]  }
 0x429   : > { %v11043_v46 = vpop.f32.mrb[189].mxu0 }
 0x42a   : > { %v11044_v26 = vadd.f32 %v11043_v46, %v11042_v11  ;;  %v11045_v62 = vpop.f32.mrb[190].mxu0  ;;  %v12007_v11 = vld [vmem:[%s17683_s3 + $0xb0] sm:$0xff]  }
 0x42b   : > { %v11046_v32 = vpop.f32.mrb[191].mxu0  ;;  %v11980_v46 = vld [vmem:[%s17683_s3 + $0x70] sm:$0xff]   ;;  %v11983_v62 = vld [vmem:[%s17683_s3 + $0x78] sm:$0xff]  }
 0x42c   : > { %v4132_v12 = vadd.f32 %v11044_v26, %v4071_v44  ;;  %v11981_v26 = vld [vmem:[%s17683_s3 + $0x30] sm:$0xff]   ;;  %v12010_v32 = vld [vmem:[%s17683_s3 + $0xf8] sm:$0xff]  }
 0x42e   : > { %v4193_v8 = vadd.f32 %v11084_v28, %v4132_v12  ;;  %v12003_v28 = vld [vmem:[%s17683_s3 + $0xa8] sm:$0xff]   ;;  %v12011_v12 = vld [vmem:[%s17683_s3 + $0xb8] sm:$0xff]  }
 0x430   : > { %v11628_v53 = vpop.f32.mrb[192].mxu0 }
 0x431   : > { %v4232_v37 = vpop.f32.mrb[193].mxu0  ;;  %v4240_v22 = vadd.f32 %v11628_v53, %v4179_v16  ;;  %v11991_v16 = vld [vmem:[%s17683_s3 + $0x90] sm:$0xff]   ;;  %v12014_v53 = vld [vmem:[%s17683_s3 + $0x1c0] sm:$0xff]  }
 0x432   : > { %v4233_v3 = vadd.f32 %v4232_v37, %v4172_v1  ;;  %v11629_v30 = vpop.f32.mrb[194].mxu0  ;;  %v11968_v1 = vld [vmem:[%s17683_s3 + $0x40] sm:$0xff]  }
 0x433   : > { %v4235_v61 = vpop.f32.mrb[195].mxu0  ;;  %v4309_v38 = vpack.c.bf16 %v4240_v22, %v4240_v22  ;;  %v11988_v37 = vld [vmem:[%s17683_s3 + $0x140] sm:$0xff]  }
 0x434   : > { %v4260_v9 = vpack.c.bf16 %v4233_v3, %v4233_v3 }
 0x435   : > { %v4311_v47 = vsel %vm4265_vm5, %v4309_v38, 0 }
 0x436   : > { %v4267_v50 = vsel %vm4265_vm5, %v4260_v9, 0 }
 0x437   : > { %11635 = vmatpush3.bf16.msra.mxu0 %v4267_v50 }
 0x438   : > { %11640 = vmatprep.subr.bf16.mxu0 %v18448_v55  ;;  %v11632_v44 = vpop.f32.mrb[196].mxu0 }
 0x439   : > { %v4254_v2 = vadd.f32 %v11632_v44, %v4193_v8  ;;  %v4246_v56 = vpop.f32.mrb[197].mxu0  ;;  %v11985_v8 = vld [vmem:[%s17683_s3 + $0x38] sm:$0xff]   ;;  %v10041_v44 = vld [vmem:[%s17691_s11 + $0x1] ss:$0 sm:$0xff] }
 0x43a   : > { %11637 = vmatmul.mubr.msk.bf16.vlgmr.msra.gmra.mrb[200].mxu0 %vm4261_vm3, %v4259_v42  ;;  %v4247_v21 = vadd.f32 %v4246_v56, %v4186_v52  ;;  %v11633_v23 = vpop.f32.mrb[198].mxu0  ;;  %v11978_v52 = vld [vmem:[%s17683_s3 + $0x68] sm:$0xff]  }
 0x43b   : > { %11641 = vmatpush3.bf16.msra.mxu0 %v4311_v47  ;;  %11642 = vmatprep.mubr.msk.bf16.mxu0 %vm18525_vm12, %v18448_v55  ;;  %v4249_v49 = vpop.f32.mrb[199].mxu0  ;;  %v4397_v15 = vpack.c.bf16 %v4254_v2, %v4254_v2 }
 0x43c   : > { %v4353_v10 = vpack.c.bf16 %v4247_v21, %v4247_v21  ;;  %11652 = vmatprep.subr.bf16.mxu0 %v18448_v55 }
 0x43d   : > { %v4399_v25 = vsel %vm4265_vm5, %v4397_v15, 0 }
 0x43e   : > { %v4355_v13 = vsel %vm4265_vm5, %v4353_v10, 0 }
 0x43f   : > { %11647 = vmatpush3.bf16.msra.mxu1 %v4355_v13 }
 0x440   : > { %11108 = vmatprep.subr.bf16.mxu1 %v11968_v1 }
 0x442   : > { %11643 = vmatmul.mubr.msk.bf16.vlgmr.msra.gmra.mrb[204].mxu0 %vm4261_vm3, %v4259_v42  ;;  %11649 = vmatmul.mubr.msk.bf16.vlgmr.msra.gmra.mrb[192].mxu1 %vm4261_vm3, %v4259_v42 }
 0x443   : > { %11653 = vmatpush3.bf16.msra.mxu0 %v4399_v25  ;;  %11654 = vmatprep.mubr.msk.bf16.mxu0 %vm18525_vm12, %v18448_v55 }
 0x444   : > { %11109 = vmatpush3.bf16.msra.mxu1 %v11969_v59  ;;  %11130 = vmatprep.subr.bf16.mxu0 %v11982_v20 }
 0x445   : > { %11110 = vmatprep.subr.bf16.mxu1 %v11970_v19 }
 0x448   : > { %11111 = vmatpush3.bf16.msra.mxu1 %v11971_v35 }
 0x449   : > { %11112 = vmatprep.subr.bf16.mxu1 %v11972_v14 }
 0x44a   : > { %11655 = vmatmul.mubr.msk.bf16.vlgmr.msra.gmra.mrb[208].mxu0 %vm4261_vm3, %v4259_v42 }
 0x44b   : > { %11131 = vmatpush3.bf16.msra.mxu0 %v11984_v36 }
 0x44c   : > { %11132 = vmatprep.subr.bf16.mxu0 %v11986_v0  ;;  %11113 = vmatpush3.bf16.msra.mxu1 %v11973_v41  ;;  %v4469_v0 = vand.u32 3, %v12416_v31  ;;  %v11993_v41 = vld [vmem:[%s17683_s3 + $0x108] sm:$0xff]  }
 0x44d   : > { %11114 = vmatprep.subr.bf16.mxu1 %v11974_v39  ;;  %v11996_v39 = vld [vmem:[%s17683_s3 + $0x150] sm:$0xff]  }
 0x44e   : > { %vm14686_vm8 = vcmp.ge.s32.totalorder %v4469_v0, 1  ;;  %vm14694_vm13 = vcmp.le.s32.totalorder %v4469_v0, 2 }
 0x44f   : > { %11133 = vmatpush3.bf16.msra.mxu0 %v11987_v33  ;;  %v4470_v33 = vand.u32 3, %v18463_v60 }
 0x450   : > { %11134 = vmatprep.subr.bf16.mxu0 %v11990_v40  ;;  %11115 = vmatpush3.bf16.msra.mxu1 %v11975_v45 }
 0x451   : > { %11116 = vmatprep.subr.bf16.mxu1 %v11976_v48  ;;  %vm14690_vm2 = vcmp.ge.s32.totalorder %v4470_v33, 1  ;;  %vm14698_vm6 = vcmp.le.s32.totalorder %v4470_v33, 2  ;;  %v12021_v33 = vld [vmem:[%s17683_s3 + $0x1d0] sm:$0xff]  }
 0x452   : > { %vm14712_vm11 = vmpackc.low %vm14690_vm2, %vm14686_vm8  ;;  %vm4535_vm8 = vsmask.f32 5376 }
 0x453   : > { %11135 = vmatpush3.bf16.msra.mxu0 %v11991_v16  ;;  %vm14723_vm3 = vmpackc.low %vm14698_vm6, %vm14694_vm13  ;;  %vm5458_vm13 = vcmask 1046528   ;;  %vm5822_vm6 = vcmask 1042432  }
 0x454   : > { %11136 = vmatprep.subr.bf16.mxu0 %v11994_v54  ;;  %11117 = vmatpush3.bf16.msra.mxu1 %v11977_v4 }
 0x455   : > { %11118 = vmatprep.subr.bf16.mxu1 %v11978_v52 }
 0x457   : > { %11137 = vmatpush3.bf16.msra.mxu0 %v11995_v58 }
 0x458   : > { %11138 = vmatprep.subr.bf16.mxu0 %v11998_v18  ;;  %11119 = vmatpush3.bf16.msra.mxu1 %v11979_v34  ;;  %v12022_v18 = vld [vmem:[%s17683_s3 + $0x190] sm:$0xff]  }
 0x459   : > { %11120 = vmatprep.subr.bf16.mxu1 %v11980_v46 }
 0x45b   : > { %11139 = vmatpush3.bf16.msra.mxu0 %v11999_v17 }
 0x45c   : > { %11140 = vmatprep.subr.bf16.mxu0 %v12002_v27  ;;  %11121 = vmatpush3.bf16.msra.mxu1 %v11981_v26 }
 0x45d   : > { %11122 = vmatprep.subr.bf16.mxu1 %v11983_v62 }
 0x45f   : > { %11141 = vmatpush3.bf16.msra.mxu0 %v12003_v28 }
 0x460   : > { %11142 = vmatprep.subr.bf16.mxu0 %v12006_v51  ;;  %11123 = vmatpush3.bf16.msra.mxu1 %v11985_v8 }
 0x461   : > { %11152 = vmatprep.subr.bf16.mxu1 %v11988_v37 }
 0x463   : > { %11143 = vmatpush3.bf16.msra.mxu0 %v12007_v11 }
 0x464   : > { %11144 = vmatprep.subr.bf16.mxu0 %v12010_v32 }
 0x467   : > { %11145 = vmatpush3.bf16.msra.mxu0 %v12011_v12 }
 0x468   : > { %11174 = vmatprep.subr.bf16.mxu0 %v12014_v53  ;;  %v12023_v53 = vld [vmem:[%s17683_s3 + $0x208] sm:$0xff]  }
 0x50d   : > { %v4303_v22 = vpop.f32.mrb[200].mxu0 }
 0x50e   : > { %v11638_v3 = vpop.f32.mrb[201].mxu0 }
 0x50f   : > { %v4306_v30 = vpop.f32.mrb[202].mxu0 }
 0x510   : > { %v11639_v61 = vpop.f32.mrb[203].mxu0 }
 0x515   : > { %v4347_v9 = vpop.f32.mrb[204].mxu0  ;;  %v4391_v50 = vpop.f32.mrb[192].mxu1 }
 0x516   : > { %v4442_v38 = vrot.slane %v4347_v9, 4  ;;  %v11644_v42 = vpop.f32.mrb[205].mxu0  ;;  %v11650_v2 = vpop.f32.mrb[193].mxu1 }
 0x517   : > { %v4350_v56 = vpop.f32.mrb[206].mxu0  ;;  %v4394_v47 = vpop.f32.mrb[194].mxu1 }
 0x518   : > { %v4447_v21 = vsel %vm4265_vm5, %v4303_v22, %v4442_v38  ;;  %v11645_v23 = vpop.f32.mrb[207].mxu0  ;;  %v11651_v49 = vpop.f32.mrb[195].mxu1 }
 0x519   : > { %v4454_v10 = vadd.f32 %v10041_v44, %v4447_v21 }
 0x51b   : > { %v4456_v1 = vmax.f32 %v4454_v10, 0.0 }
 0x51d   : > { %v4435_v15 = vpop.f32.mrb[208].mxu0  ;;  %v4461_v25 = vrot.slane %v4456_v1, 3  ;;  %v11989_v1 = vld [vmem:[%s17683_s3 + $0x100] sm:$0xff]  }
 0x51e   : > { %v4445_v13 = vrot.slane %v4435_v15, 4  ;;  %v11656_v59 = vpop.f32.mrb[209].mxu0 }
 0x51f   : > { %v4438_v19 = vpop.f32.mrb[210].mxu0  ;;  %v4467_v16 = vsel %vm4460_vm1, 0.0, %v4461_v25 }
 0x520   : > { %v4448_v20 = vsel %vm4265_vm5, %v4391_v50, %v4445_v13  ;;  %v11657_v35 = vpop.f32.mrb[211].mxu0  ;;  %v4482_v54 = vrot.slane %v4467_v16, 2  ;;  %v4492_v17 = vrot.slane %v4467_v16, 4  ;;  %v4503_v48 = vrot.slane %v4467_v16, 6  ;;  %v12016_v50 = vld [vmem:[%s17683_s3 + $0x180] sm:$0xff]  }
 0x521   : > { %v4455_v36 = vadd.f32 %v10041_v44, %v4448_v20  ;;  %v12018_v44 = vld [vmem:[%s17683_s3 + $0x1c8] sm:$0xff]  }
 0x522   : > { %v11992_v20 = vld [vmem:[%s17683_s3 + $0x148] sm:$0xff]  }
 0x523   : > { %v4457_v40 = vmax.f32 %v4455_v36, 0.0  ;;  %v12019_v35 = vld [vmem:[%s17683_s3 + $0x188] sm:$0xff]  }
 0x525   : > { %v4462_v14 = vrot.slane %v4457_v40, 3 }
 0x527   : > { %v4463_v60 = vsel %vm4460_vm1, %v4461_v25, %v4462_v14  ;;  %v4468_v45 = vsel %vm4460_vm1, %v4462_v14, 0.0  ;;  %vm18540_vm1 = vsmask.f32 7424 }
 0x528   : > { %v4476_v27 = vpack.c.bf16 %v4463_v60, %v4467_v16  ;;  %v4483_v4 = vrot.slane %v4463_v60, 2  ;;  %v4485_v28 = vrot.slane %v4468_v45, 2  ;;  %v4495_v52 = vrot.slane %v4468_v45, 4  ;;  %vm18542_vm2 = vmmov %vm18540_vm1 }
 0x529   : > { %v4506_v51 = vrot.slane %v4468_v45, 6  ;;  %v14702_v34 = vpack.c.bf16 %v4468_v45, %v4463_v60  ;;  %v4477_v11 = vpack.c.bf16 %v4468_v45, %v4468_v45  ;;  %v4493_v46 = vrot.slane %v4463_v60, 4 }
 0x52a   : > { %v4523_v26 = vshrl.u32 %v4476_v27, 16  ;;  %v4525_v62 = vshll.u32 %v4476_v27, 16  ;;  %v4484_v32 = vsel %vm18534_vm14, %v4482_v54, %v4483_v4  ;;  %v14706_v12 = vsel %vm18535_vm10, %v4483_v4, %v4485_v28  ;;  %v12001_v4 = vld [vmem:[%s17683_s3 + $0x118] sm:$0xff]  }
 0x52b   : > { %v4530_v8 = vshll.u32 %v4477_v11, 16  ;;  %v4494_v37 = vsel %vm4265_vm5, %v4492_v17, %v4493_v46  ;;  %v4496_v22 = vsel %vm4265_vm5, %v4493_v46, %v4495_v52  ;;  %v10122_v3 = vpack.c.bf16 %v14706_v12, %v4484_v32  ;;  %v11997_v17 = vld [vmem:[%s17683_s3 + $0x110] sm:$0xff]   ;;  %v12028_v52 = vld [vmem:[%s17683_s3 + $0x1a0] sm:$0xff]   ;;  %v12008_v46 = vld [vmem:[%s17683_s3 + $0x168] sm:$0xff]  }
 0x52c   : > { %v4527_v30 = vrot.slane %v4525_v62, 1  ;;  %v10119_v61 = vpack.c.bf16 %v4496_v22, %v4494_v37  ;;  %v4504_v38 = vrot.slane %v4463_v60, 6  ;;  %v4536_v42 = vrot.slane %v4523_v26, 2  ;;  %v12024_v60 = vld [vmem:[%s17683_s3 + $0x1d8] sm:$0xff]   ;;  %v12009_v32 = vld [vmem:[%s17683_s3 + $0x128] sm:$0xff]   ;;  %v12034_v37 = vld [vmem:[%s17683_s3 + $0x1b0] sm:$0xff]  }
 0x52d   : > { %v4537_v2 = vrot.slane %v4525_v62, 3  ;;  %v4539_v56 = vshrl.u32 %v4477_v11, 16  ;;  %v4542_v47 = vrot.slane %v4530_v8, 3  ;;  %v4532_v23 = vrot.slane %v4530_v8, 1  ;;  %v12005_v11 = vld [vmem:[%s17683_s3 + $0x120] sm:$0xff]   ;;  %v12033_v62 = vld [vmem:[%s17683_s3 + $0x1f0] sm:$0xff]  }
 0x52e   : > { %v4528_v21 = vor.u32 %v4527_v30, %v4523_v26  ;;  %10120 = vmatprep.mubr.msk.bf16.mxu0 %vm14712_vm11, %v10119_v61  ;;  %v4505_v49 = vsel %vm4502_vm9, %v4503_v48, %v4504_v38  ;;  %v4507_v10 = vsel %vm4502_vm9, %v4504_v38, %v4506_v51  ;;  %v4549_v25 = vshll.u32 %v14702_v34, 16  ;;  %vm18541_vm9 = vmmov %vm18535_vm10  ;;  %v12000_v48 = vld [vmem:[%s17683_s3 + $0x158] sm:$0xff]   ;;  %v12030_v51 = vld [vmem:[%s17683_s3 + $0x1e8] sm:$0xff]  }
 0x52f   : > { %10123 = vmatmul.mubr.msk.bf16.vlgmr.msra.gmra.mrb[212].mxu0 %vm14723_vm3, %v10122_v3  ;;  %v10125_v15 = vpack.c.bf16 %v4507_v10, %v4505_v49  ;;  %v4538_v13 = vor.u32 %v4537_v2, %v4536_v42  ;;  %v4541_v59 = vrot.slane %v4539_v56, 2  ;;  %v14752_v36 = vsel %vm18541_vm9, %v4485_v28, %v18457_v43  ;;  %v12004_v28 = vld [vmem:[%s17683_s3 + $0x160] sm:$0xff]   ;;  %v12031_v26 = vld [vmem:[%s17683_s3 + $0x1a8] sm:$0xff]   ;;  %v12012_v8 = vld [vmem:[%s17683_s3 + $0x170] sm:$0xff]  }
 0x530   : > { %v4533_v19 = vsel %vm18540_vm1, %v4528_v21, %v4532_v23  ;;  %11175 = vmatpush3.bf16.msra.mxu0 %v12016_v50  ;;  %v4547_v40 = vshrl.u32 %v14702_v34, 16  ;;  %v4551_v16 = vrot.slane %v4549_v25, 1  ;;  %v10131_v14 = vpack.c.bf16 %v14752_v36, %v14706_v12  ;;  %v12036_v22 = vld [vmem:[%s17683_s3 + $0x1f8] sm:$0xff]   ;;  %v12013_v3 = vld [vmem:[%s17683_s3 + $0x130] sm:$0xff]   ;;  %v12040_v38 = vld [vmem:[%s17684_s4] sm:$0xff]  }
 0x531   : > { %5168 = vmatprep.mubr.bf16.mxu1 %v4533_v19  ;;  %11176 = vmatprep.subr.bf16.mxu0 %v12018_v44  ;;  %v4543_v0 = vor.u32 %v4542_v47, %v4541_v59  ;;  %v12015_v30 = vld [vmem:[%s17683_s3 + $0x178] sm:$0xff]   ;;  %v12020_v42 = vld [vmem:[%s17683_s3 + $0x200] sm:$0xff]   ;;  %v12043_v44 = vld [vmem:[%s17684_s4 + $0x8] sm:$0xff]   ;;  %vm18545_vm10 = vcmask 130048  }
 0x532   : > { %10117 = vmatmul.mubr.msk.bf16.vlgmr.msra.gmra.mrb[196].mxu1 %vm14712_vm11, %v4476_v27  ;;  %v4552_v58 = vor.u32 %v4551_v16, %v4547_v40  ;;  %v12025_v27 = vld [vmem:[%s17683_s3 + $0x198] sm:$0xff]   ;;  %v12026_v2 = vld [vmem:[%s17683_s3 + $0x210] sm:$0xff]   ;;  %v12032_v47 = vld [vmem:[%s17683_s3 + $0x220] sm:$0xff]  }
 0x533   : > { %11153 = vmatpush3.bf16.msra.mxu1 %v11989_v1  ;;  %10126 = vmatprep.mubr.msk.bf16.mxu1 %vm14723_vm3, %v10125_v15  ;;  %v14767_v54 = vsel %vm4535_vm8, %v4538_v13, %v4543_v0  ;;  %v12037_v61 = vld [vmem:[%s17683_s3 + $0x1b8] sm:$0xff]   ;;  %v12035_v21 = vld [vmem:[%s17683_s3 + $0x228] sm:$0xff]   ;;  %v12038_v23 = vld [vmem:[%s17683_s3 + $0x230] sm:$0xff]  }
 0x534   : > { %11154 = vmatprep.subr.bf16.mxu1 %v11992_v20  ;;  %11177 = vmatpush3.bf16.msra.mxu0 %v12019_v35  ;;  %v4553_v45 = vsel %vm18542_vm2, %v4552_v58, %v18460_v24  ;;  %v12027_v24 = vld [vmem:[%s17683_s3 + $0x1e0] sm:$0xff]   ;;  %v12017_v50 = vld [vmem:[%s17683_s3 + $0x138] sm:$0xff]   ;;  %v12044_v15 = vld [vmem:[%s17684_s4 + $0x88] sm:$0xff]  }
 0x535   : > { %11178 = vmatprep.subr.bf16.mxu0 %v12021_v33  ;;  %5291 = vmatprep.mubr.bf16.mxu0 %v4553_v45  ;;  %v12029_v56 = vld [vmem:[%s17683_s3 + $0x218] sm:$0xff]   ;;  %v12041_v10 = vld [vmem:[%s17684_s4 + $0x80] sm:$0xff]   ;;  %v12045_v13 = vld [vmem:[%s17684_s4 + $0x48] sm:$0xff]  }
 0x536   : > { %v12039_v49 = vld [vmem:[%s17683_s3 + $0x238] sm:$0xff]   ;;  %v12042_v1 = vld [vmem:[%s17684_s4 + $0x40] sm:$0xff]   ;;  %v12047_v59 = vld [vmem:[%s17684_s4 + $0x90] sm:$0xff]  }
 0x537   : > { %11155 = vmatpush3.bf16.msra.mxu1 %v11993_v41  ;;  %v12048_v25 = vld [vmem:[%s17684_s4 + $0x50] sm:$0xff]   ;;  %v12049_v12 = vld [vmem:[%s17684_s4 + $0x18] sm:$0xff]   ;;  %v12052_v35 = vld [vmem:[%s17684_s4 + $0x20] sm:$0xff]  }
 0x538   : > { %11156 = vmatprep.subr.bf16.mxu1 %v11996_v39  ;;  %11179 = vmatpush3.bf16.msra.mxu0 %v12022_v18  ;;  %v12050_v19 = vld [vmem:[%s17684_s4 + $0x98] sm:$0xff]   ;;  %v12053_v36 = vld [vmem:[%s17684_s4 + $0xa0] sm:$0xff]   ;;  %v12055_v33 = vld [vmem:[%s17684_s4 + $0x28] sm:$0xff]  }
 0x539   : > { %11180 = vmatprep.subr.bf16.mxu0 %v12024_v60  ;;  %v12051_v20 = vld [vmem:[%s17684_s4 + $0x58] sm:$0xff]   ;;  %v12054_v0 = vld [vmem:[%s17684_s4 + $0x60] sm:$0xff]   ;;  %v12056_v40 = vld [vmem:[%s17684_s4 + $0xa8] sm:$0xff]  }
 0x53a   : > { %v12057_v16 = vld [vmem:[%s17684_s4 + $0x68] sm:$0xff]   ;;  %v12059_v41 = vld [vmem:[%s17684_s4 + $0xb0] sm:$0xff]   ;;  %v12061_v58 = vld [vmem:[%s17684_s4 + $0x38] sm:$0xff]  }
 0x53b   : > { %11157 = vmatpush3.bf16.msra.mxu1 %v11997_v17  ;;  %v12062_v39 = vld [vmem:[%s17684_s4 + $0xb8] sm:$0xff]   ;;  %v12064_v60 = vld [vmem:[%s17684_s4 + $0x100] sm:$0xff]   ;;  %vm18544_vm14 = vmmov %vm18541_vm9 }
 0x53c   : > { %11158 = vmatprep.subr.bf16.mxu1 %v12000_v48  ;;  %11181 = vmatpush3.bf16.msra.mxu0 %v12025_v27  ;;  %v12063_v18 = vld [vmem:[%s17684_s4 + $0x78] sm:$0xff]   ;;  %v12066_v45 = vld [vmem:[%s17684_s4 + $0x180] sm:$0xff]  }
 0x53d   : > { %11182 = vmatprep.subr.bf16.mxu0 %v12027_v24 }
 0x53f   : > { %11159 = vmatpush3.bf16.msra.mxu1 %v12001_v4 }
 0x540   : > { %11160 = vmatprep.subr.bf16.mxu1 %v12004_v28  ;;  %11183 = vmatpush3.bf16.msra.mxu0 %v12028_v52  ;;  %v10042_v52 = vld [vmem:[%s17691_s11 + $0x2] ss:$0 sm:$0xff] }
 0x541   : > { %11184 = vmatprep.subr.bf16.mxu0 %v12030_v51 }
 0x543   : > { %11161 = vmatpush3.bf16.msra.mxu1 %v12005_v11 }
 0x544   : > { %11162 = vmatprep.subr.bf16.mxu1 %v12008_v46  ;;  %11185 = vmatpush3.bf16.msra.mxu0 %v12031_v26 }
 0x545   : > { %11186 = vmatprep.subr.bf16.mxu0 %v12033_v62 }
 0x547   : > { %11163 = vmatpush3.bf16.msra.mxu1 %v12009_v32 }
 0x548   : > { %11164 = vmatprep.subr.bf16.mxu1 %v12012_v8  ;;  %11187 = vmatpush3.bf16.msra.mxu0 %v12034_v37 }
 0x549   : > { %11188 = vmatprep.subr.bf16.mxu0 %v12036_v22 }
 0x54b   : > { %11165 = vmatpush3.bf16.msra.mxu1 %v12013_v3 }
 0x54c   : > { %11166 = vmatprep.subr.bf16.mxu1 %v12015_v30  ;;  %11189 = vmatpush3.bf16.msra.mxu0 %v12037_v61 }
 0x54d   : > { %11678 = vmatprep.subr.bf16.mxu0 %v18448_v55 }
 0x54f   : > { %11167 = vmatpush3.bf16.msra.mxu1 %v12017_v50  ;;  %10129 = vmatmul.mubr.msk.bf16.vlgmr.msra.gmra.mrb[216].mxu0 %vm14712_vm11, %v14702_v34  ;;  %v12046_v34 = vld [vmem:[%s17684_s4 + $0x10] sm:$0xff]   ;;  %vm18546_vm11 = vmmov %vm18545_vm10 }
 0x550   : > { %11658 = vmatprep.subr.bf16.mxu1 %v18448_v55  ;;  %11679 = vmatpush3.bf16.msra.mxu0 %v12040_v38 }
 0x551   : > { %11680 = vmatprep.subr.bf16.mxu0 %v18448_v55  ;;  %11694 = vmatprep.mubr.msk.bf16.mxu0 %vm18525_vm12, %v18448_v55 }
 0x552   : > { %5251 = vmatmul.mubr.bf16.vlgmr.msra.gmra.mrb[200].mxu1 %v14767_v54  ;;  %v12060_v54 = vld [vmem:[%s17684_s4 + $0x70] sm:$0xff]  }
 0x553   : > { %11659 = vmatpush3.bf16.msra.mxu1 %v12020_v42  ;;  %11674 = vmatprep.mubr.msk.bf16.mxu1 %vm18525_vm12, %v18448_v55 }
 0x554   : > { %11660 = vmatprep.subr.bf16.mxu1 %v18448_v55  ;;  %11681 = vmatpush3.bf16.msra.mxu0 %v12043_v44 }
 0x555   : > { %11682 = vmatprep.subr.bf16.mxu0 %v18448_v55 }
 0x557   : > { %11661 = vmatpush3.bf16.msra.mxu1 %v12023_v53 }
 0x558   : > { %11662 = vmatprep.subr.bf16.mxu1 %v18448_v55  ;;  %11683 = vmatpush3.bf16.msra.mxu0 %v12046_v34 }
 0x559   : > { %11684 = vmatprep.subr.bf16.mxu0 %v18448_v55 }
 0x55b   : > { %11663 = vmatpush3.bf16.msra.mxu1 %v12026_v2 }
 0x55c   : > { %11664 = vmatprep.subr.bf16.mxu1 %v18448_v55  ;;  %11685 = vmatpush3.bf16.msra.mxu0 %v12049_v12 }
 0x55d   : > { %11686 = vmatprep.subr.bf16.mxu0 %v18448_v55 }
 0x55f   : > { %11665 = vmatpush3.bf16.msra.mxu1 %v12029_v56 }
 0x560   : > { %11666 = vmatprep.subr.bf16.mxu1 %v18448_v55  ;;  %11687 = vmatpush3.bf16.msra.mxu0 %v12052_v35 }
 0x561   : > { %11688 = vmatprep.subr.bf16.mxu0 %v18448_v55 }
 0x563   : > { %11667 = vmatpush3.bf16.msra.mxu1 %v12032_v47 }
 0x564   : > { %11668 = vmatprep.subr.bf16.mxu1 %v18448_v55  ;;  %11689 = vmatpush3.bf16.msra.mxu0 %v12055_v33 }
 0x565   : > { %11690 = vmatprep.subr.bf16.mxu0 %v18448_v55 }
 0x567   : > { %11669 = vmatpush3.bf16.msra.mxu1 %v12035_v21 }
 0x568   : > { %11670 = vmatprep.subr.bf16.mxu1 %v18448_v55 }
 0x56b   : > { %11671 = vmatpush3.bf16.msra.mxu1 %v12038_v23 }
 0x56c   : > { %11672 = vmatprep.subr.bf16.mxu1 %v18448_v55 }
 0x56f   : > { %11673 = vmatpush3.bf16.msra.mxu1 %v12039_v49 }
 0x570   : > { %11214 = vmatprep.subr.bf16.mxu1 %v12041_v10 }
 0x572   : > { %11675 = vmatmul.mubr.msk.bf16.vlgmr.msra.gmra.mrb[204].mxu1 %vm14723_vm3, %v10131_v14  ;;  %v12058_v14 = vld [vmem:[%s17684_s4 + $0x30] sm:$0xff]  }
 0x573   : > { %11215 = vmatpush3.bf16.msra.mxu1 %v12042_v1  ;;  %11691 = vmatpush3.bf16.msra.mxu0 %v12058_v14 }
 0x574   : > { %11216 = vmatprep.subr.bf16.mxu1 %v12044_v15  ;;  %11692 = vmatprep.subr.bf16.mxu0 %v18448_v55 }
 0x577   : > { %11217 = vmatpush3.bf16.msra.mxu1 %v12045_v13  ;;  %11693 = vmatpush3.bf16.msra.mxu0 %v12061_v58  ;;  %v12067_v58 = vld [vmem:[%s17684_s4 + $0x108] sm:$0xff]  }
 0x578   : > { %11218 = vmatprep.subr.bf16.mxu1 %v12047_v59  ;;  %11236 = vmatprep.subr.bf16.mxu0 %v12064_v60 }
 0x57b   : > { %11219 = vmatpush3.bf16.msra.mxu1 %v12048_v25 }
 0x57c   : > { %11220 = vmatprep.subr.bf16.mxu1 %v12050_v19 }
 0x57f   : > { %11221 = vmatpush3.bf16.msra.mxu1 %v12051_v20 }
 0x580   : > { %11222 = vmatprep.subr.bf16.mxu1 %v12053_v36  ;;  %v14975_v36 = vrot.slane %v18448_v55, 1 }
 0x583   : > { %11223 = vmatpush3.bf16.msra.mxu1 %v12054_v0  ;;  %v5826_v0 = vrot.slane %v18448_v55, 5 }
 0x584   : > { %11224 = vmatprep.subr.bf16.mxu1 %v12056_v40  ;;  %v12065_v40 = vld [vmem:[%s17684_s4 + $0xc0] sm:$0xff]  }
 0x587   : > { %11225 = vmatpush3.bf16.msra.mxu1 %v12057_v16 }
 0x588   : > { %11226 = vmatprep.subr.bf16.mxu1 %v12059_v41 }
 0x58b   : > { %11227 = vmatpush3.bf16.msra.mxu1 %v12060_v54 }
 0x58c   : > { %11228 = vmatprep.subr.bf16.mxu1 %v12062_v39  ;;  %v18543_v39 = vmov 0.0|0.0  }
 0x58f   : > { %11229 = vmatpush3.bf16.msra.mxu1 %v12063_v18  ;;  %v5677_v18 = vrot.slane %v18543_v39, 2  ;;  %v12111_v39 = vld [vmem:[%s17684_s4 + $0x1f8] sm:$0xff]  }
 0x590   : > { %11258 = vmatprep.subr.bf16.mxu1 %v12066_v45 }
 0x602   : > { %v11146_v17 = vpop.f32.mrb[212].mxu0 }
 0x603   : > { %v11147_v48 = vpop.f32.mrb[213].mxu0 }
 0x604   : > { %v11148_v27 = vadd.f32 %v11147_v48, %v11146_v17  ;;  %v11149_v24 = vpop.f32.mrb[214].mxu0 }
 0x605   : > { %v11124_v4 = vpop.f32.mrb[196].mxu1  ;;  %v11150_v28 = vpop.f32.mrb[215].mxu0 }
 0x606   : > { %v11125_v51 = vpop.f32.mrb[197].mxu1  ;;  %v11151_v11 = vadd.f32 %v11150_v28, %v11149_v24  ;;  %v12069_v28 = vld [vmem:[%s17684_s4 + $0xc8] sm:$0xff]  }
 0x607   : > { %v11126_v46 = vadd.f32 %v11125_v51, %v11124_v4  ;;  %v11127_v26 = vpop.f32.mrb[198].mxu1 }
 0x608   : > { %v11128_v62 = vpop.f32.mrb[199].mxu1 }
 0x609   : > { %v5171_v32 = vadd.f32 %v11126_v46, %v10042_v52  ;;  %v11129_v8 = vadd.f32 %v11128_v62, %v11127_v26  ;;  %v12072_v26 = vld [vmem:[%s17684_s4 + $0x148] sm:$0xff]   ;;  %v12073_v62 = vld [vmem:[%s17684_s4 + $0xd0] sm:$0xff]  }
 0x60b   : > { %v5174_v37 = vadd.f32 %v11129_v8, %v10042_v52  ;;  %v5212_v22 = vadd.f32 %v11148_v27, %v5171_v32  ;;  %v12068_v27 = vld [vmem:[%s17684_s4 + $0x140] sm:$0xff]   ;;  %v12070_v52 = vld [vmem:[%s17684_s4 + $0x188] sm:$0xff]   ;;  %v12074_v32 = vld [vmem:[%s17684_s4 + $0x190] sm:$0xff]  }
 0x60c   : > { %v12075_v8 = vld [vmem:[%s17684_s4 + $0x118] sm:$0xff]  }
 0x60d   : > { %v5215_v3 = vadd.f32 %v11151_v11, %v5174_v37  ;;  %v12071_v11 = vld [vmem:[%s17684_s4 + $0x110] sm:$0xff]  }
 0x60e   : > { %v12076_v37 = vld [vmem:[%s17684_s4 + $0x150] sm:$0xff]  }
 0x622   : > { %v11190_v30 = vpop.f32.mrb[216].mxu0 }
 0x623   : > { %v11191_v61 = vpop.f32.mrb[217].mxu0 }
 0x624   : > { %v11192_v50 = vadd.f32 %v11191_v61, %v11190_v30  ;;  %v11193_v38 = vpop.f32.mrb[218].mxu0  ;;  %v12079_v30 = vld [vmem:[%s17684_s4 + $0x120] sm:$0xff]   ;;  %v12080_v61 = vld [vmem:[%s17684_s4 + $0x158] sm:$0xff]  }
 0x625   : > { %v11168_v42 = vpop.f32.mrb[200].mxu1  ;;  %v11194_v44 = vpop.f32.mrb[219].mxu0 }
 0x626   : > { %v11169_v53 = vpop.f32.mrb[201].mxu1  ;;  %v11195_v34 = vadd.f32 %v11194_v44, %v11193_v38  ;;  %v12082_v38 = vld [vmem:[%s17684_s4 + $0x1a0] sm:$0xff]  }
 0x627   : > { %v11170_v2 = vadd.f32 %v11169_v53, %v11168_v42  ;;  %v11171_v56 = vpop.f32.mrb[202].mxu1  ;;  %v12083_v42 = vld [vmem:[%s17684_s4 + $0x128] sm:$0xff]   ;;  %v12084_v44 = vld [vmem:[%s17684_s4 + $0x160] sm:$0xff]  }
 0x628   : > { %v11172_v47 = vpop.f32.mrb[203].mxu1  ;;  %v12085_v53 = vld [vmem:[%s17684_s4 + $0xe8] sm:$0xff]  }
 0x629   : > { %v5253_v21 = vadd.f32 %v11170_v2, %v5212_v22  ;;  %v11173_v23 = vadd.f32 %v11172_v47, %v11171_v56  ;;  %v12077_v22 = vld [vmem:[%s17684_s4 + $0xd8] sm:$0xff]   ;;  %v12087_v2 = vld [vmem:[%s17684_s4 + $0x130] sm:$0xff]   ;;  %v12088_v56 = vld [vmem:[%s17684_s4 + $0x168] sm:$0xff]  }
 0x62a   : > { %v12089_v47 = vld [vmem:[%s17684_s4 + $0xf0] sm:$0xff]  }
 0x62b   : > { %v5256_v49 = vadd.f32 %v11173_v23, %v5215_v3  ;;  %v5294_v10 = vadd.f32 %v11192_v50, %v5253_v21  ;;  %v12078_v3 = vld [vmem:[%s17684_s4 + $0x198] sm:$0xff]   ;;  %v12081_v50 = vld [vmem:[%s17684_s4 + $0xe0] sm:$0xff]   ;;  %v12090_v21 = vld [vmem:[%s17684_s4 + $0x1b0] sm:$0xff]  }
 0x62c   : > { %v12091_v23 = vld [vmem:[%s17684_s4 + $0x138] sm:$0xff]  }
 0x62d   : > { %v5297_v1 = vadd.f32 %v11195_v34, %v5256_v49  ;;  %v12086_v34 = vld [vmem:[%s17684_s4 + $0x1a8] sm:$0xff]   ;;  %v12092_v49 = vld [vmem:[%s17684_s4 + $0x170] sm:$0xff]  }
 0x645   : > { %v5334_v15 = vpop.f32.mrb[204].mxu1 }
 0x646   : > { %v5335_v13 = vadd.f32 %v5334_v15, %v5294_v10  ;;  %v11676_v59 = vpop.f32.mrb[205].mxu1  ;;  %v12093_v10 = vld [vmem:[%s17684_s4 + $0xf8] sm:$0xff]   ;;  %v12096_v15 = vld [vmem:[%s17684_s4 + $0x200] sm:$0xff]  }
 0x647   : > { %v5337_v25 = vpop.f32.mrb[206].mxu1  ;;  %v12097_v59 = vld [vmem:[%s17684_s4 + $0x1c0] sm:$0xff]  }
 0x648   : > { %v5341_v12 = vmax.f32 %v5335_v13, 0.0  ;;  %v5338_v19 = vadd.f32 %v5337_v25, %v5297_v1  ;;  %v11677_v20 = vpop.f32.mrb[207].mxu1  ;;  %v12094_v1 = vld [vmem:[%s17684_s4 + $0x1b8] sm:$0xff]   ;;  %v12098_v25 = vld [vmem:[%s17684_s4 + $0x208] sm:$0xff]  }
 0x649   : > { %v12095_v13 = vld [vmem:[%s17684_s4 + $0x178] sm:$0xff]   ;;  %v12101_v20 = vld [vmem:[%s17684_s4 + $0x1d0] sm:$0xff]  }
 0x64a   : > { %v5342_v35 = vmax.f32 %v5338_v19, 0.0  ;;  %v5459_v33 = vrot.slane %v5341_v12, 1  ;;  %v5823_v16 = vrot.slane %v5341_v12, 5  ;;  %v12100_v19 = vld [vmem:[%s17684_s4 + $0x210] sm:$0xff]  }
 0x64c   : > { %v14981_v14 = vpack.c.bf16 %v5342_v35, %v5341_v12  ;;  %v5460_v41 = vrot.slane %v5342_v35, 1  ;;  %v5824_v54 = vrot.slane %v5342_v35, 5  ;;  %v12099_v12 = vld [vmem:[%s17684_s4 + $0x1c8] sm:$0xff]   ;;  %v12102_v35 = vld [vmem:[%s17684_s4 + $0x218] sm:$0xff]  }
 0x64e   : > { %v5461_v60 = vsel %vm5458_vm13, %v5459_v33, %v5460_v41  ;;  %v5463_v45 = vsel %vm5458_vm13, %v5460_v41, %v14975_v36  ;;  %v14990_v17 = vsel %vm5822_vm6, %v5823_v16, %v5824_v54  ;;  %v14992_v48 = vsel %vm5822_vm6, %v5824_v54, %v5826_v0  ;;  %11695 = vmatmul.mubr.bf16.vlgmr.msra.gmra.mrb[220].mxu0 %v14981_v14  ;;  %v12103_v0 = vld [vmem:[%s17684_s4 + $0x1d8] sm:$0xff]   ;;  %v12104_v33 = vld [vmem:[%s17684_s4 + $0x220] sm:$0xff]   ;;  %v12106_v16 = vld [vmem:[%s17684_s4 + $0x228] sm:$0xff]  }
 0x64f   : > { %v14998_v24 = vpack.c.bf16 %v5463_v45, %v5461_v60  ;;  %v10211_v4 = vpack.c.bf16 %v14992_v48, %v14990_v17  ;;  %11237 = vmatpush3.bf16.msra.mxu0 %v12065_v40  ;;  %5629 = vmatprep.mubr.bf16.mxu1 %v14981_v14  ;;  %v5676_v51 = vrot.slane %v14981_v14, 2  ;;  %v12105_v40 = vld [vmem:[%s17684_s4 + $0x1e0] sm:$0xff]   ;;  %v12108_v41 = vld [vmem:[%s17684_s4 + $0x230] sm:$0xff]  }
 0x650   : > { %11238 = vmatprep.subr.bf16.mxu0 %v12067_v58  ;;  %5811 = vmatprep.mubr.bf16.mxu0 %v14981_v14  ;;  %v12109_v54 = vld [vmem:[%s17684_s4 + $0x1f0] sm:$0xff]   ;;  %v12110_v58 = vld [vmem:[%s17684_s4 + $0x238] sm:$0xff]  }
 0x651   : > { %10160 = vmatmul.mubr.msk.bf16.vlgmr.msra.gmra.mrb[208].mxu1 %vm14723_vm3, %v14998_v24  ;;  %v5678_v46 = vsel %vm18544_vm14, %v5676_v51, %v5677_v18  ;;  %v10133_v18 = vld [vmem:[%s17691_s11 + $0x3] ss:$0 sm:$0xff] }
 0x652   : > { %11259 = vmatpush3.bf16.msra.mxu1 %v12068_v27  ;;  %6121 = vmatprep.mubr.bf16.mxu1 %v5678_v46 }
 0x653   : > { %11239 = vmatpush3.bf16.msra.mxu0 %v12069_v28  ;;  %11260 = vmatprep.subr.bf16.mxu1 %v12070_v52 }
 0x654   : > { %11240 = vmatprep.subr.bf16.mxu0 %v12071_v11 }
 0x656   : > { %11261 = vmatpush3.bf16.msra.mxu1 %v12072_v26 }
 0x657   : > { %11241 = vmatpush3.bf16.msra.mxu0 %v12073_v62  ;;  %11262 = vmatprep.subr.bf16.mxu1 %v12074_v32 }
 0x658   : > { %11242 = vmatprep.subr.bf16.mxu0 %v12075_v8 }
 0x65a   : > { %11263 = vmatpush3.bf16.msra.mxu1 %v12076_v37 }
 0x65b   : > { %11243 = vmatpush3.bf16.msra.mxu0 %v12077_v22  ;;  %11264 = vmatprep.subr.bf16.mxu1 %v12078_v3 }
 0x65c   : > { %11244 = vmatprep.subr.bf16.mxu0 %v12079_v30 }
 0x65e   : > { %11265 = vmatpush3.bf16.msra.mxu1 %v12080_v61 }
 0x65f   : > { %11245 = vmatpush3.bf16.msra.mxu0 %v12081_v50  ;;  %11266 = vmatprep.subr.bf16.mxu1 %v12082_v38 }
 0x660   : > { %11246 = vmatprep.subr.bf16.mxu0 %v12083_v42 }
 0x662   : > { %11267 = vmatpush3.bf16.msra.mxu1 %v12084_v44 }
 0x663   : > { %11247 = vmatpush3.bf16.msra.mxu0 %v12085_v53  ;;  %11268 = vmatprep.subr.bf16.mxu1 %v12086_v34 }
 0x664   : > { %11248 = vmatprep.subr.bf16.mxu0 %v12087_v2 }
 0x666   : > { %11269 = vmatpush3.bf16.msra.mxu1 %v12088_v56 }
 0x667   : > { %11249 = vmatpush3.bf16.msra.mxu0 %v12089_v47  ;;  %11270 = vmatprep.subr.bf16.mxu1 %v12090_v21 }
 0x668   : > { %11250 = vmatprep.subr.bf16.mxu0 %v12091_v23 }
 0x66a   : > { %11271 = vmatpush3.bf16.msra.mxu1 %v12092_v49 }
 0x66b   : > { %11251 = vmatpush3.bf16.msra.mxu0 %v12093_v10  ;;  %11272 = vmatprep.subr.bf16.mxu1 %v12094_v1 }
 0x66c   : > { %11280 = vmatprep.subr.bf16.mxu0 %v12096_v15 }
 0x66e   : > { %5812 = vmatmul.mubr.bf16.vlgmr.msra.gmra.mrb[224].mxu0 %v5678_v46  ;;  %11273 = vmatpush3.bf16.msra.mxu1 %v12095_v13 }
 0x66f   : > { %11281 = vmatpush3.bf16.msra.mxu0 %v12097_v59  ;;  %6162 = vmatprep.mubr.bf16.mxu0 %v14981_v14  ;;  %v12107_v14 = vld [vmem:[%s17684_s4 + $0x1e8] sm:$0xff]  }
 0x670   : > { %11282 = vmatprep.subr.bf16.mxu0 %v12098_v25  ;;  %11698 = vmatprep.subr.bf16.mxu1 %v18448_v55 }
 0x671   : > { %10212 = vmatmul.mubr.msk.bf16.vlgmr.msra.gmra.mrb[212].mxu1 %vm14723_vm3, %v10211_v4 }
 0x672   : > { %11700 = vmatprep.mubr.msk.bf16.mxu1 %vm18525_vm12, %v18448_v55 }
 0x673   : > { %11283 = vmatpush3.bf16.msra.mxu0 %v12099_v12 }
 0x674   : > { %11284 = vmatprep.subr.bf16.mxu0 %v12100_v19 }
 0x677   : > { %11285 = vmatpush3.bf16.msra.mxu0 %v12101_v20 }
 0x678   : > { %11286 = vmatprep.subr.bf16.mxu0 %v12102_v35 }
 0x67b   : > { %11287 = vmatpush3.bf16.msra.mxu0 %v12103_v0 }
 0x67c   : > { %11288 = vmatprep.subr.bf16.mxu0 %v12104_v33 }
 0x67f   : > { %11289 = vmatpush3.bf16.msra.mxu0 %v12105_v40 }
 0x680   : > { %11290 = vmatprep.subr.bf16.mxu0 %v12106_v16 }
 0x683   : > { %11291 = vmatpush3.bf16.msra.mxu0 %v12107_v14 }
 0x684   : > { %11292 = vmatprep.subr.bf16.mxu0 %v12108_v41 }
 0x687   : > { %11293 = vmatpush3.bf16.msra.mxu0 %v12109_v54 }
 0x688   : > { %11294 = vmatprep.subr.bf16.mxu0 %v12110_v58 }
 0x68b   : > { %11295 = vmatpush3.bf16.msra.mxu0 %v12111_v39 }
 0x68c   : > { %11704 = vmatprep.subr.bf16.mxu0 %v18448_v55 }
 0x68e   : > { %10215 = vmatmul.mubr.msk.bf16.vlgmr.msra.gmra.mrb[228].mxu0 %vm14723_vm3, %v14998_v24 }
 0x68f   : > { %11706 = vmatprep.mubr.msk.bf16.mxu0 %vm18525_vm12, %v18448_v55 }
 0x721   : > { %v5447_v60 = vpop.f32.mrb[220].mxu0 }
 0x722   : > { %v5448_v45 = vadd.f32 %v10133_v18, %v5447_v60  ;;  %v11696_v17 = vpop.f32.mrb[221].mxu0 }
 0x723   : > { %v5450_v48 = vpop.f32.mrb[222].mxu0 }
 0x724   : > { %v11230_v27 = vpop.f32.mrb[208].mxu1  ;;  %v5451_v4 = vadd.f32 %v10133_v18, %v5450_v48  ;;  %v11697_v28 = vpop.f32.mrb[223].mxu0  ;;  %v5454_v46 = vmax.f32 %v5448_v45, 0.0 }
 0x725   : > { %v11231_v52 = vpop.f32.mrb[209].mxu1 }
 0x726   : > { %v11232_v51 = vadd.f32 %v11231_v52, %v11230_v27  ;;  %v11233_v11 = vpop.f32.mrb[210].mxu1  ;;  %v5455_v62 = vmax.f32 %v5451_v4, 0.0  ;;  %v6234_v37 = vrot.slane %v5454_v46, 4 }
 0x727   : > { %v11234_v9 = vpop.f32.mrb[211].mxu1 }
 0x728   : > { %v5632_v24 = vadd.f32 %v11232_v51, %v10133_v18  ;;  %v11235_v26 = vadd.f32 %v11234_v9, %v11233_v11  ;;  %v6334_v61 = vrot.slane %v5455_v62, 4 }
 0x72a   : > { %v5638_v32 = vmax.f32 %v5632_v24, 0.0  ;;  %v5635_v8 = vadd.f32 %v11235_v26, %v10133_v18  ;;  %v12113_v26 = vld [vmem:[%s17685_s5] sm:$0xff]  }
 0x72c   : > { %v6176_v22 = vrot.slane %v5638_v32, 4  ;;  %v5639_v3 = vmax.f32 %v5635_v8, 0.0  ;;  %v6239_v30 = vsel %vm4265_vm5, %v6234_v37, %v5638_v32  ;;  %v12115_v32 = vld [vmem:[%s17685_s5 + $0x10] sm:$0xff]   ;;  %v12116_v8 = vld [vmem:[%s17685_s5 + $0x18] sm:$0xff]   ;;  %v12117_v37 = vld [vmem:[%s17685_s5 + $0x20] sm:$0xff]  }
 0x72e   : > { %v6284_v50 = vrot.slane %v5639_v3, 4  ;;  %v6181_v38 = vsel %vm4265_vm5, %v5454_v46, %v6176_v22  ;;  %v6339_v42 = vsel %vm4265_vm5, %v6334_v61, %v5639_v3  ;;  %v12118_v22 = vld [vmem:[%s17685_s5 + $0x28] sm:$0xff]   ;;  %v12119_v3 = vld [vmem:[%s17685_s5 + $0x30] sm:$0xff]   ;;  %v12122_v61 = vld [vmem:[%s17685_s5 + $0x40] sm:$0xff]  }
 0x730   : > { %v6289_v44 = vsel %vm4265_vm5, %v5455_v62, %v6284_v50  ;;  %v12114_v62 = vld [vmem:[%s17685_s5 + $0x8] sm:$0xff]  }
 0x731   : > { %v12125_v50 = vld [vmem:[%s17685_s5 + $0x88] sm:$0xff]  }
 0x741   : > { %v11252_v53 = vpop.f32.mrb[224].mxu0 }
 0x742   : > { %v11253_v34 = vpop.f32.mrb[225].mxu0 }
 0x743   : > { %v11254_v2 = vadd.f32 %v11253_v34, %v11252_v53  ;;  %v11255_v56 = vpop.f32.mrb[226].mxu0  ;;  %v12133_v53 = vld [vmem:[%s17685_s5 + $0x98] sm:$0xff]  }
 0x744   : > { %v11256_v47 = vpop.f32.mrb[227].mxu0  ;;  %v11274_v21 = vpop.f32.mrb[212].mxu1  ;;  %v12134_v34 = vld [vmem:[%s17685_s5 + $0x58] sm:$0xff]  }
 0x745   : > { %v11257_v23 = vadd.f32 %v11256_v47, %v11255_v56  ;;  %v11275_v49 = vpop.f32.mrb[213].mxu1  ;;  %v5814_v59 = vadd.f32 %v11254_v2, %v10133_v18  ;;  %v12137_v2 = vld [vmem:[%s17685_s5 + $0xa0] sm:$0xff]   ;;  %v12141_v47 = vld [vmem:[%s17685_s5 + $0xa8] sm:$0xff]  }
 0x746   : > { %v11276_v10 = vadd.f32 %v11275_v49, %v11274_v21  ;;  %v11277_v1 = vpop.f32.mrb[214].mxu1  ;;  %v12138_v56 = vld [vmem:[%s17685_s5 + $0x60] sm:$0xff]   ;;  %v12142_v21 = vld [vmem:[%s17685_s5 + $0x68] sm:$0xff]   ;;  %v12145_v49 = vld [vmem:[%s17685_s5 + $0xb0] sm:$0xff]  }
 0x747   : > { %v11278_v15 = vpop.f32.mrb[215].mxu1  ;;  %v5817_v25 = vadd.f32 %v11257_v23, %v10133_v18  ;;  %v5820_v20 = vmax.f32 %v5814_v59, 0.0  ;;  %v12120_v23 = vld [vmem:[%s17685_s5 + $0x38] sm:$0xff]   ;;  %v12153_v59 = vld [vmem:[%s17685_s5 + $0x180] sm:$0xff]  }
 0x748   : > { %v11279_v13 = vadd.f32 %v11278_v15, %v11277_v1  ;;  %v6124_v35 = vadd.f32 %v11276_v10, %v10133_v18  ;;  %v12146_v10 = vld [vmem:[%s17685_s5 + $0x70] sm:$0xff]   ;;  %v12123_v1 = vld [vmem:[%s17685_s5 + $0x100] sm:$0xff]   ;;  %v12149_v15 = vld [vmem:[%s17685_s5 + $0xb8] sm:$0xff]  }
 0x749   : > { %v5821_v16 = vmax.f32 %v5817_v25, 0.0  ;;  %v6237_v58 = vrot.slane %v5820_v20, 4 }
 0x74a   : > { %v6127_v14 = vadd.f32 %v11279_v13, %v10133_v18  ;;  %v12112_v18 = vld [vmem:[%s17689_s9] sm:$0xff]   ;;  %v12150_v13 = vld [vmem:[%s17685_s5 + $0x78] sm:$0xff]  }
 0x74b   : > { %v6337_v45 = vrot.slane %v5821_v16, 4 }
 0x761   : > { %v11296_v12 = vpop.f32.mrb[228].mxu0 }
 0x762   : > { %v11297_v19 = vpop.f32.mrb[229].mxu0 }
 0x763   : > { %v11298_v0 = vadd.f32 %v11297_v19, %v11296_v12  ;;  %v11299_v33 = vpop.f32.mrb[230].mxu0 }
 0x764   : > { %v11300_v40 = vpop.f32.mrb[231].mxu0 }
 0x765   : > { %v6165_v41 = vadd.f32 %v11298_v0, %v6124_v35  ;;  %v11301_v54 = vadd.f32 %v11300_v40, %v11299_v33 }
 0x767   : > { %v6171_v39 = vmax.f32 %v6165_v41, 0.0  ;;  %v6168_v60 = vadd.f32 %v11301_v54, %v6127_v14 }
 0x769   : > { %v6179_v17 = vrot.slane %v6171_v39, 4  ;;  %v6240_v48 = vsel %vm4265_vm5, %v6237_v58, %v6171_v39  ;;  %v6172_v27 = vmax.f32 %v6168_v60, 0.0 }
 0x76a   : > { %v6241_v4 = vpack.c.bf16 %v6240_v48, %v6239_v30  ;;  %v12121_v30 = vld [vmem:[%s17685_s5 + $0x80] sm:$0xff]   ;;  %v12127_v48 = vld [vmem:[%s17685_s5 + $0x108] sm:$0xff]  }
 0x76b   : > { %v6287_v28 = vrot.slane %v6172_v27, 4  ;;  %v6340_v52 = vsel %vm4265_vm5, %v6337_v45, %v6172_v27  ;;  %v6182_v51 = vsel %vm4265_vm5, %v5820_v20, %v6179_v17  ;;  %v12124_v45 = vld [vmem:[%s17685_s5 + $0xc0] sm:$0xff]  }
 0x76c   : > { %11705 = vmatpush3.bf16.msra.mxu0 %v6241_v4  ;;  %v6183_v11 = vpack.c.bf16 %v6182_v51, %v6181_v38  ;;  %v6341_v46 = vpack.c.bf16 %v6340_v52, %v6339_v42  ;;  %v12126_v38 = vld [vmem:[%s17685_s5 + $0x48] sm:$0xff]   ;;  %v12129_v42 = vld [vmem:[%s17685_s5 + $0x90] sm:$0xff]  }
 0x76d   : > { %11716 = vmatprep.subr.bf16.mxu0 %v18448_v55  ;;  %v6290_v9 = vsel %vm4265_vm5, %v5821_v16, %v6287_v28  ;;  %vm18547_vm5 = vmmov %vm18545_vm10  ;;  %v12154_v28 = vld [vmem:[%s17685_s5 + $0x140] sm:$0xff]  }
 0x76e   : > { %11699 = vmatpush3.bf16.msra.mxu1 %v6183_v11  ;;  %v6291_v24 = vpack.c.bf16 %v6290_v9, %v6289_v44  ;;  %vm18548_vm3 = vmmov %vm18547_vm5  ;;  %v12130_v44 = vld [vmem:[%s17685_s5 + $0x50] sm:$0xff]   ;;  %v12157_v11 = vld [vmem:[%s17685_s5 + $0x188] sm:$0xff]  }
 0x76f   : > { %11707 = vmatmul.mubr.msk.bf16.vlgmr.msra.gmra.mrb[232].mxu0 %vm18545_vm10, %v12112_v18  ;;  %11710 = vmatprep.subr.bf16.mxu1 %v18448_v55 }
 0x770   : > { %11717 = vmatpush3.bf16.msra.mxu0 %v6341_v46  ;;  %11718 = vmatprep.mubr.msk.bf16.mxu0 %vm18525_vm12, %v18448_v55  ;;  %v12128_v46 = vld [vmem:[%s17685_s5 + $0xc8] sm:$0xff]  }
 0x771   : > { %11701 = vmatmul.mubr.msk.bf16.vlgmr.msra.gmra.mrb[216].mxu1 %vm18546_vm11, %v12112_v18  ;;  %11322 = vmatprep.subr.bf16.mxu0 %v12121_v30 }
 0x772   : > { %11711 = vmatpush3.bf16.msra.mxu1 %v6291_v24  ;;  %11712 = vmatprep.mubr.msk.bf16.mxu1 %vm18525_vm12, %v18448_v55  ;;  %v12131_v24 = vld [vmem:[%s17685_s5 + $0x110] sm:$0xff]  }
 0x773   : > { %11722 = vmatprep.subr.bf16.mxu1 %v12113_v26 }
 0x777   : > { %11719 = vmatmul.mubr.msk.bf16.vlgmr.msra.gmra.mrb[236].mxu0 %vm18547_vm5, %v12112_v18  ;;  %vm18571_vm5 = vmmov %vm18541_vm9 }
 0x778   : > { %11323 = vmatpush3.bf16.msra.mxu0 %v12122_v61  ;;  %v12158_v61 = vld [vmem:[%s17685_s5 + $0x148] sm:$0xff]  }
 0x779   : > { %11713 = vmatmul.mubr.msk.bf16.vlgmr.msra.gmra.mrb[220].mxu1 %vm18548_vm3, %v12112_v18  ;;  %11324 = vmatprep.subr.bf16.mxu0 %v12125_v50 }
 0x77a   : > { %11723 = vmatpush3.bf16.msra.mxu1 %v12113_v26 }
 0x77b   : > { %11724 = vmatprep.subr.bf16.mxu1 %v12114_v62 }
 0x77c   : > { %11325 = vmatpush3.bf16.msra.mxu0 %v12126_v38 }
 0x77d   : > { %11326 = vmatprep.subr.bf16.mxu0 %v12129_v42  ;;  %v12161_v42 = vld [vmem:[%s17685_s5 + $0x190] sm:$0xff]  }
 0x77e   : > { %11725 = vmatpush3.bf16.msra.mxu1 %v12114_v62 }
 0x77f   : > { %11726 = vmatprep.subr.bf16.mxu1 %v12115_v32 }
 0x780   : > { %11327 = vmatpush3.bf16.msra.mxu0 %v12130_v44  ;;  %v12132_v44 = vld [vmem:[%s17685_s5 + $0xd0] sm:$0xff]  }
 0x781   : > { %11328 = vmatprep.subr.bf16.mxu0 %v12133_v53 }
 0x782   : > { %11727 = vmatpush3.bf16.msra.mxu1 %v12115_v32 }
 0x783   : > { %11728 = vmatprep.subr.bf16.mxu1 %v12116_v8 }
 0x784   : > { %11329 = vmatpush3.bf16.msra.mxu0 %v12134_v34 }
 0x785   : > { %11330 = vmatprep.subr.bf16.mxu0 %v12137_v2 }
 0x786   : > { %11729 = vmatpush3.bf16.msra.mxu1 %v12116_v8 }
 0x787   : > { %11730 = vmatprep.subr.bf16.mxu1 %v12117_v37 }
 0x788   : > { %11331 = vmatpush3.bf16.msra.mxu0 %v12138_v56 }
 0x789   : > { %11332 = vmatprep.subr.bf16.mxu0 %v12141_v47 }
 0x78a   : > { %11731 = vmatpush3.bf16.msra.mxu1 %v12117_v37 }
 0x78b   : > { %11732 = vmatprep.subr.bf16.mxu1 %v12118_v22 }
 0x78c   : > { %11333 = vmatpush3.bf16.msra.mxu0 %v12142_v21  ;;  %v12135_v21 = vld [vmem:[%s17685_s5 + $0x118] sm:$0xff]  }
 0x78d   : > { %11334 = vmatprep.subr.bf16.mxu0 %v12145_v49 }
 0x78e   : > { %11733 = vmatpush3.bf16.msra.mxu1 %v12118_v22 }
 0x78f   : > { %11734 = vmatprep.subr.bf16.mxu1 %v12119_v3 }
 0x790   : > { %11335 = vmatpush3.bf16.msra.mxu0 %v12146_v10 }
 0x791   : > { %11336 = vmatprep.subr.bf16.mxu0 %v12149_v15 }
 0x792   : > { %11735 = vmatpush3.bf16.msra.mxu1 %v12119_v3 }
 0x793   : > { %11736 = vmatprep.subr.bf16.mxu1 %v12120_v23 }
 0x794   : > { %11337 = vmatpush3.bf16.msra.mxu0 %v12150_v13  ;;  %v12162_v13 = vld [vmem:[%s17685_s5 + $0x150] sm:$0xff]  }
 0x795   : > { %11402 = vmatprep.subr.bf16.mxu0 %v12153_v59 }
 0x796   : > { %11737 = vmatpush3.bf16.msra.mxu1 %v12120_v23 }
 0x797   : > { %11362 = vmatprep.subr.bf16.mxu1 %v12123_v1 }
 0x842   : > { %v6276_v25 = vpop.f32.mrb[232].mxu0 }
 0x843   : > { %v6540_v12 = vrot.slane %v6276_v25, 1  ;;  %v11708_v19 = vpop.f32.mrb[233].mxu0 }
 0x844   : > { %v6226_v20 = vpop.f32.mrb[216].mxu1  ;;  %v6279_v35 = vpop.f32.mrb[234].mxu0 }
 0x845   : > { %v11702_v0 = vpop.f32.mrb[217].mxu1  ;;  %v15255_v33 = vpack.c.bf16 %v6279_v35, %v6276_v25  ;;  %v6542_v40 = vrot.slane %v6279_v35, 1  ;;  %v11709_v16 = vpop.f32.mrb[235].mxu0  ;;  %v6537_v14 = vrot.slane %v6226_v20, 1 }
 0x846   : > { %v6229_v41 = vpop.f32.mrb[218].mxu1  ;;  %v12139_v0 = vld [vmem:[%s17685_s5 + $0x120] sm:$0xff]  }
 0x847   : > { %v15257_v54 = vpack.c.bf16 %v6229_v41, %v6226_v20  ;;  %v6538_v58 = vrot.slane %v6229_v41, 1  ;;  %v15259_v39 = vpack.c.bf16 %v6276_v25, %v6229_v41  ;;  %v15262_v60 = vsel %vm5458_vm13, %v6540_v12, %v6542_v40  ;;  %v11703_v17 = vpop.f32.mrb[219].mxu1  ;;  %v12136_v20 = vld [vmem:[%s17685_s5 + $0xd8] sm:$0xff]   ;;  %v12169_v16 = vld [vmem:[%s17685_s5 + $0x1a0] sm:$0xff]   ;;  %v12143_v41 = vld [vmem:[%s17685_s5 + $0x128] sm:$0xff]  }
 0x848   : > { %v12144_v17 = vld [vmem:[%s17685_s5 + $0xe8] sm:$0xff]  }
 0x849   : > { %v6539_v27 = vsel %vm5458_vm13, %v6537_v14, %v6538_v58  ;;  %v15272_v4 = vsel %vm5458_vm13, %v6538_v58, %v6540_v12  ;;  %11738 = vmatprep.mubr.bf16.mxu1 %v15257_v54  ;;  %6733 = vmatprep.mubr.bf16.mxu0 %v15257_v54  ;;  %v12165_v12 = vld [vmem:[%s17685_s5 + $0x198] sm:$0xff]   ;;  %v12140_v14 = vld [vmem:[%s17685_s5 + $0xe0] sm:$0xff]  }
 0x84a   : > { %v15280_v52 = vpack.c.bf16 %v15272_v4, %v6539_v27  ;;  %v10307_v51 = vpack.c.bf16 %v15262_v60, %v15272_v4  ;;  %11739 = vmatmul.mubr.bf16.vlgmr.msra.gmra.mrb[224].mxu1 %v15255_v33  ;;  %v6376_v18 = vpop.f32.mrb[236].mxu0  ;;  %v12170_v58 = vld [vmem:[%s17685_s5 + $0x160] sm:$0xff]   ;;  %v12174_v27 = vld [vmem:[%s17685_s5 + $0x168] sm:$0xff]  }
 0x84b   : > { %11363 = vmatpush3.bf16.msra.mxu1 %v12124_v45  ;;  %v11720_v9 = vpop.f32.mrb[237].mxu0  ;;  %v6548_v62 = vrot.slane %v6376_v18, 1  ;;  %v12173_v45 = vld [vmem:[%s17685_s5 + $0x1a8] sm:$0xff]   ;;  %v12171_v4 = vld [vmem:[%s17685_s5 + $0x220] sm:$0xff]  }
 0x84c   : > { %11364 = vmatprep.subr.bf16.mxu1 %v12127_v48  ;;  %v6326_v26 = vpop.f32.mrb[220].mxu1  ;;  %v15294_v32 = vpop.f32.mrb[238].mxu0  ;;  %10248 = vmatmul.mubr.msk.bf16.vlgmr.msra.gmra.mrb[240].mxu0 %vm14181_vm15, %v15280_v52  ;;  %v12147_v48 = vld [vmem:[%s17685_s5 + $0x130] sm:$0xff]   ;;  %v12181_v9 = vld [vmem:[%s17685_s5 + $0x1b8] sm:$0xff]  }
 0x84d   : > { %v6544_v8 = vrot.slane %v6326_v26, 1  ;;  %v15299_v37 = vpack.c.bf16 %v6326_v26, %v6279_v35  ;;  %v11714_v22 = vpop.f32.mrb[221].mxu1  ;;  %v15302_v3 = vpack.c.bf16 %v15294_v32, %v6376_v18  ;;  %v6550_v30 = vrot.slane %v15294_v32, 1  ;;  %11403 = vmatpush3.bf16.msra.mxu0 %v12154_v28  ;;  %6741 = vmatprep.mubr.bf16.mxu0 %v15255_v33  ;;  %v11721_v50 = vpop.f32.mrb[239].mxu0  ;;  %v12177_v28 = vld [vmem:[%s17685_s5 + $0x1b0] sm:$0xff]  }
 0x84e   : > { %v6329_v38 = vpop.f32.mrb[222].mxu1  ;;  %11404 = vmatprep.subr.bf16.mxu0 %v12157_v11  ;;  %v12151_v11 = vld [vmem:[%s17685_s5 + $0x138] sm:$0xff]   ;;  %v12159_v22 = vld [vmem:[%s17685_s5 + $0x208] sm:$0xff]  }
 0x84f   : > { %11365 = vmatpush3.bf16.msra.mxu1 %v12128_v46  ;;  %v15316_v53 = vsel %vm5458_vm13, %v6542_v40, %v6544_v8  ;;  %v15318_v34 = vpack.c.bf16 %v6329_v38, %v6326_v26  ;;  %v6546_v2 = vrot.slane %v6329_v38, 1  ;;  %v15320_v56 = vpack.c.bf16 %v6376_v18, %v6329_v38  ;;  %v11715_v47 = vpop.f32.mrb[223].mxu1  ;;  %v12166_v40 = vld [vmem:[%s17685_s5 + $0x158] sm:$0xff]   ;;  %v12148_v18 = vld [vmem:[%s17685_s5 + $0xf0] sm:$0xff]   ;;  %v12155_v26 = vld [vmem:[%s17685_s5 + $0x200] sm:$0xff]  }
 0x850   : > { %11366 = vmatprep.subr.bf16.mxu1 %v12131_v24  ;;  %v15326_v23 = vsel %vm5458_vm13, %v6548_v62, %v6550_v30  ;;  %v15330_v49 = vsel %vm5458_vm13, %v6550_v30, %v14975_v36  ;;  %v15334_v10 = vpack.c.bf16 %v15316_v53, %v15262_v60  ;;  %v12178_v46 = vld [vmem:[%s17685_s5 + $0x170] sm:$0xff]   ;;  %v12152_v24 = vld [vmem:[%s17685_s5 + $0xf8] sm:$0xff]   ;;  %v12160_v30 = vld [vmem:[%s17685_s5 + $0x1c8] sm:$0xff]   ;;  %v6777_v38 = vpack.c.bf16 %v18448_v55, %v15294_v32 }
 0x851   : > { %v15337_v1 = vsel %vm5458_vm13, %v6544_v8, %v6546_v2  ;;  %v15340_v15 = vsel %vm5458_vm13, %v6546_v2, %v6548_v62  ;;  %11742 = vmatprep.mubr.bf16.mxu1 %v15318_v34  ;;  %11405 = vmatpush3.bf16.msra.mxu0 %v12158_v61  ;;  %v15364_v35 = vpack.c.bf16 %v15330_v49, %v15326_v23  ;;  %v12182_v62 = vld [vmem:[%s17685_s5 + $0x178] sm:$0xff]   ;;  %v12156_v8 = vld [vmem:[%s17685_s5 + $0x1c0] sm:$0xff]   ;;  %v12163_v61 = vld [vmem:[%s17685_s5 + $0x210] sm:$0xff]  }
 0x852   : > { %v10310_v59 = vpack.c.bf16 %v15337_v1, %v15316_v53  ;;  %v10313_v25 = vpack.c.bf16 %v15326_v23, %v15340_v15  ;;  %11743 = vmatmul.mubr.bf16.gmra.mrb[228].mxu1 %v15302_v3  ;;  %11406 = vmatprep.subr.bf16.mxu0 %v12161_v42  ;;  %v15356_v19 = vpack.c.bf16 %v15340_v15, %v15337_v1  ;;  %v12167_v50 = vld [vmem:[%s17685_s5 + $0x218] sm:$0xff]   ;;  %v12176_v42 = vld [vmem:[%s17685_s5 + $0x1e8] sm:$0xff]   ;;  %v12180_v55 = vld [vmem:[%s17685_s5 + $0x1f0] sm:$0xff]  }
 0x853   : > { %11367 = vmatpush3.bf16.msra.mxu1 %v12132_v44  ;;  %6938 = vmatprep.mubr.bf16.mxu1 %v15257_v54  ;;  %v12168_v60 = vld [vmem:[%s17685_s5 + $0x1d8] sm:$0xff]   ;;  %v12179_v44 = vld [vmem:[%s17685_s5 + $0x230] sm:$0xff]   ;;  %v10316_v53 = vpack.c.bf16 %v14975_v36, %v15330_v49 }
 0x854   : > { %11368 = vmatprep.subr.bf16.mxu1 %v12135_v21  ;;  %10251 = vmatmul.mubr.msk.bf16.gmra.mrb[244].mxu0 %vm14280_vm0, %v15334_v10  ;;  %v12183_v32 = vld [vmem:[%s17685_s5 + $0x238] sm:$0xff]  }
 0x855   : > { %11407 = vmatpush3.bf16.msra.mxu0 %v12162_v13  ;;  %6749 = vmatprep.mubr.bf16.mxu0 %v15318_v34  ;;  %v12184_v2 = vld [vmem:[%s17685_s5 + $0x1f8] sm:$0xff]  }
 0x856   : > { %11408 = vmatprep.subr.bf16.mxu0 %v12165_v12 }
 0x857   : > { %11369 = vmatpush3.bf16.msra.mxu1 %v12136_v20 }
 0x858   : > { %11370 = vmatprep.subr.bf16.mxu1 %v12139_v0 }
 0x859   : > { %11409 = vmatpush3.bf16.msra.mxu0 %v12166_v40 }
 0x85a   : > { %11410 = vmatprep.subr.bf16.mxu0 %v12169_v16 }
 0x85b   : > { %11371 = vmatpush3.bf16.msra.mxu1 %v12140_v14 }
 0x85c   : > { %11372 = vmatprep.subr.bf16.mxu1 %v12143_v41  ;;  %10254 = vmatmul.mubr.msk.bf16.gmra.mrb[248].mxu0 %vm14393_vm4, %v15356_v19 }
 0x85d   : > { %11411 = vmatpush3.bf16.msra.mxu0 %v12170_v58  ;;  %6757 = vmatprep.mubr.bf16.mxu0 %v15302_v3 }
 0x85e   : > { %11412 = vmatprep.subr.bf16.mxu0 %v12173_v45 }
 0x85f   : > { %11373 = vmatpush3.bf16.msra.mxu1 %v12144_v17 }
 0x860   : > { %11374 = vmatprep.subr.bf16.mxu1 %v12147_v48 }
 0x861   : > { %11413 = vmatpush3.bf16.msra.mxu0 %v12174_v27 }
 0x862   : > { %11414 = vmatprep.subr.bf16.mxu0 %v12177_v28 }
 0x863   : > { %11375 = vmatpush3.bf16.msra.mxu1 %v12148_v18 }
 0x864   : > { %11376 = vmatprep.subr.bf16.mxu1 %v12151_v11  ;;  %10257 = vmatmul.mubr.msk.bf16.gmra.mrb[252].mxu0 %vm14458_vm7, %v15364_v35 }
 0x865   : > { %11415 = vmatpush3.bf16.msra.mxu0 %v12178_v46  ;;  %7281 = vmatprep.mubr.bf16.mxu0 %v15259_v39 }
 0x866   : > { %11416 = vmatprep.subr.bf16.mxu0 %v12181_v9 }
 0x867   : > { %11377 = vmatpush3.bf16.msra.mxu1 %v12152_v24 }
 0x868   : > { %11442 = vmatprep.subr.bf16.mxu1 %v12155_v26 }
 0x869   : > { %11417 = vmatpush3.bf16.msra.mxu0 %v12182_v62 }
 0x86a   : > { %6939 = vmatmul.mubr.bf16.vlgmr.msra.gmra.mrb[232].mxu1 %v15259_v39  ;;  %v12164_v39 = vld [vmem:[%s17685_s5 + $0x1d0] sm:$0xff]  }
 0x86b   : > { %11443 = vmatpush3.bf16.msra.mxu1 %v12156_v8  ;;  %6946 = vmatprep.mubr.bf16.mxu1 %v15255_v33 }
 0x86c   : > { %11444 = vmatprep.subr.bf16.mxu1 %v12159_v22  ;;  %10308 = vmatmul.mubr.msk.bf16.vlgmr.msra.gmra.mrb[0].mxu0 %vm14181_vm15, %v10307_v51  ;;  %v12172_v51 = vld [vmem:[%s17685_s5 + $0x1e0] sm:$0xff]  }
 0x86d   : > { %7289 = vmatprep.mubr.bf16.mxu0 %v15299_v37 }
 0x86f   : > { %11445 = vmatpush3.bf16.msra.mxu1 %v12160_v30 }
 0x870   : > { %11446 = vmatprep.subr.bf16.mxu1 %v12163_v61 }
 0x872   : > { %6947 = vmatmul.mubr.bf16.gmra.mrb[236].mxu1 %v15299_v37  ;;  %v12175_v37 = vld [vmem:[%s17685_s5 + $0x228] sm:$0xff]  }
 0x873   : > { %11447 = vmatpush3.bf16.msra.mxu1 %v12164_v39  ;;  %6954 = vmatprep.mubr.bf16.mxu1 %v15318_v34 }
 0x874   : > { %11448 = vmatprep.subr.bf16.mxu1 %v12167_v50  ;;  %10311 = vmatmul.mubr.msk.bf16.gmra.mrb[4].mxu0 %vm14280_vm0, %v10310_v59 }
 0x875   : > { %7297 = vmatprep.mubr.bf16.mxu0 %v15320_v56 }
 0x877   : > { %11449 = vmatpush3.bf16.msra.mxu1 %v12168_v60 }
 0x878   : > { %11450 = vmatprep.subr.bf16.mxu1 %v12171_v4 }
 0x87a   : > { %6955 = vmatmul.mubr.bf16.gmra.mrb[240].mxu1 %v15320_v56 }
 0x87b   : > { %11451 = vmatpush3.bf16.msra.mxu1 %v12172_v51  ;;  %6962 = vmatprep.mubr.bf16.mxu1 %v15302_v3 }
 0x87c   : > { %11452 = vmatprep.subr.bf16.mxu1 %v12175_v37  ;;  %10314 = vmatmul.mubr.msk.bf16.gmra.mrb[8].mxu0 %vm14393_vm4, %v10313_v25 }
 0x87d   : > { %7305 = vmatprep.mubr.bf16.mxu0 %v6777_v38 }
 0x87f   : > { %11453 = vmatpush3.bf16.msra.mxu1 %v12176_v42 }
 0x880   : > { %11454 = vmatprep.subr.bf16.mxu1 %v12179_v44 }
 0x882   : > { %6963 = vmatmul.mubr.bf16.gmra.mrb[244].mxu1 %v6777_v38 }
 0x883   : > { %11455 = vmatpush3.bf16.msra.mxu1 %v12180_v55  ;;  %7346 = vmatprep.mubr.bf16.mxu1 %v15257_v54 }
 0x884   : > { %11456 = vmatprep.subr.bf16.mxu1 %v12183_v32  ;;  %10317 = vmatmul.mubr.msk.bf16.gmra.mrb[12].mxu0 %vm14458_vm7, %v10316_v53 }
 0x887   : > { %11457 = vmatpush3.bf16.msra.mxu1 %v12184_v2 }
 0x88a   : > { %10320 = vmatmul.mubr.msk.bf16.vlgmr.msra.gmra.mrb[248].mxu1 %vm14181_vm15, %v15280_v52  ;;  %vm7403_vm15 = vcmask 261120  }
 0x88b   : > { %7354 = vmatprep.mubr.bf16.mxu1 %v15255_v33  ;;  %11750 = vmatprep.mubr.msk.bf16.mxu0 %vm7403_vm15, %v15525_v6 }
 0x892   : > { %10323 = vmatmul.mubr.msk.bf16.gmra.mrb[252].mxu1 %vm14280_vm0, %v15334_v10  ;;  %vm18553_vm0 = vcmask 1040384  }
 0x893   : > { %7362 = vmatprep.mubr.bf16.mxu1 %v15318_v34  ;;  %vm18558_vm12 = vmmov %vm18553_vm0 }
 0x894   : > { %vm18559_vm1 = vmmov %vm18553_vm0 }
 0x895   : > { %vm18560_vm8 = vmmov %vm18553_vm0 }
 0x896   : > { %vm18567_vm6 = vmmov %vm18553_vm0 }
 0x897   : > { %vm18568_vm14 = vmmov %vm18553_vm0 }
 0x898   : > { %vm18569_vm10 = vmmov %vm18553_vm0 }
 0x899   : > { %vm18570_vm11 = vmmov %vm18553_vm0 }
 0x89a   : > { %10326 = vmatmul.mubr.msk.bf16.gmra.mrb[0].mxu1 %vm14393_vm4, %v15356_v19 }
 0x89b   : > { %7370 = vmatprep.mubr.bf16.mxu1 %v15302_v3 }
 0x8a2   : > { %10329 = vmatmul.mubr.msk.bf16.gmra.mrb[4].mxu1 %vm14458_vm7, %v15364_v35 }
 0x8a3   : > { %11782 = vmatprep.mubr.msk.bf16.mxu1 %vm7403_vm15, %v15525_v6 }
 0x91d   : > { %v11740_v57 = vpop.f32.mrb[224].mxu1 }
 0x91e   : > { %v6499_v29 = vadd.f32 %v11740_v57, %v15534_v63  ;;  %v6490_v36 = vpop.f32.mrb[225].mxu1 }
 0x91f   : > { %v11741_v33 = vpop.f32.mrb[226].mxu1  ;;  %v11338_v54 = vpop.f32.mrb[240].mxu0  ;;  %v6491_v56 = vadd.f32 %v15534_v63, %v6490_v36 }
 0x920   : > { %v6502_v52 = vadd.f32 %v11741_v33, %v15534_v63  ;;  %v6493_v3 = vpop.f32.mrb[227].mxu1  ;;  %v11339_v34 = vpop.f32.mrb[241].mxu0  ;;  %v6523_v46 = vmax.f32 %v6499_v29, 0.0 }
 0x921   : > { %v6494_v47 = vadd.f32 %v15534_v63, %v6493_v3  ;;  %v11340_v21 = vadd.f32 %v11339_v34, %v11338_v54  ;;  %v11341_v23 = vpop.f32.mrb[242].mxu0  ;;  %v6521_v15 = vmax.f32 %v6491_v56, 0.0 }
 0x922   : > { %v11342_v49 = vpop.f32.mrb[243].mxu0  ;;  %v6524_v26 = vmax.f32 %v6502_v52, 0.0 }
 0x923   : > { %v6736_v10 = vadd.f32 %v11340_v21, %v15534_v63  ;;  %v11343_v1 = vadd.f32 %v11342_v49, %v11341_v23  ;;  %v6522_v20 = vmax.f32 %v6494_v47, 0.0 }
 0x925   : > { %v11744_v13 = vpop.f32.mrb[228].mxu1  ;;  %v6766_v59 = vmax.f32 %v6736_v10, 0.0  ;;  %v6739_v25 = vadd.f32 %v11343_v1, %v15534_v63 }
 0x926   : > { %v6515_v12 = vadd.f32 %v11744_v13, %v15534_v63  ;;  %v6506_v19 = vpop.f32.mrb[229].mxu1 }
 0x927   : > { %v11745_v35 = vpop.f32.mrb[230].mxu1  ;;  %v6767_v0 = vmax.f32 %v6739_v25, 0.0  ;;  %v11344_v40 = vpop.f32.mrb[244].mxu0  ;;  %v7391_v16 = vpack.c.bf16 %v6766_v59, %v6521_v15  ;;  %v6507_v62 = vadd.f32 %v15534_v63, %v6506_v19 }
 0x928   : > { %v6518_v14 = vadd.f32 %v11745_v35, %v15534_v63  ;;  %v6509_v41 = vpop.f32.mrb[231].mxu1  ;;  %v11345_v58 = vpop.f32.mrb[245].mxu0  ;;  %v6527_v34 = vmax.f32 %v6515_v12, 0.0 }
 0x929   : > { %v6510_v45 = vadd.f32 %v15534_v63, %v6509_v41  ;;  %v11346_v17 = vadd.f32 %v11345_v58, %v11344_v40  ;;  %v11347_v48 = vpop.f32.mrb[246].mxu0  ;;  %11746 = vmatprep.subr.bf16.mxu0 %v7391_v16  ;;  %v15545_v27 = vpack.c.bf16 %v6767_v0, %v6522_v20  ;;  %v6525_v51 = vmax.f32 %v6507_v62, 0.0 }
 0x92a   : > { %v11348_v28 = vpop.f32.mrb[247].mxu0  ;;  %11747 = vmatpush3.bf16.msra.mxu0 %v7391_v16  ;;  %v6528_v49 = vmax.f32 %v6518_v14, 0.0 }
 0x92b   : > { %v6744_v18 = vadd.f32 %v11346_v17, %v15534_v63  ;;  %v11349_v11 = vadd.f32 %v11348_v28, %v11347_v48  ;;  %v6526_v55 = vmax.f32 %v6510_v45, 0.0 }
 0x92d   : > { %v6768_v9 = vmax.f32 %v6744_v18, 0.0  ;;  %v6747_v24 = vadd.f32 %v11349_v11, %v15534_v63 }
 0x92f   : > { %v6769_v8 = vmax.f32 %v6747_v24, 0.0  ;;  %v11350_v22 = vpop.f32.mrb[248].mxu0  ;;  %v15550_v30 = vpack.c.bf16 %v6768_v9, %v6523_v46 }
 0x930   : > { %v11351_v61 = vpop.f32.mrb[249].mxu0 }
 0x931   : > { %v11352_v39 = vadd.f32 %v11351_v61, %v11350_v22  ;;  %v11353_v50 = vpop.f32.mrb[250].mxu0  ;;  %v15552_v60 = vpack.c.bf16 %v6769_v8, %v6524_v26 }
 0x932   : > { %v11354_v4 = vpop.f32.mrb[251].mxu0 }
 0x933   : > { %v6752_v37 = vadd.f32 %v11352_v39, %v15534_v63  ;;  %v11355_v38 = vadd.f32 %v11354_v4, %v11353_v50 }
 0x935   : > { %v6770_v42 = vmax.f32 %v6752_v37, 0.0  ;;  %v6755_v44 = vadd.f32 %v11355_v38, %v15534_v63 }
 0x937   : > { %v6771_v32 = vmax.f32 %v6755_v44, 0.0  ;;  %v11356_v53 = vpop.f32.mrb[252].mxu0  ;;  %v7612_v2 = vpack.c.bf16 %v6770_v42, %v6525_v51 }
 0x938   : > { %v11357_v57 = vpop.f32.mrb[253].mxu0 }
 0x939   : > { %v11358_v29 = vadd.f32 %v11357_v57, %v11356_v53  ;;  %v11359_v36 = vpop.f32.mrb[254].mxu0  ;;  %11778 = vmatprep.subr.bf16.mxu1 %v7612_v2  ;;  %v15556_v33 = vpack.c.bf16 %v6771_v32, %v6526_v55 }
 0x93a   : > { %v11360_v54 = vpop.f32.mrb[255].mxu0  ;;  %11779 = vmatpush3.bf16.msra.mxu1 %v7612_v2 }
 0x93b   : > { %v6760_v52 = vadd.f32 %v11358_v29, %v15534_v63  ;;  %v11361_v3 = vadd.f32 %v11360_v54, %v11359_v36 }
 0x93d   : > { %v11378_v56 = vpop.f32.mrb[232].mxu1  ;;  %v6772_v47 = vmax.f32 %v6760_v52, 0.0  ;;  %v6763_v21 = vadd.f32 %v11361_v3, %v15534_v63 }
 0x93e   : > { %v11379_v23 = vpop.f32.mrb[233].mxu1 }
 0x93f   : > { %v15560_v10 = vadd.f32 %v11379_v23, %v11378_v56  ;;  %v11381_v1 = vpop.f32.mrb[234].mxu1  ;;  %v6773_v15 = vmax.f32 %v6763_v21, 0.0  ;;  %v11418_v13 = vpop.f32.mrb[0].mxu0  ;;  %v15562_v59 = vpack.c.bf16 %v6772_v47, %v6527_v34 }
 0x940   : > { %v11382_v25 = vpop.f32.mrb[235].mxu1  ;;  %v11419_v19 = vpop.f32.mrb[1].mxu0 }
 0x941   : > { %v11383_v20 = vadd.f32 %v11382_v25, %v11381_v1  ;;  %v11420_v35 = vadd.f32 %v11419_v19, %v11418_v13  ;;  %v11421_v0 = vpop.f32.mrb[2].mxu0  ;;  %v15564_v40 = vpack.c.bf16 %v6773_v15, %v6528_v49 }
 0x942   : > { %v11422_v12 = vpop.f32.mrb[3].mxu0 }
 0x943   : > { %v15567_v16 = vadd.f32 %v11383_v20, %v15534_v63  ;;  %v11423_v41 = vadd.f32 %v11422_v12, %v11421_v0 }
 0x945   : > { %v11384_v14 = vpop.f32.mrb[236].mxu1  ;;  %v7287_v58 = vadd.f32 %v11423_v41, %v15534_v63 }
 0x946   : > { %v11385_v45 = vpop.f32.mrb[237].mxu1 }
 0x947   : > { %v11386_v17 = vadd.f32 %v11385_v45, %v11384_v14  ;;  %v11387_v48 = vpop.f32.mrb[238].mxu1  ;;  %v11424_v28 = vpop.f32.mrb[4].mxu0 }
 0x948   : > { %v11388_v18 = vpop.f32.mrb[239].mxu1  ;;  %v11425_v11 = vpop.f32.mrb[5].mxu0 }
 0x949   : > { %v15571_v46 = vadd.f32 %v11386_v17, %v15534_v63  ;;  %v11389_v9 = vadd.f32 %v11388_v18, %v11387_v48  ;;  %v11426_v24 = vadd.f32 %v11425_v11, %v11424_v28  ;;  %v11427_v26 = vpop.f32.mrb[6].mxu0  ;;  %v6941_v17 = vadd.f32 %v15560_v10, %v15534_v63  ;;  %v15609_v10 = vld [vmem:[%s17690_s10 + $0x8] sm:$0xff]  }
 0x94a   : > { %v11428_v62 = vpop.f32.mrb[7].mxu0  ;;  %v7284_v48 = vadd.f32 %v11420_v35, %v15534_v63 }
 0x94b   : > { %v15574_v8 = vadd.f32 %v11389_v9, %v15534_v63  ;;  %v7292_v22 = vadd.f32 %v11426_v24, %v15534_v63  ;;  %v11429_v61 = vadd.f32 %v11428_v62, %v11427_v26  ;;  %v6971_v26 = vmax.f32 %v6941_v17, 0.0 }
 0x94d   : > { %v11390_v39 = vpop.f32.mrb[240].mxu1  ;;  %v7295_v50 = vadd.f32 %v11429_v61, %v15534_v63 }
 0x94e   : > { %v11391_v4 = vpop.f32.mrb[241].mxu1 }
 0x94f   : > { %v11392_v51 = vadd.f32 %v11391_v4, %v11390_v39  ;;  %v11393_v37 = vpop.f32.mrb[242].mxu1  ;;  %v11430_v38 = vpop.f32.mrb[8].mxu0  ;;  %v6972_v39 = vmax.f32 %v15567_v16, 0.0  ;;  %v6973_v16 = vmax.f32 %v15571_v46, 0.0 }
 0x950   : > { %v11394_v42 = vpop.f32.mrb[243].mxu1  ;;  %v11431_v44 = vpop.f32.mrb[9].mxu0 }
 0x951   : > { %v15579_v55 = vadd.f32 %v11392_v51, %v15534_v63  ;;  %v11395_v32 = vadd.f32 %v11394_v42, %v11393_v37  ;;  %v11432_v53 = vadd.f32 %v11431_v44, %v11430_v38  ;;  %v11433_v2 = vpop.f32.mrb[10].mxu0 }
 0x952   : > { %v11434_v57 = vpop.f32.mrb[11].mxu0 }
 0x953   : > { %v15582_v29 = vadd.f32 %v11395_v32, %v15534_v63  ;;  %v15585_v36 = vadd.f32 %v11432_v53, %v15534_v63  ;;  %v11435_v54 = vadd.f32 %v11434_v57, %v11433_v2  ;;  %v6974_v57 = vmax.f32 %v15574_v8, 0.0 }
 0x955   : > { %v11396_v52 = vpop.f32.mrb[244].mxu1  ;;  %v15588_v3 = vadd.f32 %v11435_v54, %v15534_v63 }
 0x956   : > { %v11397_v34 = vpop.f32.mrb[245].mxu1 }
 0x957   : > { %v11398_v56 = vadd.f32 %v11397_v34, %v11396_v52  ;;  %v11399_v47 = vpop.f32.mrb[246].mxu1  ;;  %v11436_v21 = vpop.f32.mrb[12].mxu0 }
 0x958   : > { %v11400_v23 = vpop.f32.mrb[247].mxu1  ;;  %v11437_v49 = vpop.f32.mrb[13].mxu0 }
 0x959   : > { %v15591_v1 = vadd.f32 %v11398_v56, %v15534_v63  ;;  %v11401_v15 = vadd.f32 %v11400_v23, %v11399_v47  ;;  %v11438_v13 = vadd.f32 %v11437_v49, %v11436_v21  ;;  %v11439_v25 = vpop.f32.mrb[14].mxu0  ;;  %v6975_v23 = vmax.f32 %v15579_v55, 0.0 }
 0x95a   : > { %v11440_v19 = vpop.f32.mrb[15].mxu0 }
 0x95b   : > { %v15594_v20 = vadd.f32 %v11401_v15, %v15534_v63  ;;  %v15597_v0 = vadd.f32 %v11438_v13, %v15534_v63  ;;  %v11441_v12 = vadd.f32 %v11440_v19, %v11439_v25  ;;  %v6976_v15 = vmax.f32 %v15582_v29, 0.0 }
 0x95c   : > { %v6977_v29 = vmax.f32 %v15591_v1, 0.0 }
 0x95d   : > { %v11458_v41 = vpop.f32.mrb[248].mxu1  ;;  %v15600_v14 = vadd.f32 %v11441_v12, %v15534_v63 }
 0x95e   : > { %v11459_v45 = vpop.f32.mrb[249].mxu1 }
 0x95f   : > { %v11460_v28 = vadd.f32 %v11459_v45, %v11458_v41  ;;  %v11461_v18 = vpop.f32.mrb[250].mxu1 }
 0x960   : > { %v11462_v11 = vpop.f32.mrb[251].mxu1 }
 0x961   : > { %v7349_v9 = vadd.f32 %v11460_v28, %v7284_v48  ;;  %v11463_v24 = vadd.f32 %v11462_v11, %v11461_v18 }
 0x963   : > { %v7379_v62 = vmax.f32 %v7349_v9, 0.0  ;;  %v7352_v61 = vadd.f32 %v11463_v24, %v7287_v58 }
 0x965   : > { %v7380_v4 = vmax.f32 %v7352_v61, 0.0  ;;  %v7392_v51 = vpack.c.bf16 %v7379_v62, %v6971_v26  ;;  %v11464_v37 = vpop.f32.mrb[252].mxu1  ;;  %v15693_v26 = vld [vmem:[%s17686_s6 + $0x4] ss:$0 sm:$0xff] }
 0x966   : > { %v11465_v38 = vpop.f32.mrb[253].mxu1 }
 0x967   : > { %11748 = vmatprep.subr.bf16.mxu0 %v7392_v51  ;;  %v11466_v63 = vadd.f32 %v11465_v38, %v11464_v37  ;;  %v7460_v35 = vpack.c.bf16 %v7380_v4, %v6972_v39  ;;  %v11467_v42 = vpop.f32.mrb[254].mxu1 }
 0x968   : > { %11749 = vmatpush3.bf16.msra.mxu0 %v7392_v51  ;;  %v11468_v44 = vpop.f32.mrb[255].mxu1 }
 0x969   : > { %11754 = vmatprep.subr.bf16.mxu0 %v15545_v27  ;;  %v7357_v58 = vadd.f32 %v11466_v63, %v7292_v22  ;;  %v11469_v32 = vadd.f32 %v11468_v44, %v11467_v42  ;;  %v18556_v44 = vld [vmem:[#allocation10_spill] sm:$0xff] }
 0x96a   : > { %vm18557_vm7 = vnez %v18556_v44 }
 0x96b   : > { %11751 = vmatmul.mubr.msk.bf16.vlgmr.msra.gmra.mrb[16].mxu0 %vm7403_vm15, %v15609_v10  ;;  %v7381_v53 = vmax.f32 %v7357_v58, 0.0  ;;  %v7360_v2 = vadd.f32 %v11469_v32, %v7295_v50  ;;  %v15716_v32 = vld [vmem:[%s17686_s6 + $0x3] ss:$0 sm:$0xff] }
 0x96c   : > { %11755 = vmatpush3.bf16.msra.mxu0 %v15545_v27  ;;  %11758 = vmatprep.mubr.msk.bf16.mxu0 %vm7403_vm15, %v15525_v6 }
 0x96d   : > { %11756 = vmatprep.subr.bf16.mxu0 %v7460_v35  ;;  %v7382_v54 = vmax.f32 %v7360_v2, 0.0  ;;  %v11470_v52 = vpop.f32.mrb[0].mxu1  ;;  %v7511_v34 = vpack.c.bf16 %v7381_v53, %v6973_v16 }
 0x96e   : > { %v11471_v22 = vpop.f32.mrb[1].mxu1 }
 0x96f   : > { %v11472_v56 = vadd.f32 %v11471_v22, %v11470_v52  ;;  %v7562_v47 = vpack.c.bf16 %v7382_v54, %v6974_v57  ;;  %v11473_v46 = vpop.f32.mrb[2].mxu1 }
 0x970   : > { %11757 = vmatpush3.bf16.msra.mxu0 %v7460_v35  ;;  %v11474_v21 = vpop.f32.mrb[3].mxu1 }
 0x971   : > { %11762 = vmatprep.subr.bf16.mxu0 %v15550_v30  ;;  %v7365_v50 = vadd.f32 %v11472_v56, %v15585_v36  ;;  %v11475_v27 = vadd.f32 %v11474_v21, %v11473_v46 }
 0x973   : > { %11759 = vmatmul.mubr.msk.bf16.vlgmr.msra.gmra.mrb[20].mxu0 %vm7403_vm15, %v15609_v10  ;;  %v7383_v8 = vmax.f32 %v7365_v50, 0.0  ;;  %v7368_v49 = vadd.f32 %v11475_v27, %v15588_v3 }
 0x974   : > { %11763 = vmatpush3.bf16.msra.mxu0 %v15550_v30  ;;  %11766 = vmatprep.mubr.msk.bf16.mxu0 %vm7403_vm15, %v15525_v6 }
 0x975   : > { %11764 = vmatprep.subr.bf16.mxu0 %v7511_v34  ;;  %v7613_v13 = vpack.c.bf16 %v7383_v8, %v6975_v23  ;;  %v7384_v25 = vmax.f32 %v7368_v49, 0.0  ;;  %v11476_v36 = vpop.f32.mrb[4].mxu1 }
 0x976   : > { %v11477_v19 = vpop.f32.mrb[5].mxu1 }
 0x977   : > { %11780 = vmatprep.subr.bf16.mxu1 %v7613_v13  ;;  %v7664_v55 = vpack.c.bf16 %v7384_v25, %v6976_v15  ;;  %v11478_v12 = vadd.f32 %v11477_v19, %v11476_v36  ;;  %v11479_v41 = vpop.f32.mrb[6].mxu1 }
 0x978   : > { %11765 = vmatpush3.bf16.msra.mxu0 %v7511_v34  ;;  %11781 = vmatpush3.bf16.msra.mxu1 %v7613_v13  ;;  %v11480_v45 = vpop.f32.mrb[7].mxu1 }
 0x979   : > { %11770 = vmatprep.subr.bf16.mxu0 %v15552_v60  ;;  %v7373_v30 = vadd.f32 %v11478_v12, %v15597_v0  ;;  %11794 = vmatprep.subr.bf16.mxu1 %v15562_v59  ;;  %v11481_v3 = vadd.f32 %v11480_v45, %v11479_v41  ;;  %v6978_v0 = vmax.f32 %v15594_v20, 0.0  ;;  %v18565_v41 = vld [vmem:[#allocation17_spill] sm:$0xff] }
 0x97a   : > { %vm18566_vm2 = vnez %v18565_v41 }
 0x97b   : > { %11767 = vmatmul.mubr.msk.bf16.vlgmr.msra.gmra.mrb[24].mxu0 %vm7403_vm15, %v15609_v10  ;;  %11783 = vmatmul.mubr.msk.bf16.vlgmr.msra.gmra.mrb[8].mxu1 %vm7403_vm15, %v15609_v10  ;;  %v7385_v17 = vmax.f32 %v7373_v30, 0.0  ;;  %v7376_v48 = vadd.f32 %v11481_v3, %v15600_v14  ;;  %v15683_v14 = vld [vmem:[%s17686_s6 + $0x2] ss:$0 sm:$0xff] }
 0x97c   : > { %11771 = vmatpush3.bf16.msra.mxu0 %v15552_v60  ;;  %11774 = vmatprep.mubr.msk.bf16.mxu0 %vm7403_vm15, %v15525_v6  ;;  %v15664_v60 = vld [vmem:[%s17686_s6 + $0x1] ss:$0 sm:$0xff]  ;;  %v8370_v4 = vmul.f32 %v15683_v14, %v18457_v43 }
 0x97d   : > { %11772 = vmatprep.subr.bf16.mxu0 %v7562_v47  ;;  %11795 = vmatpush3.bf16.msra.mxu1 %v15562_v59  ;;  %v7715_v1 = vpack.c.bf16 %v7385_v17, %v6977_v29  ;;  %v7386_v28 = vmax.f32 %v7376_v48, 0.0  ;;  %v15672_v59 = vld [vmem:[%s17686_s6] ss:$0 sm:$0xff] }
 0x97e   : > { %11798 = vmatprep.mubr.msk.bf16.mxu1 %vm7403_vm15, %v15525_v6 }
 0x97f   : > { %11796 = vmatprep.subr.bf16.mxu1 %v7715_v1  ;;  %v7766_v18 = vpack.c.bf16 %v7386_v28, %v6978_v0 }
 0x980   : > { %11773 = vmatpush3.bf16.msra.mxu0 %v7562_v47 }
 0x981   : > { %11786 = vmatprep.subr.bf16.mxu0 %v15556_v33  ;;  %11797 = vmatpush3.bf16.msra.mxu1 %v7715_v1 }
 0x983   : > { %11775 = vmatmul.mubr.msk.bf16.vlgmr.msra.gmra.mrb[28].mxu0 %vm7403_vm15, %v15609_v10 }
 0x984   : > { %11787 = vmatpush3.bf16.msra.mxu0 %v15556_v33  ;;  %11790 = vmatprep.mubr.msk.bf16.mxu0 %vm7403_vm15, %v15525_v6  ;;  %v15667_v33 = vmul.f32 0.0, %v15664_v60 }
 0x985   : > { %11788 = vmatprep.subr.bf16.mxu0 %v7664_v55  ;;  %11799 = vmatmul.mubr.msk.bf16.vlgmr.msra.gmra.mrb[12].mxu1 %vm7403_vm15, %v15609_v10 }
 0x988   : > { %11789 = vmatpush3.bf16.msra.mxu0 %v7664_v55 }
 0x989   : > { %11802 = vmatprep.subr.bf16.mxu0 %v15564_v40 }
 0x98b   : > { %11791 = vmatmul.mubr.msk.bf16.vlgmr.msra.gmra.mrb[32].mxu0 %vm7403_vm15, %v15609_v10 }
 0x98c   : > { %11803 = vmatpush3.bf16.msra.mxu0 %v15564_v40  ;;  %11806 = vmatprep.mubr.msk.bf16.mxu0 %vm7403_vm15, %v15525_v6  ;;  %v8112_v6 = vrot.slane %v15667_v33, 1  ;;  %v15676_v40 = vmul.f32 0.0, %v15672_v59 }
 0x98d   : > { %11804 = vmatprep.subr.bf16.mxu0 %v7766_v18 }
 0x98e   : > { %v8208_v39 = vadd.f32 %v8112_v6, %v15676_v40 }
 0x990   : > { %11805 = vmatpush3.bf16.msra.mxu0 %v7766_v18  ;;  %v8402_v52 = vadd.f32 %v8370_v4, %v8208_v39 }
 0x993   : > { %11807 = vmatmul.mubr.msk.bf16.vlgmr.msra.gmra.mrb[36].mxu0 %vm7403_vm15, %v15609_v10  ;;  %v18554_v10 = vld [vmem:[#allocation13_spill] sm:$0xff]  ;;  %vm18578_vm15 = vmmov %vm18571_vm5 }
 0x994   : > { %vm18555_vm4 = vnez %v18554_v10 }
 0xa3e   : > { %v15678_v20 = vpop.f32.mrb[16].mxu0 }
 0xa3f   : > { %18549 = vst [vmem:[#allocation33_spill] sm:$0xff] %v15678_v20  ;;  %v15685_v11 = vpop.f32.mrb[17].mxu0  ;;  %v7851_v51 = vrot.slane %v15678_v20, 7 }
 0xa40   : > { %18550 = vst [vmem:[#allocation31_spill] sm:$0xff] %v15685_v11  ;;  %v7848_v9 = vrot.slane %v15685_v11, 7  ;;  %v15688_v24 = vpop.f32.mrb[18].mxu0  ;;  %v18617_v11 = vld [vmem:[#allocation16_spill] sm:$0xff] }
 0xa41   : > { %18551 = vst [vmem:[#allocation24_spill] sm:$0xff] %v15688_v24  ;;  %v7853_v62 = vrot.slane %v15688_v24, 7  ;;  %v15696_v61 = vpop.f32.mrb[19].mxu0 }
 0xa42   : > { %18552 = vst [vmem:[#allocation20_spill] sm:$0xff] %v15696_v61  ;;  %v7944_v37 = vsel %vm18553_vm0, 0.0, %v7848_v9  ;;  %v7849_v38 = vrot.slane %v15696_v61, 7 }
 0xa43   : > { %v7946_v63 = vsel %vm18555_vm4, %v7944_v37, 0.0  ;;  %v15709_v35 = vmul.f32 %v15664_v60, %v7944_v37  ;;  %v8241_v42 = vrot.slane %v7944_v37, 2  ;;  %v8434_v58 = vsel %vm18557_vm7, %v7944_v37, 0.0 }
 0xa44   : > { %v8540_v16 = vmul.f32 %v15693_v26, %v7944_v37  ;;  %v15720_v53 = vsel %vm18558_vm12, %v7851_v51, %v7853_v62  ;;  %v15723_v2 = vmul.f32 %v15672_v59, %v7946_v63  ;;  %v15726_v57 = vsel %vm18559_vm1, %v7848_v9, %v7849_v38  ;;  %vm18586_vm12 = vmmov %vm18553_vm0 }
 0xa45   : > { %v15729_v54 = vsel %vm18560_vm8, %v7849_v38, %v7851_v51  ;;  %v17930_v34 = vrot.slane %v15709_v35, 1  ;;  %v15734_v22 = vsel %vm18541_vm9, %v18457_v43, %v8241_v42  ;;  %v8471_v56 = vmul.f32 %v15716_v32, %v8434_v58  ;;  %v18572_v51 = vld [vmem:[#allocation12_spill] sm:$0xff]  ;;  %vm18588_vm1 = vmmov %vm18553_vm0 }
 0xa46   : > { %v15739_v47 = vmul.f32 %v15664_v60, %v15726_v57  ;;  %v15741_v46 = vpop.f32.mrb[20].mxu0  ;;  %v8606_v21 = vrot.slane %v8540_v16, 1  ;;  %v7983_v50 = vmul.f32 %v15672_v59, %v15726_v57  ;;  %v8051_v27 = vmul.f32 %v15664_v60, %v15729_v54  ;;  %v15811_v16 = vld [vmem:[%s17686_s6 + $0x5] ss:$0 sm:$0xff]  ;;  %vm18597_vm8 = vmmov %vm18571_vm5 }
 0xa47   : > { %18561 = vst [vmem:[#allocation21_spill] sm:$0xff] %v15741_v46  ;;  %v17935_v23 = vrot.slane %v15726_v57, 2  ;;  %v15748_v8 = vpop.f32.mrb[21].mxu0  ;;  %v15753_v15 = vmul.f32 %v15693_v26, %v15726_v57  ;;  %v7859_v13 = vrot.slane %v15741_v46, 7  ;;  %v7948_v45 = vsel %vm18566_vm2, %v15729_v54, 0.0  ;;  %vm18601_vm9 = vmmov %vm18553_vm0 }
 0xa48   : > { %18562 = vst [vmem:[#allocation41_spill] sm:$0xff] %v15748_v8  ;;  %v17931_v49 = vrot.slane %v15739_v47, 1  ;;  %v7855_v25 = vrot.slane %v15748_v8, 7  ;;  %v15757_v36 = vpop.f32.mrb[22].mxu0  ;;  %v8118_v19 = vrot.slane %v8051_v27, 1  ;;  %v15767_v30 = vmul.f32 %v15664_v60, %v15720_v53 }
 0xa49   : > { %18563 = vst [vmem:[#allocation37_spill] sm:$0xff] %v15757_v36  ;;  %v7861_v55 = vrot.slane %v15757_v36, 7  ;;  %v15760_v12 = vpop.f32.mrb[23].mxu0  ;;  %v17932_v3 = vrot.slane %v15753_v15, 1  ;;  %v7984_v48 = vmul.f32 %v15672_v59, %v7948_v45  ;;  %v8244_v4 = vsel %vm18571_vm5, %v8241_v42, %v17935_v23 }
 0xa4a   : > { %18564 = vst [vmem:[#allocation28_spill] sm:$0xff] %v15760_v12  ;;  %v15771_v29 = vsel %vm18567_vm6, %v7853_v62, %v7855_v25  ;;  %v7857_v17 = vrot.slane %v15760_v12, 7  ;;  %v8119_v0 = vsel %vm5458_vm13, %v17931_v49, %v8118_v19  ;;  %v17933_v18 = vrot.slane %v15767_v30, 1  ;;  %v15853_v49 = vld [vmem:[%s17686_s6 + $0x8] ss:$0 sm:$0xff]  ;;  %vm18604_vm6 = vmmov %vm18553_vm0 }
 0xa4b   : > { %v15780_v1 = vmul.f32 %v15664_v60, %v15771_v29  ;;  %v15783_v28 = vsel %vm18568_vm14, %v7859_v13, %v7861_v55  ;;  %v15786_v9 = vadd.f32 %v8119_v0, %v7983_v50  ;;  %vm18573_vm3 = vnez %v18572_v51  ;;  %vm18607_vm14 = vmmov %vm18553_vm0 }
 0xa4c   : > { %v15789_v62 = vsel %vm18569_vm10, %v7855_v25, %v7857_v17  ;;  %v15792_v39 = vsel %vm18570_vm11, %v7857_v17, %v7859_v13  ;;  %v8121_v63 = vsel %vm5458_vm13, %v8118_v19, %v17933_v18  ;;  %v17936_v58 = vrot.slane %v15729_v54, 2  ;;  %v15822_v19 = vld [vmem:[%s17686_s6 + $0x7] ss:$0 sm:$0xff]  ;;  %vm18609_vm10 = vmmov %vm18553_vm0 }
 0xa4d   : > { %v15802_v38 = vmul.f32 %v15664_v60, %v15792_v39  ;;  %v8212_v50 = vadd.f32 %v8121_v63, %v7984_v48  ;;  %v17934_v27 = vrot.slane %v15720_v53, 2  ;;  %v8503_v13 = vadd.f32 %v8471_v56, %v8402_v52 }
 0xa4e   : > { %v15813_v42 = vpop.f32.mrb[24].mxu0  ;;  %v8608_v25 = vsel %vm5458_vm13, %v8606_v21, %v17932_v3  ;;  %v15824_v45 = vpop.f32.mrb[8].mxu1  ;;  %v8115_v17 = vsel %vm5458_vm13, %v8112_v6, %v17930_v34  ;;  %v15833_v52 = vmul.f32 %v15716_v32, %v15726_v57  ;;  %v8843_v48 = vsel %vm18557_vm7, %v15729_v54, 0.0  ;;  %vm18584_vm7 = vmmov %vm18553_vm0 }
 0xa4f   : > { %18574 = vst [vmem:[#allocation25_spill] sm:$0xff] %v15813_v42  ;;  %18575 = vst [vmem:[#allocation26_spill] sm:$0xff] %v15824_v45  ;;  %v15836_v21 = vpop.f32.mrb[25].mxu0  ;;  %v15841_v0 = vpop.f32.mrb[9].mxu1  ;;  %v8248_v33 = vsel %vm18578_vm15, %v17936_v58, %v17934_v27  ;;  %v8703_v6 = vadd.f32 %v8608_v25, %v8503_v13  ;;  %v8779_v34 = vmul.f32 %v15811_v16, %v8244_v4  ;;  %v15864_v27 = vld [vmem:[%s17686_s6 + $0x6] ss:$0 sm:$0xff]  ;;  %vm18618_vm11 = vnez %v18617_v11 }
 0xa50   : > { %18576 = vst [vmem:[#allocation47_spill] sm:$0xff] %v15836_v21  ;;  %18577 = vst [vmem:[#allocation39_spill] sm:$0xff] %v15841_v0  ;;  %v7863_v63 = vrot.slane %v15836_v21, 7  ;;  %v15855_v44 = vpop.f32.mrb[26].mxu0  ;;  %v15857_v3 = vpop.f32.mrb[10].mxu1  ;;  %v8374_v56 = vmul.f32 %v15683_v14, %v8248_v33  ;;  %v8948_v13 = vmul.f32 %v15822_v19, %v15729_v54  ;;  %v15870_v25 = vmul.f32 %v15822_v19, %v15720_v53 }
 0xa51   : > { %18579 = vst [vmem:[#allocation34_spill] sm:$0xff] %v15855_v44  ;;  %18580 = vst [vmem:[#allocation32_spill] sm:$0xff] %v15857_v3  ;;  %v15872_v37 = vpop.f32.mrb[27].mxu0  ;;  %v15874_v23 = vpop.f32.mrb[11].mxu1  ;;  %v7867_v18 = vrot.slane %v15813_v42, 7  ;;  %v8811_v31 = vadd.f32 %v8779_v34, %v8703_v6  ;;  %v8879_v21 = vmul.f32 %v15864_v27, %v8843_v48  ;;  %v9178_v8 = vmul.f32 %v15853_v49, %v8248_v33 }
 0xa52   : > { %18581 = vst [vmem:[#allocation29_spill] sm:$0xff] %v15872_v37  ;;  %18582 = vst [vmem:[#allocation53_spill] sm:$0xff] %v15874_v23  ;;  %v15878_v58 = vsel %vm18553_vm0, %v7861_v55, %v7863_v63  ;;  %v8406_v36 = vadd.f32 %v8374_v56, %v8212_v50  ;;  %v9012_v46 = vrot.slane %v8948_v13, 1  ;;  %v17948_v12 = vrot.slane %v15870_v25, 1 }
 0xa53   : > { %v8911_v24 = vadd.f32 %v8879_v21, %v8811_v31  ;;  %v8438_v20 = vsel %vm18566_vm2, %v15771_v29, 0.0  ;;  %v7869_v61 = vrot.slane %v15855_v44, 7  ;;  %v7865_v42 = vrot.slane %v15872_v37, 7 }
 0xa54   : > { %v15890_v34 = vmul.f32 %v15664_v60, %v15878_v58  ;;  %v9014_v55 = vsel %vm5458_vm13, %v9012_v46, %v17948_v12  ;;  %v8475_v50 = vmul.f32 %v15716_v32, %v8438_v20  ;;  %v7883_v31 = vrot.slane %v15824_v45, 7 }
 0xa55   : > { %v9108_v56 = vadd.f32 %v9014_v55, %v8911_v24  ;;  %v15898_v21 = vsel %vm18584_vm7, %v7867_v18, %v7869_v61  ;;  %v15901_v48 = vsel %vm18586_vm12, %v7863_v63, %v7865_v42  ;;  %v15904_v6 = vsel %vm18588_vm1, %v7865_v42, %v7867_v18  ;;  %vm18641_vm12 = vmmov %vm18571_vm5 }
 0xa56   : > { %18583 = vst [vmem:[#allocation43_spill] sm:$0xff] %v15890_v34  ;;  %18585 = vst [vmem:[#allocation45_spill] sm:$0xff] %v15898_v21  ;;  %v15906_v13 = vpop.f32.mrb[28].mxu0  ;;  %v15909_v44 = vmul.f32 %v15811_v16, %v8248_v33  ;;  %v15912_v46 = vmul.f32 %v15683_v14, %v8244_v4  ;;  %v15914_v20 = vadd.f32 %v8475_v50, %v8406_v36  ;;  %v7881_v42 = vrot.slane %v15874_v23, 7 }
 0xa57   : > { %18587 = vst [vmem:[#allocation36_spill] sm:$0xff] %v15901_v48  ;;  %18589 = vst [vmem:[#allocation38_spill] sm:$0xff] %v15904_v6  ;;  %v15917_v55 = vpop.f32.mrb[29].mxu0  ;;  %v9210_v12 = vadd.f32 %v9178_v8, %v9108_v56  ;;  %v15929_v36 = vmul.f32 %v15664_v60, %v15904_v6  ;;  %v8209_v50 = vadd.f32 %v8115_v17, %v15676_v40  ;;  %v18595_v8 = vrot.slane %v15729_v54, 2 }
 0xa58   : > { %18590 = vst [vmem:[#allocation60_spill] sm:$0xff] %v15906_v13  ;;  %18591 = vst [vmem:[#allocation55_spill] sm:$0xff] %v15917_v55  ;;  %v15922_v45 = vpop.f32.mrb[30].mxu0  ;;  %v15924_v33 = vpop.f32.mrb[12].mxu1  ;;  %v18596_v56 = vrot.slane %v15726_v57, 2  ;;  %v18600_v23 = vrot.slane %v15917_v55, 7  ;;  %v16010_v21 = vmul.f32 %v15822_v19, %v15771_v29 }
 0xa59   : > { %18592 = vst [vmem:[#allocation51_spill] sm:$0xff] %v15922_v45  ;;  %18593 = vst [vmem:[#allocation46_spill] sm:$0xff] %v15924_v33  ;;  %v15937_v18 = vpop.f32.mrb[31].mxu0  ;;  %v15939_v63 = vpop.f32.mrb[13].mxu1  ;;  %9242 = vadd.xlane.f32.xlu0 %v9210_v12  ;;  %v18603_v37 = vrot.slane %v15857_v3, 7  ;;  %v18606_v17 = vrot.slane %v15841_v0, 7 }
 0xa5a   : > { %18594 = vst [vmem:[#allocation62_spill] sm:$0xff] %v15929_v36  ;;  %v8246_v24 = vsel %vm18597_vm8, %v18596_v56, %v18595_v8  ;;  %18598 = vst [vmem:[#allocation57_spill] sm:$0xff] %v15937_v18  ;;  %v15944_v4 = vsel %vm18601_vm9, %v7869_v61, %v18600_v23  ;;  %v15957_v8 = vsel %vm18609_vm10, %v7881_v42, %v7883_v31  ;;  %v15959_v56 = vpop.f32.mrb[14].mxu1  ;;  %v18619_v5 = vsel %vm18573_vm3, %v15734_v22, 0.0 }
 0xa5b   : > { %18599 = vst [vmem:[#allocation52_spill] sm:$0xff] %v15939_v63  ;;  %18602 = vst [vmem:[#allocation69_spill] sm:$0xff] %v15944_v4  ;;  %v15949_v40 = vsel %vm18604_vm6, %v7883_v31, %v18603_v37  ;;  %v15954_v57 = vsel %vm18607_vm14, %v18606_v17, %v7881_v42  ;;  %v15963_v12 = vmul.f32 %v15664_v60, %v15944_v4  ;;  %v15977_v31 = vpop.f32.mrb[15].mxu1  ;;  %v8249_v17 = vrot.slane %v15771_v29, 2 }
 0xa5c   : > { %18605 = vst [vmem:[#allocation63_spill] sm:$0xff] %v15949_v40  ;;  %18608 = vst [vmem:[#allocation58_spill] sm:$0xff] %v15954_v57  ;;  %v15967_v61 = vmul.f32 %v15664_v60, %v15949_v40  ;;  %v15971_v23 = vmul.f32 %v15664_v60, %v15954_v57  ;;  %v15975_v37 = vmul.f32 %v15664_v60, %v15957_v8  ;;  %v8336_v43 = vsel %vm18618_vm11, %v8246_v24, 0.0 }
 0xa5d   : > { %18610 = vst [vmem:[#allocation67_spill] sm:$0xff] %v15957_v8  ;;  %18611 = vst [vmem:[#allocation50_spill] sm:$0xff] %v15959_v56  ;;  %v8371_v4 = vmul.f32 %v15683_v14, %v18619_v5  ;;  %v7985_v42 = vmul.f32 %v15672_v59, %v15720_v53  ;;  %v16001_v5 = vmul.f32 %v15693_v26, %v15729_v54  ;;  %v7877_v6 = vrot.slane %v15922_v45, 7 }
 0xa5e   : > { %18612 = vst [vmem:[#allocation7_spill] sm:$0xff] %v15963_v12  ;;  %18613 = vst [vmem:[#allocation4_spill] sm:$0xff] %v15967_v61  ;;  %v16003_v22 = vpop.f32.mrb[32].mxu0  ;;  %v8373_v40 = vmul.f32 %v15683_v14, %v8336_v43  ;;  %v8880_v8 = vmul.f32 %v15864_v27, %v15720_v53  ;;  %v9015_v43 = vrot.slane %v16010_v21, 1  ;;  %v18631_v48 = vrot.slane %v15739_v47, 1 }
 0xa5f   : > { %18614 = vst [vmem:[#allocation5_spill] sm:$0xff] %v15971_v23  ;;  %18615 = vst [vmem:[#allocation6_spill] sm:$0xff] %v15975_v37  ;;  %v8403_v33 = vadd.f32 %v8371_v4, %v8209_v50  ;;  %v16012_v61 = vpop.f32.mrb[33].mxu0  ;;  %v8609_v50 = vrot.slane %v16001_v5, 1  ;;  %v18624_v37 = vrot.slane %v15780_v1, 1  ;;  %v18626_v5 = vld [vmem:[#allocation18_spill] sm:$0xff] }
 0xa60   : > { %18616 = vst [vmem:[#allocation8_spill] sm:$0xff] %v15977_v31  ;;  %v18620_v31 = vrot.slane %v15720_v53, 2  ;;  %18621 = vst [vmem:[#allocation9_spill] sm:$0xff] %v16003_v22  ;;  %v16020_v12 = vpop.f32.mrb[34].mxu0  ;;  %vm18627_vm15 = vnez %v18626_v5  ;;  %v18629_v23 = vrot.slane %v15753_v15, 1  ;;  %v18651_v11 = vrot.slane %v15906_v13, 7 }
 0xa61   : > { %18622 = vst [vmem:[#allocation14_spill] sm:$0xff] %v16012_v61  ;;  %v8504_v4 = vadd.f32 %v15833_v52, %v8403_v33  ;;  %18623 = vst [vmem:[#allocation15_spill] sm:$0xff] %v16020_v12  ;;  %v18625_v52 = vrot.slane %v15767_v30, 1  ;;  %v16034_v57 = vpop.f32.mrb[35].mxu0 }
 0xa62   : > { %v15997_v56 = vsel %vm18571_vm5, %v18620_v31, %v8249_v17  ;;  %v8743_v31 = vsel %vm18573_vm3, %v8246_v24, 0.0  ;;  %18628 = vst [vmem:[#allocation13_spill] sm:$0xff] %v16034_v57  ;;  %v8610_v21 = vsel %vm5458_vm13, %v18629_v23, %v8609_v50  ;;  %v18632_v57 = vrot.slane %v15709_v35, 1  ;;  %vm18650_vm8 = vmmov %vm18553_vm0 }
 0xa63   : > { %v9143_v7 = vsel %vm18573_vm3, %v15997_v56, 0.0  ;;  %v8123_v33 = vsel %vm5458_vm13, %v18625_v52, %v18624_v37  ;;  %v8338_v24 = vsel %vm18627_vm15, %v15997_v56, 0.0  ;;  %v8704_v63 = vadd.f32 %v8610_v21, %v8504_v4  ;;  %vm18634_vm3 = vmmov %vm18553_vm0 }
 0xa64   : > { %v8213_v36 = vadd.f32 %v8123_v33, %v7985_v42  ;;  %v8375_v51 = vmul.f32 %v15683_v14, %v8338_v24  ;;  %v8780_v30 = vmul.f32 %v15811_v16, %v8743_v31  ;;  %v18630_v37 = vrot.slane %v15870_v25, 1  ;;  %v18636_v25 = vld [vmem:[#allocation19_spill] sm:$0xff]  ;;  %vm18652_vm9 = vmmov %vm18553_vm0 }
 0xa65   : > { %v8117_v15 = vsel %vm5458_vm13, %v18632_v57, %v18631_v48  ;;  %v18633_v23 = vrot.slane %v15906_v13, 7  ;;  %v18635_v4 = vrot.slane %v15841_v0, 7  ;;  %vm18637_vm7 = vnez %v18636_v25  ;;  %vm18659_vm10 = vmmov %vm18553_vm0 }
 0xa66   : > { %v9016_v52 = vsel %vm5458_vm13, %v18630_v37, %v9015_v43  ;;  %v16050_v34 = vadd.f32 %v8375_v51, %v8213_v36  ;;  %v7950_v47 = vsel %vm18637_vm7, %v15771_v29, 0.0  ;;  %v8812_v33 = vadd.f32 %v8780_v30, %v8704_v63  ;;  %v16082_v63 = vpop.f32.mrb[36].mxu0 }
 0xa67   : > { %v16055_v42 = vsel %vm18634_vm3, %v18633_v23, %v7877_v6  ;;  %v16060_v31 = vsel %vm18553_vm0, %v7877_v6, %v18635_v4  ;;  %v9179_v35 = vmul.f32 %v15853_v49, %v9143_v7  ;;  %v8745_v48 = vsel %vm18618_vm11, %v15997_v56, 0.0  ;;  %18639 = vst [vmem:[#allocation17_spill] sm:$0xff] %v16082_v63  ;;  %v16087_v37 = vpop.f32.mrb[37].mxu0  ;;  %v18664_v56 = vld [vmem:[#allocation27_spill] sm:$0xff] }
 0xa68   : > { %v16071_v36 = vmul.f32 %v15664_v60, %v16055_v42  ;;  %v16075_v57 = vmul.f32 %v15664_v60, %v16060_v31  ;;  %v8210_v6 = vadd.f32 %v8117_v15, %v15723_v2  ;;  %v8251_v24 = vrot.slane %v15789_v62, 2  ;;  %18640 = vst [vmem:[#allocation12_spill] sm:$0xff] %v16087_v37  ;;  %v16095_v4 = vpop.f32.mrb[38].mxu0 }
 0xa69   : > { %v8436_v7 = vsel %vm18555_vm4, %v15729_v54, 0.0  ;;  %v8912_v21 = vadd.f32 %v8880_v8, %v8812_v33  ;;  %v7986_v30 = vmul.f32 %v15672_v59, %v7950_v47  ;;  %v8440_v15 = vsel %vm18637_vm7, %v15792_v39, 0.0  ;;  %18642 = vst [vmem:[#allocation16_spill] sm:$0xff] %v16095_v4 }
 0xa6a   : > { %18638 = vst [vmem:[#allocation10_spill] sm:$0xff] %v16075_v57  ;;  %v8252_v23 = vsel %vm18641_vm12, %v8249_v17, %v8251_v24  ;;  %v8404_v2 = vadd.f32 %v15912_v46, %v8210_v6  ;;  %v8473_v54 = vmul.f32 %v15716_v32, %v8436_v7  ;;  %v8543_v33 = vmul.f32 %v15693_v26, %v15720_v53  ;;  %v16104_v46 = vpop.f32.mrb[39].mxu0  ;;  %vm18670_vm12 = vmmov %vm18553_vm0 }
 0xa6b   : > { %v9109_v8 = vadd.f32 %v9016_v52, %v8912_v21  ;;  %v8845_v47 = vsel %vm18555_vm4, %v15771_v29, 0.0  ;;  %v8951_v17 = vmul.f32 %v15822_v19, %v15789_v62  ;;  %18643 = vst [vmem:[#allocation18_spill] sm:$0xff] %v16104_v46  ;;  %v8054_v52 = vmul.f32 %v15664_v60, %v15789_v62  ;;  %vm18645_vm4 = vmmov %vm18571_vm5 }
 0xa6c   : > { %v8505_v7 = vadd.f32 %v8473_v54, %v8404_v2  ;;  %v8477_v51 = vmul.f32 %v15716_v32, %v8440_v15  ;;  %v8611_v45 = vrot.slane %v8543_v33, 1  ;;  %v8881_v10 = vmul.f32 %v15864_v27, %v8845_v47  ;;  %vm18656_vm14 = vmmov %vm18645_vm4 }
 0xa6d   : > { %v9211_v21 = vadd.f32 %v9179_v35, %v9109_v8  ;;  %v9017_v0 = vrot.slane %v8951_v17, 1  ;;  %v8124_v4 = vrot.slane %v8054_v52, 1  ;;  %v8253_v37 = vrot.slane %v15792_v39, 2 }
 0xa6e   : > { %v8405_v46 = vadd.f32 %v8373_v40, %v15786_v9  ;;  %v8612_v6 = vsel %vm5458_vm13, %v8609_v50, %v8611_v45  ;;  %v8474_v54 = vmul.f32 %v15716_v32, %v15720_v53  ;;  %v8544_v35 = vmul.f32 %v15693_v26, %v15771_v29 }
 0xa6f   : > { %9244 = vadd.xlane.f32.xlu0 %v9211_v21  ;;  %v9018_v2 = vsel %vm5458_vm13, %v9015_v43, %v9017_v0  ;;  %v8705_v15 = vadd.f32 %v8612_v6, %v8505_v7  ;;  %v9180_v8 = vmul.f32 %v15853_v49, %v8252_v23  ;;  %v18644_v33 = vrot.slane %v15780_v1, 1 }
 0xa70   : > { %v16125_v9 = vsel %vm18645_vm4, %v8251_v24, %v8253_v37  ;;  %v8376_v50 = vmul.f32 %v15683_v14, %v8252_v23  ;;  %v8506_v43 = vadd.f32 %v8474_v54, %v8405_v46  ;;  %v8613_v17 = vrot.slane %v8544_v35, 1 }
 0xa71   : > { %v8125_v47 = vsel %vm5458_vm13, %v18644_v33, %v8124_v4  ;;  %v8813_v53 = vadd.f32 %v15909_v44, %v8705_v15  ;;  %v8782_v52 = vmul.f32 %v15811_v16, %v8745_v48  ;;  %v8952_v29 = vmul.f32 %v15822_v19, %v15792_v39  ;;  %v18647_v33 = vld [vmem:[#allocation22_spill] sm:$0xff] }
 0xa72   : > { %v8214_v40 = vadd.f32 %v8125_v47, %v7986_v30  ;;  %v7987_v1 = vmul.f32 %v15672_v59, %v15789_v62  ;;  %v8614_v7 = vsel %vm5458_vm13, %v8611_v45, %v8613_v17  ;;  %v8882_v24 = vmul.f32 %v15864_v27, %v15789_v62 }
 0xa73   : > { %v18646_v30 = vrot.slane %v15802_v38, 1  ;;  %v8913_v21 = vadd.f32 %v8881_v10, %v8813_v53  ;;  %v8706_v44 = vadd.f32 %v8614_v7, %v8506_v43  ;;  %v9019_v54 = vrot.slane %v8952_v29, 1  ;;  %v18653_v29 = vld [vmem:[#allocation23_spill] sm:$0xff] }
 0xa74   : > { %v8408_v6 = vadd.f32 %v8376_v50, %v8214_v40  ;;  %v9145_v15 = vsel %vm18618_vm11, %v16125_v9, 0.0  ;;  %vm18648_vm1 = vnez %v18647_v33  ;;  %v7873_v47 = vrot.slane %v15937_v18, 7  ;;  %vm18661_vm11 = vmmov %vm18645_vm4 }
 0xa75   : > { %v8127_v46 = vsel %vm5458_vm13, %v8124_v4, %v18646_v30  ;;  %v8340_v45 = vsel %vm18648_vm1, %v16125_v9, 0.0  ;;  %v9110_v40 = vadd.f32 %v9018_v2, %v8913_v21  ;;  %v8814_v50 = vadd.f32 %v8782_v52, %v8706_v44 }
 0xa76   : > { %v8215_v48 = vadd.f32 %v8127_v46, %v7987_v1  ;;  %v16140_v35 = vadd.f32 %v8477_v51, %v8408_v6  ;;  %v9020_v4 = vsel %vm5458_vm13, %v9017_v0, %v9019_v54  ;;  %v8377_v10 = vmul.f32 %v15683_v14, %v8340_v45 }
 0xa77   : > { %v18649_v43 = vrot.slane %v15917_v55, 7  ;;  %v16159_v53 = vsel %vm18652_vm9, %v7873_v47, %v18651_v11  ;;  %vm18654_vm6 = vnez %v18653_v29  ;;  %v8056_v2 = vmul.f32 %v15664_v60, %v15783_v28  ;;  %vm18690_vm9 = vmmov %vm18553_vm0 }
 0xa78   : > { %v7952_v1 = vsel %vm18654_vm6, %v15792_v39, 0.0  ;;  %v9212_v0 = vadd.f32 %v9180_v8, %v9110_v40  ;;  %v8783_v52 = vmul.f32 %v15811_v16, %v8252_v23  ;;  %v8914_v6 = vadd.f32 %v8882_v24, %v8814_v50 }
 0xa79   : > { %v16154_v51 = vsel %vm18650_vm8, %v18649_v43, %v7873_v47  ;;  %v16167_v7 = vadd.f32 %v8377_v10, %v8215_v48  ;;  %v9181_v30 = vmul.f32 %v15853_v49, %v9145_v15  ;;  %v16172_v46 = vmul.f32 %v15664_v60, %v16159_v53 }
 0xa7a   : > { %v8128_v21 = vrot.slane %v8056_v2, 1  ;;  %v8255_v44 = vrot.slane %v15783_v28, 2  ;;  %9246 = vadd.xlane.f32.xlu1 %v9212_v0  ;;  %v9111_v45 = vadd.f32 %v9020_v4, %v8914_v6  ;;  %v8747_v8 = vsel %vm18627_vm15, %v16125_v9, 0.0 }
 0xa7b   : > { %v7988_v23 = vmul.f32 %v15672_v59, %v7952_v1  ;;  %v8545_v24 = vmul.f32 %v15693_v26, %v15789_v62  ;;  %v18655_v48 = vrot.slane %v15802_v38, 1  ;;  %v8847_v40 = vsel %vm18566_vm2, %v15792_v39, 0.0  ;;  %vm18658_vm2 = vmmov %vm18553_vm0 }
 0xa7c   : > { %v8256_v47 = vsel %vm18656_vm14, %v8253_v37, %v8255_v44  ;;  %v8953_v50 = vmul.f32 %v15822_v19, %v15783_v28  ;;  %v9213_v4 = vadd.f32 %v9181_v30, %v9111_v45  ;;  %v7891_v2 = vrot.slane %v16003_v22, 7 }
 0xa7d   : > { %v8129_v15 = vsel %vm5458_vm13, %v18655_v48, %v8128_v21  ;;  %v8378_v10 = vmul.f32 %v15683_v14, %v8256_v47  ;;  %v8615_v43 = vrot.slane %v8545_v24, 1  ;;  %v7887_v0 = vrot.slane %v16012_v61, 7  ;;  %v18667_v61 = vld [vmem:[#allocation30_spill] sm:$0xff] }
 0xa7e   : > { %v8216_v9 = vadd.f32 %v8129_v15, %v7988_v23  ;;  %v9021_v1 = vrot.slane %v8953_v50, 1  ;;  %9248 = vadd.xlane.f32.xlu0 %v9213_v4  ;;  %v17992_v6 = vrot.slane %v16020_v12, 7  ;;  %v8883_v45 = vmul.f32 %v15864_v27, %v8847_v40 }
 0xa7f   : > { %v8616_v41 = vsel %vm5458_vm13, %v8613_v17, %v8615_v43  ;;  %v8257_v24 = vrot.slane %v15878_v58, 2  ;;  %v18657_v48 = vrot.slane %v15857_v3, 7  ;;  %v8476_v50 = vmul.f32 %v15716_v32, %v15789_v62  ;;  %v18673_v3 = vld [vmem:[#allocation38_spill] sm:$0xff] }
 0xa80   : > { %v16194_v37 = vadd.f32 %v8378_v10, %v8216_v9  ;;  %v8707_v30 = vadd.f32 %v8616_v41, %v15914_v20  ;;  %v9022_v23 = vsel %vm5458_vm13, %v9019_v54, %v9021_v1  ;;  %v16211_v17 = vsel %vm18659_vm10, %v7891_v2, %v17992_v6  ;;  %vm18701_vm10 = vmmov %vm18645_vm4 }
 0xa81   : > { %v16206_v15 = vsel %vm18658_vm2, %v18657_v48, %v7887_v0  ;;  %18660 = vst [vmem:[#allocation19_spill] sm:$0xff] %v16211_v17  ;;  %v8546_v20 = vmul.f32 %v15693_v26, %v15792_v39  ;;  %v9182_v54 = vmul.f32 %v15853_v49, %v8256_v47  ;;  %v7989_v4 = vmul.f32 %v15672_v59, %v15783_v28  ;;  %vm18695_vm2 = vmmov %vm18553_vm0 }
 0xa82   : > { %v8815_v40 = vadd.f32 %v8783_v52, %v8707_v30  ;;  %v16221_v9 = vsel %vm18661_vm11, %v8255_v44, %v8257_v24  ;;  %v8508_v10 = vadd.f32 %v8476_v50, %v16050_v34  ;;  %v8784_v48 = vmul.f32 %v15811_v16, %v8747_v8  ;;  %v18662_v52 = vld [vmem:[#allocation43_spill] sm:$0xff] }
 0xa83   : > { %v8617_v41 = vrot.slane %v8546_v20, 1  ;;  %v8954_v62 = vmul.f32 %v15822_v19, %v15878_v58  ;;  %v8884_v39 = vmul.f32 %v15864_v27, %v15783_v28  ;;  %v18663_v30 = vrot.slane %v18662_v52, 1 }
 0xa84   : > { %v8915_v38 = vadd.f32 %v8883_v45, %v8815_v40  ;;  %vm18665_vm5 = vnez %v18664_v56  ;;  %v9147_v45 = vsel %vm18627_vm15, %v16221_v9, 0.0  ;;  %v18666_v40 = vld [vmem:[#allocation13_spill] sm:$0xff]  ;;  %vm18668_vm3 = vnez %v18667_v61  ;;  %vm18671_vm15 = vmmov %vm18645_vm4 }
 0xa85   : > { %v8131_v11 = vsel %vm5458_vm13, %v8128_v21, %v18663_v30  ;;  %v8342_v44 = vsel %vm18665_vm5, %v16221_v9, 0.0  ;;  %v8618_v34 = vsel %vm5458_vm13, %v8615_v43, %v8617_v41  ;;  %v9023_v50 = vrot.slane %v8954_v62, 1  ;;  %v18669_v62 = vld [vmem:[#allocation36_spill] sm:$0xff] }
 0xa86   : > { %v8217_v20 = vadd.f32 %v8131_v11, %v7989_v4  ;;  %v8379_v8 = vmul.f32 %v15683_v14, %v8342_v44  ;;  %v9112_v6 = vadd.f32 %v9022_v23, %v8915_v38  ;;  %v8708_v22 = vadd.f32 %v8618_v34, %v8508_v10 }
 0xa87   : > { %v7889_v13 = vrot.slane %v18666_v40, 7  ;;  %v9024_v21 = vsel %vm5458_vm13, %v9021_v1, %v9023_v50  ;;  %v7954_v43 = vsel %vm18668_vm3, %v15878_v58, 0.0  ;;  %v8259_v11 = vrot.slane %v18669_v62, 2 }
 0xa88   : > { %v16242_v30 = vadd.f32 %v8379_v8, %v8217_v20  ;;  %v9214_v4 = vadd.f32 %v9182_v54, %v9112_v6  ;;  %v8816_v44 = vadd.f32 %v8784_v48, %v8708_v22  ;;  %v8785_v23 = vmul.f32 %v15811_v16, %v8256_v47 }
 0xa89   : > { %v16249_v38 = vsel %vm18553_vm0, %v7887_v0, %v7889_v13  ;;  %v16252_v5 = vsel %vm18670_vm12, %v7889_v13, %v7891_v2  ;;  %v8260_v10 = vsel %vm18671_vm15, %v8257_v24, %v8259_v11  ;;  %v8547_v34 = vmul.f32 %v15693_v26, %v15783_v28 }
 0xa8a   : > { %v16257_v1 = vmul.f32 %v15664_v60, %v16252_v5  ;;  %9250 = vadd.xlane.f32.xlu0 %v9214_v4  ;;  %v8916_v6 = vadd.f32 %v8884_v39, %v8816_v44  ;;  %v9183_v22 = vmul.f32 %v15853_v49, %v9147_v45  ;;  %v8849_v13 = vsel %vm18637_vm7, %v15878_v58, 0.0  ;;  %v18672_v44 = vld [vmem:[#allocation52_spill] sm:$0xff]  ;;  %vm18676_vm7 = vmmov %vm18553_vm0 }
 0xa8b   : > { %v8955_v47 = vmul.f32 %v15822_v19, %v18669_v62  ;;  %v8749_v2 = vsel %vm18648_vm1, %v16221_v9, 0.0  ;;  %v7990_v0 = vmul.f32 %v15672_v59, %v7954_v43  ;;  %v8619_v24 = vrot.slane %v8547_v34, 1 }
 0xa8c   : > { %v8058_v54 = vmul.f32 %v15664_v60, %v18669_v62  ;;  %v9113_v48 = vadd.f32 %v9024_v21, %v8916_v6  ;;  %v9184_v25 = vmul.f32 %v15853_v49, %v8260_v10  ;;  %v8885_v45 = vmul.f32 %v15864_v27, %v8849_v13 }
 0xa8d   : > { %v9025_v20 = vrot.slane %v8955_v47, 1  ;;  %v8620_v8 = vsel %vm5458_vm13, %v8617_v41, %v8619_v24  ;;  %v7895_v40 = vrot.slane %v18672_v44, 7  ;;  %v8261_v18 = vrot.slane %v18673_v3, 2 }
 0xa8e   : > { %v8132_v4 = vrot.slane %v8058_v54, 1  ;;  %v9215_v9 = vadd.f32 %v9183_v22, %v9113_v48  ;;  %v8709_v43 = vadd.f32 %v8620_v8, %v16140_v35  ;;  %v18674_v21 = vrot.slane %v18662_v52, 1  ;;  %v18678_v8 = vld [vmem:[#allocation46_spill] sm:$0xff] }
 0xa8f   : > { %v9026_v34 = vsel %vm5458_vm13, %v9023_v50, %v9025_v20  ;;  %v18675_v47 = vrot.slane %v16020_v12, 7  ;;  %v8478_v13 = vmul.f32 %v15716_v32, %v15783_v28  ;;  %v16294_v22 = vmul.f32 %v15693_v26, %v15878_v58 }
 0xa90   : > { %v8133_v6 = vsel %vm5458_vm13, %v18674_v21, %v8132_v4  ;;  %9252 = vadd.xlane.f32.xlu0 %v9215_v9  ;;  %v8817_v35 = vadd.f32 %v8785_v23, %v8709_v43  ;;  %v8380_v54 = vmul.f32 %v15683_v14, %v8260_v10  ;;  %v16298_v52 = vsel %vm18645_vm4, %v8259_v11, %v8261_v18 }
 0xa91   : > { %v16288_v41 = vsel %vm18676_vm7, %v18675_v47, %v7895_v40  ;;  %v8218_v50 = vadd.f32 %v8133_v6, %v7990_v0  ;;  %v16301_v48 = vmul.f32 %v15811_v16, %v8260_v10  ;;  %v7899_v21 = vrot.slane %v18678_v8, 7  ;;  %v18680_v0 = vld [vmem:[#allocation35_spill] sm:$0xff]  ;;  %v18684_v8 = vld [vmem:[#allocation50_spill] sm:$0xff] }
 0xa92   : > { %18677 = vst [vmem:[#allocation22_spill] sm:$0xff] %v16288_v41  ;;  %v8510_v47 = vadd.f32 %v8478_v13, %v16167_v7  ;;  %v8621_v28 = vrot.slane %v16294_v22, 1  ;;  %v8917_v39 = vadd.f32 %v8885_v45, %v8817_v35  ;;  %v16310_v23 = vmul.f32 %v15664_v60, %v16288_v41  ;;  %v18682_v35 = vld [vmem:[#allocation62_spill] sm:$0xff] }
 0xa93   : > { %v16306_v44 = vadd.f32 %v8380_v54, %v8218_v50  ;;  %vm18681_vm8 = vnez %v18680_v0  ;;  %v8786_v9 = vmul.f32 %v15811_v16, %v8749_v2  ;;  %v8886_v7 = vmul.f32 %v15864_v27, %v18669_v62  ;;  %v18815_v0 = vld [vmem:[#allocation61_spill] sm:$0xff] }
 0xa94   : > { %18679 = vst [vmem:[#allocation23_spill] sm:$0xff] %v16310_v23  ;;  %v8344_v11 = vsel %vm18681_vm8, %v16298_v52, 0.0  ;;  %v8622_v10 = vsel %vm5458_vm13, %v8619_v24, %v8621_v28  ;;  %v16321_v45 = vmul.f32 %v15822_v19, %v18673_v3  ;;  %v9114_v43 = vadd.f32 %v9026_v34, %v8917_v39 }
 0xa95   : > { %v8710_v6 = vadd.f32 %v8622_v10, %v8510_v47  ;;  %v9149_v13 = vsel %vm18648_vm1, %v16298_v52, 0.0  ;;  %v7991_v22 = vmul.f32 %v15672_v59, %v18669_v62  ;;  %v8381_v24 = vmul.f32 %v15683_v14, %v8344_v11  ;;  %v18685_v47 = vld [vmem:[#allocation8_spill] sm:$0xff]  ;;  %vm18686_vm1 = vmmov %vm18553_vm0 }
 0xa96   : > { %v9027_v2 = vrot.slane %v16321_v45, 1  ;;  %v18683_v50 = vrot.slane %v18682_v35, 1  ;;  %v18003_v12 = vrot.slane %v18684_v8, 7  ;;  %v9216_v55 = vadd.f32 %v9184_v25, %v9114_v43  ;;  %v18688_v45 = vld [vmem:[#allocation45_spill] sm:$0xff]  ;;  %vm18713_vm0 = vmmov %vm18645_vm4 }
 0xa97   : > { %v8818_v39 = vadd.f32 %v8786_v9, %v8710_v6  ;;  %v7897_v10 = vrot.slane %v18685_v47, 7  ;;  %v9185_v41 = vmul.f32 %v15853_v49, %v9149_v13  ;;  %v16344_v17 = vmul.f32 %v15664_v60, %v18688_v45  ;;  %vm18722_vm15 = vmmov %vm18713_vm0 }
 0xa98   : > { %v8135_v54 = vsel %vm5458_vm13, %v8132_v4, %v18683_v50  ;;  %v9028_v33 = vsel %vm5458_vm13, %v9025_v20, %v9027_v2  ;;  %v16340_v11 = vsel %vm18686_vm1, %v7899_v21, %v18003_v12  ;;  %9254 = vadd.xlane.f32.xlu0 %v9216_v55  ;;  %v18692_v20 = vld [vmem:[#allocation40_spill] sm:$0xff]  ;;  %v18700_v6 = vrot.slane %v18682_v35, 1  ;;  %vm18724_vm7 = vmmov %vm18713_vm0 }
 0xa99   : > { %v8219_v34 = vadd.f32 %v8135_v54, %v7991_v22  ;;  %18687 = vst [vmem:[#allocation43_spill] sm:$0xff] %v16340_v11  ;;  %v8918_v4 = vadd.f32 %v8886_v7, %v8818_v39  ;;  %v16348_v25 = vmul.f32 %v15664_v60, %v16340_v11  ;;  %v16351_v9 = vsel %vm18690_vm9, %v7895_v40, %v7897_v10  ;;  %v18704_v12 = vld [vmem:[#allocation56_spill] sm:$0xff]  ;;  %vm18732_vm4 = vmmov %vm18713_vm0 }
 0xa9a   : > { %18691 = vst [vmem:[#allocation30_spill] sm:$0xff] %v16351_v9  ;;  %vm18693_vm14 = vnez %v18692_v20  ;;  %v16363_v55 = vsel %vm18695_vm2, %v7897_v10, %v7899_v21  ;;  %v16367_v40 = vmul.f32 %v15672_v59, %v16351_v9  ;;  %v16371_v50 = vmul.f32 %v15664_v60, %v16351_v9  ;;  %vm18748_vm9 = vmmov %vm18713_vm0 }
 0xa9b   : > { %18689 = vst [vmem:[#allocation27_spill] sm:$0xff] %v16348_v25  ;;  %v7956_v43 = vsel %vm18693_vm14, %v18673_v3, 0.0  ;;  %v16360_v22 = vadd.f32 %v8381_v24, %v8219_v34  ;;  %18696 = vst [vmem:[#allocation38_spill] sm:$0xff] %v16363_v55  ;;  %v9115_v7 = vadd.f32 %v9028_v33, %v8918_v4  ;;  %v16376_v39 = vmul.f32 %v15664_v60, %v16363_v55  ;;  %v18702_v33 = vld [vmem:[#allocation73_spill] sm:$0xff]  ;;  %v18718_v25 = vld [vmem:[#allocation63_spill] sm:$0xff] }
 0xa9c   : > { %18697 = vst [vmem:[#allocation35_spill] sm:$0xff] %v16367_v40  ;;  %18698 = vst [vmem:[#allocation62_spill] sm:$0xff] %v16371_v50  ;;  %v7992_v24 = vmul.f32 %v15672_v59, %v7956_v43  ;;  %v18004_v21 = vrot.slane %v16344_v17, 1  ;;  %v18005_v34 = vrot.slane %v18688_v45, 2  ;;  %v8442_v4 = vsel %vm18654_vm6, %v15878_v58, 0.0 }
 0xa9d   : > { %18694 = vst [vmem:[#allocation36_spill] sm:$0xff] %v16360_v22  ;;  %18699 = vst [vmem:[#allocation45_spill] sm:$0xff] %v16376_v39  ;;  %v9217_v10 = vadd.f32 %v9185_v41, %v9115_v7  ;;  %v16387_v54 = vmul.f32 %v15693_v26, %v18669_v62  ;;  %v8479_v7 = vmul.f32 %v15716_v32, %v8442_v4  ;;  %v8851_v58 = vsel %vm18654_vm6, %v18673_v3, 0.0 }
 0xa9e   : > { %v8137_v43 = vsel %vm5458_vm13, %v18700_v6, %v18004_v21  ;;  %v8264_v41 = vsel %vm18701_vm10, %v8261_v18, %v18005_v34  ;;  %vm18703_vm11 = vnez %v18702_v33  ;;  %v16411_v29 = vmul.f32 %v15822_v19, %v18688_v45  ;;  %v18707_v33 = vld [vmem:[#allocation5_spill] sm:$0xff]  ;;  %vm18758_vm10 = vmmov %vm18713_vm0 }
 0xa9f   : > { %9256 = vadd.xlane.f32.xlu0 %v9217_v10  ;;  %v8220_v13 = vadd.f32 %v8137_v43, %v7992_v24  ;;  %v8382_v35 = vmul.f32 %v15683_v14, %v8264_v41  ;;  %v18006_v6 = vrot.slane %v16387_v54, 1  ;;  %v8511_v4 = vadd.f32 %v8479_v7, %v16194_v37 }
 0xaa0   : > { %v16417_v24 = vmul.f32 %v15811_v16, %v8264_v41  ;;  %v8887_v43 = vmul.f32 %v15864_v27, %v8851_v58  ;;  %vm18705_vm6 = vnez %v18704_v12  ;;  %v9186_v7 = vmul.f32 %v15853_v49, %v8264_v41  ;;  %v18710_v58 = vld [vmem:[#allocation58_spill] sm:$0xff] }
 0xaa1   : > { %v8624_v10 = vsel %vm5458_vm13, %v8621_v28, %v18006_v6  ;;  %v7962_v21 = vsel %vm18705_vm6, %v16060_v31, 0.0  ;;  %v16426_v47 = vadd.f32 %v8382_v35, %v8220_v13  ;;  %v18708_v28 = vrot.slane %v18707_v33, 1  ;;  %v18716_v13 = vld [vmem:[#allocation65_spill] sm:$0xff] }
 0xaa2   : > { %v8711_v18 = vadd.f32 %v8624_v10, %v8511_v4  ;;  %v7998_v34 = vmul.f32 %v15672_v59, %v7962_v21  ;;  %v18709_v6 = vrot.slane %v16075_v57, 1  ;;  %v18711_v39 = vrot.slane %v18710_v58, 2  ;;  %v18715_v10 = vld [vmem:[#allocation67_spill] sm:$0xff] }
 0xaa3   : > { %18706 = vst [vmem:[#allocation56_spill] sm:$0xff] %v16426_v47  ;;  %v18712_v50 = vrot.slane %v16060_v31, 2  ;;  %v18024_v37 = vrot.slane %v18715_v10, 2  ;;  %vm18717_vm12 = vnez %v18716_v13  ;;  %v18023_v11 = vrot.slane %v18718_v25, 2 }
 0xaa4   : > { %v8149_v40 = vsel %vm5458_vm13, %v18709_v6, %v18708_v28  ;;  %v8819_v41 = vadd.f32 %v16301_v48, %v8711_v18  ;;  %v7966_v21 = vsel %vm18717_vm12, %v16206_v15, 0.0  ;;  %v18719_v6 = vrot.slane %v16411_v29, 1 }
 0xaa5   : > { %v16438_v4 = vsel %vm18713_vm0, %v18712_v50, %v18711_v39  ;;  %v8226_v35 = vadd.f32 %v8149_v40, %v7998_v34  ;;  %v16451_v55 = vmul.f32 %v15664_v60, %v16206_v15  ;;  %v18022_v50 = vrot.slane %v16249_v38, 2 }
 0xaa6   : > { %18714 = vst [vmem:[#allocation5_spill] sm:$0xff] %v16438_v4  ;;  %v9030_v28 = vsel %vm5458_vm13, %v9027_v2, %v18719_v6  ;;  %v8388_v48 = vmul.f32 %v15683_v14, %v16438_v4  ;;  %v8919_v39 = vadd.f32 %v8887_v43, %v8819_v41  ;;  %v8452_v40 = vsel %vm18705_vm6, %v18715_v10, 0.0 }
 0xaa7   : > { %18720 = vst [vmem:[#allocation58_spill] sm:$0xff] %v16451_v55  ;;  %v16462_v34 = vmul.f32 %v15693_v26, %v18715_v10  ;;  %v8002_v2 = vmul.f32 %v15672_v59, %v7966_v21  ;;  %v16470_v6 = vsel %vm18722_vm15, %v18024_v37, %v18023_v11  ;;  %v8489_v41 = vmul.f32 %v15716_v32, %v8452_v40 }
 0xaa8   : > { %v8420_v43 = vadd.f32 %v8388_v48, %v8226_v35  ;;  %v9116_v18 = vadd.f32 %v9030_v28, %v8919_v39  ;;  %v18723_v13 = vrot.slane %v16206_v15, 2  ;;  %v16480_v21 = vmul.f32 %v15693_v26, %v18718_v25  ;;  %v18727_v39 = vld [vmem:[#allocation69_spill] sm:$0xff] }
 0xaa9   : > { %18721 = vst [vmem:[#allocation67_spill] sm:$0xff] %v16462_v34  ;;  %v18026_v9 = vrot.slane %v16462_v34, 1  ;;  %v8861_v35 = vsel %vm18705_vm6, %v16206_v15, 0.0  ;;  %v16488_v28 = vmul.f32 %v15822_v19, %v16206_v15  ;;  %v16492_v48 = vmul.f32 %v15822_v19, %v16249_v38 }
 0xaaa   : > { %v8284_v57 = vsel %vm18724_vm7, %v18723_v13, %v18022_v50  ;;  %v8521_v23 = vadd.f32 %v8489_v41, %v8420_v43  ;;  %v9218_v13 = vadd.f32 %v9186_v7, %v9116_v18  ;;  %v16497_v40 = vmul.f32 %v15683_v14, %v16470_v6 }
 0xaab   : > { %18725 = vst [vmem:[#allocation63_spill] sm:$0xff] %v16488_v28  ;;  %v18027_v43 = vrot.slane %v16480_v21, 1  ;;  %v8797_v12 = vmul.f32 %v15811_v16, %v16470_v6  ;;  %v16506_v11 = vmul.f32 %v15664_v60, %v16249_v38  ;;  %v8897_v18 = vmul.f32 %v15864_v27, %v8861_v35 }
 0xaac   : > { %18726 = vst [vmem:[#allocation77_spill] sm:$0xff] %v16497_v40  ;;  %9258 = vadd.xlane.f32.xlu0 %v9218_v13  ;;  %v9196_v37 = vmul.f32 %v15853_v49, %v8284_v57  ;;  %v18029_v47 = vrot.slane %v18727_v39, 2  ;;  %v8392_v20 = vmul.f32 %v15683_v14, %v8284_v57  ;;  %v8480_v60 = vmul.f32 %v15716_v32, %v18669_v62 }
 0xaad   : > { %v8644_v7 = vsel %vm5458_vm13, %v18026_v9, %v18027_v43  ;;  %v18031_v50 = vrot.slane %v16506_v11, 1  ;;  %v18728_v13 = vrot.slane %v16492_v48, 1  ;;  %v18729_v34 = vrot.slane %v16488_v28, 1 }
 0xaae   : > { %v8721_v41 = vadd.f32 %v8644_v7, %v8521_v23  ;;  %v16526_v35 = vmul.f32 %v15811_v16, %v8284_v57  ;;  %v18731_v23 = vrot.slane %v18688_v45, 2  ;;  %v16537_v43 = vmul.f32 %v15693_v26, %v18673_v3 }
 0xaaf   : > { %v9050_v9 = vsel %vm5458_vm13, %v18729_v34, %v18728_v13  ;;  %v18733_v28 = vrot.slane %v16451_v55, 1  ;;  %v8512_v57 = vadd.f32 %v8480_v60, %v16242_v30  ;;  %v16547_v13 = vmul.f32 %v15822_v19, %v18727_v39 }
 0xab0   : > { %18730 = vst [vmem:[#allocation69_spill] sm:$0xff] %v16526_v35  ;;  %v16533_v7 = vsel %vm18732_vm4, %v18731_v23, %v18029_v47  ;;  %v8829_v62 = vadd.f32 %v8797_v12, %v8721_v41  ;;  %v18032_v23 = vrot.slane %v16537_v43, 1  ;;  %v18734_v12 = vld [vmem:[#allocation7_spill] sm:$0xff]  ;;  %v18736_v40 = vrot.slane %v16344_v17, 1 }
 0xab1   : > { %v8157_v34 = vsel %vm5458_vm13, %v18733_v28, %v18031_v50  ;;  %v9151_v47 = vsel %vm18665_vm5, %v16533_v7, 0.0  ;;  %v18735_v41 = vrot.slane %v18734_v12, 1  ;;  %v7993_v30 = vmul.f32 %v15672_v59, %v18688_v45 }
 0xab2   : > { %v8230_v35 = vadd.f32 %v8157_v34, %v8002_v2  ;;  %v8929_v28 = vadd.f32 %v8897_v18, %v8829_v62  ;;  %v18737_v2 = vsel %vm18665_vm5, %v16298_v52, 0.0  ;;  %v8888_v34 = vmul.f32 %v15864_v27, %v18688_v45  ;;  %v18740_v62 = vld [vmem:[#allocation42_spill] sm:$0xff] }
 0xab3   : > { %v8139_v55 = vsel %vm5458_vm13, %v18736_v40, %v18735_v41  ;;  %v8788_v60 = vmul.f32 %v15811_v16, %v18737_v2  ;;  %v18739_v17 = vrot.slane %v16387_v54, 1  ;;  %vm18741_vm1 = vnez %v18740_v62 }
 0xab4   : > { %v16567_v50 = vadd.f32 %v8392_v20, %v8230_v35  ;;  %v8346_v56 = vsel %vm18741_vm1, %v16533_v7, 0.0  ;;  %v9126_v52 = vadd.f32 %v9050_v9, %v8929_v28  ;;  %v9187_v2 = vmul.f32 %v15853_v49, %v9151_v47  ;;  %v18742_v20 = vld [vmem:[#allocation49_spill] sm:$0xff] }
 0xab5   : > { %v8626_v40 = vsel %vm5458_vm13, %v18739_v17, %v18032_v23  ;;  %v8221_v22 = vadd.f32 %v8139_v55, %v7993_v30  ;;  %vm18743_vm5 = vnez %v18742_v20  ;;  %v18745_v54 = vrot.slane %v16172_v46, 1 }
 0xab6   : > { %18738 = vst [vmem:[#allocation7_spill] sm:$0xff] %v16567_v50  ;;  %v8712_v41 = vadd.f32 %v8626_v40, %v8512_v57  ;;  %v7960_v35 = vsel %vm18743_vm5, %v16159_v53, 0.0  ;;  %v18744_v50 = vrot.slane %v16071_v36, 1  ;;  %v18746_v23 = vrot.slane %v16055_v42, 2 }
 0xab7   : > { %v18747_v18 = vrot.slane %v16159_v53, 2  ;;  %v8450_v47 = vsel %vm18743_vm5, %v16060_v31, 0.0  ;;  %v9228_v55 = vadd.f32 %v9196_v37, %v9126_v52  ;;  %v8383_v28 = vmul.f32 %v15683_v14, %v8346_v56 }
 0xab8   : > { %v8145_v17 = vsel %vm5458_vm13, %v18745_v54, %v18744_v50  ;;  %v8820_v57 = vadd.f32 %v8788_v60, %v8712_v41  ;;  %v7996_v30 = vmul.f32 %v15672_v59, %v7960_v35  ;;  %v8487_v59 = vmul.f32 %v15716_v32, %v8450_v47 }
 0xab9   : > { %v16592_v9 = vsel %vm18748_vm9, %v18747_v18, %v18746_v23  ;;  %v16606_v23 = vmul.f32 %v15693_v26, %v16060_v31  ;;  %v16610_v18 = vmul.f32 %v15693_v26, %v18710_v58  ;;  %9278 = vadd.xlane.f32.xlu1 %v9228_v55  ;;  %v8859_v56 = vsel %vm18743_vm5, %v18715_v10, 0.0 }
 0xaba   : > { %v8386_v40 = vmul.f32 %v15683_v14, %v16592_v9  ;;  %v8920_v37 = vadd.f32 %v8888_v34, %v8820_v57  ;;  %v8224_v60 = vadd.f32 %v8145_v17, %v7996_v30  ;;  %v18751_v52 = vrot.slane %v16547_v13, 1 }
 0xabb   : > { %18749 = vst [vmem:[#allocation42_spill] sm:$0xff] %v16606_v23  ;;  %18750 = vst [vmem:[#allocation49_spill] sm:$0xff] %v16610_v18  ;;  %v18752_v14 = vrot.slane %v16411_v29, 1  ;;  %v18033_v35 = vrot.slane %v16606_v23, 1  ;;  %v18034_v26 = vrot.slane %v16610_v18, 1  ;;  %v16625_v34 = vmul.f32 %v15822_v19, %v18715_v10 }
 0xabc   : > { %v16627_v32 = vadd.f32 %v8383_v28, %v8221_v22  ;;  %v8418_v17 = vadd.f32 %v8386_v40, %v8224_v60  ;;  %v16631_v20 = vmul.f32 %v15822_v19, %v18718_v25  ;;  %v8795_v47 = vmul.f32 %v15811_v16, %v16438_v4 }
 0xabd   : > { %v9032_v41 = vsel %vm5458_vm13, %v18752_v14, %v18751_v52  ;;  %18753 = vst [vmem:[#allocation78_spill] sm:$0xff] %v16625_v34  ;;  %v8640_v29 = vsel %vm5458_vm13, %v18033_v35, %v18034_v26  ;;  %v8895_v55 = vmul.f32 %v15864_v27, %v8859_v56  ;;  %v9194_v22 = vmul.f32 %v15853_v49, %v16470_v6  ;;  %v16655_v6 = vld [vmem:[%s17686_s6 + $0x4] ss:$0 sm:$0xff]  ;;  %v16665_v14 = vld [vmem:[%s17686_s6 + $0x3] ss:$0 sm:$0xff] }
 0xabe   : > { %v9117_v54 = vadd.f32 %v9032_v41, %v8920_v37  ;;  %18754 = vst [vmem:[#allocation79_spill] sm:$0xff] %v16631_v20  ;;  %v8519_v28 = vadd.f32 %v8487_v59, %v8418_v17  ;;  %v18035_v30 = vrot.slane %v16625_v34, 1  ;;  %v18036_v40 = vrot.slane %v16631_v20, 1  ;;  %v18755_v37 = vld [vmem:[#allocation44_spill] sm:$0xff]  ;;  %v18762_v34 = vld [vmem:[#allocation6_spill] sm:$0xff] }
 0xabf   : > { %vm18756_vm2 = vnez %v18755_v37  ;;  %v18037_v52 = vrot.slane %v16154_v51, 2  ;;  %v8444_v16 = vsel %vm18668_vm3, %v18673_v3, 0.0  ;;  %v8853_v41 = vsel %vm18668_vm3, %v18727_v39, 0.0  ;;  %vm18767_vm3 = vmmov %vm18713_vm0 }
 0xac0   : > { %v9219_v57 = vadd.f32 %v9187_v2, %v9117_v54  ;;  %v7958_v60 = vsel %vm18756_vm2, %v18727_v39, 0.0  ;;  %v16659_v2 = vmul.f32 %v16655_v6, %v18688_v45  ;;  %v8719_v59 = vadd.f32 %v8640_v29, %v8519_v28  ;;  %v16684_v28 = vld [vmem:[%s17686_s6 + $0x1] ss:$0 sm:$0xff]  ;;  %vm18779_vm15 = vmmov %vm18767_vm3 }
 0xac1   : > { %v8481_v3 = vmul.f32 %v16665_v14, %v8444_v16  ;;  %v18757_v54 = vrot.slane %v18727_v39, 2  ;;  %v16688_v61 = vmul.f32 %v16684_v28, %v16154_v51  ;;  %v18759_v50 = vrot.slane %v16537_v43, 1  ;;  %vm18781_vm7 = vmmov %vm18767_vm3 }
 0xac2   : > { %9260 = vadd.xlane.f32.xlu0 %v9219_v57  ;;  %v18038_v29 = vrot.slane %v16659_v2, 1  ;;  %v16679_v57 = vmul.f32 %v15822_v19, %v16154_v51  ;;  %v8827_v16 = vadd.f32 %v8795_v47, %v8719_v59  ;;  %v16698_v19 = vld [vmem:[%s17686_s6] ss:$0 sm:$0xff]  ;;  %v8889_v59 = vmul.f32 %v15864_v27, %v8853_v41  ;;  %vm18790_vm5 = vmmov %vm18767_vm3 }
 0xac3   : > { %v8268_v17 = vsel %vm18758_vm10, %v18757_v54, %v18037_v52  ;;  %v9046_v54 = vsel %vm5458_vm13, %v18035_v30, %v18036_v40  ;;  %v7994_v35 = vmul.f32 %v16698_v19, %v7958_v60  ;;  %v8513_v26 = vadd.f32 %v8481_v3, %v16306_v44  ;;  %v16712_v30 = vld [vmem:[%s17686_s6 + $0x2] ss:$0 sm:$0xff]  ;;  %v18760_v44 = vld [vmem:[#allocation12_spill] sm:$0xff] }
 0xac4   : > { %v8628_v47 = vsel %vm5458_vm13, %v18759_v50, %v18038_v29  ;;  %v18042_v56 = vrot.slane %v16688_v61, 1  ;;  %v8384_v40 = vmul.f32 %v16712_v30, %v8268_v17  ;;  %v8927_v60 = vadd.f32 %v8895_v55, %v8827_v16 }
 0xac5   : > { %v8713_v52 = vadd.f32 %v8628_v47, %v8513_v26  ;;  %v7999_v43 = vmul.f32 %v16698_v19, %v18710_v58  ;;  %v18761_v41 = vrot.slane %v18734_v12, 1  ;;  %v18763_v23 = vrot.slane %v18762_v34, 1 }
 0xac6   : > { %v18764_v4 = vrot.slane %v18707_v33, 1  ;;  %v18765_v26 = vrot.slane %v18715_v10, 2  ;;  %v18766_v16 = vrot.slane %v18710_v58, 2  ;;  %v9124_v50 = vadd.f32 %v9046_v54, %v8927_v60 }
 0xac7   : > { %v8141_v29 = vsel %vm5458_vm13, %v18761_v41, %v18042_v56  ;;  %v8821_v3 = vadd.f32 %v16417_v24, %v8713_v52  ;;  %v18769_v12 = vrot.slane %v18760_v44, 7  ;;  %v18770_v41 = vrot.slane %v18684_v8, 7 }
 0xac8   : > { %v8151_v55 = vsel %vm5458_vm13, %v18764_v4, %v18763_v23  ;;  %v16734_v47 = vsel %vm18767_vm3, %v18766_v16, %v18765_v26  ;;  %v8222_v37 = vadd.f32 %v8141_v29, %v7994_v35  ;;  %vm18771_vm6 = vcmask 1040384   ;;  %v18773_v35 = vld [vmem:[#allocation59_spill] sm:$0xff] }
 0xac9   : > { %18768 = vst [vmem:[#allocation6_spill] sm:$0xff] %v16734_v47  ;;  %v16742_v56 = vsel %vm18771_vm6, %v18770_v41, %v18769_v12  ;;  %v9188_v33 = vmul.f32 %v15853_v49, %v8268_v17  ;;  %v8227_v23 = vadd.f32 %v8151_v55, %v7999_v43  ;;  %v18043_v26 = vrot.slane %v16252_v5, 2  ;;  %vm18794_vm10 = vmmov %vm18771_vm6 }
 0xaca   : > { %v16747_v4 = vmul.f32 %v16684_v28, %v16742_v56  ;;  %v9226_v54 = vadd.f32 %v9194_v22, %v9124_v50  ;;  %v8921_v60 = vadd.f32 %v8889_v59, %v8821_v3  ;;  %v16750_v24 = vadd.f32 %v8384_v40, %v8222_v37  ;;  %v18782_v59 = vld [vmem:[#allocation66_spill] sm:$0xff]  ;;  %vm18796_vm3 = vmmov %vm18771_vm6 }
 0xacb   : > { %vm18774_vm0 = vnez %v18773_v35  ;;  %v18775_v29 = vrot.slane %v16679_v57, 1  ;;  %v18776_v16 = vrot.slane %v16547_v13, 1  ;;  %v18777_v12 = vrot.slane %v16206_v15, 2  ;;  %v18791_v35 = vld [vmem:[#allocation64_spill] sm:$0xff] }
 0xacc   : > { %18772 = vst [vmem:[#allocation80_spill] sm:$0xff] %v16750_v24  ;;  %v8352_v52 = vsel %vm18774_vm0, %v16734_v47, 0.0  ;;  %v18778_v43 = vrot.slane %v18718_v25, 2  ;;  %v18780_v22 = vrot.slane %v16249_v38, 2  ;;  %9274 = vadd.xlane.f32.xlu1 %v9226_v54  ;;  %vm18783_vm4 = vnez %v18782_v59  ;;  %v18884_v59 = vld [vmem:[#allocation74_spill] sm:$0xff] }
 0xacd   : > { %v9034_v49 = vsel %vm5458_vm13, %v18776_v16, %v18775_v29  ;;  %v8389_v37 = vmul.f32 %v16712_v30, %v8352_v52  ;;  %v8490_v50 = vmul.f32 %v16665_v14, %v18718_v25  ;;  %v16782_v41 = vmul.f32 %v16655_v6, %v16206_v15  ;;  %v16787_v29 = vld [vmem:[%s17686_s6 + $0x5] ss:$0 sm:$0xff] }
 0xace   : > { %v16765_v55 = vsel %vm18779_vm15, %v18778_v43, %v18777_v12  ;;  %v16772_v40 = vsel %vm18781_vm7, %v18780_v22, %v18043_v26  ;;  %v9118_v13 = vadd.f32 %v9034_v49, %v8921_v60  ;;  %v16790_v52 = vmul.f32 %v16787_v29, %v8268_v17  ;;  %v16804_v17 = vld [vmem:[%s17686_s6 + $0x7] ss:$0 sm:$0xff]  ;;  %vm18818_vm15 = vmmov %vm18796_vm3 }
 0xacf   : > { %v8356_v3 = vsel %vm18783_vm4, %v16772_v40, 0.0  ;;  %v8421_v60 = vadd.f32 %v8389_v37, %v8227_v23  ;;  %v8761_v16 = vsel %vm18774_vm0, %v16765_v55, 0.0  ;;  %v18046_v43 = vrot.slane %v16782_v41, 1  ;;  %vm18820_vm7 = vmmov %vm18796_vm3 }
 0xad0   : > { %v9220_v49 = vadd.f32 %v9188_v33, %v9118_v13  ;;  %v8393_v12 = vmul.f32 %v16712_v30, %v8356_v3  ;;  %v8798_v22 = vmul.f32 %v16787_v29, %v8761_v16  ;;  %v8898_v8 = vmul.f32 %v15864_v27, %v16249_v38  ;;  %v18787_v16 = vld [vmem:[#allocation16_spill] sm:$0xff] }
 0xad1   : > { %v8522_v26 = vadd.f32 %v8490_v50, %v8421_v60  ;;  %v16808_v23 = vmul.f32 %v16804_v17, %v16252_v5  ;;  %v8003_v33 = vmul.f32 %v16698_v19, %v16249_v38  ;;  %v18784_v37 = vrot.slane %v16480_v21, 1 }
 0xad2   : > { %9262 = vadd.xlane.f32.xlu0 %v9220_v49  ;;  %v9161_v27 = vsel %vm18774_vm0, %v16772_v40, 0.0  ;;  %v18785_v3 = vrot.slane %v16257_v1, 1  ;;  %v18786_v50 = vrot.slane %v16506_v11, 1  ;;  %v7909_v54 = vrot.slane %v18787_v16, 7 }
 0xad3   : > { %v8646_v13 = vsel %vm5458_vm13, %v18784_v37, %v18046_v43  ;;  %v18050_v49 = vrot.slane %v16808_v23, 1  ;;  %v18788_v21 = vrot.slane %v16159_v53, 2  ;;  %v18789_v37 = vrot.slane %v16154_v51, 2 }
 0xad4   : > { %v8159_v60 = vsel %vm5458_vm13, %v18786_v50, %v18785_v3  ;;  %v8722_v24 = vadd.f32 %v8646_v13, %v8522_v26  ;;  %vm18792_vm9 = vnez %v18791_v35  ;;  %v18793_v26 = vrot.slane %v16082_v63, 7  ;;  %v16851_v50 = vld [vmem:[%s17686_s6 + $0x8] ss:$0 sm:$0xff] }
 0xad5   : > { %v8231_v20 = vadd.f32 %v8159_v60, %v8003_v33  ;;  %v16832_v43 = vsel %vm18790_vm5, %v18789_v37, %v18788_v21  ;;  %v16846_v33 = vsel %vm18796_vm3, %v7909_v54, 0.0  ;;  %v9197_v60 = vmul.f32 %v16851_v50, %v9161_v27  ;;  %v18798_v21 = vld [vmem:[#allocation48_spill] sm:$0xff] }
 0xad6   : > { %v16843_v13 = vsel %vm18794_vm10, %v18793_v26, %v7909_v54  ;;  %18797 = vst [vmem:[#allocation64_spill] sm:$0xff] %v16846_v33  ;;  %v8830_v3 = vadd.f32 %v8798_v22, %v8722_v24  ;;  %vm18799_vm6 = vnez %v18798_v21  ;;  %v8482_v11 = vmul.f32 %v16665_v14, %v18688_v45 }
 0xad7   : > { %18795 = vst [vmem:[#allocation59_spill] sm:$0xff] %v16843_v13  ;;  %v8348_v37 = vsel %vm18799_vm6, %v16832_v43, 0.0  ;;  %v18800_v54 = vrot.slane %v16492_v48, 1  ;;  %v16864_v22 = vadd.f32 %v8393_v12, %v8231_v20  ;;  %v16868_v26 = vmul.f32 %v16655_v6, %v16843_v13  ;;  %v18805_v48 = vld [vmem:[#allocation36_spill] sm:$0xff]  ;;  %v18806_v20 = vld [vmem:[#allocation75_spill] sm:$0xff] }
 0xad8   : > { %v16872_v27 = vmul.f32 %v16655_v6, %v16846_v33  ;;  %v8930_v47 = vadd.f32 %v8898_v8, %v8830_v3  ;;  %v16876_v45 = vmul.f32 %v16665_v14, %v16843_v13  ;;  %v8514_v18 = vadd.f32 %v8482_v11, %v18805_v48  ;;  %v18812_v48 = vld [vmem:[#allocation18_spill] sm:$0xff] }
 0xad9   : > { %v9052_v24 = vsel %vm5458_vm13, %v18800_v54, %v18050_v49  ;;  %18801 = vst [vmem:[#allocation48_spill] sm:$0xff] %v16864_v22  ;;  %18802 = vst [vmem:[#allocation81_spill] sm:$0xff] %v16868_v26  ;;  %vm18807_vm0 = vnez %v18806_v20  ;;  %v16885_v54 = vmul.f32 %v16804_v17, %v16846_v33  ;;  %v8385_v49 = vmul.f32 %v16712_v30, %v8348_v37 }
 0xada   : > { %18803 = vst [vmem:[#allocation82_spill] sm:$0xff] %v16872_v27  ;;  %18804 = vst [vmem:[#allocation83_spill] sm:$0xff] %v16876_v45  ;;  %v16890_v8 = vmul.f32 %v16655_v6, %v18727_v39  ;;  %v9127_v3 = vadd.f32 %v9052_v24, %v8930_v47  ;;  %v18809_v12 = vsel %vm18681_vm8, %v16533_v7, 0.0  ;;  %v16905_v33 = vmul.f32 %v16804_v17, %v16159_v53 }
 0xadb   : > { %18808 = vst [vmem:[#allocation36_spill] sm:$0xff] %v16885_v54  ;;  %v8790_v37 = vmul.f32 %v16787_v29, %v18809_v12  ;;  %v7995_v47 = vmul.f32 %v16698_v19, %v16154_v51  ;;  %v9153_v16 = vsel %vm18681_vm8, %v16832_v43, 0.0  ;;  %v18810_v45 = vrot.slane %v16172_v46, 1  ;;  %v18848_v54 = vld [vmem:[#allocation23_spill] sm:$0xff] }
 0xadc   : > { %v9229_v24 = vadd.f32 %v9197_v60, %v9127_v3  ;;  %v18811_v11 = vrot.slane %v16688_v61, 1  ;;  %v7905_v12 = vrot.slane %v18812_v48, 7  ;;  %v18813_v27 = vrot.slane %v16890_v8, 1  ;;  %v16930_v61 = vld [vmem:[%s17686_s6 + $0x6] ss:$0 sm:$0xff] }
 0xadd   : > { %v18814_v26 = vrot.slane %v16659_v2, 1  ;;  %v18059_v60 = vrot.slane %v16905_v33, 1  ;;  %vm18816_vm8 = vnez %v18815_v0  ;;  %v18817_v2 = vrot.slane %v18760_v44, 7 }
 0xade   : > { %v8143_v7 = vsel %vm5458_vm13, %v18811_v11, %v18810_v45  ;;  %v7964_v22 = vsel %vm18816_vm8, %v18715_v10, 0.0  ;;  %9280 = vadd.xlane.f32.xlu1 %v9229_v24  ;;  %v8890_v45 = vmul.f32 %v16930_v61, %v16154_v51  ;;  %vm18834_vm10 = vcmask 1045504  }
 0xadf   : > { %v8630_v13 = vsel %vm5458_vm13, %v18814_v26, %v18813_v27  ;;  %v8223_v3 = vadd.f32 %v8143_v7, %v7995_v47  ;;  %v16937_v26 = vsel %vm18818_vm15, %v18817_v2, %v7905_v12  ;;  %v18819_v27 = vrot.slane %v16082_v63, 7  ;;  %v18824_v47 = vld [vmem:[#allocation68_spill] sm:$0xff]  ;;  %v18829_v63 = vld [vmem:[#allocation19_spill] sm:$0xff]  ;;  %vm18858_vm3 = vmmov %vm18834_vm10 }
 0xae0   : > { %v8714_v46 = vadd.f32 %v8630_v13, %v8514_v18  ;;  %vm18825_vm5 = vnez %v18824_v47  ;;  %v18826_v2 = vrot.slane %v16679_v57, 1  ;;  %v18832_v57 = vrot.slane %v18762_v34, 1 }
 0xae1   : > { %v16942_v11 = vsel %vm18820_vm7, %v7905_v12, %v18819_v27  ;;  %v16945_v18 = vadd.f32 %v8385_v49, %v8223_v3  ;;  %v7968_v24 = vsel %vm18825_vm5, %v16252_v5, 0.0  ;;  %v9189_v27 = vmul.f32 %v16851_v50, %v9153_v16  ;;  %vm18874_vm7 = vmmov %vm18858_vm3 }
 0xae2   : > { %18821 = vst [vmem:[#allocation75_spill] sm:$0xff] %v16942_v11  ;;  %v16949_v13 = vmul.f32 %v16684_v28, %v16942_v11  ;;  %v8822_v7 = vadd.f32 %v8790_v37, %v8714_v46  ;;  %v9036_v12 = vsel %vm5458_vm13, %v18826_v2, %v18059_v60  ;;  %v8000_v49 = vmul.f32 %v16698_v19, %v7964_v22  ;;  %v18830_v46 = vld [vmem:[#allocation4_spill] sm:$0xff] }
 0xae3   : > { %18822 = vst [vmem:[#allocation61_spill] sm:$0xff] %v16945_v18  ;;  %v16963_v3 = vmul.f32 %v16684_v28, %v16937_v26  ;;  %v16967_v10 = vmul.f32 %v16655_v6, %v16942_v11  ;;  %v8072_v37 = vmul.f32 %v16684_v28, %v18829_v63  ;;  %v18831_v48 = vrot.slane %v18830_v46, 1 }
 0xae4   : > { %18823 = vst [vmem:[#allocation84_spill] sm:$0xff] %v16949_v13  ;;  %v8922_v16 = vadd.f32 %v8890_v45, %v8822_v7  ;;  %v8004_v22 = vmul.f32 %v16698_v19, %v7968_v24  ;;  %v8287_v44 = vrot.slane %v18829_v63, 2  ;;  %v8454_v11 = vsel %vm18816_vm8, %v16206_v15, 0.0  ;;  %v18835_v24 = vld [vmem:[#allocation77_spill] sm:$0xff] }
 0xae5   : > { %18827 = vst [vmem:[#allocation85_spill] sm:$0xff] %v16963_v3  ;;  %18828 = vst [vmem:[#allocation86_spill] sm:$0xff] %v16967_v10  ;;  %v8153_v2 = vsel %vm5458_vm13, %v18832_v57, %v18831_v48  ;;  %v8160_v47 = vrot.slane %v8072_v37, 1  ;;  %v16984_v28 = vmul.f32 %v16655_v6, %v16249_v38  ;;  %v18833_v48 = vrot.slane %v16252_v5, 2  ;;  %v18850_v3 = vld [vmem:[#allocation22_spill] sm:$0xff] }
 0xae6   : > { %v8228_v60 = vadd.f32 %v8153_v2, %v8000_v49  ;;  %v9119_v34 = vadd.f32 %v9036_v12, %v8922_v16  ;;  %v8491_v49 = vmul.f32 %v16665_v14, %v8454_v11  ;;  %v18836_v57 = vrot.slane %v16257_v1, 1 }
 0xae7   : > { %v8288_v45 = vsel %vm18834_vm10, %v18833_v48, %v8287_v44  ;;  %v8647_v15 = vrot.slane %v16984_v28, 1  ;;  %v8863_v12 = vsel %vm18816_vm8, %v16252_v5, 0.0  ;;  %v8446_v0 = vsel %vm18693_vm14, %v18727_v39, 0.0  ;;  %v18841_v39 = vld [vmem:[#allocation69_spill] sm:$0xff] }
 0xae8   : > { %v8422_v7 = vadd.f32 %v18835_v24, %v8228_v60  ;;  %v8161_v37 = vsel %vm5458_vm13, %v18836_v57, %v8160_v47  ;;  %v8394_v2 = vmul.f32 %v16712_v30, %v8288_v45  ;;  %v9221_v16 = vadd.f32 %v9189_v27, %v9119_v34 }
 0xae9   : > { %v8232_v48 = vadd.f32 %v8161_v37, %v8004_v22  ;;  %v18837_v60 = vrot.slane %v16782_v41, 1  ;;  %v17004_v1 = vmul.f32 %v16787_v29, %v8288_v45  ;;  %v17008_v24 = vmul.f32 %v16804_v17, %v18829_v63 }
 0xaea   : > { %v8523_v13 = vadd.f32 %v8491_v49, %v8422_v7  ;;  %9264 = vadd.xlane.f32.xlu0 %v9221_v16  ;;  %v8899_v22 = vmul.f32 %v16930_v61, %v8863_v12  ;;  %v8483_v34 = vmul.f32 %v16665_v14, %v8446_v0  ;;  %v17017_v41 = vmul.f32 %v16655_v6, %v16154_v51  ;;  %v18842_v16 = vld [vmem:[#allocation56_spill] sm:$0xff] }
 0xaeb   : > { %v8648_v11 = vsel %vm5458_vm13, %v18837_v60, %v8647_v15  ;;  %18838 = vst [vmem:[#allocation19_spill] sm:$0xff] %v17004_v1  ;;  %v17019_v7 = vadd.f32 %v8394_v2, %v8232_v48  ;;  %v9053_v49 = vrot.slane %v17008_v24, 1  ;;  %v9198_v57 = vmul.f32 %v16851_v50, %v8288_v45 }
 0xaec   : > { %v8723_v27 = vadd.f32 %v8648_v11, %v8523_v13  ;;  %v17025_v37 = vmul.f32 %v16804_v17, %v16055_v42  ;;  %v8515_v12 = vadd.f32 %v8483_v34, %v18842_v16  ;;  %v8631_v60 = vrot.slane %v17017_v41, 1 }
 0xaed   : > { %18840 = vst [vmem:[#allocation4_spill] sm:$0xff] %v17019_v7  ;;  %v8855_v11 = vsel %vm18693_vm14, %v16159_v53, 0.0  ;;  %v18843_v2 = vrot.slane %v16808_v23, 1  ;;  %v8001_v24 = vmul.f32 %v16698_v19, %v18718_v25  ;;  %v8005_v0 = vmul.f32 %v16698_v19, %v18829_v63  ;;  %vm18854_vm14 = vmmov %vm18834_vm10 }
 0xaee   : > { %v8831_v13 = vadd.f32 %v18841_v39, %v8723_v27  ;;  %v18844_v34 = vrot.slane %v16890_v8, 1  ;;  %v18845_v39 = vld [vmem:[#allocation58_spill] sm:$0xff]  ;;  %v18847_v23 = vrot.slane %v18830_v46, 1  ;;  %v18849_v45 = vrot.slane %v18848_v54, 1 }
 0xaef   : > { %v9054_v48 = vsel %vm5458_vm13, %v18843_v2, %v9053_v49  ;;  %v18846_v16 = vrot.slane %v18845_v39, 1  ;;  %v8891_v1 = vmul.f32 %v16930_v61, %v8855_v11  ;;  %v8289_v8 = vrot.slane %v18850_v3, 2 }
 0xaf0   : > { %v8931_v27 = vadd.f32 %v8899_v22, %v8831_v13  ;;  %v8632_v28 = vsel %vm5458_vm13, %v18844_v34, %v8631_v60  ;;  %v8163_v10 = vsel %vm5458_vm13, %v8160_v47, %v18849_v45  ;;  %v18851_v34 = vsel %vm18792_vm9, %v16765_v55, 0.0 }
 0xaf1   : > { %v8155_v2 = vsel %vm5458_vm13, %v18847_v23, %v18846_v16  ;;  %v8715_v7 = vadd.f32 %v8632_v28, %v8515_v12  ;;  %v8233_v13 = vadd.f32 %v8163_v10, %v8005_v0  ;;  %v8391_v46 = vmul.f32 %v16712_v30, %v18851_v34 }
 0xaf2   : > { %v8229_v22 = vadd.f32 %v8155_v2, %v8001_v24  ;;  %v9128_v18 = vadd.f32 %v9054_v48, %v8931_v27  ;;  %v8492_v39 = vmul.f32 %v16665_v14, %v16249_v38  ;;  %v18852_v47 = vrot.slane %v17025_v37, 1  ;;  %v18856_v38 = vld [vmem:[#allocation30_spill] sm:$0xff] }
 0xaf3   : > { %v8823_v16 = vadd.f32 %v16790_v52, %v8715_v7  ;;  %v18853_v12 = vrot.slane %v16905_v33, 1  ;;  %v9190_v11 = vmul.f32 %v16851_v50, %v16592_v9  ;;  %v17073_v48 = vmul.f32 %v16655_v6, %v16252_v5  ;;  %v18859_v27 = vld [vmem:[#allocation70_spill] sm:$0xff] }
 0xaf4   : > { %v9230_v45 = vadd.f32 %v9198_v57, %v9128_v18  ;;  %v17076_v24 = vsel %vm18854_vm14, %v8287_v44, %v8289_v8  ;;  %v18857_v0 = vrot.slane %v18856_v38, 2  ;;  %v8423_v7 = vadd.f32 %v8391_v46, %v8229_v22 }
 0xaf5   : > { %v9038_v10 = vsel %vm5458_vm13, %v18853_v12, %v18852_v47  ;;  %18855 = vst [vmem:[#allocation77_spill] sm:$0xff] %v17076_v24  ;;  %v8923_v33 = vadd.f32 %v8891_v1, %v8823_v16  ;;  %vm18860_vm8 = vnez %v18859_v27  ;;  %v18070_v23 = vrot.slane %v17073_v48, 1  ;;  %v18863_v12 = vld [vmem:[#allocation10_spill] sm:$0xff] }
 0xaf6   : > { %v17081_v52 = vsel %vm18858_vm3, %v8289_v8, %v18857_v0  ;;  %v8358_v28 = vsel %vm18860_vm8, %v17076_v24, 0.0  ;;  %v18861_v18 = vsel %vm18792_vm9, %v16772_v40, 0.0  ;;  %9282 = vadd.xlane.f32.xlu1 %v9230_v45  ;;  %v8524_v2 = vadd.f32 %v8492_v39, %v8423_v7 }
 0xaf7   : > { %v8800_v44 = vmul.f32 %v16787_v29, %v18861_v18  ;;  %v8395_v57 = vmul.f32 %v16712_v30, %v8358_v28  ;;  %v8900_v22 = vmul.f32 %v16930_v61, %v18829_v63  ;;  %v17097_v1 = vmul.f32 %v16804_v17, %v18850_v3 }
 0xaf8   : > { %v9120_v8 = vadd.f32 %v9038_v10, %v8923_v33  ;;  %v8650_v34 = vsel %vm5458_vm13, %v8647_v15, %v18070_v23  ;;  %v9163_v40 = vsel %vm18792_vm9, %v17076_v24, 0.0  ;;  %v7997_v46 = vmul.f32 %v16698_v19, %v16055_v42  ;;  %vm18868_vm9 = vmmov %vm18858_vm3 }
 0xaf9   : > { %18862 = vst [vmem:[#allocation40_spill] sm:$0xff] %v17097_v1  ;;  %v8427_v39 = vadd.f32 %v8395_v57, %v8233_v13  ;;  %v8724_v16 = vadd.f32 %v8650_v34, %v8524_v2  ;;  %v18069_v47 = vrot.slane %v17097_v1, 1  ;;  %v18864_v45 = vrot.slane %v18863_v12, 1 }
 0xafa   : > { %v18865_v0 = vrot.slane %v16071_v36, 1  ;;  %v9222_v7 = vadd.f32 %v9190_v11, %v9120_v8  ;;  %v18866_v15 = vrot.slane %v16060_v31, 2  ;;  %v18867_v35 = vrot.slane %v16055_v42, 2  ;;  %v18869_v36 = vld [vmem:[#allocation54_spill] sm:$0xff] }
 0xafb   : > { %v8484_v13 = vmul.f32 %v16665_v14, %v16154_v51  ;;  %v8832_v18 = vadd.f32 %v8800_v44, %v8724_v16  ;;  %v9056_v57 = vsel %vm5458_vm13, %v9053_v49, %v18069_v47  ;;  %vm18870_vm15 = vnez %v18869_v36  ;;  %v18879_v47 = vld [vmem:[#allocation72_spill] sm:$0xff]  ;;  %v18897_v36 = vld [vmem:[#allocation62_spill] sm:$0xff] }
 0xafc   : > { %v8147_v10 = vsel %vm5458_vm13, %v18865_v0, %v18864_v45  ;;  %v17118_v28 = vsel %vm18868_vm9, %v18867_v35, %v18866_v15  ;;  %v17130_v2 = vmul.f32 %v16655_v6, %v16159_v53  ;;  %9266 = vadd.xlane.f32.xlu0 %v9222_v7  ;;  %v9199_v51 = vmul.f32 %v16851_v50, %v9163_v40 }
 0xafd   : > { %v8225_v33 = vadd.f32 %v8147_v10, %v7997_v46  ;;  %v8350_v11 = vsel %vm18870_vm15, %v17118_v28, 0.0  ;;  %v8516_v34 = vadd.f32 %v8484_v13, %v16627_v32  ;;  %v8932_v49 = vadd.f32 %v8900_v22, %v8832_v18  ;;  %v18872_v22 = vld [vmem:[#allocation38_spill] sm:$0xff]  ;;  %v18876_v18 = vld [vmem:[#allocation43_spill] sm:$0xff] }
 0xafe   : > { %v8387_v44 = vmul.f32 %v16712_v30, %v8350_v11  ;;  %v18072_v46 = vrot.slane %v17130_v2, 1  ;;  %v17144_v12 = vmul.f32 %v16804_v17, %v16060_v31  ;;  %v18871_v40 = vsel %vm18741_vm1, %v16832_v43, 0.0 }
 0xaff   : > { %v8792_v0 = vmul.f32 %v16787_v29, %v18871_v40  ;;  %v9155_v32 = vsel %vm18741_vm1, %v17118_v28, 0.0  ;;  %v8293_v10 = vrot.slane %v18872_v22, 2  ;;  %v9129_v7 = vadd.f32 %v9056_v57, %v8932_v49  ;;  %vm18877_vm1 = vmmov %vm18858_vm3 }
 0xb00   : > { %v8419_v45 = vadd.f32 %v8387_v44, %v8225_v33  ;;  %v8634_v15 = vsel %vm5458_vm13, %v8631_v60, %v18072_v46  ;;  %v8892_v33 = vmul.f32 %v16930_v61, %v16055_v42  ;;  %v18071_v43 = vrot.slane %v17144_v12, 1  ;;  %vm18901_vm9 = vmmov %vm18877_vm1 }
 0xb01   : > { %v8716_v35 = vadd.f32 %v8634_v15, %v8516_v34  ;;  %v18873_v13 = vrot.slane %v18856_v38, 2  ;;  %v8295_v11 = vrot.slane %v18876_v18, 2  ;;  %v8297_v57 = vrot.slane %v16742_v56, 2 }
 0xb02   : > { %v9231_v44 = vadd.f32 %v9199_v51, %v9129_v7  ;;  %v9191_v41 = vmul.f32 %v16851_v50, %v9155_v32  ;;  %v8009_v60 = vmul.f32 %v16698_v19, %v18876_v18  ;;  %v8496_v49 = vmul.f32 %v16665_v14, %v18856_v38 }
 0xb03   : > { %v17166_v62 = vsel %vm18874_vm7, %v18873_v13, %v8293_v10  ;;  %v8824_v40 = vadd.f32 %v8792_v0, %v8716_v35  ;;  %v17176_v34 = vsel %vm18877_vm1, %v8295_v11, %v8297_v57  ;;  %v17180_v15 = vmul.f32 %v16655_v6, %v18856_v38 }
 0xb04   : > { %18875 = vst [vmem:[#allocation69_spill] sm:$0xff] %v17166_v62  ;;  %v17184_v13 = vmul.f32 %v16655_v6, %v18872_v22  ;;  %9284 = vadd.xlane.f32.xlu1 %v9231_v44  ;;  %v18878_v51 = vrot.slane %v17025_v37, 1  ;;  %v8528_v7 = vadd.f32 %v8496_v49, %v8427_v39  ;;  %v8767_v0 = vsel %vm18860_vm8, %v17166_v62, 0.0 }
 0xb05   : > { %v17196_v35 = vmul.f32 %v16804_v17, %v18876_v18  ;;  %v8924_v8 = vadd.f32 %v8892_v33, %v8824_v40  ;;  %vm18880_vm10 = vnez %v18879_v47  ;;  %v18078_v16 = vrot.slane %v17180_v15, 1  ;;  %v18882_v40 = vld [vmem:[#allocation27_spill] sm:$0xff] }
 0xb06   : > { %v9040_v32 = vsel %vm5458_vm13, %v18878_v51, %v18071_v43  ;;  %v8657_v37 = vrot.slane %v17184_v13, 1  ;;  %v8804_v51 = vmul.f32 %v16787_v29, %v8767_v0  ;;  %v17206_v39 = vmul.f32 %v16804_v17, %v16742_v56 }
 0xb07   : > { %v9167_v49 = vsel %vm18860_vm8, %v17176_v34, 0.0  ;;  %v18881_v33 = vrot.slane %v16747_v4, 1  ;;  %v18883_v23 = vrot.slane %v18882_v40, 1  ;;  %v9121_v43 = vadd.f32 %v9040_v32, %v8924_v8  ;;  %vm18900_vm8 = vmmov %vm18877_vm1 }
 0xb08   : > { %v8658_v13 = vsel %vm5458_vm13, %v18078_v16, %v8657_v37  ;;  %v8904_v0 = vmul.f32 %v16930_v61, %v18876_v18  ;;  %v18079_v24 = vrot.slane %v17196_v35, 1  ;;  %v9063_v27 = vrot.slane %v17206_v39, 1  ;;  %v18888_v39 = vld [vmem:[#allocation49_spill] sm:$0xff] }
 0xb09   : > { %v8171_v44 = vsel %vm5458_vm13, %v18883_v23, %v18881_v33  ;;  %v8728_v62 = vadd.f32 %v8658_v13, %v8528_v7  ;;  %vm18885_vm14 = vnez %v18884_v59  ;;  %v9223_v1 = vadd.f32 %v9191_v41, %v9121_v43  ;;  %v18886_v7 = vld [vmem:[#allocation67_spill] sm:$0xff]  ;;  %v18890_v59 = vld [vmem:[#allocation6_spill] sm:$0xff] }
 0xb0a   : > { %v8237_v46 = vadd.f32 %v8171_v44, %v8009_v60  ;;  %v8362_v40 = vsel %vm18885_vm14, %v17176_v34, 0.0  ;;  %v9203_v23 = vmul.f32 %v16851_v50, %v9167_v49  ;;  %v8488_v32 = vmul.f32 %v16665_v14, %v18710_v58 }
 0xb0b   : > { %v8399_v8 = vmul.f32 %v16712_v30, %v8362_v40  ;;  %v8836_v33 = vadd.f32 %v8804_v51, %v8728_v62  ;;  %v9064_v60 = vsel %vm5458_vm13, %v18079_v24, %v9063_v27  ;;  %v18887_v44 = vrot.slane %v18886_v7, 1  ;;  %9268 = vadd.xlane.f32.xlu0 %v9223_v1  ;;  %v18895_v24 = vld [vmem:[#allocation79_spill] sm:$0xff]  ;;  %v18925_v21 = vld [vmem:[#allocation69_spill] sm:$0xff] }
 0xb0c   : > { %v18889_v13 = vrot.slane %v18888_v39, 1  ;;  %v8759_v43 = vsel %vm18870_vm15, %v18890_v59, 0.0  ;;  %v8520_v51 = vadd.f32 %v8488_v32, %v8419_v45  ;;  %v8896_v7 = vmul.f32 %v16930_v61, %v18718_v25  ;;  %v18891_v39 = vld [vmem:[#allocation71_spill] sm:$0xff] }
 0xb0d   : > { %v17241_v41 = vadd.f32 %v8399_v8, %v8237_v46  ;;  %v8796_v49 = vmul.f32 %v16787_v29, %v8759_v43  ;;  %v8936_v40 = vadd.f32 %v8904_v0, %v8836_v33  ;;  %vm18892_vm3 = vnez %v18891_v39  ;;  %v18893_v8 = vld [vmem:[#allocation63_spill] sm:$0xff] }
 0xb0e   : > { %v8642_v16 = vsel %vm5458_vm13, %v18889_v13, %v18887_v44  ;;  %v9159_v44 = vsel %vm18870_vm15, %v16765_v55, 0.0  ;;  %v7970_v1 = vsel %vm18892_vm3, %v18850_v3, 0.0  ;;  %v18894_v13 = vrot.slane %v18893_v8, 1 }
 0xb0f   : > { %v8720_v46 = vadd.f32 %v8642_v16, %v8520_v51  ;;  %v18896_v62 = vrot.slane %v18895_v24, 1  ;;  %v7974_v0 = vsel %vm18807_vm0, %v16742_v56, 0.0  ;;  %v8006_v25 = vmul.f32 %v16698_v19, %v7970_v1 }
 0xb10   : > { %v9133_v32 = vadd.f32 %v9064_v60, %v8936_v40  ;;  %v18898_v55 = vrot.slane %v18897_v36, 1  ;;  %v18899_v33 = vrot.slane %v18848_v54, 1  ;;  %v17270_v16 = vsel %vm18900_vm8, %v8293_v10, %v8295_v11 }
 0xb11   : > { %v9048_v45 = vsel %vm5458_vm13, %v18896_v62, %v18894_v13  ;;  %v8299_v24 = vrot.slane %v16937_v26, 2  ;;  %v8828_v51 = vadd.f32 %v8796_v49, %v8720_v46  ;;  %v9195_v62 = vmul.f32 %v16851_v50, %v9159_v44 }
 0xb12   : > { %v8165_v43 = vsel %vm5458_vm13, %v18899_v33, %v18898_v55  ;;  %v8396_v13 = vmul.f32 %v16712_v30, %v17081_v52  ;;  %v9235_v1 = vadd.f32 %v9203_v23, %v9133_v32  ;;  %v8460_v54 = vsel %vm18892_vm3, %v18872_v22, 0.0  ;;  %v18902_v55 = vld [vmem:[#allocation85_spill] sm:$0xff] }
 0xb13   : > { %v8234_v8 = vadd.f32 %v8165_v43, %v8006_v25  ;;  %v17279_v60 = vsel %vm18901_vm9, %v8297_v57, %v8299_v24  ;;  %v17286_v10 = vmul.f32 %v16655_v6, %v18876_v18  ;;  %v8928_v11 = vadd.f32 %v8896_v7, %v8828_v51 }
 0xb14   : > { %v8010_v49 = vmul.f32 %v16698_v19, %v7974_v0  ;;  %v8497_v44 = vmul.f32 %v16665_v14, %v8460_v54  ;;  %9292 = vadd.xlane.f32.xlu1 %v9235_v1  ;;  %v17292_v23 = vmul.f32 %v16712_v30, %v17270_v16  ;;  %v8869_v46 = vsel %vm18892_vm3, %v16742_v56, 0.0 }
 0xb15   : > { %v8428_v40 = vadd.f32 %v8396_v13, %v8234_v8  ;;  %v8659_v57 = vrot.slane %v17286_v10, 1  ;;  %v17300_v25 = vmul.f32 %v16804_v17, %v16937_v26  ;;  %v9125_v7 = vadd.f32 %v9048_v45, %v8928_v11 }
 0xb16   : > { %v8805_v32 = vmul.f32 %v16787_v29, %v17270_v16  ;;  %v18081_v33 = vrot.slane %v18902_v55, 1  ;;  %v8905_v51 = vmul.f32 %v16930_v61, %v8869_v46  ;;  %v8400_v8 = vmul.f32 %v16712_v30, %v17279_v60 }
 0xb17   : > { %v8529_v0 = vadd.f32 %v8497_v44, %v8428_v40  ;;  %v8660_v43 = vsel %vm5458_vm13, %v8657_v37, %v8659_v57  ;;  %v18080_v39 = vrot.slane %v17300_v25, 1  ;;  %v9227_v13 = vadd.f32 %v9195_v62, %v9125_v7 }
 0xb18   : > { %v18903_v45 = vrot.slane %v16747_v4, 1  ;;  %v8448_v40 = vsel %vm18756_vm2, %v16159_v53, 0.0  ;;  %v8555_v62 = vmul.f32 %v16655_v6, %v16055_v42  ;;  %v9204_v4 = vmul.f32 %v16851_v50, %v17279_v60 }
 0xb19   : > { %v8729_v1 = vadd.f32 %v8660_v43, %v8529_v0  ;;  %v9066_v37 = vsel %vm5458_vm13, %v9063_v27, %v18080_v39  ;;  %v8485_v46 = vmul.f32 %v16665_v14, %v8448_v40  ;;  %9276 = vadd.xlane.f32.xlu0 %v9227_v13  ;;  %v8857_v0 = vsel %vm18756_vm2, %v16060_v31, 0.0  ;;  %v18905_v27 = vld [vmem:[#allocation80_spill] sm:$0xff] }
 0xb1a   : > { %v8173_v54 = vsel %vm5458_vm13, %v18903_v45, %v18081_v33  ;;  %v8963_v53 = vmul.f32 %v16804_v17, %v18710_v58  ;;  %v8635_v45 = vrot.slane %v8555_v62, 1  ;;  %v8456_v11 = vsel %vm18717_vm12, %v16252_v5, 0.0  ;;  %v18909_v5 = vld [vmem:[#allocation5_spill] sm:$0xff] }
 0xb1b   : > { %v8238_v44 = vadd.f32 %v8173_v54, %v8010_v49  ;;  %v8837_v7 = vadd.f32 %v8805_v32, %v8729_v1  ;;  %v8517_v49 = vadd.f32 %v8485_v46, %v18905_v27  ;;  %v8793_v54 = vmul.f32 %v16787_v29, %v16592_v9 }
 0xb1c   : > { %v8893_v32 = vmul.f32 %v16930_v61, %v8857_v0  ;;  %v9041_v1 = vrot.slane %v8963_v53, 1  ;;  %v18907_v31 = vrot.slane %v17130_v2, 1  ;;  %v8865_v9 = vsel %vm18717_vm12, %v18850_v3, 0.0  ;;  %v18910_v0 = vld [vmem:[#allocation7_spill] sm:$0xff]  ;;  %vm18936_vm12 = vmmov %vm18877_vm1 }
 0xb1d   : > { %v17333_v43 = vadd.f32 %v8400_v8, %v8238_v44  ;;  %v8937_v13 = vadd.f32 %v8905_v51, %v8837_v7  ;;  %v8493_v8 = vmul.f32 %v16665_v14, %v8456_v11  ;;  %v8563_v44 = vmul.f32 %v16655_v6, %v18829_v63 }
 0xb1e   : > { %v8636_v39 = vsel %vm5458_vm13, %v18907_v31, %v8635_v45  ;;  %v18908_v62 = vrot.slane %v17144_v12, 1  ;;  %v9192_v2 = vmul.f32 %v16851_v50, %v18909_v5  ;;  %v8901_v11 = vmul.f32 %v16930_v61, %v8865_v9  ;;  %v18916_v5 = vld [vmem:[#allocation40_spill] sm:$0xff] }
 0xb1f   : > { %v9134_v51 = vadd.f32 %v9066_v37, %v8937_v13  ;;  %v8717_v46 = vadd.f32 %v8636_v39, %v8517_v49  ;;  %v8525_v53 = vadd.f32 %v8493_v8, %v18910_v0  ;;  %v8651_v27 = vrot.slane %v8563_v44, 1  ;;  %v18912_v8 = vld [vmem:[#allocation42_spill] sm:$0xff] }
 0xb20   : > { %v9042_v7 = vsel %vm5458_vm13, %v18908_v62, %v9041_v1  ;;  %v8971_v31 = vmul.f32 %v16804_v17, %v18856_v38  ;;  %v9200_v39 = vmul.f32 %v16851_v50, %v17081_v52  ;;  %v8486_v12 = vmul.f32 %v16665_v14, %v16055_v42  ;;  %v18915_v62 = vld [vmem:[#allocation61_spill] sm:$0xff] }
 0xb21   : > { %v9236_v33 = vadd.f32 %v9204_v4, %v9134_v51  ;;  %v8825_v40 = vadd.f32 %v8793_v54, %v8717_v46  ;;  %v18911_v37 = vrot.slane %v17073_v48, 1  ;;  %v18913_v44 = vrot.slane %v18912_v8, 1 }
 0xb22   : > { %v9057_v13 = vrot.slane %v8971_v31, 1  ;;  %v18914_v4 = vsel %vm18799_vm6, %v17118_v28, 0.0  ;;  %v8518_v42 = vadd.f32 %v8486_v12, %v18915_v62  ;;  %v8894_v48 = vmul.f32 %v16930_v61, %v18710_v58 }
 0xb23   : > { %v8652_v49 = vsel %vm5458_vm13, %v18911_v37, %v8651_v27  ;;  %v8638_v9 = vsel %vm5458_vm13, %v8635_v45, %v18913_v44  ;;  %v8794_v54 = vmul.f32 %v16787_v29, %v18914_v4  ;;  %9294 = vadd.xlane.f32.xlu1 %v9236_v33  ;;  %v8925_v51 = vadd.f32 %v8893_v32, %v8825_v40  ;;  %v18918_v37 = vld [vmem:[#allocation78_spill] sm:$0xff] }
 0xb24   : > { %v8725_v46 = vadd.f32 %v8652_v49, %v8525_v53  ;;  %v18917_v0 = vrot.slane %v18916_v5, 1  ;;  %v18919_v45 = vrot.slane %v18918_v37, 1  ;;  %v8494_v28 = vmul.f32 %v16665_v14, %v18829_v63  ;;  %v18920_v53 = vld [vmem:[#allocation19_spill] sm:$0xff]  ;;  %v18921_v49 = vld [vmem:[#allocation48_spill] sm:$0xff] }
 0xb25   : > { %v8564_v33 = vmul.f32 %v16655_v6, %v18850_v3  ;;  %v9122_v32 = vadd.f32 %v9042_v7, %v8925_v51  ;;  %v8718_v12 = vadd.f32 %v8638_v9, %v8518_v42  ;;  %v9157_v58 = vsel %vm18799_vm6, %v18890_v59, 0.0  ;;  %vm18969_vm6 = vmmov %vm18877_vm1 }
 0xb26   : > { %v9058_v31 = vsel %vm5458_vm13, %v18917_v0, %v9057_v13  ;;  %v9044_v8 = vsel %vm5458_vm13, %v9041_v1, %v18919_v45  ;;  %v8833_v40 = vadd.f32 %v18920_v53, %v8725_v46  ;;  %v8526_v44 = vadd.f32 %v8494_v28, %v18921_v49  ;;  %v18923_v1 = vld [vmem:[#allocation77_spill] sm:$0xff] }
 0xb27   : > { %v8653_v4 = vrot.slane %v8564_v33, 1  ;;  %v18924_v5 = vsel %vm18783_vm4, %v18923_v1, 0.0  ;;  %v8902_v0 = vmul.f32 %v16930_v61, %v18856_v38  ;;  %v9224_v7 = vadd.f32 %v9192_v2, %v9122_v32 }
 0xb28   : > { %v8802_v63 = vmul.f32 %v16787_v29, %v18924_v5  ;;  %v8933_v51 = vadd.f32 %v8901_v11, %v8833_v40  ;;  %v8826_v46 = vadd.f32 %v8794_v54, %v8718_v12  ;;  %v8972_v9 = vmul.f32 %v16804_v17, %v18872_v22 }
 0xb29   : > { %v8654_v59 = vsel %vm5458_vm13, %v8651_v27, %v8653_v4  ;;  %v9165_v42 = vsel %vm18783_vm4, %v18925_v21, 0.0  ;;  %v8458_v45 = vsel %vm18825_vm5, %v18850_v3, 0.0  ;;  %v18927_v28 = vrot.slane %v17180_v15, 1  ;;  %9270 = vadd.xlane.f32.xlu0 %v9224_v7  ;;  %v18930_v7 = vld [vmem:[#allocation45_spill] sm:$0xff]  ;;  %vm18950_vm4 = vmmov %vm18877_vm1 }
 0xb2a   : > { %v9130_v2 = vadd.f32 %v9058_v31, %v8933_v51  ;;  %v8926_v11 = vadd.f32 %v8894_v48, %v8826_v46  ;;  %v8726_v54 = vadd.f32 %v8654_v59, %v8526_v44  ;;  %v9059_v33 = vrot.slane %v8972_v9, 1  ;;  %v18934_v9 = vld [vmem:[#allocation35_spill] sm:$0xff] }
 0xb2b   : > { %v8656_v38 = vsel %vm5458_vm13, %v8653_v4, %v18927_v28  ;;  %v9193_v32 = vmul.f32 %v16851_v50, %v9157_v58  ;;  %v9201_v27 = vmul.f32 %v16851_v50, %v9165_v42  ;;  %v8495_v53 = vmul.f32 %v16665_v14, %v8458_v45  ;;  %v18928_v4 = vld [vmem:[#allocation4_spill] sm:$0xff] }
 0xb2c   : > { %v8867_v40 = vsel %vm18825_vm5, %v18872_v22, 0.0  ;;  %v9232_v3 = vadd.f32 %v9200_v39, %v9130_v2  ;;  %v9123_v12 = vadd.f32 %v9044_v8, %v8926_v11  ;;  %v8834_v15 = vadd.f32 %v8802_v63, %v8726_v54  ;;  %v18933_v63 = vld [vmem:[#allocation75_spill] sm:$0xff] }
 0xb2d   : > { %v9060_v49 = vsel %vm5458_vm13, %v9057_v13, %v9059_v33  ;;  %v8527_v31 = vadd.f32 %v8495_v53, %v18928_v4  ;;  %v8803_v48 = vmul.f32 %v16787_v29, %v17081_v52  ;;  %v8903_v58 = vmul.f32 %v16930_v61, %v8867_v40 }
 0xb2e   : > { %v18929_v44 = vrot.slane %v17196_v35, 1  ;;  %9286 = vadd.xlane.f32.xlu1 %v9232_v3  ;;  %v9225_v1 = vadd.f32 %v9193_v32, %v9123_v12  ;;  %v8934_v5 = vadd.f32 %v8902_v0, %v8834_v15  ;;  %v18931_v39 = vrot.slane %v18930_v7, 1  ;;  %v18940_v3 = vld [vmem:[#allocation84_spill] sm:$0xff] }
 0xb2f   : > { %v18932_v8 = vrot.slane %v18897_v36, 1  ;;  %v8301_v51 = vrot.slane %v18933_v63, 2  ;;  %v8727_v46 = vadd.f32 %v8656_v38, %v8527_v31  ;;  %v18935_v35 = vsel %vm18880_vm10, %v18925_v21, 0.0  ;;  %v18937_v38 = vld [vmem:[#allocation76_spill] sm:$0xff] }
 0xb30   : > { %v9062_v62 = vsel %vm5458_vm13, %v9059_v33, %v18929_v44  ;;  %v8397_v59 = vmul.f32 %v16712_v30, %v18935_v35  ;;  %v8498_v0 = vmul.f32 %v16665_v14, %v18876_v18  ;;  %v17442_v42 = vmul.f32 %v16787_v29, %v17279_v60  ;;  %9272 = vadd.xlane.f32.xlu0 %v9225_v1  ;;  %v18945_v44 = vld [vmem:[#allocation27_spill] sm:$0xff] }
 0xb31   : > { %v8167_v13 = vsel %vm5458_vm13, %v18932_v8, %v18931_v39  ;;  %v9131_v36 = vadd.f32 %v9060_v49, %v8934_v5  ;;  %v8302_v37 = vsel %vm18936_vm12, %v8299_v24, %v8301_v51  ;;  %v8568_v45 = vmul.f32 %v16655_v6, %v16742_v56  ;;  %v18949_v35 = vld [vmem:[#allocation59_spill] sm:$0xff] }
 0xb32   : > { %v8235_v52 = vadd.f32 %v8167_v13, %v18934_v9  ;;  %v8835_v28 = vadd.f32 %v8803_v48, %v8727_v46  ;;  %v9202_v21 = vmul.f32 %v16851_v50, %v17270_v16  ;;  %vm18938_vm2 = vnez %v18937_v38 }
 0xb33   : > { %v8364_v18 = vsel %vm18938_vm2, %v8302_v37, 0.0  ;;  %v9233_v11 = vadd.f32 %v9201_v27, %v9131_v36  ;;  %v8661_v54 = vrot.slane %v8568_v45, 1  ;;  %v18939_v33 = vsel %vm18880_vm10, %v17176_v34, 0.0 }
 0xb34   : > { %v8429_v2 = vadd.f32 %v8397_v59, %v8235_v52  ;;  %v8401_v60 = vmul.f32 %v16712_v30, %v8364_v18  ;;  %v8806_v24 = vmul.f32 %v16787_v29, %v18939_v33  ;;  %v8935_v32 = vadd.f32 %v8903_v58, %v8835_v28 }
 0xb35   : > { %v8906_v40 = vmul.f32 %v16930_v61, %v16937_v26  ;;  %v8976_v16 = vmul.f32 %v16804_v17, %v18933_v63  ;;  %9288 = vadd.xlane.f32.xlu1 %v9233_v11  ;;  %v8662_v30 = vsel %vm5458_vm13, %v8659_v57, %v8661_v54  ;;  %v9169_v27 = vsel %vm18880_vm10, %v8302_v37, 0.0 }
 0xb36   : > { %v8530_v53 = vadd.f32 %v8498_v0, %v8429_v2  ;;  %v8011_v34 = vmul.f32 %v16698_v19, %v16937_v26  ;;  %v18941_v12 = vrot.slane %v18940_v3, 1  ;;  %v18942_v15 = vrot.slane %v18902_v55, 1 }
 0xb37   : > { %v9132_v4 = vadd.f32 %v9062_v62, %v8935_v32  ;;  %v9067_v48 = vrot.slane %v8976_v16, 1  ;;  %v18944_v10 = vsel %vm18703_vm11, %v18872_v22, 0.0  ;;  %v18946_v1 = vrot.slane %v18945_v44, 1 }
 0xb38   : > { %v8175_v49 = vsel %vm5458_vm13, %v18942_v15, %v18941_v12  ;;  %v8730_v31 = vadd.f32 %v8662_v30, %v8530_v53  ;;  %v8008_v57 = vmul.f32 %v16698_v19, %v18944_v10  ;;  %v18947_v5 = vmov %v18931_v39  ;;  %v18954_v53 = vld [vmem:[#allocation64_spill] sm:$0xff] }
 0xb39   : > { %v8239_v47 = vadd.f32 %v8175_v49, %v8011_v34  ;;  %v8169_v39 = vsel %vm5458_vm13, %v18947_v5, %v18946_v1  ;;  %v8462_v55 = vsel %vm18703_vm11, %v16742_v56, 0.0  ;;  %v8569_v62 = vmul.f32 %v16655_v6, %v16937_v26  ;;  %v18957_v15 = vld [vmem:[#allocation36_spill] sm:$0xff] }
 0xb3a   : > { %v9234_v8 = vadd.f32 %v9202_v21, %v9132_v4  ;;  %v8838_v13 = vadd.f32 %v8806_v24, %v8730_v31  ;;  %v18948_v22 = vrot.slane %v17300_v25, 1  ;;  %v8236_v46 = vadd.f32 %v8169_v39, %v8008_v57 }
 0xb3b   : > { %v8433_v9 = vadd.f32 %v8401_v60, %v8239_v47  ;;  %v8499_v52 = vmul.f32 %v16665_v14, %v8462_v55  ;;  %v8663_v7 = vrot.slane %v8569_v62, 1  ;;  %v8736_v59 = vrot.slane %v18949_v35, 2  ;;  %v18959_v47 = vld [vmem:[#allocation81_spill] sm:$0xff] }
 0xb3c   : > { %v9068_v19 = vsel %vm5458_vm13, %v18948_v22, %v9067_v48  ;;  %9290 = vadd.xlane.f32.xlu1 %v9234_v8  ;;  %v8938_v0 = vadd.f32 %v8906_v40, %v8838_v13  ;;  %v9205_v56 = vmul.f32 %v16851_v50, %v9169_v27  ;;  %v8430_v36 = vadd.f32 %v17292_v23, %v8236_v46 }
 0xb3d   : > { %v8977_v6 = vmul.f32 %v16804_v17, %v18949_v35  ;;  %v8664_v25 = vsel %vm5458_vm13, %v8661_v54, %v8663_v7  ;;  %v8737_v45 = vsel %vm18950_vm4, %v8301_v51, %v8736_v59  ;;  %v8871_v28 = vsel %vm18703_vm11, %v18933_v63, 0.0  ;;  %v18952_v51 = vld [vmem:[#allocation86_spill] sm:$0xff]  ;;  %vm18956_vm11 = vmmov %vm18877_vm1 }
 0xb3e   : > { %v8500_v21 = vmul.f32 %v16665_v14, %v16937_v26  ;;  %v8771_v2 = vsel %vm18885_vm14, %v8302_v37, 0.0  ;;  %v9135_v11 = vadd.f32 %v9068_v19, %v8938_v0  ;;  %v8531_v60 = vadd.f32 %v8499_v52, %v8430_v36  ;;  %v18963_v19 = vld [vmem:[#allocation83_spill] sm:$0xff] }
 0xb3f   : > { %v9069_v23 = vrot.slane %v8977_v6, 1  ;;  %v8464_v33 = vsel %vm18807_vm0, %v18933_v63, 0.0  ;;  %v18953_v24 = vrot.slane %v18952_v51, 1  ;;  %v18955_v40 = vrot.slane %v18954_v53, 2 }
 0xb40   : > { %v8532_v54 = vadd.f32 %v8500_v21, %v17241_v41  ;;  %v9237_v16 = vadd.f32 %v9205_v56, %v9135_v11  ;;  %v8731_v30 = vadd.f32 %v8664_v25, %v8531_v60  ;;  %v8907_v37 = vmul.f32 %v16930_v61, %v8871_v28  ;;  %v18967_v56 = vld [vmem:[#allocation11_spill] sm:$0xff] }
 0xb41   : > { %v8666_v32 = vsel %vm5458_vm13, %v8663_v7, %v18953_v24  ;;  %v8739_v26 = vsel %vm18956_vm11, %v8736_v59, %v18955_v40  ;;  %v9070_v27 = vsel %vm5458_vm13, %v9067_v48, %v9069_v23  ;;  %v8808_v41 = vmul.f32 %v16787_v29, %v8771_v2  ;;  %v18964_v59 = vld [vmem:[#allocation82_spill] sm:$0xff] }
 0xb42   : > { %v8732_v34 = vadd.f32 %v8666_v32, %v8532_v54  ;;  %v8773_v63 = vsel %vm18938_vm2, %v8739_v26, 0.0  ;;  %v8908_v3 = vmul.f32 %v16930_v61, %v18949_v35  ;;  %9296 = vadd.xlane.f32.xlu1 %v9237_v16  ;;  %v8839_v12 = vadd.f32 %v17442_v42, %v8731_v30  ;;  %v9243_v54 = vpop.xlane.xlu0 %9242 }
 0xb43   : > { %v18958_v49 = vrot.slane %v18957_v15, 1  ;;  %v9171_v31 = vsel %vm18885_vm14, %v8739_v26, 0.0  ;;  %v8501_v48 = vmul.f32 %v16665_v14, %v8464_v33  ;;  %v8809_v58 = vmul.f32 %v16787_v29, %v8737_v45 }
 0xb44   : > { %v9206_v10 = vmul.f32 %v16851_v50, %v8737_v45  ;;  %v8840_v57 = vadd.f32 %v8808_v41, %v8732_v34  ;;  %v18960_v44 = vrot.slane %v18959_v47, 1  ;;  %v18961_v1 = vmov %v18953_v24  ;;  %v18973_v34 = vld [vmem:[#allocation20_spill] sm:$0xff] }
 0xb45   : > { %v9072_v4 = vsel %vm5458_vm13, %v9069_v23, %v18958_v49  ;;  %v8939_v5 = vadd.f32 %v8907_v37, %v8839_v12  ;;  %v8810_v39 = vmul.f32 %v16787_v29, %v8773_v63  ;;  %v8533_v55 = vadd.f32 %v8501_v48, %v17333_v43  ;;  %v18972_v37 = vld [vmem:[#allocation31_spill] sm:$0xff]  ;;  %v9247_v63 = vpop.xlane.xlu1 %9246 }
 0xb46   : > { %v8668_v42 = vsel %vm5458_vm13, %v18961_v1, %v18960_v44  ;;  %v8979_v62 = vmul.f32 0.0, %v16804_v17  ;;  %v8940_v8 = vadd.f32 %v8908_v3, %v8840_v57  ;;  %v9207_v14 = vmul.f32 %v16851_v50, %v9171_v31  ;;  %v18974_v3 = vld [vmem:[#allocation33_spill] sm:$0xff] }
 0xb47   : > { %v18962_v13 = vsel %vm18807_vm0, %v18954_v53, 0.0  ;;  %v8534_v46 = vadd.f32 %v18963_v19, %v8433_v9  ;;  %v9136_v52 = vadd.f32 %v9070_v27, %v8939_v5  ;;  %v8733_v7 = vadd.f32 %v8668_v42, %v8533_v55  ;;  %v9245_v53 = vpop.xlane.xlu0 %9244  ;;  %v18976_v31 = vld [vmem:[#allocation41_spill] sm:$0xff] }
 0xb48   : > { %v8909_v22 = vmul.f32 %v16930_v61, %v18962_v13  ;;  %v9073_v35 = vrot.slane %v8979_v62, 1  ;;  %v18965_v29 = vrot.slane %v18964_v59, 1  ;;  %v18966_v43 = vmov %v18960_v44  ;;  %v18978_v44 = vld [vmem:[#allocation21_spill] sm:$0xff]  ;;  %v18980_v62 = vld [vmem:[#allocation47_spill] sm:$0xff] }
 0xb49   : > { %v9137_v0 = vadd.f32 %v9072_v4, %v8940_v8  ;;  %v18968_v36 = vmov %v18955_v40  ;;  %v9238_v25 = vadd.f32 %v9206_v10, %v9136_v52  ;;  %v8841_v45 = vadd.f32 %v8809_v58, %v8733_v7  ;;  %v18977_v10 = vld [vmem:[#allocation28_spill] sm:$0xff]  ;;  %v18979_v42 = vld [vmem:[#allocation37_spill] sm:$0xff]  ;;  %v9279_v55 = vpop.xlane.xlu1 %9278 }
 0xb4a   : > { %v8670_v17 = vsel %vm5458_vm13, %v18966_v43, %v18965_v29  ;;  %v9140_v20 = vsel %vm18969_vm6, %v18968_v36, %v18967_v56  ;;  %v8910_v9 = vmul.f32 0.0, %v16930_v61  ;;  %v18970_v21 = vmov %v18958_v49  ;;  %v18975_v49 = vld [vmem:[#allocation24_spill] sm:$0xff]  ;;  %v18983_v7 = vld [vmem:[#allocation25_spill] sm:$0xff]  ;;  %v18984_v29 = vld [vmem:[#allocation34_spill] sm:$0xff] }
 0xb4b   : > { %v8734_v6 = vadd.f32 %v8670_v17, %v8534_v46  ;;  %v9239_v28 = vadd.f32 %v9207_v14, %v9137_v0  ;;  %v9074_v18 = vsel %vm5458_vm13, %v18970_v21, %v9073_v35  ;;  %9298 = vadd.xlane.f32.xlu1 %v9238_v25  ;;  %v8941_v11 = vadd.f32 %v8909_v22, %v8841_v45  ;;  %v9249_v30 = vpop.xlane.xlu0 %9248  ;;  %v18981_v22 = vld [vmem:[#allocation29_spill] sm:$0xff]  ;;  %v18982_v46 = vld [vmem:[#allocation39_spill] sm:$0xff] }
 0xb4c   : > { %v9208_v60 = vmul.f32 %v16851_v50, %v9140_v20  ;;  %v1269_v51 = vsel %vm18938_vm2, %v18967_v56, 0.0  ;;  %v18971_v26 = vlaneseq  ;;  %v18985_v0 = vld [vmem:[#allocation55_spill] sm:$0xff]  ;;  %v18987_v21 = vld [vmem:[#allocation53_spill] sm:$0xff] }
 0xb4d   : > { %v8842_v2 = vadd.f32 %v8810_v39, %v8734_v6  ;;  %v9138_v23 = vadd.f32 %v9074_v18, %v8941_v11  ;;  %v9209_v32 = vmul.f32 %v16851_v50, %v1269_v51  ;;  %v18986_v6 = vld [vmem:[#allocation57_spill] sm:$0xff]  ;;  %v18990_v51 = vld [vmem:[#allocation14_spill] sm:$0xff] }
 0xb4e   : > { %v17568_v16 = vand.u32 127, %v18971_v26  ;;  %vm9428_vm0 = vcmp.lt.s32.totalorder %v18971_v26, 256 }
 0xb4f   : > { %v8942_v33 = vadd.f32 %v8910_v9, %v8842_v2  ;;  %9300 = vadd.xlane.f32.xlu1 %v9239_v28  ;;  %v9240_v24 = vadd.f32 %v9208_v60, %v9138_v23  ;;  %v9251_v27 = vpop.xlane.xlu0 %9250  ;;  %v18988_v2 = vld [vmem:[#allocation26_spill] sm:$0xff]  ;;  %v18989_v23 = vld [vmem:[#allocation32_spill] sm:$0xff] }
 0xb50   : > { %vm9308_vm13 = vcmp.eq.s32.totalorder %v17568_v16, 4 }
 0xb51   : > { %v9139_v61 = vadd.f32 %v9073_v35, %v8942_v33  ;;  %v9309_v38 = vsel %vm9308_vm13, %v9243_v54, %v18972_v37  ;;  %v9310_v50 = vsel %vm9308_vm13, %v9245_v53, %v18973_v34  ;;  %v9311_v12 = vsel %vm9308_vm13, %v9247_v63, %v18974_v3  ;;  %v18995_v3 = vld [vmem:[#allocation15_spill] sm:$0xff] }
 0xb52   : > { %v9312_v4 = vsel %vm9308_vm13, %v9249_v30, %v18975_v49  ;;  %v9313_v48 = vsel %vm9308_vm13, %v9251_v27, %v18976_v31  ;;  %v9327_v11 = vsel %vm9308_vm13, %v9279_v55, %v18988_v2  ;;  %v18993_v27 = vld [vmem:[#allocation51_spill] sm:$0xff]  ;;  %v18996_v49 = vld [vmem:[#allocation52_spill] sm:$0xff]  ;;  %v19001_v55 = vld [vmem:[#allocation18_spill] sm:$0xff] }
 0xb53   : > { %9302 = vadd.xlane.f32.xlu1 %v9240_v24  ;;  %v9241_v40 = vadd.f32 %v9209_v32, %v9139_v61  ;;  %v9253_v41 = vpop.xlane.xlu0 %9252  ;;  %v18991_v32 = vld [vmem:[#allocation60_spill] sm:$0xff] }
 0xb54   : > { %v9314_v57 = vsel %vm9308_vm13, %v9253_v41, %v18977_v10  ;;  %v18997_v31 = vld [vmem:[#allocation8_spill] sm:$0xff]  ;;  %v18998_v10 = vld [vmem:[#allocation46_spill] sm:$0xff] }
 0xb57   : > { %9304 = vadd.xlane.f32.xlu1 %v9241_v40  ;;  %v9255_v15 = vpop.xlane.xlu0 %9254  ;;  %v18992_v40 = vld [vmem:[#allocation13_spill] sm:$0xff] }
 0xb58   : > { %v9315_v1 = vsel %vm9308_vm13, %v9255_v15, %v18978_v44 }
 0xb59   : > { %v9275_v13 = vpop.xlane.xlu1 %9274 }
 0xb5a   : > { %v9325_v52 = vsel %vm9308_vm13, %v9275_v13, %v18982_v46 }
 0xb5b   : > { %v9257_v58 = vpop.xlane.xlu0 %9256 }
 0xb5c   : > { %v9316_v5 = vsel %vm9308_vm13, %v9257_v58, %v18979_v42  ;;  %v19000_v42 = vld [vmem:[#allocation12_spill] sm:$0xff] }
 0xb5d   : > { %9341 = vxpose.xlu0.b32.start [1/16] (narrow) %v9309_v38, 8 }
 0xb5f   : > { %v9259_v47 = vpop.xlane.xlu0 %9258 }
 0xb60   : > { %v9317_v8 = vsel %vm9308_vm13, %v9259_v47, %v18980_v62  ;;  %v18999_v47 = vld [vmem:[#allocation50_spill] sm:$0xff] }
 0xb61   : > { %9342 = vxpose.xlu0.b32.cont [2/16] (narrow) %v9310_v50, 8  ;;  %v18994_v50 = vld [vmem:[#allocation9_spill] sm:$0xff] }
 0xb63   : > { %v9261_v39 = vpop.xlane.xlu0 %9260 }
 0xb64   : > { %v9318_v19 = vsel %vm9308_vm13, %v9261_v39, %v18981_v22 }
 0xb65   : > { %9343 = vxpose.xlu0.b32.cont [3/16] (narrow) %v9311_v12, 8 }
 0xb67   : > { %v9263_v14 = vpop.xlane.xlu0 %9262 }
 0xb68   : > { %v9319_v35 = vsel %vm9308_vm13, %v9263_v14, %v18983_v7  ;;  %v19002_v14 = vld [vmem:[#allocation17_spill] sm:$0xff] }
 0xb69   : > { %9344 = vxpose.xlu0.b32.cont [4/16] (narrow) %v9312_v4, 8 }
 0xb6b   : > { %v9281_v36 = vpop.xlane.xlu1 %9280 }
 0xb6c   : > { %v9328_v33 = vsel %vm9308_vm13, %v9281_v36, %v18989_v23 }
 0xb6d   : > { %9345 = vxpose.xlu0.b32.cont [5/16] (narrow) %v9313_v48, 8 }
 0xb71   : > { %9346 = vxpose.xlu0.b32.cont [6/16] (narrow) %v9314_v57, 8 }
 0xb75   : > { %9347 = vxpose.xlu0.b32.cont [7/16] (narrow) %v9315_v1, 8 }
 0xb77   : > { %v9265_v59 = vpop.xlane.xlu0 %9264 }
 0xb78   : > { %v9320_v43 = vsel %vm9308_vm13, %v9265_v59, %v18984_v29  ;;  %v19004_v29 = vld [vmem:[#allocation3_spill] sm:$0xff] }
 0xb79   : > { %9348 = vxpose.xlu0.b32.cont [8/16] (narrow) %v9316_v5, 8 }
 0xb7d   : > { %9349 = vxpose.xlu0.b32.cont [9/16] (narrow) %v9317_v8, 8 }
 0xb81   : > { %9350 = vxpose.xlu0.b32.cont [10/16] (narrow) %v9318_v19, 8  ;;  %v19003_v19 = vld [vmem:[#allocation16_spill] sm:$0xff] }
 0xb83   : > { %v9283_v45 = vpop.xlane.xlu1 %9282 }
 0xb84   : > { %v9329_v24 = vsel %vm9308_vm13, %v9283_v45, %v18990_v51 }
 0xb85   : > { %9351 = vxpose.xlu0.b32.cont [11/16] (narrow) %v9319_v35, 8 }
 0xb89   : > { %9352 = vxpose.xlu0.b32.cont [12/16] (narrow) %v9320_v43, 8  ;;  %v9267_v17 = vpop.xlane.xlu0 %9266 }
 0xb8a   : > { %9373 = vxpose.xlu1.b32.start [1/16] (narrow) %v9325_v52, 8  ;;  %v9321_v56 = vsel %vm9308_vm13, %v9267_v17, %v18985_v0  ;;  %v12210_v52 = vmov 1966171168  }
 0xb8b   : > { %v9412_v7 = vunpack.c.l.s4 %v12210_v52 }
 0xb8d   : > { %9353 = vxpose.xlu0.b32.cont [13/16] (narrow) %v9321_v56, 8  ;;  %v9413_v35 = vunpack.c.0.s8 %v9412_v7 }
 0xb8f   : > { %v9416_v43 = vsub.s32 %v9413_v35, %v19004_v29 }
 0xb91   : > { %v9285_v9 = vpop.xlane.xlu1 %9284 }
 0xb92   : > { %v9330_v30 = vsel %vm9308_vm13, %v9285_v9, %v18992_v40 }
 0xb98   : > { %v9269_v20 = vpop.xlane.xlu0 %9268 }
 0xb99   : > { %v9322_v25 = vsel %vm9308_vm13, %v9269_v20, %v18986_v6 }
 0xb9a   : > { %9354 = vxpose.xlu0.b32.cont [14/16] (narrow) %v9322_v25, 8 }
 0xba1   : > { %v9293_v60 = vpop.xlane.xlu1 %9292 }
 0xba2   : > { %v9334_v48 = vsel %vm9308_vm13, %v9293_v60, %v18997_v31 }
 0xba6   : > { %v9277_v28 = vpop.xlane.xlu0 %9276 }
 0xba7   : > { %v9326_v18 = vsel %vm9308_vm13, %v9277_v28, %v18987_v21 }
 0xba8   : > { %9374 = vxpose.xlu1.b32.cont [2/16] (narrow) %v9326_v18, 8 }
 0xbac   : > { %9375 = vxpose.xlu1.b32.cont [3/16] (narrow) %v9327_v11, 8 }
 0xbb0   : > { %9376 = vxpose.xlu1.b32.cont [4/16] (narrow) %v9328_v33, 8  ;;  %v9295_v54 = vpop.xlane.xlu1 %9294 }
 0xbb1   : > { %v9335_v57 = vsel %vm9308_vm13, %v9295_v54, %v18998_v10 }
 0xbb4   : > { %9377 = vxpose.xlu1.b32.cont [5/16] (narrow) %v9329_v24, 8 }
 0xbb6   : > { %v9271_v61 = vpop.xlane.xlu0 %9270 }
 0xbb7   : > { %v9323_v53 = vsel %vm9308_vm13, %v9271_v61, %v18991_v32 }
 0xbb8   : > { %9355 = vxpose.xlu0.b32.cont [15/16] (narrow) %v9323_v53, 8  ;;  %9378 = vxpose.xlu1.b32.cont [6/16] (narrow) %v9330_v30, 8 }
 0xbbb   : > { %v9287_v37 = vpop.xlane.xlu1 %9286 }
 0xbbc   : > { %v9331_v63 = vsel %vm9308_vm13, %v9287_v37, %v18994_v50 }
 0xbbd   : > { %v9273_v38 = vpop.xlane.xlu0 %9272  ;;  %9379 = vxpose.xlu1.b32.cont [7/16] (narrow) %v9331_v63, 8 }
 0xbbe   : > { %v9324_v34 = vsel %vm9308_vm13, %v9273_v38, %v18993_v27 }
 0xbbf   : > { %9356 = vxpose.xlu0.b32.end [16/16] (narrow) %v9324_v34, 8 }
 0xbc2   : > { %v9289_v41 = vpop.xlane.xlu1 %9288 }
 0xbc3   : > { %v9332_v12 = vsel %vm9308_vm13, %v9289_v41, %v18995_v3 }
 0xbc4   : > { %9380 = vxpose.xlu1.b32.cont [8/16] (narrow) %v9332_v12, 8 }
 0xbc9   : > { %v9291_v15 = vpop.xlane.xlu1 %9290 }
 0xbca   : > { %v9333_v4 = vsel %vm9308_vm13, %v9291_v15, %v18996_v49 }
 0xbcb   : > { %9381 = vxpose.xlu1.b32.cont [9/16] (narrow) %v9333_v4, 8 }
 0xbcf   : > { %9382 = vxpose.xlu1.b32.cont [10/16] (narrow) %v9334_v48, 8  ;;  %v9297_v58 = vpop.xlane.xlu1 %9296 }
 0xbd0   : > { %v9336_v44 = vsel %vm9308_vm13, %v9297_v58, %v18999_v47 }
 0xbd3   : > { %9383 = vxpose.xlu1.b32.cont [11/16] (narrow) %v9335_v57, 8 }
 0xbd7   : > { %9384 = vxpose.xlu1.b32.cont [12/16] (narrow) %v9336_v44, 8 }
 0xbd8   : > { %v9299_v1 = vpop.xlane.xlu1 %9298 }
 0xbd9   : > { %v9337_v5 = vsel %vm9308_vm13, %v9299_v1, %v19000_v42 }
 0xbdb   : > { %9385 = vxpose.xlu1.b32.cont [13/16] (narrow) %v9337_v5, 8 }
 0xbdc   : > { %v9301_v39 = vpop.xlane.xlu1 %9300 }
 0xbdd   : > { %v9338_v62 = vsel %vm9308_vm13, %v9301_v39, %v19001_v55 }
 0xbdf   : > { %9386 = vxpose.xlu1.b32.cont [14/16] (narrow) %v9338_v62, 8 }
 0xbe0   : > { %v9303_v8 = vpop.xlane.xlu1 %9302 }
 0xbe1   : > { %v9339_v13 = vsel %vm9308_vm13, %v9303_v8, %v19002_v14 }
 0xbe3   : > { %9387 = vxpose.xlu1.b32.cont [15/16] (narrow) %v9339_v13, 8 }
 0xbe4   : > { %v9305_v22 = vpop.xlane.xlu1 %9304 }
 0xbe5   : > { %v9340_v46 = vsel %vm9308_vm13, %v9305_v22, %v19003_v19 }
 0xbe7   : > { %9388 = vxpose.xlu1.b32.end [16/16] (narrow) %v9340_v46, 8 }
 0xc03   : > { %v9357_v59 = vpop.trf.xlu0 }
 0xc2b   : > { %v9389_v17 = vpop.trf.xlu1 }
 0xc2c   : > { %v9407_v0 = vcombine.low %v9357_v59, %v9389_v17  ;;  %v9410_v56 = vcombine.high %v9357_v59, %v9389_v17 }
 0xc2e   : > { %9409 = vst [vmem:[%s451_s17] sm:$0xff] %v9407_v0  ;;  %v9417_v36 = vrot.slane %v9410_v56, %v9416_v43 }
 0xc30   : > { %v9424_v16 = vrot.slane %v9417_v36, %v9416_v43 }
 0xc32   : > { %9430 = vst.msk [vmem:[%s446_s21] sm:$0x3] %vm9428_vm0, %v9424_v16 }
 0xc33 PF: > { %s24_s25 = sadd.s32 1, %s12203_s25  }
 0xc34   : > { %p21_p4 = scmp.ge.s32.totalorder %s24_s25, 4  }
 0xc36   :  { %23 = sbr.rel (!%p21_p4) target bundleno = 1 (0x1), region = 110 }

</bundles_post_ra>
